<compile_context>
chip_gen: v5e
topology: v5e:2x2
jax: 0.10.0
libtpu: 0.0.40
codegen_flags: <defaults>
</compile_context>

<pallas_src>
import functools

import jax
import jax.numpy as jnp
from jax.experimental import pallas as pl
from jax.experimental.pallas import tpu as pltpu

K = 4          # conv kernel size
EPS = 1e-5     # BatchNorm eps


# ---------------------------------------------------------------------------
# Wrapper-side table construction (tiny, plain JAX)
# ---------------------------------------------------------------------------
def _toeplitz_hw(wk, H, W, last):
    """Fold the (kh, kw, ci) -> (oh, ow, co) part of one depth tap into a matrix.

    wk : (4, 4, Cin, Cout)  -- w[kd], already multiplied by the BN scale.
    Rows run over the zero-padded input plane (jin, iin, ci) with
    (Hp, Wp) = (H+2, W+2).  For last=False the columns are the *zero-padded*
    output plane (j', i', co) over (Ho+2, Wo+2, Cout), so a layer's matmul
    result is directly the next layer's (H, W)-padded input rows.  For
    last=True the columns are just (oh, ow, co).
    """
    Cin, Cout = wk.shape[2], wk.shape[3]
    Ho, Wo = H // 2, W // 2
    Hp, Wp = H + 2, W + 2

    jin = jnp.arange(Hp)[:, None]
    oh = jnp.arange(Ho)[None, :]
    kh = jin - 2 * oh                            # (Hp, Ho)
    vh = (kh >= 0) & (kh < 4)
    khc = jnp.clip(kh, 0, 3)

    iin = jnp.arange(Wp)[:, None]
    ow = jnp.arange(Wo)[None, :]
    kw = iin - 2 * ow                            # (Wp, Wo)
    vw = (kw >= 0) & (kw < 4)
    kwc = jnp.clip(kw, 0, 3)

    # (Hp, Ho, Wp, Wo, Cin, Cout)
    b = wk[khc[:, :, None, None], kwc[None, None, :, :], :, :]
    mask = (vh[:, :, None, None] & vw[None, None, :, :]).astype(wk.dtype)
    b = b * mask[..., None, None]
    # -> (Hp, Wp, Cin, Ho, Wo, Cout)
    b = jnp.transpose(b, (0, 2, 4, 1, 3, 5))
    if last:
        return b.reshape(Hp * Wp * Cin, Ho * Wo * Cout)
    b = jnp.pad(b, ((0, 0), (0, 0), (0, 0), (1, 1), (1, 1), (0, 0)))
    return b.reshape(Hp * Wp * Cin, (Ho + 2) * (Wo + 2) * Cout)


def _interior_bias(beta, Ho, Wo, Cout):
    """(1, (Ho+2)(Wo+2)Cout) bias vector: beta on interior columns, 0 on padding."""
    b = jnp.broadcast_to(beta.reshape(1, 1, Cout), (Ho, Wo, Cout))
    b = jnp.pad(b, ((1, 1), (1, 1), (0, 0)))
    return b.reshape(1, (Ho + 2) * (Wo + 2) * Cout).astype(jnp.float32)


# ---------------------------------------------------------------------------
# Fused Pallas kernel: one batch sample per grid step, 4 layers, VMEM-resident
# ---------------------------------------------------------------------------
def _fused_disc_kernel(x1_ref, b1_ref, c1_ref, b2_ref, c2_ref, b3_ref, c3_ref,
                       b4_ref, o_ref, x2_ref, x3_ref, x4_ref, *, d_out, d_final):
    def run_layer(read_lhs, b_ref, dout):
        acc = None
        for q in (0, 1):
            for r in (0, 1):
                lhs = read_lhs(r, q, dout).astype(jnp.bfloat16)
                part = jnp.dot(lhs, b_ref[2 * q + r],
                               preferred_element_type=jnp.float32)
                acc = part if acc is None else acc + part
        return acc

    def rephase_into(nxt_ref, out):
        # out: (Dout, N) f32 -- even depth rows -> phase 1, odd -> phase 0,
        # zero depth-padding rows at both ends.
        dout = out.shape[0]
        n = nxt_ref.shape[-1]
        zero = jnp.zeros((1, n), nxt_ref.dtype)
        nxt_ref[0, 0:1, :] = zero
        nxt_ref[1, dout // 2:dout // 2 + 1, :] = zero
        for a in range(dout // 2):
            nxt_ref[1, a:a + 1, :] = out[2 * a:2 * a + 1, :]
            nxt_ref[0, a + 1:a + 2, :] = out[2 * a + 1:2 * a + 2, :]

    def leaky(v):
        return jnp.where(v > 0, v, 0.2 * v)

    d1, d2, d3 = d_out

    out = run_layer(lambda r, q, n: x1_ref[0, r, q:q + n, :], b1_ref, d1)
    out = leaky(out + c1_ref[...])
    rephase_into(x2_ref, out)

    out = run_layer(lambda r, q, n: x2_ref[r, q:q + n, :], b2_ref, d2)
    out = leaky(out + c2_ref[...])
    rephase_into(x3_ref, out)

    out = run_layer(lambda r, q, n: x3_ref[r, q:q + n, :], b3_ref, d3)
    out = leaky(out + c3_ref[...])
    rephase_into(x4_ref, out)

    out = run_layer(lambda r, q, n: x4_ref[r, q:q + n, :], b4_ref, d_final)
    out = jax.nn.sigmoid(out)                          # (d_final, 128) f32
    o_ref[...] = jnp.zeros(o_ref.shape, o_ref.dtype)
    o_ref[0, 0:d_final, :] = out.astype(o_ref.dtype)


# ---------------------------------------------------------------------------
# Full forward pass of ConvDiscriminator
# ---------------------------------------------------------------------------
def conv_discriminator_forward(x, params, output_shape):
    S = int(output_shape)
    assert S % 16 == 0, "4 stride-2 convs need output_shape to be a multiple of 16"
    batch = x.size // (S ** 3)

    # out = x.view(-1, 1, S, S, S) (NCDHW) -> channels-last NDHWC
    xr = x.reshape(batch, 1, S, S, S).astype(jnp.float32)
    x_ndhwc = jnp.transpose(xr, (0, 2, 3, 4, 1))       # (B, S, S, S, 1)

    # Depth-phased, zero-padded input: X1[b, r, a, (j, i, ci)] = xpad[b, 2a+r, j, i, ci]
    xp = jnp.pad(x_ndhwc, ((0, 0), (1, 1), (1, 1), (1, 1), (0, 0)))
    a1 = S // 2 + 1
    x1 = xp.reshape(batch, a1, 2, S + 2, S + 2, 1)
    x1 = jnp.transpose(x1, (0, 2, 1, 3, 4, 5)).reshape(batch, 2, a1, (S + 2) * (S + 2))

    # Per-layer Toeplitz weight tables (BN scale folded in) + interior biases.
    spatial = [S, S // 2, S // 4, S // 8]              # input spatial size per layer
    b_tabs, biases = [], []
    for i in (1, 2, 3, 4):
        p = params[f"conv{i}"]
        w = p[0]                                       # (Cout, Cin, 4, 4, 4) -- PyTorch layout
        cout = w.shape[0]
        h = spatial[i - 1]
        last = (i == 4)
        if last:
            scale = jnp.ones((cout,), jnp.float32)
        else:
            gamma, beta = p[1], p[2]
            scale = gamma / jnp.sqrt(1.0 + EPS)        # eval-mode BN, running stats at init
            biases.append(_interior_bias(beta, h // 2, h // 2, cout))
        wt = jnp.transpose(w, (2, 3, 4, 1, 0)) * scale.reshape(1, 1, 1, 1, cout)
        tab = jnp.stack([_toeplitz_hw(wt[kd], h, h, last) for kd in range(4)], axis=0)
        if last:
            assert tab.shape[-1] <= 128
            tab = jnp.pad(tab, ((0, 0), (0, 0), (0, 128 - tab.shape[-1])))
        b_tabs.append(tab.astype(jnp.bfloat16))

    b1, b2, b3, b4 = b_tabs
    c1, c2, c3 = biases
    d1, d2, d3, d_final = S // 2, S // 4, S // 8, S // 16
    a2, a3, a4 = d1 // 2 + 1, d2 // 2 + 1, d3 // 2 + 1
    n1, n2, n3 = b1.shape[2], b2.shape[2], b3.shape[2]
    d_pad = ((d_final + 7) // 8) * 8

    kernel = functools.partial(_fused_disc_kernel,
                               d_out=(d1, d2, d3), d_final=d_final)
    full3 = lambda b: (0, 0, 0)
    full2 = lambda b: (0, 0)

    out_full = pl.pallas_call(
        kernel,
        out_shape=jax.ShapeDtypeStruct((batch, d_pad, 128), jnp.float32),
        grid=(batch,),
        in_specs=[
            pl.BlockSpec((1, 2, a1, x1.shape[-1]), lambda b: (b, 0, 0, 0)),
            pl.BlockSpec(b1.shape, full3),
            pl.BlockSpec(c1.shape, full2),
            pl.BlockSpec(b2.shape, full3),
            pl.BlockSpec(c2.shape, full2),
            pl.BlockSpec(b3.shape, full3),
            pl.BlockSpec(c3.shape, full2),
            pl.BlockSpec(b4.shape, full3),
        ],
        out_specs=pl.BlockSpec((1, d_pad, 128), lambda b: (b, 0, 0)),
        scratch_shapes=[
            pltpu.VMEM((2, a2, n1), jnp.float32),   # layer-2 phased input
            pltpu.VMEM((2, a3, n2), jnp.float32),   # layer-3 phased input
            pltpu.VMEM((2, a4, n3), jnp.float32),   # layer-4 phased input
        ],
        compiler_params=pltpu.CompilerParams(
            dimension_semantics=("parallel",)),
    )(x1, b1, c1, b2, c2, b3, c3, b4)

    # rows = od, cols = (oh, ow) -> NCDHW (B, 1, Df, Df, Df), then torch.squeeze
    res = out_full[:, :d_final, :d_final * d_final]
    res = res.reshape(batch, 1, d_final, d_final, d_final)
    return jnp.squeeze(res)


# ---------------------------------------------------------------------------
# Plain-JAX reference (same eval-mode semantics) for a numerical self-check
# ---------------------------------------------------------------------------
def _reference_forward(x, params, output_shape):
    S = int(output_shape)
    batch = x.size // (S ** 3)
    out = x.reshape(batch, 1, S, S, S).astype(jnp.float32)
    for i in (1, 2, 3, 4):
        p = params[f"conv{i}"]
        out = jax.lax.conv_general_dilated(
            out, p[0], window_strides=(2, 2, 2),
            padding=((1, 1), (1, 1), (1, 1)),
            dimension_numbers=("NCDHW", "OIDHW", "NCDHW"),
            precision=jax.lax.Precision.HIGHEST)
        if i < 4:
            gamma, beta = p[1], p[2]
            scale = (gamma / jnp.sqrt(1.0 + EPS)).reshape(1, -1, 1, 1, 1)
            out = out * scale + beta.reshape(1, -1, 1, 1, 1)
            out = jnp.where(out > 0, out, 0.2 * out)     # LeakyReLU(0.2); Dropout3d = identity (eval)
        else:
            out = jax.nn.sigmoid(out)
    return jnp.squeeze(out)


# ---------------------------------------------------------------------------
# Deterministic parameter construction (no checkpoints)
# ---------------------------------------------------------------------------
def make_params(key, feature_dim):
    # Weight scale inflated to 0.1 (vs DCGAN's 0.02) and random beta so the
    # numerical self-check exercises a well-spread sigmoid output.
    dims = [1, feature_dim, feature_dim * 2, feature_dim * 4, 1]
    keys = jax.random.split(key, 12)
    params = {}
    ki = 0
    for i in range(1, 5):
        cin, cout = dims[i - 1], dims[i]
        w = 0.1 * jax.random.normal(keys[ki], (cout, cin, K, K, K), jnp.float32)
        ki += 1
        if i < 4:
            gamma = 1.0 + 0.02 * jax.random.normal(keys[ki], (cout,), jnp.float32)
            ki += 1
            beta = 0.1 * jax.random.normal(keys[ki], (cout,), jnp.float32)
            ki += 1
            params[f"conv{i}"] = (w, gamma, beta)
        else:
            params[f"conv{i}"] = (w,)
    return params


if __name__ == "__main__":
    feature_dim = 4
    output_shape = 16   # 4 stride-2 convs take the 16^3 cube down to 1^3

    root = jax.random.PRNGKey(0)
    pkey, xkey = jax.random.split(root)
    params = make_params(pkey, feature_dim)

    # Input: anything reshapable to (-1, 1, 16, 16, 16); here batch = 2 cubes.
    x = jax.random.normal(xkey, (2, 16, 16, 16), jnp.float32)

    fwd = jax.jit(functools.partial(conv_discriminator_forward,
                                    output_shape=output_shape))
    y = jax.block_until_ready(fwd(x, params))
    assert y.shape == (2,), y.shape
    assert bool(jnp.all(jnp.isfinite(y)))

    y_ref = jax.block_until_ready(_reference_forward(x, params, output_shape))
    err = float(jnp.max(jnp.abs(y - y_ref)))
    assert err < 5e-2, f"mismatch vs reference: {err}"

    print("KERNEL_OK")
</pallas_src>

<mosaic_0001>
module attributes {stable_mosaic.version = 11 : i64} {
  func.func @_fused_disc_kernel(%arg0: i32, %arg1: memref<1x2x9x324xf32, #tpu.memory_space<vmem>>, %arg2: memref<4x324x400xbf16, #tpu.memory_space<vmem>>, %arg3: memref<1x400xf32, #tpu.memory_space<vmem>>, %arg4: memref<4x400x288xbf16, #tpu.memory_space<vmem>>, %arg5: memref<1x288xf32, #tpu.memory_space<vmem>>, %arg6: memref<4x288x256xbf16, #tpu.memory_space<vmem>>, %arg7: memref<1x256xf32, #tpu.memory_space<vmem>>, %arg8: memref<4x256x128xbf16, #tpu.memory_space<vmem>>, %arg9: memref<1x8x128xf32, #tpu.memory_space<vmem>>, %arg10: memref<2x5x400xf32, #tpu.memory_space<vmem>>, %arg11: memref<2x3x288xf32, #tpu.memory_space<vmem>>, %arg12: memref<2x2x256xf32, #tpu.memory_space<vmem>>) attributes {dimension_semantics = [#tpu.dimension_semantics<parallel>], iteration_bounds = array<i64: 2>, scalar_prefetch = 0 : i64, scratch_operands = 3 : i64, tpu.core_type = #tpu.core_type<tc>, window_params = [{transform_indices = @transform_0, window_bounds = array<i64: 1, 2, 9, 324>}, {pipeline_mode = #tpu.pipeline_mode<synchronous>, transform_indices = @transform_1, window_bounds = array<i64: 4, 324, 400>}, {pipeline_mode = #tpu.pipeline_mode<synchronous>, transform_indices = @transform_2, window_bounds = array<i64: 1, 400>}, {pipeline_mode = #tpu.pipeline_mode<synchronous>, transform_indices = @transform_3, window_bounds = array<i64: 4, 400, 288>}, {pipeline_mode = #tpu.pipeline_mode<synchronous>, transform_indices = @transform_4, window_bounds = array<i64: 1, 288>}, {pipeline_mode = #tpu.pipeline_mode<synchronous>, transform_indices = @transform_5, window_bounds = array<i64: 4, 288, 256>}, {pipeline_mode = #tpu.pipeline_mode<synchronous>, transform_indices = @transform_6, window_bounds = array<i64: 1, 256>}, {pipeline_mode = #tpu.pipeline_mode<synchronous>, transform_indices = @transform_7, window_bounds = array<i64: 4, 256, 128>}, {transform_indices = @transform_8, window_bounds = array<i64: 1, 8, 128>}]} {
    %c0 = arith.constant 0 : index
    %c0_0 = arith.constant 0 : index
    %c0_1 = arith.constant 0 : index
    %c0_2 = arith.constant 0 : index
    %0 = vector.load %arg1[%c0, %c0_0, %c0_1, %c0_2] : memref<1x2x9x324xf32, #tpu.memory_space<vmem>>, vector<1x1x8x324xf32>
    %1 = vector.shape_cast %0 : vector<1x1x8x324xf32> to vector<8x324xf32>
    %2 = arith.truncf %1 : vector<8x324xf32> to vector<8x324xbf16>
    %c0_3 = arith.constant 0 : index
    %c0_4 = arith.constant 0 : index
    %c0_5 = arith.constant 0 : index
    %3 = vector.load %arg2[%c0_3, %c0_4, %c0_5] : memref<4x324x400xbf16, #tpu.memory_space<vmem>>, vector<1x324x400xbf16>
    %4 = vector.shape_cast %3 : vector<1x324x400xbf16> to vector<324x400xbf16>
    %cst = arith.constant dense<0.000000e+00> : vector<8x400xf32>
    %5 = tpu.matmul %2, %4, %cst {dimension_numbers = #tpu.dot_dimension_numbers<[1], [0], [0], [1], [0, 0, 1, 1], [], []>} : vector<8x324xbf16>, vector<324x400xbf16>, vector<8x400xf32> -> vector<8x400xf32>
    %c0_6 = arith.constant 0 : index
    %c1 = arith.constant 1 : index
    %c0_7 = arith.constant 0 : index
    %c0_8 = arith.constant 0 : index
    %6 = vector.load %arg1[%c0_6, %c1, %c0_7, %c0_8] : memref<1x2x9x324xf32, #tpu.memory_space<vmem>>, vector<1x1x8x324xf32>
    %7 = vector.shape_cast %6 : vector<1x1x8x324xf32> to vector<8x324xf32>
    %8 = arith.truncf %7 : vector<8x324xf32> to vector<8x324xbf16>
    %c1_9 = arith.constant 1 : index
    %c0_10 = arith.constant 0 : index
    %c0_11 = arith.constant 0 : index
    %9 = vector.load %arg2[%c1_9, %c0_10, %c0_11] : memref<4x324x400xbf16, #tpu.memory_space<vmem>>, vector<1x324x400xbf16>
    %10 = vector.shape_cast %9 : vector<1x324x400xbf16> to vector<324x400xbf16>
    %cst_12 = arith.constant dense<0.000000e+00> : vector<8x400xf32>
    %11 = tpu.matmul %8, %10, %cst_12 {dimension_numbers = #tpu.dot_dimension_numbers<[1], [0], [0], [1], [0, 0, 1, 1], [], []>} : vector<8x324xbf16>, vector<324x400xbf16>, vector<8x400xf32> -> vector<8x400xf32>
    %12 = arith.addf %5, %11 : vector<8x400xf32>
    %c0_13 = arith.constant 0 : index
    %c0_14 = arith.constant 0 : index
    %c1_15 = arith.constant 1 : index
    %c0_16 = arith.constant 0 : index
    %13 = vector.load %arg1[%c0_13, %c0_14, %c1_15, %c0_16] : memref<1x2x9x324xf32, #tpu.memory_space<vmem>>, vector<1x1x8x324xf32>
    %14 = vector.shape_cast %13 : vector<1x1x8x324xf32> to vector<8x324xf32>
    %15 = arith.truncf %14 : vector<8x324xf32> to vector<8x324xbf16>
    %c2 = arith.constant 2 : index
    %c0_17 = arith.constant 0 : index
    %c0_18 = arith.constant 0 : index
    %16 = vector.load %arg2[%c2, %c0_17, %c0_18] : memref<4x324x400xbf16, #tpu.memory_space<vmem>>, vector<1x324x400xbf16>
    %17 = vector.shape_cast %16 : vector<1x324x400xbf16> to vector<324x400xbf16>
    %cst_19 = arith.constant dense<0.000000e+00> : vector<8x400xf32>
    %18 = tpu.matmul %15, %17, %cst_19 {dimension_numbers = #tpu.dot_dimension_numbers<[1], [0], [0], [1], [0, 0, 1, 1], [], []>} : vector<8x324xbf16>, vector<324x400xbf16>, vector<8x400xf32> -> vector<8x400xf32>
    %19 = arith.addf %12, %18 : vector<8x400xf32>
    %c0_20 = arith.constant 0 : index
    %c1_21 = arith.constant 1 : index
    %c1_22 = arith.constant 1 : index
    %c0_23 = arith.constant 0 : index
    %20 = vector.load %arg1[%c0_20, %c1_21, %c1_22, %c0_23] : memref<1x2x9x324xf32, #tpu.memory_space<vmem>>, vector<1x1x8x324xf32>
    %21 = vector.shape_cast %20 : vector<1x1x8x324xf32> to vector<8x324xf32>
    %22 = arith.truncf %21 : vector<8x324xf32> to vector<8x324xbf16>
    %c3 = arith.constant 3 : index
    %c0_24 = arith.constant 0 : index
    %c0_25 = arith.constant 0 : index
    %23 = vector.load %arg2[%c3, %c0_24, %c0_25] : memref<4x324x400xbf16, #tpu.memory_space<vmem>>, vector<1x324x400xbf16>
    %24 = vector.shape_cast %23 : vector<1x324x400xbf16> to vector<324x400xbf16>
    %cst_26 = arith.constant dense<0.000000e+00> : vector<8x400xf32>
    %25 = tpu.matmul %22, %24, %cst_26 {dimension_numbers = #tpu.dot_dimension_numbers<[1], [0], [0], [1], [0, 0, 1, 1], [], []>} : vector<8x324xbf16>, vector<324x400xbf16>, vector<8x400xf32> -> vector<8x400xf32>
    %26 = arith.addf %19, %25 : vector<8x400xf32>
    %c0_27 = arith.constant 0 : index
    %c0_28 = arith.constant 0 : index
    %27 = vector.load %arg3[%c0_27, %c0_28] : memref<1x400xf32, #tpu.memory_space<vmem>>, vector<1x400xf32>
    %28 = vector.broadcast %27 : vector<1x400xf32> to vector<8x400xf32>
    %29 = arith.addf %26, %28 : vector<8x400xf32>
    %cst_29 = arith.constant 0.000000e+00 : f32
    %30 = vector.broadcast %cst_29 : f32 to vector<8x400xf32>
    %31 = arith.cmpf ogt, %29, %30 : vector<8x400xf32>
    %cst_30 = arith.constant 2.000000e-01 : f32
    %32 = vector.broadcast %cst_30 : f32 to vector<8x400xf32>
    %33 = arith.mulf %32, %29 : vector<8x400xf32>
    %34 = arith.select %31, %29, %33 : vector<8x400xi1>, vector<8x400xf32>
    %cst_31 = arith.constant 0.000000e+00 : f32
    %35 = vector.broadcast %cst_31 : f32 to vector<1x400xf32>
    %c0_32 = arith.constant 0 : index
    %c0_33 = arith.constant 0 : index
    %c0_34 = arith.constant 0 : index
    %36 = vector.load %arg10[%c0_32, %c0_33, %c0_34] : memref<2x5x400xf32, #tpu.memory_space<vmem>>, vector<1x1x400xf32>
    %37 = vector.shape_cast %36 : vector<1x1x400xf32> to vector<1x400xf32>
    %38 = vector.shape_cast %35 : vector<1x400xf32> to vector<1x1x400xf32>
    tpu.vector_store %arg10[%c0_32, %c0_33, %c0_34], %38 {strides = array<i32>} : memref<2x5x400xf32, #tpu.memory_space<vmem>>, vector<1x1x400xf32>,
    %c1_35 = arith.constant 1 : index
    %c4 = arith.constant 4 : index
    %c0_36 = arith.constant 0 : index
    %39 = vector.load %arg10[%c1_35, %c4, %c0_36] : memref<2x5x400xf32, #tpu.memory_space<vmem>>, vector<1x1x400xf32>
    %40 = vector.shape_cast %39 : vector<1x1x400xf32> to vector<1x400xf32>
    %41 = vector.shape_cast %35 : vector<1x400xf32> to vector<1x1x400xf32>
    tpu.vector_store %arg10[%c1_35, %c4, %c0_36], %41 {strides = array<i32>} : memref<2x5x400xf32, #tpu.memory_space<vmem>>, vector<1x1x400xf32>,
    %42 = vector.extract_strided_slice %34 {offsets = [0, 0], sizes = [1, 400], strides = [1, 1]} : vector<8x400xf32> to vector<1x400xf32>
    %c1_37 = arith.constant 1 : index
    %c0_38 = arith.constant 0 : index
    %c0_39 = arith.constant 0 : index
    %43 = vector.load %arg10[%c1_37, %c0_38, %c0_39] : memref<2x5x400xf32, #tpu.memory_space<vmem>>, vector<1x1x400xf32>
    %44 = vector.shape_cast %43 : vector<1x1x400xf32> to vector<1x400xf32>
    %45 = vector.shape_cast %42 : vector<1x400xf32> to vector<1x1x400xf32>
    tpu.vector_store %arg10[%c1_37, %c0_38, %c0_39], %45 {strides = array<i32>} : memref<2x5x400xf32, #tpu.memory_space<vmem>>, vector<1x1x400xf32>,
    %46 = vector.extract_strided_slice %34 {offsets = [1, 0], sizes = [1, 400], strides = [1, 1]} : vector<8x400xf32> to vector<1x400xf32>
    %c0_40 = arith.constant 0 : index
    %c1_41 = arith.constant 1 : index
    %c0_42 = arith.constant 0 : index
    %47 = vector.load %arg10[%c0_40, %c1_41, %c0_42] : memref<2x5x400xf32, #tpu.memory_space<vmem>>, vector<1x1x400xf32>
    %48 = vector.shape_cast %47 : vector<1x1x400xf32> to vector<1x400xf32>
    %49 = vector.shape_cast %46 : vector<1x400xf32> to vector<1x1x400xf32>
    tpu.vector_store %arg10[%c0_40, %c1_41, %c0_42], %49 {strides = array<i32>} : memref<2x5x400xf32, #tpu.memory_space<vmem>>, vector<1x1x400xf32>,
    %50 = vector.extract_strided_slice %34 {offsets = [2, 0], sizes = [1, 400], strides = [1, 1]} : vector<8x400xf32> to vector<1x400xf32>
    %c1_43 = arith.constant 1 : index
    %c1_44 = arith.constant 1 : index
    %c0_45 = arith.constant 0 : index
    %51 = vector.load %arg10[%c1_43, %c1_44, %c0_45] : memref<2x5x400xf32, #tpu.memory_space<vmem>>, vector<1x1x400xf32>
    %52 = vector.shape_cast %51 : vector<1x1x400xf32> to vector<1x400xf32>
    %53 = vector.shape_cast %50 : vector<1x400xf32> to vector<1x1x400xf32>
    tpu.vector_store %arg10[%c1_43, %c1_44, %c0_45], %53 {strides = array<i32>} : memref<2x5x400xf32, #tpu.memory_space<vmem>>, vector<1x1x400xf32>,
    %54 = vector.extract_strided_slice %34 {offsets = [3, 0], sizes = [1, 400], strides = [1, 1]} : vector<8x400xf32> to vector<1x400xf32>
    %c0_46 = arith.constant 0 : index
    %c2_47 = arith.constant 2 : index
    %c0_48 = arith.constant 0 : index
    %55 = vector.load %arg10[%c0_46, %c2_47, %c0_48] : memref<2x5x400xf32, #tpu.memory_space<vmem>>, vector<1x1x400xf32>
    %56 = vector.shape_cast %55 : vector<1x1x400xf32> to vector<1x400xf32>
    %57 = vector.shape_cast %54 : vector<1x400xf32> to vector<1x1x400xf32>
    tpu.vector_store %arg10[%c0_46, %c2_47, %c0_48], %57 {strides = array<i32>} : memref<2x5x400xf32, #tpu.memory_space<vmem>>, vector<1x1x400xf32>,
    %58 = vector.extract_strided_slice %34 {offsets = [4, 0], sizes = [1, 400], strides = [1, 1]} : vector<8x400xf32> to vector<1x400xf32>
    %c1_49 = arith.constant 1 : index
    %c2_50 = arith.constant 2 : index
    %c0_51 = arith.constant 0 : index
    %59 = vector.load %arg10[%c1_49, %c2_50, %c0_51] : memref<2x5x400xf32, #tpu.memory_space<vmem>>, vector<1x1x400xf32>
    %60 = vector.shape_cast %59 : vector<1x1x400xf32> to vector<1x400xf32>
    %61 = vector.shape_cast %58 : vector<1x400xf32> to vector<1x1x400xf32>
    tpu.vector_store %arg10[%c1_49, %c2_50, %c0_51], %61 {strides = array<i32>} : memref<2x5x400xf32, #tpu.memory_space<vmem>>, vector<1x1x400xf32>,
    %62 = vector.extract_strided_slice %34 {offsets = [5, 0], sizes = [1, 400], strides = [1, 1]} : vector<8x400xf32> to vector<1x400xf32>
    %c0_52 = arith.constant 0 : index
    %c3_53 = arith.constant 3 : index
    %c0_54 = arith.constant 0 : index
    %63 = vector.load %arg10[%c0_52, %c3_53, %c0_54] : memref<2x5x400xf32, #tpu.memory_space<vmem>>, vector<1x1x400xf32>
    %64 = vector.shape_cast %63 : vector<1x1x400xf32> to vector<1x400xf32>
    %65 = vector.shape_cast %62 : vector<1x400xf32> to vector<1x1x400xf32>
    tpu.vector_store %arg10[%c0_52, %c3_53, %c0_54], %65 {strides = array<i32>} : memref<2x5x400xf32, #tpu.memory_space<vmem>>, vector<1x1x400xf32>,
    %66 = vector.extract_strided_slice %34 {offsets = [6, 0], sizes = [1, 400], strides = [1, 1]} : vector<8x400xf32> to vector<1x400xf32>
    %c1_55 = arith.constant 1 : index
    %c3_56 = arith.constant 3 : index
    %c0_57 = arith.constant 0 : index
    %67 = vector.load %arg10[%c1_55, %c3_56, %c0_57] : memref<2x5x400xf32, #tpu.memory_space<vmem>>, vector<1x1x400xf32>
    %68 = vector.shape_cast %67 : vector<1x1x400xf32> to vector<1x400xf32>
    %69 = vector.shape_cast %66 : vector<1x400xf32> to vector<1x1x400xf32>
    tpu.vector_store %arg10[%c1_55, %c3_56, %c0_57], %69 {strides = array<i32>} : memref<2x5x400xf32, #tpu.memory_space<vmem>>, vector<1x1x400xf32>,
    %70 = vector.extract_strided_slice %34 {offsets = [7, 0], sizes = [1, 400], strides = [1, 1]} : vector<8x400xf32> to vector<1x400xf32>
    %c0_58 = arith.constant 0 : index
    %c4_59 = arith.constant 4 : index
    %c0_60 = arith.constant 0 : index
    %71 = vector.load %arg10[%c0_58, %c4_59, %c0_60] : memref<2x5x400xf32, #tpu.memory_space<vmem>>, vector<1x1x400xf32>
    %72 = vector.shape_cast %71 : vector<1x1x400xf32> to vector<1x400xf32>
    %73 = vector.shape_cast %70 : vector<1x400xf32> to vector<1x1x400xf32>
    tpu.vector_store %arg10[%c0_58, %c4_59, %c0_60], %73 {strides = array<i32>} : memref<2x5x400xf32, #tpu.memory_space<vmem>>, vector<1x1x400xf32>,
    %c0_61 = arith.constant 0 : index
    %c0_62 = arith.constant 0 : index
    %c0_63 = arith.constant 0 : index
    %74 = vector.load %arg10[%c0_61, %c0_62, %c0_63] : memref<2x5x400xf32, #tpu.memory_space<vmem>>, vector<1x4x400xf32>
    %75 = vector.shape_cast %74 : vector<1x4x400xf32> to vector<4x400xf32>
    %76 = arith.truncf %75 : vector<4x400xf32> to vector<4x400xbf16>
    %c0_64 = arith.constant 0 : index
    %c0_65 = arith.constant 0 : index
    %c0_66 = arith.constant 0 : index
    %77 = vector.load %arg4[%c0_64, %c0_65, %c0_66] : memref<4x400x288xbf16, #tpu.memory_space<vmem>>, vector<1x400x288xbf16>
    %78 = vector.shape_cast %77 : vector<1x400x288xbf16> to vector<400x288xbf16>
    %cst_67 = arith.constant dense<0.000000e+00> : vector<4x288xf32>
    %79 = tpu.matmul %76, %78, %cst_67 {dimension_numbers = #tpu.dot_dimension_numbers<[1], [0], [0], [1], [0, 0, 1, 1], [], []>} : vector<4x400xbf16>, vector<400x288xbf16>, vector<4x288xf32> -> vector<4x288xf32>
    %c1_68 = arith.constant 1 : index
    %c0_69 = arith.constant 0 : index
    %c0_70 = arith.constant 0 : index
    %80 = vector.load %arg10[%c1_68, %c0_69, %c0_70] : memref<2x5x400xf32, #tpu.memory_space<vmem>>, vector<1x4x400xf32>
    %81 = vector.shape_cast %80 : vector<1x4x400xf32> to vector<4x400xf32>
    %82 = arith.truncf %81 : vector<4x400xf32> to vector<4x400xbf16>
    %c1_71 = arith.constant 1 : index
    %c0_72 = arith.constant 0 : index
    %c0_73 = arith.constant 0 : index
    %83 = vector.load %arg4[%c1_71, %c0_72, %c0_73] : memref<4x400x288xbf16, #tpu.memory_space<vmem>>, vector<1x400x288xbf16>
    %84 = vector.shape_cast %83 : vector<1x400x288xbf16> to vector<400x288xbf16>
    %cst_74 = arith.constant dense<0.000000e+00> : vector<4x288xf32>
    %85 = tpu.matmul %82, %84, %cst_74 {dimension_numbers = #tpu.dot_dimension_numbers<[1], [0], [0], [1], [0, 0, 1, 1], [], []>} : vector<4x400xbf16>, vector<400x288xbf16>, vector<4x288xf32> -> vector<4x288xf32>
    %86 = arith.addf %79, %85 : vector<4x288xf32>
    %c0_75 = arith.constant 0 : index
    %c1_76 = arith.constant 1 : index
    %c0_77 = arith.constant 0 : index
    %87 = vector.load %arg10[%c0_75, %c1_76, %c0_77] : memref<2x5x400xf32, #tpu.memory_space<vmem>>, vector<1x4x400xf32>
    %88 = vector.shape_cast %87 : vector<1x4x400xf32> to vector<4x400xf32>
    %89 = arith.truncf %88 : vector<4x400xf32> to vector<4x400xbf16>
    %c2_78 = arith.constant 2 : index
    %c0_79 = arith.constant 0 : index
    %c0_80 = arith.constant 0 : index
    %90 = vector.load %arg4[%c2_78, %c0_79, %c0_80] : memref<4x400x288xbf16, #tpu.memory_space<vmem>>, vector<1x400x288xbf16>
    %91 = vector.shape_cast %90 : vector<1x400x288xbf16> to vector<400x288xbf16>
    %cst_81 = arith.constant dense<0.000000e+00> : vector<4x288xf32>
    %92 = tpu.matmul %89, %91, %cst_81 {dimension_numbers = #tpu.dot_dimension_numbers<[1], [0], [0], [1], [0, 0, 1, 1], [], []>} : vector<4x400xbf16>, vector<400x288xbf16>, vector<4x288xf32> -> vector<4x288xf32>
    %93 = arith.addf %86, %92 : vector<4x288xf32>
    %c1_82 = arith.constant 1 : index
    %c1_83 = arith.constant 1 : index
    %c0_84 = arith.constant 0 : index
    %94 = vector.load %arg10[%c1_82, %c1_83, %c0_84] : memref<2x5x400xf32, #tpu.memory_space<vmem>>, vector<1x4x400xf32>
    %95 = vector.shape_cast %94 : vector<1x4x400xf32> to vector<4x400xf32>
    %96 = arith.truncf %95 : vector<4x400xf32> to vector<4x400xbf16>
    %c3_85 = arith.constant 3 : index
    %c0_86 = arith.constant 0 : index
    %c0_87 = arith.constant 0 : index
    %97 = vector.load %arg4[%c3_85, %c0_86, %c0_87] : memref<4x400x288xbf16, #tpu.memory_space<vmem>>, vector<1x400x288xbf16>
    %98 = vector.shape_cast %97 : vector<1x400x288xbf16> to vector<400x288xbf16>
    %cst_88 = arith.constant dense<0.000000e+00> : vector<4x288xf32>
    %99 = tpu.matmul %96, %98, %cst_88 {dimension_numbers = #tpu.dot_dimension_numbers<[1], [0], [0], [1], [0, 0, 1, 1], [], []>} : vector<4x400xbf16>, vector<400x288xbf16>, vector<4x288xf32> -> vector<4x288xf32>
    %100 = arith.addf %93, %99 : vector<4x288xf32>
    %c0_89 = arith.constant 0 : index
    %c0_90 = arith.constant 0 : index
    %101 = vector.load %arg5[%c0_89, %c0_90] : memref<1x288xf32, #tpu.memory_space<vmem>>, vector<1x288xf32>
    %102 = vector.broadcast %101 : vector<1x288xf32> to vector<4x288xf32>
    %103 = arith.addf %100, %102 : vector<4x288xf32>
    %cst_91 = arith.constant 0.000000e+00 : f32
    %104 = vector.broadcast %cst_91 : f32 to vector<4x288xf32>
    %105 = arith.cmpf ogt, %103, %104 : vector<4x288xf32>
    %cst_92 = arith.constant 2.000000e-01 : f32
    %106 = vector.broadcast %cst_92 : f32 to vector<4x288xf32>
    %107 = arith.mulf %106, %103 : vector<4x288xf32>
    %108 = arith.select %105, %103, %107 : vector<4x288xi1>, vector<4x288xf32>
    %cst_93 = arith.constant 0.000000e+00 : f32
    %109 = vector.broadcast %cst_93 : f32 to vector<1x288xf32>
    %c0_94 = arith.constant 0 : index
    %c0_95 = arith.constant 0 : index
    %c0_96 = arith.constant 0 : index
    %110 = vector.load %arg11[%c0_94, %c0_95, %c0_96] : memref<2x3x288xf32, #tpu.memory_space<vmem>>, vector<1x1x288xf32>
    %111 = vector.shape_cast %110 : vector<1x1x288xf32> to vector<1x288xf32>
    %112 = vector.shape_cast %109 : vector<1x288xf32> to vector<1x1x288xf32>
    tpu.vector_store %arg11[%c0_94, %c0_95, %c0_96], %112 {strides = array<i32>} : memref<2x3x288xf32, #tpu.memory_space<vmem>>, vector<1x1x288xf32>,
    %c1_97 = arith.constant 1 : index
    %c2_98 = arith.constant 2 : index
    %c0_99 = arith.constant 0 : index
    %113 = vector.load %arg11[%c1_97, %c2_98, %c0_99] : memref<2x3x288xf32, #tpu.memory_space<vmem>>, vector<1x1x288xf32>
    %114 = vector.shape_cast %113 : vector<1x1x288xf32> to vector<1x288xf32>
    %115 = vector.shape_cast %109 : vector<1x288xf32> to vector<1x1x288xf32>
    tpu.vector_store %arg11[%c1_97, %c2_98, %c0_99], %115 {strides = array<i32>} : memref<2x3x288xf32, #tpu.memory_space<vmem>>, vector<1x1x288xf32>,
    %116 = vector.extract_strided_slice %108 {offsets = [0, 0], sizes = [1, 288], strides = [1, 1]} : vector<4x288xf32> to vector<1x288xf32>
    %c1_100 = arith.constant 1 : index
    %c0_101 = arith.constant 0 : index
    %c0_102 = arith.constant 0 : index
    %117 = vector.load %arg11[%c1_100, %c0_101, %c0_102] : memref<2x3x288xf32, #tpu.memory_space<vmem>>, vector<1x1x288xf32>
    %118 = vector.shape_cast %117 : vector<1x1x288xf32> to vector<1x288xf32>
    %119 = vector.shape_cast %116 : vector<1x288xf32> to vector<1x1x288xf32>
    tpu.vector_store %arg11[%c1_100, %c0_101, %c0_102], %119 {strides = array<i32>} : memref<2x3x288xf32, #tpu.memory_space<vmem>>, vector<1x1x288xf32>,
    %120 = vector.extract_strided_slice %108 {offsets = [1, 0], sizes = [1, 288], strides = [1, 1]} : vector<4x288xf32> to vector<1x288xf32>
    %c0_103 = arith.constant 0 : index
    %c1_104 = arith.constant 1 : index
    %c0_105 = arith.constant 0 : index
    %121 = vector.load %arg11[%c0_103, %c1_104, %c0_105] : memref<2x3x288xf32, #tpu.memory_space<vmem>>, vector<1x1x288xf32>
    %122 = vector.shape_cast %121 : vector<1x1x288xf32> to vector<1x288xf32>
    %123 = vector.shape_cast %120 : vector<1x288xf32> to vector<1x1x288xf32>
    tpu.vector_store %arg11[%c0_103, %c1_104, %c0_105], %123 {strides = array<i32>} : memref<2x3x288xf32, #tpu.memory_space<vmem>>, vector<1x1x288xf32>,
    %124 = vector.extract_strided_slice %108 {offsets = [2, 0], sizes = [1, 288], strides = [1, 1]} : vector<4x288xf32> to vector<1x288xf32>
    %c1_106 = arith.constant 1 : index
    %c1_107 = arith.constant 1 : index
    %c0_108 = arith.constant 0 : index
    %125 = vector.load %arg11[%c1_106, %c1_107, %c0_108] : memref<2x3x288xf32, #tpu.memory_space<vmem>>, vector<1x1x288xf32>
    %126 = vector.shape_cast %125 : vector<1x1x288xf32> to vector<1x288xf32>
    %127 = vector.shape_cast %124 : vector<1x288xf32> to vector<1x1x288xf32>
    tpu.vector_store %arg11[%c1_106, %c1_107, %c0_108], %127 {strides = array<i32>} : memref<2x3x288xf32, #tpu.memory_space<vmem>>, vector<1x1x288xf32>,
    %128 = vector.extract_strided_slice %108 {offsets = [3, 0], sizes = [1, 288], strides = [1, 1]} : vector<4x288xf32> to vector<1x288xf32>
    %c0_109 = arith.constant 0 : index
    %c2_110 = arith.constant 2 : index
    %c0_111 = arith.constant 0 : index
    %129 = vector.load %arg11[%c0_109, %c2_110, %c0_111] : memref<2x3x288xf32, #tpu.memory_space<vmem>>, vector<1x1x288xf32>
    %130 = vector.shape_cast %129 : vector<1x1x288xf32> to vector<1x288xf32>
    %131 = vector.shape_cast %128 : vector<1x288xf32> to vector<1x1x288xf32>
    tpu.vector_store %arg11[%c0_109, %c2_110, %c0_111], %131 {strides = array<i32>} : memref<2x3x288xf32, #tpu.memory_space<vmem>>, vector<1x1x288xf32>,
    %c0_112 = arith.constant 0 : index
    %c0_113 = arith.constant 0 : index
    %c0_114 = arith.constant 0 : index
    %132 = vector.load %arg11[%c0_112, %c0_113, %c0_114] : memref<2x3x288xf32, #tpu.memory_space<vmem>>, vector<1x2x288xf32>
    %133 = vector.shape_cast %132 : vector<1x2x288xf32> to vector<2x288xf32>
    %134 = arith.truncf %133 : vector<2x288xf32> to vector<2x288xbf16>
    %c0_115 = arith.constant 0 : index
    %c0_116 = arith.constant 0 : index
    %c0_117 = arith.constant 0 : index
    %135 = vector.load %arg6[%c0_115, %c0_116, %c0_117] : memref<4x288x256xbf16, #tpu.memory_space<vmem>>, vector<1x288x256xbf16>
    %136 = vector.shape_cast %135 : vector<1x288x256xbf16> to vector<288x256xbf16>
    %cst_118 = arith.constant dense<0.000000e+00> : vector<2x256xf32>
    %137 = tpu.matmul %134, %136, %cst_118 {dimension_numbers = #tpu.dot_dimension_numbers<[1], [0], [0], [1], [0, 0, 1, 1], [], []>} : vector<2x288xbf16>, vector<288x256xbf16>, vector<2x256xf32> -> vector<2x256xf32>
    %c1_119 = arith.constant 1 : index
    %c0_120 = arith.constant 0 : index
    %c0_121 = arith.constant 0 : index
    %138 = vector.load %arg11[%c1_119, %c0_120, %c0_121] : memref<2x3x288xf32, #tpu.memory_space<vmem>>, vector<1x2x288xf32>
    %139 = vector.shape_cast %138 : vector<1x2x288xf32> to vector<2x288xf32>
    %140 = arith.truncf %139 : vector<2x288xf32> to vector<2x288xbf16>
    %c1_122 = arith.constant 1 : index
    %c0_123 = arith.constant 0 : index
    %c0_124 = arith.constant 0 : index
    %141 = vector.load %arg6[%c1_122, %c0_123, %c0_124] : memref<4x288x256xbf16, #tpu.memory_space<vmem>>, vector<1x288x256xbf16>
    %142 = vector.shape_cast %141 : vector<1x288x256xbf16> to vector<288x256xbf16>
    %cst_125 = arith.constant dense<0.000000e+00> : vector<2x256xf32>
    %143 = tpu.matmul %140, %142, %cst_125 {dimension_numbers = #tpu.dot_dimension_numbers<[1], [0], [0], [1], [0, 0, 1, 1], [], []>} : vector<2x288xbf16>, vector<288x256xbf16>, vector<2x256xf32> -> vector<2x256xf32>
    %144 = arith.addf %137, %143 : vector<2x256xf32>
    %c0_126 = arith.constant 0 : index
    %c1_127 = arith.constant 1 : index
    %c0_128 = arith.constant 0 : index
    %145 = vector.load %arg11[%c0_126, %c1_127, %c0_128] : memref<2x3x288xf32, #tpu.memory_space<vmem>>, vector<1x2x288xf32>
    %146 = vector.shape_cast %145 : vector<1x2x288xf32> to vector<2x288xf32>
    %147 = arith.truncf %146 : vector<2x288xf32> to vector<2x288xbf16>
    %c2_129 = arith.constant 2 : index
    %c0_130 = arith.constant 0 : index
    %c0_131 = arith.constant 0 : index
    %148 = vector.load %arg6[%c2_129, %c0_130, %c0_131] : memref<4x288x256xbf16, #tpu.memory_space<vmem>>, vector<1x288x256xbf16>
    %149 = vector.shape_cast %148 : vector<1x288x256xbf16> to vector<288x256xbf16>
    %cst_132 = arith.constant dense<0.000000e+00> : vector<2x256xf32>
    %150 = tpu.matmul %147, %149, %cst_132 {dimension_numbers = #tpu.dot_dimension_numbers<[1], [0], [0], [1], [0, 0, 1, 1], [], []>} : vector<2x288xbf16>, vector<288x256xbf16>, vector<2x256xf32> -> vector<2x256xf32>
    %151 = arith.addf %144, %150 : vector<2x256xf32>
    %c1_133 = arith.constant 1 : index
    %c1_134 = arith.constant 1 : index
    %c0_135 = arith.constant 0 : index
    %152 = vector.load %arg11[%c1_133, %c1_134, %c0_135] : memref<2x3x288xf32, #tpu.memory_space<vmem>>, vector<1x2x288xf32>
    %153 = vector.shape_cast %152 : vector<1x2x288xf32> to vector<2x288xf32>
    %154 = arith.truncf %153 : vector<2x288xf32> to vector<2x288xbf16>
    %c3_136 = arith.constant 3 : index
    %c0_137 = arith.constant 0 : index
    %c0_138 = arith.constant 0 : index
    %155 = vector.load %arg6[%c3_136, %c0_137, %c0_138] : memref<4x288x256xbf16, #tpu.memory_space<vmem>>, vector<1x288x256xbf16>
    %156 = vector.shape_cast %155 : vector<1x288x256xbf16> to vector<288x256xbf16>
    %cst_139 = arith.constant dense<0.000000e+00> : vector<2x256xf32>
    %157 = tpu.matmul %154, %156, %cst_139 {dimension_numbers = #tpu.dot_dimension_numbers<[1], [0], [0], [1], [0, 0, 1, 1], [], []>} : vector<2x288xbf16>, vector<288x256xbf16>, vector<2x256xf32> -> vector<2x256xf32>
    %158 = arith.addf %151, %157 : vector<2x256xf32>
    %c0_140 = arith.constant 0 : index
    %c0_141 = arith.constant 0 : index
    %159 = vector.load %arg7[%c0_140, %c0_141] : memref<1x256xf32, #tpu.memory_space<vmem>>, vector<1x256xf32>
    %160 = vector.broadcast %159 : vector<1x256xf32> to vector<2x256xf32>
    %161 = arith.addf %158, %160 : vector<2x256xf32>
    %cst_142 = arith.constant 0.000000e+00 : f32
    %162 = vector.broadcast %cst_142 : f32 to vector<2x256xf32>
    %163 = arith.cmpf ogt, %161, %162 : vector<2x256xf32>
    %cst_143 = arith.constant 2.000000e-01 : f32
    %164 = vector.broadcast %cst_143 : f32 to vector<2x256xf32>
    %165 = arith.mulf %164, %161 : vector<2x256xf32>
    %166 = arith.select %163, %161, %165 : vector<2x256xi1>, vector<2x256xf32>
    %cst_144 = arith.constant 0.000000e+00 : f32
    %167 = vector.broadcast %cst_144 : f32 to vector<1x256xf32>
    %c0_145 = arith.constant 0 : index
    %c0_146 = arith.constant 0 : index
    %c0_147 = arith.constant 0 : index
    %168 = vector.load %arg12[%c0_145, %c0_146, %c0_147] : memref<2x2x256xf32, #tpu.memory_space<vmem>>, vector<1x1x256xf32>
    %169 = vector.shape_cast %168 : vector<1x1x256xf32> to vector<1x256xf32>
    %170 = vector.shape_cast %167 : vector<1x256xf32> to vector<1x1x256xf32>
    tpu.vector_store %arg12[%c0_145, %c0_146, %c0_147], %170 {strides = array<i32>} : memref<2x2x256xf32, #tpu.memory_space<vmem>>, vector<1x1x256xf32>,
    %c1_148 = arith.constant 1 : index
    %c1_149 = arith.constant 1 : index
    %c0_150 = arith.constant 0 : index
    %171 = vector.load %arg12[%c1_148, %c1_149, %c0_150] : memref<2x2x256xf32, #tpu.memory_space<vmem>>, vector<1x1x256xf32>
    %172 = vector.shape_cast %171 : vector<1x1x256xf32> to vector<1x256xf32>
    %173 = vector.shape_cast %167 : vector<1x256xf32> to vector<1x1x256xf32>
    tpu.vector_store %arg12[%c1_148, %c1_149, %c0_150], %173 {strides = array<i32>} : memref<2x2x256xf32, #tpu.memory_space<vmem>>, vector<1x1x256xf32>,
    %174 = vector.extract_strided_slice %166 {offsets = [0, 0], sizes = [1, 256], strides = [1, 1]} : vector<2x256xf32> to vector<1x256xf32>
    %c1_151 = arith.constant 1 : index
    %c0_152 = arith.constant 0 : index
    %c0_153 = arith.constant 0 : index
    %175 = vector.load %arg12[%c1_151, %c0_152, %c0_153] : memref<2x2x256xf32, #tpu.memory_space<vmem>>, vector<1x1x256xf32>
    %176 = vector.shape_cast %175 : vector<1x1x256xf32> to vector<1x256xf32>
    %177 = vector.shape_cast %174 : vector<1x256xf32> to vector<1x1x256xf32>
    tpu.vector_store %arg12[%c1_151, %c0_152, %c0_153], %177 {strides = array<i32>} : memref<2x2x256xf32, #tpu.memory_space<vmem>>, vector<1x1x256xf32>,
    %178 = vector.extract_strided_slice %166 {offsets = [1, 0], sizes = [1, 256], strides = [1, 1]} : vector<2x256xf32> to vector<1x256xf32>
    %c0_154 = arith.constant 0 : index
    %c1_155 = arith.constant 1 : index
    %c0_156 = arith.constant 0 : index
    %179 = vector.load %arg12[%c0_154, %c1_155, %c0_156] : memref<2x2x256xf32, #tpu.memory_space<vmem>>, vector<1x1x256xf32>
    %180 = vector.shape_cast %179 : vector<1x1x256xf32> to vector<1x256xf32>
    %181 = vector.shape_cast %178 : vector<1x256xf32> to vector<1x1x256xf32>
    tpu.vector_store %arg12[%c0_154, %c1_155, %c0_156], %181 {strides = array<i32>} : memref<2x2x256xf32, #tpu.memory_space<vmem>>, vector<1x1x256xf32>,
    %c0_157 = arith.constant 0 : index
    %c0_158 = arith.constant 0 : index
    %c0_159 = arith.constant 0 : index
    %182 = vector.load %arg12[%c0_157, %c0_158, %c0_159] : memref<2x2x256xf32, #tpu.memory_space<vmem>>, vector<1x1x256xf32>
    %183 = vector.shape_cast %182 : vector<1x1x256xf32> to vector<1x256xf32>
    %184 = arith.truncf %183 : vector<1x256xf32> to vector<1x256xbf16>
    %c0_160 = arith.constant 0 : index
    %c0_161 = arith.constant 0 : index
    %c0_162 = arith.constant 0 : index
    %185 = vector.load %arg8[%c0_160, %c0_161, %c0_162] : memref<4x256x128xbf16, #tpu.memory_space<vmem>>, vector<1x256x128xbf16>
    %186 = vector.shape_cast %185 : vector<1x256x128xbf16> to vector<256x128xbf16>
    %cst_163 = arith.constant dense<0.000000e+00> : vector<1x128xf32>
    %187 = tpu.matmul %184, %186, %cst_163 {dimension_numbers = #tpu.dot_dimension_numbers<[1], [0], [0], [1], [0, 0, 1, 1], [], []>} : vector<1x256xbf16>, vector<256x128xbf16>, vector<1x128xf32> -> vector<1x128xf32>
    %c1_164 = arith.constant 1 : index
    %c0_165 = arith.constant 0 : index
    %c0_166 = arith.constant 0 : index
    %188 = vector.load %arg12[%c1_164, %c0_165, %c0_166] : memref<2x2x256xf32, #tpu.memory_space<vmem>>, vector<1x1x256xf32>
    %189 = vector.shape_cast %188 : vector<1x1x256xf32> to vector<1x256xf32>
    %190 = arith.truncf %189 : vector<1x256xf32> to vector<1x256xbf16>
    %c1_167 = arith.constant 1 : index
    %c0_168 = arith.constant 0 : index
    %c0_169 = arith.constant 0 : index
    %191 = vector.load %arg8[%c1_167, %c0_168, %c0_169] : memref<4x256x128xbf16, #tpu.memory_space<vmem>>, vector<1x256x128xbf16>
    %192 = vector.shape_cast %191 : vector<1x256x128xbf16> to vector<256x128xbf16>
    %cst_170 = arith.constant dense<0.000000e+00> : vector<1x128xf32>
    %193 = tpu.matmul %190, %192, %cst_170 {dimension_numbers = #tpu.dot_dimension_numbers<[1], [0], [0], [1], [0, 0, 1, 1], [], []>} : vector<1x256xbf16>, vector<256x128xbf16>, vector<1x128xf32> -> vector<1x128xf32>
    %194 = arith.addf %187, %193 : vector<1x128xf32>
    %c0_171 = arith.constant 0 : index
    %c1_172 = arith.constant 1 : index
    %c0_173 = arith.constant 0 : index
    %195 = vector.load %arg12[%c0_171, %c1_172, %c0_173] : memref<2x2x256xf32, #tpu.memory_space<vmem>>, vector<1x1x256xf32>
    %196 = vector.shape_cast %195 : vector<1x1x256xf32> to vector<1x256xf32>
    %197 = arith.truncf %196 : vector<1x256xf32> to vector<1x256xbf16>
    %c2_174 = arith.constant 2 : index
    %c0_175 = arith.constant 0 : index
    %c0_176 = arith.constant 0 : index
    %198 = vector.load %arg8[%c2_174, %c0_175, %c0_176] : memref<4x256x128xbf16, #tpu.memory_space<vmem>>, vector<1x256x128xbf16>
    %199 = vector.shape_cast %198 : vector<1x256x128xbf16> to vector<256x128xbf16>
    %cst_177 = arith.constant dense<0.000000e+00> : vector<1x128xf32>
    %200 = tpu.matmul %197, %199, %cst_177 {dimension_numbers = #tpu.dot_dimension_numbers<[1], [0], [0], [1], [0, 0, 1, 1], [], []>} : vector<1x256xbf16>, vector<256x128xbf16>, vector<1x128xf32> -> vector<1x128xf32>
    %201 = arith.addf %194, %200 : vector<1x128xf32>
    %c1_178 = arith.constant 1 : index
    %c1_179 = arith.constant 1 : index
    %c0_180 = arith.constant 0 : index
    %202 = vector.load %arg12[%c1_178, %c1_179, %c0_180] : memref<2x2x256xf32, #tpu.memory_space<vmem>>, vector<1x1x256xf32>
    %203 = vector.shape_cast %202 : vector<1x1x256xf32> to vector<1x256xf32>
    %204 = arith.truncf %203 : vector<1x256xf32> to vector<1x256xbf16>
    %c3_181 = arith.constant 3 : index
    %c0_182 = arith.constant 0 : index
    %c0_183 = arith.constant 0 : index
    %205 = vector.load %arg8[%c3_181, %c0_182, %c0_183] : memref<4x256x128xbf16, #tpu.memory_space<vmem>>, vector<1x256x128xbf16>
    %206 = vector.shape_cast %205 : vector<1x256x128xbf16> to vector<256x128xbf16>
    %cst_184 = arith.constant dense<0.000000e+00> : vector<1x128xf32>
    %207 = tpu.matmul %204, %206, %cst_184 {dimension_numbers = #tpu.dot_dimension_numbers<[1], [0], [0], [1], [0, 0, 1, 1], [], []>} : vector<1x256xbf16>, vector<256x128xbf16>, vector<1x128xf32> -> vector<1x128xf32>
    %208 = arith.addf %201, %207 : vector<1x128xf32>
    %209 = arith.negf %208 : vector<1x128xf32>
    %210 = math.exp %209 : vector<1x128xf32>
    %cst_185 = arith.constant 1.000000e+00 : f32
    %211 = vector.broadcast %cst_185 : f32 to vector<1x128xf32>
    %212 = arith.addf %211, %210 : vector<1x128xf32>
    %213 = arith.divf %211, %212 : vector<1x128xf32>
    %cst_186 = arith.constant 0.000000e+00 : f32
    %214 = vector.broadcast %cst_186 : f32 to vector<1x8x128xf32>
    %c0_187 = arith.constant 0 : index
    %c0_188 = arith.constant 0 : index
    %c0_189 = arith.constant 0 : index
    %215 = vector.load %arg9[%c0_187, %c0_188, %c0_189] : memref<1x8x128xf32, #tpu.memory_space<vmem>>, vector<1x8x128xf32>
    tpu.vector_store %arg9[%c0_187, %c0_188, %c0_189], %214 {strides = array<i32>} : memref<1x8x128xf32, #tpu.memory_space<vmem>>, vector<1x8x128xf32>,
    %c0_190 = arith.constant 0 : index
    %c0_191 = arith.constant 0 : index
    %c0_192 = arith.constant 0 : index
    %216 = vector.load %arg9[%c0_190, %c0_191, %c0_192] : memref<1x8x128xf32, #tpu.memory_space<vmem>>, vector<1x1x128xf32>
    %217 = vector.shape_cast %216 : vector<1x1x128xf32> to vector<1x128xf32>
    %218 = vector.shape_cast %213 : vector<1x128xf32> to vector<1x1x128xf32>
    tpu.vector_store %arg9[%c0_190, %c0_191, %c0_192], %218 {strides = array<i32>} : memref<1x8x128xf32, #tpu.memory_space<vmem>>, vector<1x1x128xf32>,
    return
  }
  func.func @transform_0(%arg0: i32) -> (i32, i32, i32, i32) {
    %c0_i32 = arith.constant 0 : i32
    %c0_i32_0 = arith.constant 0 : i32
    %c0_i32_1 = arith.constant 0 : i32
    %c0_i32_2 = arith.constant 0 : i32
    return %arg0, %c0_i32, %c0_i32_0, %c0_i32_1 : i32, i32, i32, i32
  }
  func.func @transform_1(%arg0: i32) -> (i32, i32, i32) {
    %c0_i32 = arith.constant 0 : i32
    %c0_i32_0 = arith.constant 0 : i32
    %c0_i32_1 = arith.constant 0 : i32
    %c0_i32_2 = arith.constant 0 : i32
    return %c0_i32, %c0_i32_0, %c0_i32_1 : i32, i32, i32
  }
  func.func @transform_2(%arg0: i32) -> (i32, i32) {
    %c0_i32 = arith.constant 0 : i32
    %c0_i32_0 = arith.constant 0 : i32
    %c0_i32_1 = arith.constant 0 : i32
    return %c0_i32, %c0_i32_0 : i32, i32
  }
  func.func @transform_3(%arg0: i32) -> (i32, i32, i32) {
    %c0_i32 = arith.constant 0 : i32
    %c0_i32_0 = arith.constant 0 : i32
    %c0_i32_1 = arith.constant 0 : i32
    %c0_i32_2 = arith.constant 0 : i32
    return %c0_i32, %c0_i32_0, %c0_i32_1 : i32, i32, i32
  }
  func.func @transform_4(%arg0: i32) -> (i32, i32) {
    %c0_i32 = arith.constant 0 : i32
    %c0_i32_0 = arith.constant 0 : i32
    %c0_i32_1 = arith.constant 0 : i32
    return %c0_i32, %c0_i32_0 : i32, i32
  }
  func.func @transform_5(%arg0: i32) -> (i32, i32, i32) {
    %c0_i32 = arith.constant 0 : i32
    %c0_i32_0 = arith.constant 0 : i32
    %c0_i32_1 = arith.constant 0 : i32
    %c0_i32_2 = arith.constant 0 : i32
    return %c0_i32, %c0_i32_0, %c0_i32_1 : i32, i32, i32
  }
  func.func @transform_6(%arg0: i32) -> (i32, i32) {
    %c0_i32 = arith.constant 0 : i32
    %c0_i32_0 = arith.constant 0 : i32
    %c0_i32_1 = arith.constant 0 : i32
    return %c0_i32, %c0_i32_0 : i32, i32
  }
  func.func @transform_7(%arg0: i32) -> (i32, i32, i32) {
    %c0_i32 = arith.constant 0 : i32
    %c0_i32_0 = arith.constant 0 : i32
    %c0_i32_1 = arith.constant 0 : i32
    %c0_i32_2 = arith.constant 0 : i32
    return %c0_i32, %c0_i32_0, %c0_i32_1 : i32, i32, i32
  }
  func.func @transform_8(%arg0: i32) -> (i32, i32, i32) {
    %c0_i32 = arith.constant 0 : i32
    %c0_i32_0 = arith.constant 0 : i32
    %c0_i32_1 = arith.constant 0 : i32
    return %arg0, %c0_i32, %c0_i32_0 : i32, i32, i32
  }
}

</mosaic_0001>

<bundles_post_ra>
// kernel: conv_discriminator_forward.1
= control target key start
LH: loop header
LB: loop body
LE: loop exit
PB: predicated region body
PF: predicated region fallthrough
CT: control target
= control target key end

     0   :  { %s13053_s27 = smov 0   ;;  %s18500_s0 = inlined_call_operand.vmem [shape: f32[2,2,9,324], index: 0, kind: input, shape index: {}]   ;;  %s18501_s1 = inlined_call_operand.vmem [shape: bf16[4,324,400], index: 1, kind: input, shape index: {}]   ;;  %s18502_s2 = inlined_call_operand.vmem [shape: f32[1,400], index: 2, kind: input, shape index: {}]   ;;  %s18503_s3 = inlined_call_operand.vmem [shape: bf16[4,400,288], index: 3, kind: input, shape index: {}]   ;;  %s18504_s4 = inlined_call_operand.vmem [shape: f32[1,288], index: 4, kind: input, shape index: {}]   ;;  %s18505_s5 = inlined_call_operand.vmem [shape: bf16[4,288,256], index: 5, kind: input, shape index: {}]   ;;  %s18506_s6 = inlined_call_operand.vmem [shape: f32[1,256], index: 6, kind: input, shape index: {}]   ;;  %s18507_s7 = inlined_call_operand.vmem [shape: bf16[4,256,128], index: 7, kind: input, shape index: {}]   ;;  %s18508_s8 = inlined_call_operand.vmem [shape: f32[2,8,128], index: 8, kind: output, shape index: {}]  }
   0x1 LB: > { %s8040_s28 = sadd.s32 4294967295, %s13005_s27   ;;  %p8044_p0 = scmp.ge.s32.totalorder %s13005_s27, 1  ;;  %s13005_s27 = sphi %s13053_s27, %s18_s27  }
   0x2   : > { %p262_p1 = scmp.lt.s32.totalorder %s13005_s27, 3 }
   0x4   : > { %p263_p2 = pnand %p8044_p0, %p262_p1 }
   0x5   : > { %p13233_p3 = scmp.lt.s32.totalorder (!%p263_p2), %s8040_s28, 1 }
   0x6   : > { %266 = sbr.rel (%p263_p2) target bundleno = 1521 (0x5f1), region = 52 }
   0xb   : > { %v8246_v0 = vld [vmem:[%s18501_s1 + $0x370] sm:$0xf]  ;;  %v12267_v1 = vld [vmem:[%s18501_s1 + $0x37c] sm:$0xf0]  ;;  %v12265_v5 = vld [vmem:[%s18501_s1 + $0x374] sm:$0xf] }
   0xc   : > { %v8374_v2 = vld [vmem:[%s18501_s1 + $0x470] sm:$0xf]  ;;  %v8247_v3 = vor.u32 %v12267_v1, %v8246_v0  ;;  %v12299_v4 = vld [vmem:[%s18501_s1 + $0x47c] sm:$0xf0]  ;;  %v8248_v6 = vld [vmem:[%s18501_s1 + $0x380] sm:$0xf0] }
   0xd   : > { %v8375_v7 = vor.u32 %v12299_v4, %v8374_v2  ;;  %v8251_v8 = vor.u32 %v12265_v5, %v8248_v6  ;;  %v13082_v9 = vld [vmem:[%s18501_s1 + $0x510] sm:$0x33]  ;;  %vm897_vm0 = vcmask 1041408   ;;  %v12263_v12 = vld [vmem:[%s18501_s1 + $0x35c] sm:$0xf0]  ;;  %s18517_s28 = smov (!%p13233_p3, %s8040_s28), 1 }
   0xe   : > { %v8230_v10 = vld [vmem:[%s18501_s1 + $0x350] sm:$0xf]  ;;  %910 = vmatpush.bf16.msra.mxu0 %v8247_v3  ;;  %v725_v11 = vunpack.c.l.b16 %v13082_v9  ;;  %v12295_v14 = vld [vmem:[%s18501_s1 + $0x45c] sm:$0xf0]  ;;  %v12261_v17 = vld [vmem:[%s18501_s1 + $0x354] sm:$0xf] }
   0xf   : > { %v8358_v13 = vld [vmem:[%s18501_s1 + $0x450] sm:$0xf]  ;;  %923 = vmatpush.bf16.msra.mxu1 %v8375_v7  ;;  %949 = vmatpush.bf16.msra.mxu3 %v8251_v8  ;;  %v8231_v15 = vor.u32 %v12263_v12, %v8230_v10  ;;  %v8232_v18 = vld [vmem:[%s18501_s1 + $0x360] sm:$0xf0]  ;;  %v12315_v22 = vld [vmem:[%s18501_s1 + $0x4fc] sm:$0xf0]  ;;  %v726_v10 = vunpack.c.h.b16 %v13082_v9 }
  0x10   : > { %v8359_v16 = vor.u32 %v12295_v14, %v8358_v13  ;;  %v8438_v19 = vld [vmem:[%s18501_s1 + $0x4f0] sm:$0xf]  ;;  %v809_v20 = vpack.c.b16 %v725_v11, %v725_v11  ;;  %v8235_v21 = vor.u32 %v12261_v17, %v8232_v18  ;;  %v12259_v24 = vld [vmem:[%s18501_s1 + $0x33c] sm:$0xf0]  ;;  %v12257_v27 = vld [vmem:[%s18501_s1 + $0x334] sm:$0xf] }
  0x11   : > { %v8214_v23 = vld [vmem:[%s18501_s1 + $0x330] sm:$0xf]  ;;  %v12291_v26 = vld [vmem:[%s18501_s1 + $0x43c] sm:$0xf0]  ;;  %v8216_v30 = vld [vmem:[%s18501_s1 + $0x340] sm:$0xf0]  ;;  %v8439_v31 = vor.u32 %v12315_v22, %v8438_v19 }
  0x12   : > { %v8342_v25 = vld [vmem:[%s18501_s1 + $0x430] sm:$0xf]  ;;  %v899_v28 = vsel %vm897_vm0, %v809_v20, 0  ;;  %911 = vmatpush.bf16.msra.mxu0 %v8231_v15  ;;  %v8215_v29 = vor.u32 %v12259_v24, %v8214_v23  ;;  %v12255_v35 = vld [vmem:[%s18501_s1 + $0x31c] sm:$0xf0]  ;;  %v8219_v36 = vor.u32 %v12257_v27, %v8216_v30  ;;  %v810_v23 = vpack.c.b16 %v726_v10, %v726_v10  ;;  %s12985_s14 = smul.u32 96, %s18517_s28 }
  0x13   : > { %939 = vmatpush.bf16.msra.mxu2 %v899_v28  ;;  %924 = vmatpush.bf16.msra.mxu1 %v8359_v16  ;;  %v8343_v32 = vor.u32 %v12291_v26, %v8342_v25  ;;  %v8422_v33 = vld [vmem:[%s18501_s1 + $0x4d0] sm:$0xf]  ;;  %v12311_v37 = vld [vmem:[%s18501_s1 + $0x4dc] sm:$0xf0]  ;;  %v12253_v40 = vld [vmem:[%s18501_s1 + $0x314] sm:$0xf] }
  0x14   : > { %v8198_v34 = vld [vmem:[%s18501_s1 + $0x310] sm:$0xf]  ;;  %950 = vmatpush.bf16.msra.mxu3 %v8235_v21  ;;  %v12287_v39 = vld [vmem:[%s18501_s1 + $0x41c] sm:$0xf0]  ;;  %v8200_v41 = vld [vmem:[%s18501_s1 + $0x320] sm:$0xf0]  ;;  %v8423_v43 = vor.u32 %v12311_v37, %v8422_v33  ;;  %s13317_s30 = scalar_lea.vmem %s18500_s0, %s12985_s14 }
  0x15   : > { %v8326_v38 = vld [vmem:[%s18501_s1 + $0x410] sm:$0xf]  ;;  %v8199_v42 = vor.u32 %v12255_v35, %v8198_v34  ;;  %v12251_v47 = vld [vmem:[%s18501_s1 + $0x2fc] sm:$0xf0]  ;;  %v8203_v48 = vor.u32 %v12253_v40, %v8200_v41  ;;  %v12249_v52 = vld [vmem:[%s18501_s1 + $0x2f4] sm:$0xf] }
  0x16   : > { %912 = vmatpush.bf16.msra.mxu0 %v8215_v29  ;;  %v8327_v44 = vor.u32 %v12287_v39, %v8326_v38  ;;  %v8406_v45 = vld [vmem:[%s18501_s1 + $0x4b0] sm:$0xf]  ;;  %v12307_v49 = vld [vmem:[%s18501_s1 + $0x4bc] sm:$0xf0]  ;;  %v8184_v53 = vld [vmem:[%s18501_s1 + $0x300] sm:$0xf0] }
  0x17   : > { %940 = vmatpush.bf16.msra.mxu2 %v8439_v31  ;;  %925 = vmatpush.bf16.msra.mxu1 %v8343_v32  ;;  %v8182_v46 = vld [vmem:[%s18501_s1 + $0x2f0] sm:$0xf]  ;;  %v12283_v51 = vld [vmem:[%s18501_s1 + $0x3fc] sm:$0xf0]  ;;  %v8407_v56 = vor.u32 %v12307_v49, %v8406_v45  ;;  %v8187_v61 = vor.u32 %v12249_v52, %v8184_v53  ;;  %v12245_v0 = vld [vmem:[%s18501_s1 + $0x2d4] sm:$0xf] }
  0x18   : > { %951 = vmatpush.bf16.msra.mxu3 %v8219_v36  ;;  %v8310_v50 = vld [vmem:[%s18501_s1 + $0x3f0] sm:$0xf]  ;;  %v8183_v54 = vor.u32 %v12251_v47, %v8182_v46  ;;  %v12303_v58 = vld [vmem:[%s18501_s1 + $0x49c] sm:$0xf0]  ;;  %v8168_v1 = vld [vmem:[%s18501_s1 + $0x2e0] sm:$0xf0] }
  0x19   : > { %v8390_v55 = vld [vmem:[%s18501_s1 + $0x490] sm:$0xf]  ;;  %v8311_v57 = vor.u32 %v12283_v51, %v8310_v50  ;;  %v12247_v60 = vld [vmem:[%s18501_s1 + $0x2dc] sm:$0xf0]  ;;  %v12297_v2 = vld [vmem:[%s18501_s1 + $0x474] sm:$0xf]  ;;  %v8171_v11 = vor.u32 %v12245_v0, %v8168_v1 }
  0x1a   : > { %913 = vmatpush.bf16.msra.mxu0 %v8199_v42  ;;  %v8166_v59 = vld [vmem:[%s18501_s1 + $0x2d0] sm:$0xf]  ;;  %v12279_v63 = vld [vmem:[%s18501_s1 + $0x3dc] sm:$0xf0]  ;;  %v8376_v3 = vld [vmem:[%s18501_s1 + $0x480] sm:$0xf0]  ;;  %v8391_v5 = vor.u32 %v12303_v58, %v8390_v55 }
  0x1b   : > { %941 = vmatpush.bf16.msra.mxu2 %v8423_v43  ;;  %926 = vmatpush.bf16.msra.mxu1 %v8327_v44  ;;  %v8294_v62 = vld [vmem:[%s18501_s1 + $0x3d0] sm:$0xf]  ;;  %v8167_v4 = vor.u32 %v12247_v60, %v8166_v59  ;;  %v12243_v8 = vld [vmem:[%s18501_s1 + $0x2bc] sm:$0xf0]  ;;  %v8379_v12 = vor.u32 %v12297_v2, %v8376_v3  ;;  %v12241_v15 = vld [vmem:[%s18501_s1 + $0x2b4] sm:$0xf] }
  0x1c   : > { %952 = vmatpush.bf16.msra.mxu3 %v8203_v48  ;;  %v8295_v6 = vor.u32 %v12279_v63, %v8294_v62  ;;  %v8150_v7 = vld [vmem:[%s18501_s1 + $0x2b0] sm:$0xf]  ;;  %v12275_v14 = vld [vmem:[%s18501_s1 + $0x3bc] sm:$0xf0]  ;;  %v8152_v16 = vld [vmem:[%s18501_s1 + $0x2c0] sm:$0xf0] }
  0x1d   : > { %v8278_v13 = vld [vmem:[%s18501_s1 + $0x3b0] sm:$0xf]  ;;  %v12293_v9 = vld [vmem:[%s18501_s1 + $0x454] sm:$0xf]  ;;  %v8360_v17 = vld [vmem:[%s18501_s1 + $0x460] sm:$0xf0]  ;;  %v8151_v18 = vor.u32 %v12243_v8, %v8150_v7  ;;  %v8155_v24 = vor.u32 %v12241_v15, %v8152_v16 }
  0x1e   : > { %914 = vmatpush.bf16.msra.mxu0 %v8183_v54  ;;  %v8279_v19 = vor.u32 %v12275_v14, %v8278_v13  ;;  %v8134_v20 = vld [vmem:[%s18501_s1 + $0x290] sm:$0xf]  ;;  %v12239_v21 = vld [vmem:[%s18501_s1 + $0x29c] sm:$0xf0]  ;;  %v8363_v25 = vor.u32 %v12293_v9, %v8360_v17  ;;  %v12237_v27 = vld [vmem:[%s18501_s1 + $0x294] sm:$0xf] }
  0x1f   : > { %942 = vmatpush.bf16.msra.mxu2 %v8407_v56  ;;  %927 = vmatpush.bf16.msra.mxu1 %v8311_v57  ;;  %v8262_v22 = vld [vmem:[%s18501_s1 + $0x390] sm:$0xf]  ;;  %v12271_v26 = vld [vmem:[%s18501_s1 + $0x39c] sm:$0xf0]  ;;  %v8136_v28 = vld [vmem:[%s18501_s1 + $0x2a0] sm:$0xf0]  ;;  %v8135_v32 = vor.u32 %v12239_v21, %v8134_v20 }
  0x20   : > { %953 = vmatpush.bf16.msra.mxu3 %v8187_v61  ;;  %v12289_v29 = vld [vmem:[%s18501_s1 + $0x434] sm:$0xf]  ;;  %v8344_v30 = vld [vmem:[%s18501_s1 + $0x440] sm:$0xf0]  ;;  %v8254_v31 = vld [vmem:[%s18501_s1 + $0x378] sm:$0xf]  ;;  %v8263_v36 = vor.u32 %v12271_v26, %v8262_v22  ;;  %v8139_v39 = vor.u32 %v12237_v27, %v8136_v28 }
  0x21   : > { %v12268_v33 = vld [vmem:[%s18501_s1 + $0x384] sm:$0xf0]  ;;  %v8382_v34 = vld [vmem:[%s18501_s1 + $0x478] sm:$0xf]  ;;  %v902_v37 = vsel %vm897_vm0, %v810_v23, 0  ;;  %v8347_v40 = vor.u32 %v12289_v29, %v8344_v30  ;;  %v8047_v57 = vld [vmem:[%s13317_s30 + $0x30] sm:$0xff] }
  0x22   : > { %915 = vmatpush.bf16.msra.mxu0 %v8167_v4  ;;  %v12300_v35 = vld [vmem:[%s18501_s1 + $0x484] sm:$0xf0]  ;;  %v12285_v38 = vld [vmem:[%s18501_s1 + $0x414] sm:$0xf]  ;;  %v8328_v41 = vld [vmem:[%s18501_s1 + $0x420] sm:$0xf0]  ;;  %v8255_v44 = vor.u32 %v12268_v33, %v8254_v31  ;;  %v13333_v63 = vpack.c.bf16 %v8047_v57, %v8047_v57 }
  0x23   : > { %943 = vmatpush.bf16.msra.mxu2 %v8391_v5  ;;  %928 = vmatpush.bf16.msra.mxu1 %v8295_v6  ;;  %v12313_v42 = vld [vmem:[%s18501_s1 + $0x4f4] sm:$0xf]  ;;  %v8440_v43 = vld [vmem:[%s18501_s1 + $0x500] sm:$0xf0]  ;;  %v8383_v45 = vor.u32 %v12300_v35, %v8382_v34  ;;  %v8238_v46 = vld [vmem:[%s18501_s1 + $0x358] sm:$0xf]  ;;  %v8331_v54 = vor.u32 %v12285_v38, %v8328_v41 }
  0x24   : > { %954 = vmatpush.bf16.msra.mxu3 %v8171_v11  ;;  %v12264_v47 = vld [vmem:[%s18501_s1 + $0x364] sm:$0xf0]  ;;  %v8366_v48 = vld [vmem:[%s18501_s1 + $0x458] sm:$0xf]  ;;  %v8443_v50 = vor.u32 %v12313_v42, %v8440_v43  ;;  %v12281_v51 = vld [vmem:[%s18501_s1 + $0x3f4] sm:$0xf] }
  0x25   : > { %v12296_v49 = vld [vmem:[%s18501_s1 + $0x464] sm:$0xf0]  ;;  %v8312_v52 = vld [vmem:[%s18501_s1 + $0x400] sm:$0xf0]  ;;  %v12309_v53 = vld [vmem:[%s18501_s1 + $0x4d4] sm:$0xf]  ;;  %v8239_v55 = vor.u32 %v12264_v47, %v8238_v46 }
  0x26   : > { %916 = vmatpush.bf16.msra.mxu0 %v8151_v18  ;;  %v8424_v56 = vld [vmem:[%s18501_s1 + $0x4e0] sm:$0xf0]  ;;  %vm893_vm1 = vcmask 556032   ;;  %v8367_v59 = vor.u32 %v12296_v49, %v8366_v48  ;;  %v8222_v60 = vld [vmem:[%s18501_s1 + $0x338] sm:$0xf]  ;;  %v8315_v6 = vor.u32 %v12281_v51, %v8312_v52  ;;  %vm3090_vm5 = vcmask 1040384  }
  0x27   : > { %962 = vmatpush.bf16.msrb.mxu2 %v8379_v12  ;;  %929 = vmatpush.bf16.msra.mxu1 %v8279_v19  ;;  %v8049_v58 = vld [vmem:[%s13317_s30 + $0x40] sm:$0xff]  ;;  %v12260_v61 = vld [vmem:[%s18501_s1 + $0x344] sm:$0xf0]  ;;  %v8350_v62 = vld [vmem:[%s18501_s1 + $0x438] sm:$0xf]  ;;  %v8427_v4 = vor.u32 %v12309_v53, %v8424_v56  ;;  %vm3092_vm7 = vcmask 1042434  }
  0x28   : > { %955 = vmatpush.bf16.msra.mxu3 %v8155_v24  ;;  %v13335_v0 = vpack.c.bf16 %v8049_v58, %v8049_v58  ;;  %v12292_v1 = vld [vmem:[%s18501_s1 + $0x444] sm:$0xf0]  ;;  %v8048_v2 = vld [vmem:[%s13317_s30 + $0x38] sm:$0xff]  ;;  %v12305_v7 = vld [vmem:[%s18501_s1 + $0x4b4] sm:$0xf]  ;;  %v8223_v10 = vor.u32 %v12260_v61, %v8222_v60  ;;  %vm3785_vm9 = vcmask 130048  }
  0x29   : > { %v13344_v3 = vld [vmem:[%s18501_s1 + $0x518] sm:$0x33]  ;;  %v13348_v5 = vpack.c.bf16 %v8048_v2, %v8048_v2  ;;  %v8408_v8 = vld [vmem:[%s18501_s1 + $0x4c0] sm:$0xf0]  ;;  %v8351_v11 = vor.u32 %v12292_v1, %v8350_v62  ;;  %v12277_v12 = vld [vmem:[%s18501_s1 + $0x3d4] sm:$0xf] }
  0x2a   : > { %917 = vmatpush.bf16.msra.mxu0 %v8135_v32  ;;  %8452 = vmatmul.msk.bf16.vlgmr.msra.gmra.mxu2 %vm893_vm1, %v13335_v0  ;;  %v8296_v13 = vld [vmem:[%s18501_s1 + $0x3e0] sm:$0xf0]  ;;  %v8206_v14 = vld [vmem:[%s18501_s1 + $0x318] sm:$0xf]  ;;  %v727_v15 = vunpack.c.l.b16 %v13344_v3  ;;  %v12256_v16 = vld [vmem:[%s18501_s1 + $0x324] sm:$0xf0]  ;;  %v8411_v18 = vor.u32 %v12305_v7, %v8408_v8  ;;  %v728_v61 = vunpack.c.h.b16 %v13344_v3 }
  0x2b   : > { %963 = vmatpush.bf16.msrb.mxu2 %v8363_v25  ;;  %930 = vmatpush.bf16.msra.mxu1 %v8263_v36  ;;  %v8334_v9 = vld [vmem:[%s18501_s1 + $0x418] sm:$0xf]  ;;  %v12288_v17 = vld [vmem:[%s18501_s1 + $0x424] sm:$0xf0]  ;;  %v8299_v19 = vor.u32 %v12277_v12, %v8296_v13  ;;  %v12301_v20 = vld [vmem:[%s18501_s1 + $0x494] sm:$0xf]  ;;  %v8207_v22 = vor.u32 %v12256_v16, %v8206_v14 }
  0x2c   : > { %956 = vmatpush.bf16.msra.mxu3 %v8139_v39  ;;  %v8392_v21 = vld [vmem:[%s18501_s1 + $0x4a0] sm:$0xf0]  ;;  %v8335_v23 = vor.u32 %v12288_v17, %v8334_v9  ;;  %v12273_v24 = vld [vmem:[%s18501_s1 + $0x3b4] sm:$0xf]  ;;  %v8190_v26 = vld [vmem:[%s18501_s1 + $0x2f8] sm:$0xf]  ;;  %v811_v27 = vpack.c.b16 %v727_v15, %v727_v15  ;;  %v812_v15 = vpack.c.b16 %v728_v61, %v728_v61 }
  0x2d   : > { %918 = vmatmul.bf16.vlgmr.msra.gmra.mxu0 %v13333_v63  ;;  %v8280_v25 = vld [vmem:[%s18501_s1 + $0x3c0] sm:$0xf0]  ;;  %v12252_v28 = vld [vmem:[%s18501_s1 + $0x304] sm:$0xf0]  ;;  %v8318_v29 = vld [vmem:[%s18501_s1 + $0x3f8] sm:$0xf]  ;;  %v8395_v31 = vor.u32 %v12301_v20, %v8392_v21 }
  0x2e   : > { %978 = vmatpush.bf16.msrb.mxu0 %v902_v37  ;;  %931 = vmatmul.bf16.vlgmr.msra.gmra.mxu1 %v13348_v5  ;;  %v12284_v30 = vld [vmem:[%s18501_s1 + $0x404] sm:$0xf0]  ;;  %v8283_v32 = vor.u32 %v12273_v24, %v8280_v25  ;;  %v12269_v33 = vld [vmem:[%s18501_s1 + $0x394] sm:$0xf]  ;;  %v8264_v34 = vld [vmem:[%s18501_s1 + $0x3a0] sm:$0xf0]  ;;  %v8191_v36 = vor.u32 %v12252_v28, %v8190_v26 }
  0x2f   : > { %964 = vmatpush.bf16.msrb.mxu2 %v8347_v40  ;;  %988 = vmatpush.bf16.msrb.mxu1 %v8255_v44  ;;  %v8174_v35 = vld [vmem:[%s18501_s1 + $0x2d8] sm:$0xf]  ;;  %v8319_v37 = vor.u32 %v12284_v30, %v8318_v29  ;;  %v905_v38 = vsel %vm897_vm0, %v811_v27, 0  ;;  %v12316_v40 = vld [vmem:[%s18501_s1 + $0x504] sm:$0xf0]  ;;  %v8267_v46 = vor.u32 %v12269_v33, %v8264_v34  ;;  %v908_v27 = vsel %vm897_vm0, %v812_v15, 0 }
  0x30   : > { %1001 = vmatpush.bf16.msrb.mxu3 %v8383_v45  ;;  %v8446_v39 = vld [vmem:[%s18501_s1 + $0x4f8] sm:$0xf]  ;;  %v12248_v41 = vld [vmem:[%s18501_s1 + $0x2e4] sm:$0xf0]  ;;  %v12266_v44 = vld [vmem:[%s18501_s1 + $0x37c] sm:$0xf] }
  0x31   : > { %957 = vmatmul.bf16.vlgmr.msra.gmra.mxu3 %v13333_v63  ;;  %v8302_v42 = vld [vmem:[%s18501_s1 + $0x3d8] sm:$0xf]  ;;  %v12280_v43 = vld [vmem:[%s18501_s1 + $0x3e4] sm:$0xf0]  ;;  %v8256_v45 = vld [vmem:[%s18501_s1 + $0x388] sm:$0xf0]  ;;  %v8447_v47 = vor.u32 %v12316_v40, %v8446_v39  ;;  %v8175_v48 = vor.u32 %v12248_v41, %v8174_v35 }
  0x32   : > { %979 = vmatpush.bf16.msrb.mxu0 %v8443_v50  ;;  %v8303_v49 = vor.u32 %v12280_v43, %v8302_v42  ;;  %v8158_v50 = vld [vmem:[%s18501_s1 + $0x2b8] sm:$0xf]  ;;  %v12312_v52 = vld [vmem:[%s18501_s1 + $0x4e4] sm:$0xf0]  ;;  %v8259_v53 = vor.u32 %v12266_v44, %v8256_v45  ;;  %v12262_v57 = vld [vmem:[%s18501_s1 + $0x35c] sm:$0xf] }
  0x33   : > { %965 = vmatpush.bf16.msrb.mxu2 %v8331_v54  ;;  %989 = vmatpush.bf16.msrb.mxu1 %v8239_v55  ;;  %v8430_v51 = vld [vmem:[%s18501_s1 + $0x4d8] sm:$0xf]  ;;  %v12244_v54 = vld [vmem:[%s18501_s1 + $0x2c4] sm:$0xf0]  ;;  %v8240_v58 = vld [vmem:[%s18501_s1 + $0x368] sm:$0xf0] }
  0x34   : > { %1002 = vmatpush.bf16.msrb.mxu3 %v8367_v59  ;;  %v8286_v55 = vld [vmem:[%s18501_s1 + $0x3b8] sm:$0xf]  ;;  %v12276_v56 = vld [vmem:[%s18501_s1 + $0x3c4] sm:$0xf0]  ;;  %v8431_v59 = vor.u32 %v12312_v52, %v8430_v51  ;;  %v8159_v62 = vor.u32 %v12244_v54, %v8158_v50  ;;  %v8243_v7 = vor.u32 %v12262_v57, %v8240_v58  ;;  %v12298_v12 = vld [vmem:[%s18501_s1 + $0x47c] sm:$0xf] }
  0x35   : > { %v8142_v60 = vld [vmem:[%s18501_s1 + $0x298] sm:$0xf]  ;;  %v8287_v1 = vor.u32 %v12276_v56, %v8286_v55  ;;  %v12240_v2 = vld [vmem:[%s18501_s1 + $0x2a4] sm:$0xf0]  ;;  %v8384_v13 = vld [vmem:[%s18501_s1 + $0x488] sm:$0xf0] }
  0x36   : > { %980 = vmatpush.bf16.msrb.mxu0 %v8427_v4  ;;  %v8414_v4 = vld [vmem:[%s18501_s1 + $0x4b8] sm:$0xf]  ;;  %v12272_v8 = vld [vmem:[%s18501_s1 + $0x3a4] sm:$0xf0]  ;;  %v8143_v16 = vor.u32 %v12240_v2, %v8142_v60  ;;  %v8387_v20 = vor.u32 %v12298_v12, %v8384_v13  ;;  %v12254_v21 = vld [vmem:[%s18501_s1 + $0x31c] sm:$0xf] }
  0x37   : > { %966 = vmatpush.bf16.msrb.mxu2 %v8315_v6  ;;  %990 = vmatpush.bf16.msrb.mxu1 %v8223_v10  ;;  %v12308_v6 = vld [vmem:[%s18501_s1 + $0x4c4] sm:$0xf0]  ;;  %v8270_v3 = vld [vmem:[%s18501_s1 + $0x398] sm:$0xf]  ;;  %v12258_v10 = vld [vmem:[%s18501_s1 + $0x33c] sm:$0xf] }
  0x38   : > { %1003 = vmatpush.bf16.msrb.mxu3 %v8351_v11  ;;  %v8224_v11 = vld [vmem:[%s18501_s1 + $0x348] sm:$0xf0]  ;;  %v8415_v14 = vor.u32 %v12308_v6, %v8414_v4  ;;  %v8271_v9 = vor.u32 %v12272_v8, %v8270_v3  ;;  %v8398_v17 = vld [vmem:[%s18501_s1 + $0x498] sm:$0xf]  ;;  %v12294_v25 = vld [vmem:[%s18501_s1 + $0x45c] sm:$0xf] }
  0x39   : > { %v8208_v24 = vld [vmem:[%s18501_s1 + $0x328] sm:$0xf0]  ;;  %v12314_v29 = vld [vmem:[%s18501_s1 + $0x4fc] sm:$0xf]  ;;  %v8554_v35 = vld [vmem:[%s18501_s1 + $0xc0] sm:$0xf] }
  0x3a   : > { %981 = vmatpush.bf16.msrb.mxu0 %v8411_v18  ;;  %v12304_v18 = vld [vmem:[%s18501_s1 + $0x4a4] sm:$0xf0]  ;;  %v8368_v26 = vld [vmem:[%s18501_s1 + $0x468] sm:$0xf0]  ;;  %v12250_v34 = vld [vmem:[%s18501_s1 + $0x2fc] sm:$0xf] }
  0x3b   : > { %967 = vmatpush.bf16.msrb.mxu2 %v8299_v19  ;;  %991 = vmatpush.bf16.msrb.mxu1 %v8207_v22  ;;  %v8227_v19 = vor.u32 %v12258_v10, %v8224_v11  ;;  %v8570_v22 = vld [vmem:[%s18501_s1 + $0xe0] sm:$0xf]  ;;  %v8399_v28 = vor.u32 %v12304_v18, %v8398_v17  ;;  %v8448_v30 = vld [vmem:[%s18501_s1 + $0x508] sm:$0xf0]  ;;  %v8371_v33 = vor.u32 %v12294_v25, %v8368_v26  ;;  %v12290_v39 = vld [vmem:[%s18501_s1 + $0x43c] sm:$0xf] }
  0x3c   : > { %1004 = vmatpush.bf16.msrb.mxu3 %v8335_v23  ;;  %v12187_v23 = vld [vmem:[%s18501_s1 + $0xec] sm:$0xf0]  ;;  %v8352_v40 = vld [vmem:[%s18501_s1 + $0x448] sm:$0xf0]  ;;  %v12310_v41 = vld [vmem:[%s18501_s1 + $0x4dc] sm:$0xf] }
  0x3d   : > { %v8432_v42 = vld [vmem:[%s18501_s1 + $0x4e8] sm:$0xf0]  ;;  %v12246_v44 = vld [vmem:[%s18501_s1 + $0x2dc] sm:$0xf]  ;;  %v8522_v61 = vld [vmem:[%s18501_s1 + $0x80] sm:$0xf] }
  0x3e   : > { %982 = vmatpush.bf16.msrb.mxu0 %v8395_v31  ;;  %v8571_v31 = vor.u32 %v12187_v23, %v8570_v22  ;;  %v8435_v50 = vor.u32 %v12310_v41, %v8432_v42  ;;  %v8176_v51 = vld [vmem:[%s18501_s1 + $0x2e8] sm:$0xf0]  ;;  %v12286_v52 = vld [vmem:[%s18501_s1 + $0x41c] sm:$0xf]  ;;  %v12171_v15 = vld [vmem:[%s18501_s1 + $0x6c] sm:$0xf0] }
  0x3f   : > { %968 = vmatpush.bf16.msrb.mxu2 %v8283_v32  ;;  %992 = vmatpush.bf16.msrb.mxu1 %v8191_v36  ;;  %v8211_v32 = vor.u32 %v12254_v21, %v8208_v24  ;;  %v12183_v36 = vld [vmem:[%s18501_s1 + $0xcc] sm:$0xf0]  ;;  %v12306_v54 = vld [vmem:[%s18501_s1 + $0x4bc] sm:$0xf]  ;;  %v8416_v55 = vld [vmem:[%s18501_s1 + $0x4c8] sm:$0xf0]  ;;  %v8179_v58 = vor.u32 %v12246_v44, %v8176_v51 }
  0x40   : > { %1005 = vmatpush.bf16.msrb.mxu3 %v8319_v37  ;;  %v8451_v37 = vor.u32 %v12314_v29, %v8448_v30  ;;  %v8555_v43 = vor.u32 %v12183_v36, %v8554_v35  ;;  %v12242_v60 = vld [vmem:[%s18501_s1 + $0x2bc] sm:$0xf]  ;;  %v8160_v2 = vld [vmem:[%s18501_s1 + $0x2c8] sm:$0xf0]  ;;  %v8762_v23 = vld [vmem:[%s18501_s1 + $0x260] sm:$0xf] }
  0x41   : > { %8453 = vmatmul.msk.bf16.vlgmr.msrb.gmra.mxu0 %vm893_vm1, %v13335_v0  ;;  %v12282_v4 = vld [vmem:[%s18501_s1 + $0x3fc] sm:$0xf]  ;;  %v8320_v6 = vld [vmem:[%s18501_s1 + $0x408] sm:$0xf0]  ;;  %v8163_v11 = vor.u32 %v12242_v60, %v8160_v2  ;;  %v12235_v24 = vld [vmem:[%s18501_s1 + $0x26c] sm:$0xf0] }
  0x42   : > { %1017 = vmatpush.bf16.msra.mxu0 %v905_v38  ;;  %v8192_v38 = vld [vmem:[%s18501_s1 + $0x308] sm:$0xf0]  ;;  %v8323_v12 = vor.u32 %v12282_v4, %v8320_v6  ;;  %v12238_v13 = vld [vmem:[%s18501_s1 + $0x29c] sm:$0xf]  ;;  %v8746_v36 = vld [vmem:[%s18501_s1 + $0x240] sm:$0xf] }
  0x43   : > { %969 = vmatpush.bf16.msrb.mxu2 %v8267_v46  ;;  %993 = vmatpush.bf16.msrb.mxu1 %v8175_v48  ;;  %v8195_v45 = vor.u32 %v12250_v34, %v8192_v38  ;;  %v8355_v46 = vor.u32 %v12290_v39, %v8352_v40  ;;  %v12179_v48 = vld [vmem:[%s18501_s1 + $0xac] sm:$0xf0]  ;;  %v8400_v3 = vld [vmem:[%s18501_s1 + $0x4a8] sm:$0xf0]  ;;  %v12278_v17 = vld [vmem:[%s18501_s1 + $0x3dc] sm:$0xf] }
  0x44   : > { %1006 = vmatpush.bf16.msrb.mxu3 %v8303_v49  ;;  %v13560_v49 = vld [vmem:[%s18501_s1 + $0x280] sm:$0x33]  ;;  %v8304_v18 = vld [vmem:[%s18501_s1 + $0x3e8] sm:$0xf0]  ;;  %v12274_v30 = vld [vmem:[%s18501_s1 + $0x3bc] sm:$0xf] }
  0x45   : > { %v1308_v57 = vunpack.c.l.b16 %v13560_v49  ;;  %v8307_v26 = vor.u32 %v12278_v17, %v8304_v18  ;;  %v12215_v34 = vld [vmem:[%s18501_s1 + $0x1cc] sm:$0xf0]  ;;  %v8474_v39 = vld [vmem:[%s18501_s1 + $0x20] sm:$0xf]  ;;  %v12270_v42 = vld [vmem:[%s18501_s1 + $0x39c] sm:$0xf] }
  0x46   : > { %1018 = vmatpush.bf16.msra.mxu0 %v8447_v47  ;;  %970 = vmatmul.bf16.vlgmr.msrb.gmra.mxu2 %v13348_v5  ;;  %v8538_v47 = vld [vmem:[%s18501_s1 + $0xa0] sm:$0xf]  ;;  %v12163_v40 = vld [vmem:[%s18501_s1 + $0x2c] sm:$0xf0]  ;;  %v8540_v17 = vld [vmem:[%s18501_s1 + $0xb0] sm:$0xf0] }
  0x47   : > { %1027 = vmatpush.bf16.msra.mxu2 %v8259_v53  ;;  %994 = vmatpush.bf16.msrb.mxu1 %v8159_v62  ;;  %v8336_v53 = vld [vmem:[%s18501_s1 + $0x428] sm:$0xf0]  ;;  %v8539_v56 = vor.u32 %v12179_v48, %v8538_v47  ;;  %v12175_v62 = vld [vmem:[%s18501_s1 + $0x8c] sm:$0xf0]  ;;  %v1392_v10 = vpack.c.b16 %v1308_v57, %v1308_v57  ;;  %v8666_v44 = vld [vmem:[%s18501_s1 + $0x1a0] sm:$0xf] }
  0x48   : > { %1007 = vmatpush.bf16.msrb.mxu3 %v8287_v1  ;;  %v8419_v1 = vor.u32 %v12306_v54, %v8416_v55  ;;  %v8523_v8 = vor.u32 %v12175_v62, %v8522_v61  ;;  %v12185_v47 = vld [vmem:[%s18501_s1 + $0xe4] sm:$0xf]  ;;  %v8572_v48 = vld [vmem:[%s18501_s1 + $0xf0] sm:$0xf0]  ;;  %v12227_v51 = vld [vmem:[%s18501_s1 + $0x22c] sm:$0xf0]  ;;  %v1309_v55 = vunpack.c.h.b16 %v13560_v49 }
  0x49   : > { %v1480_v21 = vsel %vm897_vm0, %v1392_v10, 0  ;;  %v12159_v54 = vld [vmem:[%s18501_s1 + $0xc] sm:$0xf0]  ;;  %v8575_v57 = vor.u32 %v12185_v47, %v8572_v48  ;;  %v12181_v61 = vld [vmem:[%s18501_s1 + $0xc4] sm:$0xf]  ;;  %vm6252_vm14 = vcmask 261120  }
  0x4a   : > { %1019 = vmatpush.bf16.msra.mxu0 %v8431_v59  ;;  %v8339_v59 = vor.u32 %v12286_v52, %v8336_v53  ;;  %v8458_v53 = vld [vmem:[%s18501_s1] sm:$0xf]  ;;  %v12207_v49 = vld [vmem:[%s18501_s1 + $0x18c] sm:$0xf0]  ;;  %v8556_v62 = vld [vmem:[%s18501_s1 + $0xd0] sm:$0xf0] }
  0x4b   : > { %1028 = vmatpush.bf16.msra.mxu2 %v8243_v7  ;;  %995 = vmatpush.bf16.msrb.mxu1 %v8143_v16  ;;  %v12302_v7 = vld [vmem:[%s18501_s1 + $0x49c] sm:$0xf]  ;;  %v8714_v2 = vld [vmem:[%s18501_s1 + $0x200] sm:$0xf]  ;;  %v12223_v4 = vld [vmem:[%s18501_s1 + $0x20c] sm:$0xf0]  ;;  %v8559_v10 = vor.u32 %v12181_v61, %v8556_v62 }
  0x4c   : > { %1008 = vmatpush.bf16.msrb.mxu3 %v8271_v9  ;;  %v8403_v16 = vor.u32 %v12302_v7, %v8400_v3  ;;  %v8144_v9 = vld [vmem:[%s18501_s1 + $0x2a8] sm:$0xf0]  ;;  %v305_v6 = vld [vmem:[%s13317_s30] sm:$0xff]  ;;  %v1393_v3 = vpack.c.b16 %v1309_v55, %v1309_v55  ;;  %v307_v18 = vld [vmem:[%s13317_s30 + $0x10] sm:$0xff] }
  0x4d   : > { %v8147_v25 = vor.u32 %v12238_v13, %v8144_v9  ;;  %v8684_v13 = vld [vmem:[%s18501_s1 + $0x1d0] sm:$0xf0]  ;;  %v12177_v9 = vld [vmem:[%s18501_s1 + $0xa4] sm:$0xf]  ;;  %v8586_v47 = vld [vmem:[%s18501_s1 + $0x100] sm:$0xf] }
  0x4e   : > { %1020 = vmatpush.bf16.msra.mxu0 %v8415_v14  ;;  %996 = vmatmul.bf16.vlgmr.msrb.gmra.mxu1 %v13333_v63  ;;  %v8506_v14 = vld [vmem:[%s18501_s1 + $0x60] sm:$0xf]  ;;  %v13827_v55 = vld [vmem:[%s18501_s1 + $0x288] sm:$0x33] }
  0x4f   : > { %1029 = vmatpush.bf16.msra.mxu2 %v8227_v19  ;;  %1040 = vmatpush.bf16.msra.mxu1 %v8387_v20  ;;  %v8698_v19 = vld [vmem:[%s18501_s1 + $0x1e0] sm:$0xf]  ;;  %v12219_v20 = vld [vmem:[%s18501_s1 + $0x1ec] sm:$0xf0]  ;;  %v8507_v22 = vor.u32 %v12171_v15, %v8506_v14  ;;  %v8715_v14 = vor.u32 %v12223_v4, %v8714_v2  ;;  %v13733_v15 = vpack.c.bf16 %v305_v6, %v305_v6  ;;  %v12220_v2 = vld [vmem:[%s18501_s1 + $0x1f4] sm:$0xf0]  ;;  %v1310_v6 = vunpack.c.l.b16 %v13827_v55 }
  0x50   : > { %1056 = vmatpush.bf16.msra.mxu3 %v908_v27  ;;  %v8490_v27 = vld [vmem:[%s18501_s1 + $0x40] sm:$0xf]  ;;  %v8699_v29 = vor.u32 %v12219_v20, %v8698_v19  ;;  %v1483_v19 = vsel %vm897_vm0, %v1393_v3, 0  ;;  %v12161_v4 = vld [vmem:[%s18501_s1 + $0x24] sm:$0xf] }
  0x51   : > { %1009 = vmatmul.bf16.vlgmr.msrb.gmra.mxu3 %v13348_v5  ;;  %v8476_v3 = vld [vmem:[%s18501_s1 + $0x30] sm:$0xf0] }
  0x52   : > { %1021 = vmatpush.bf16.msra.mxu0 %v8399_v28  ;;  %v12167_v28 = vld [vmem:[%s18501_s1 + $0x4c] sm:$0xf0] }
  0x53   : > { %1030 = vmatpush.bf16.msra.mxu2 %v8211_v32  ;;  %1041 = vmatpush.bf16.msra.mxu1 %v8371_v33  ;;  %v8763_v32 = vor.u32 %v12235_v24, %v8762_v23  ;;  %v8682_v33 = vld [vmem:[%s18501_s1 + $0x1c0] sm:$0xf]  ;;  %v8491_v35 = vor.u32 %v12167_v28, %v8490_v27  ;;  %v8543_v24 = vor.u32 %v12177_v9, %v8540_v17  ;;  %v12199_v27 = vld [vmem:[%s18501_s1 + $0x14c] sm:$0xf0]  ;;  %v12173_v28 = vld [vmem:[%s18501_s1 + $0x84] sm:$0xf] }
  0x54   : > { %1057 = vmatpush.bf16.msra.mxu3 %v8451_v37  ;;  %v12231_v37 = vld [vmem:[%s18501_s1 + $0x24c] sm:$0xf0]  ;;  %v8683_v41 = vor.u32 %v12215_v34, %v8682_v33  ;;  %v12229_v33 = vld [vmem:[%s18501_s1 + $0x244] sm:$0xf]  ;;  %v8748_v34 = vld [vmem:[%s18501_s1 + $0x250] sm:$0xf0]  ;;  %v8479_v9 = vor.u32 %v12161_v4, %v8476_v3 }
  0x55   : > { %8454 = vmatmul.msk.bf16.vlgmr.msra.gmra.mxu0 %vm893_vm1, %v13335_v0  ;;  %v8626_v3 = vld [vmem:[%s18501_s1 + $0x148] sm:$0xf] }
  0x56   : > { %1491 = vmatpush.bf16.msrb.mxu0 %v8571_v31  ;;  %v8288_v31 = vld [vmem:[%s18501_s1 + $0x3c8] sm:$0xf0] }
  0x57   : > { %1031 = vmatpush.bf16.msra.mxu2 %v8195_v45  ;;  %1042 = vmatpush.bf16.msra.mxu1 %v8355_v46  ;;  %v8291_v38 = vor.u32 %v12274_v30, %v8288_v31  ;;  %v8747_v45 = vor.u32 %v12231_v37, %v8746_v36  ;;  %v12211_v46 = vld [vmem:[%s18501_s1 + $0x1ac] sm:$0xf0]  ;;  %v13772_v30 = vpack.c.bf16 %v307_v18, %v307_v18  ;;  %v8602_v37 = vld [vmem:[%s18501_s1 + $0x120] sm:$0xf]  ;;  %v8690_v18 = vld [vmem:[%s18501_s1 + $0x1c8] sm:$0xf] }
  0x58   : > { %1058 = vmatpush.bf16.msra.mxu3 %v8435_v50  ;;  %v8475_v50 = vor.u32 %v12163_v40, %v8474_v39  ;;  %v8652_v39 = vld [vmem:[%s18501_s1 + $0x190] sm:$0xf0]  ;;  %v12195_v40 = vld [vmem:[%s18501_s1 + $0x12c] sm:$0xf0] }
  0x59   : > { %v8603_v48 = vor.u32 %v12195_v40, %v8602_v37  ;;  %v8588_v37 = vld [vmem:[%s18501_s1 + $0x110] sm:$0xf0]  ;;  %v12236_v40 = vld [vmem:[%s18501_s1 + $0x274] sm:$0xf0] }
  0x5a   : > { %1492 = vmatpush.bf16.msrb.mxu0 %v8555_v43  ;;  %v8272_v43 = vld [vmem:[%s18501_s1 + $0x3a8] sm:$0xf0] }
  0x5b   : > { %1032 = vmatpush.bf16.msra.mxu2 %v8179_v58  ;;  %1043 = vmatpush.bf16.msra.mxu1 %v8339_v59  ;;  %v8275_v52 = vor.u32 %v12270_v42, %v8272_v43  ;;  %v12217_v58 = vld [vmem:[%s18501_s1 + $0x1e4] sm:$0xf]  ;;  %v8700_v59 = vld [vmem:[%s18501_s1 + $0x1f0] sm:$0xf0]  ;;  %v8751_v43 = vor.u32 %v12229_v33, %v8748_v34  ;;  %v12212_v33 = vld [vmem:[%s18501_s1 + $0x1b4] sm:$0xf0] }
  0x5c   : > { %1059 = vmatpush.bf16.msra.mxu3 %v8419_v1  ;;  %v8459_v1 = vor.u32 %v12159_v54, %v8458_v53  ;;  %v8703_v7 = vor.u32 %v12217_v58, %v8700_v59  ;;  %v8508_v42 = vld [vmem:[%s18501_s1 + $0x70] sm:$0xf0]  ;;  %v12165_v53 = vld [vmem:[%s18501_s1 + $0x44] sm:$0xf] }
  0x5d   : > { %v8492_v54 = vld [vmem:[%s18501_s1 + $0x50] sm:$0xf0]  ;;  %v12221_v59 = vld [vmem:[%s18501_s1 + $0x204] sm:$0xf] }
  0x5e   : > { %1493 = vmatpush.bf16.msrb.mxu0 %v8539_v56  ;;  %v8667_v56 = vor.u32 %v12211_v46, %v8666_v44  ;;  %v8732_v46 = vld [vmem:[%s18501_s1 + $0x230] sm:$0xf0]  ;;  %v8495_v62 = vor.u32 %v12165_v53, %v8492_v54  ;;  %v12232_v53 = vld [vmem:[%s18501_s1 + $0x254] sm:$0xf0] }
  0x5f   : > { %1033 = vmatpush.bf16.msra.mxu2 %v8163_v11  ;;  %1044 = vmatpush.bf16.msra.mxu1 %v8323_v12  ;;  %v8634_v11 = vld [vmem:[%s18501_s1 + $0x160] sm:$0xf]  ;;  %v12213_v12 = vld [vmem:[%s18501_s1 + $0x1c4] sm:$0xf] }
  0x60   : > { %1060 = vmatpush.bf16.msra.mxu3 %v8403_v16  ;;  %v12203_v16 = vld [vmem:[%s18501_s1 + $0x16c] sm:$0xf0]  ;;  %v8687_v20 = vor.u32 %v12213_v12, %v8684_v13  ;;  %v8562_v12 = vld [vmem:[%s18501_s1 + $0xc8] sm:$0xf]  ;;  %v12184_v13 = vld [vmem:[%s18501_s1 + $0xd4] sm:$0xf0] }
  0x61   : > { %v8635_v23 = vor.u32 %v12203_v16, %v8634_v11 }
  0x62   : > { %1494 = vmatpush.bf16.msrb.mxu0 %v8523_v8 }
  0x63   : > { %1034 = vmatpush.bf16.msra.mxu2 %v8147_v25  ;;  %1045 = vmatpush.bf16.msra.mxu1 %v8307_v26  ;;  %v12209_v25 = vld [vmem:[%s18501_s1 + $0x1a4] sm:$0xf]  ;;  %v8668_v26 = vld [vmem:[%s18501_s1 + $0x1b0] sm:$0xf0] }
  0x64   : > { %1520 = vmatpush.bf16.msrb.mxu3 %v1480_v21  ;;  %v12233_v21 = vld [vmem:[%s18501_s1 + $0x264] sm:$0xf] }
  0x65   : > { %8455 = vmatmul.msk.bf16.vlgmr.msra.gmra.mxu3 %vm893_vm1, %v13335_v0  ;;  %v8730_v0 = vld [vmem:[%s18501_s1 + $0x220] sm:$0xf] }
  0x66   : > { %1495 = vmatpush.bf16.msrb.mxu0 %v8507_v22  ;;  %1035 = vmatmul.bf16.vlgmr.msra.gmra.mxu2 %v13333_v63  ;;  %v8650_v63 = vld [vmem:[%s18501_s1 + $0x180] sm:$0xf]  ;;  %v8731_v60 = vor.u32 %v12227_v51, %v8730_v0  ;;  %v8764_v22 = vld [vmem:[%s18501_s1 + $0x270] sm:$0xf0]  ;;  %v12191_v0 = vld [vmem:[%s18501_s1 + $0x10c] sm:$0xf0] }
  0x67   : > { %1504 = vmatpush.bf16.msrb.mxu2 %v8699_v29  ;;  %1046 = vmatpush.bf16.msra.mxu1 %v8291_v38  ;;  %v8651_v8 = vor.u32 %v12207_v49, %v8650_v63  ;;  %v8524_v29 = vld [vmem:[%s18501_s1 + $0x90] sm:$0xf0]  ;;  %v8767_v31 = vor.u32 %v12233_v21, %v8764_v22  ;;  %v12205_v38 = vld [vmem:[%s18501_s1 + $0x184] sm:$0xf]  ;;  %v12188_v63 = vld [vmem:[%s18501_s1 + $0xf4] sm:$0xf0]  ;;  %v8587_v61 = vor.u32 %v12191_v0, %v8586_v47 }
  0x68   : > { %1521 = vmatpush.bf16.msrb.mxu3 %v8763_v32  ;;  %v8671_v32 = vor.u32 %v12209_v25, %v8668_v26  ;;  %v8527_v36 = vor.u32 %v12173_v28, %v8524_v29  ;;  %v8655_v44 = vor.u32 %v12205_v38, %v8652_v39  ;;  %v12201_v51 = vld [vmem:[%s18501_s1 + $0x164] sm:$0xf]  ;;  %v306_v49 = vld [vmem:[%s13317_s30 + $0x8] sm:$0xff]  ;;  %v1394_v21 = vpack.c.b16 %v1310_v6, %v1310_v6  ;;  %v12180_v26 = vld [vmem:[%s18501_s1 + $0xb4] sm:$0xf0] }
  0x69   : > { %v8563_v22 = vor.u32 %v12184_v13, %v8562_v12  ;;  %v8546_v25 = vld [vmem:[%s18501_s1 + $0xa8] sm:$0xf]  ;;  %v12176_v38 = vld [vmem:[%s18501_s1 + $0x94] sm:$0xf0]  ;;  %v12178_v6 = vld [vmem:[%s18501_s1 + $0xac] sm:$0xf] }
  0x6a   : > { %1496 = vmatpush.bf16.msrb.mxu0 %v8491_v35  ;;  %v8547_v34 = vor.u32 %v12180_v26, %v8546_v25  ;;  %v8770_v39 = vld [vmem:[%s18501_s1 + $0x268] sm:$0xf]  ;;  %v12164_v13 = vld [vmem:[%s18501_s1 + $0x34] sm:$0xf0] }
  0x6b   : > { %1505 = vmatpush.bf16.msrb.mxu2 %v8683_v41  ;;  %1047 = vmatpush.bf16.msra.mxu1 %v8275_v52  ;;  %v12169_v41 = vld [vmem:[%s18501_s1 + $0x64] sm:$0xf]  ;;  %v8636_v52 = vld [vmem:[%s18501_s1 + $0x170] sm:$0xf0]  ;;  %v8482_v12 = vld [vmem:[%s18501_s1 + $0x28] sm:$0xf] }
  0x6c   : > { %1522 = vmatpush.bf16.msrb.mxu3 %v8747_v45  ;;  %v12225_v45 = vld [vmem:[%s18501_s1 + $0x224] sm:$0xf]  ;;  %v8639_v58 = vor.u32 %v12201_v51, %v8636_v52  ;;  %v12172_v51 = vld [vmem:[%s18501_s1 + $0x74] sm:$0xf0]  ;;  %v8754_v52 = vld [vmem:[%s18501_s1 + $0x248] sm:$0xf] }
  0x6e   : > { %1497 = vmatpush.bf16.msrb.mxu0 %v8475_v50  ;;  %1048 = vmatmul.bf16.vlgmr.msra.gmra.mxu1 %v13348_v5  ;;  %v8618_v5 = vld [vmem:[%s18501_s1 + $0x140] sm:$0xf]  ;;  %v8511_v50 = vor.u32 %v12169_v41, %v8508_v42  ;;  %v12186_v42 = vld [vmem:[%s18501_s1 + $0xec] sm:$0xf] }
  0x6f   : > { %1506 = vmatpush.bf16.msrb.mxu2 %v8667_v56  ;;  %1530 = vmatpush.bf16.msrb.mxu1 %v8575_v57  ;;  %v8619_v35 = vor.u32 %v12199_v27, %v8618_v5  ;;  %v8735_v56 = vor.u32 %v12225_v45, %v8732_v46  ;;  %v8578_v57 = vld [vmem:[%s18501_s1 + $0xe8] sm:$0xf]  ;;  %v8604_v5 = vld [vmem:[%s18501_s1 + $0x130] sm:$0xf0]  ;;  %v12208_v46 = vld [vmem:[%s18501_s1 + $0x194] sm:$0xf0] }
  0x70   : > { %1523 = vmatpush.bf16.msrb.mxu3 %v8731_v60  ;;  %v8716_v60 = vld [vmem:[%s18501_s1 + $0x210] sm:$0xf0]  ;;  %v8658_v45 = vld [vmem:[%s18501_s1 + $0x188] sm:$0xf] }
  0x71   : > { %v8719_v11 = vor.u32 %v12221_v59, %v8716_v60  ;;  %v8659_v54 = vor.u32 %v12208_v46, %v8658_v45  ;;  %v8755_v60 = vor.u32 %v12232_v53, %v8754_v52  ;;  %v12234_v46 = vld [vmem:[%s18501_s1 + $0x26c] sm:$0xf]  ;;  %v8676_v52 = vld [vmem:[%s18501_s1 + $0x1b8] sm:$0xf0]  ;;  %v8960_v53 = vld [vmem:[%s18501_s1 + $0x5e0] sm:$0xf] }
  0x72   : > { %1498 = vmatpush.bf16.msrb.mxu0 %v8459_v1  ;;  %v8706_v1 = vld [vmem:[%s18501_s1 + $0x1e8] sm:$0xf] }
  0x73   : > { %1507 = vmatpush.bf16.msrb.mxu2 %v8651_v8  ;;  %1531 = vmatpush.bf16.msrb.mxu1 %v8559_v10  ;;  %v12197_v8 = vld [vmem:[%s18501_s1 + $0x144] sm:$0xf]  ;;  %v8620_v10 = vld [vmem:[%s18501_s1 + $0x150] sm:$0xf0]  ;;  %v8707_v16 = vor.u32 %v12220_v2, %v8706_v1  ;;  %v8738_v1 = vld [vmem:[%s18501_s1 + $0x228] sm:$0xf] }
  0x74   : > { %1524 = vmatpush.bf16.msrb.mxu3 %v8715_v14  ;;  %v13867_v14 = vpack.c.bf16 %v306_v49, %v306_v49  ;;  %v8623_v17 = vor.u32 %v12197_v8, %v8620_v10  ;;  %v8498_v49 = vld [vmem:[%s18501_s1 + $0x48] sm:$0xf]  ;;  %v12228_v2 = vld [vmem:[%s18501_s1 + $0x234] sm:$0xf0] }
  0x75   : > { %1499 = vmatmul.bf16.vlgmr.msrb.gmra.mxu0 %v13733_v15  ;;  %v12200_v8 = vld [vmem:[%s18501_s1 + $0x154] sm:$0xf0] }
  0x76   : > { %1543 = vmatpush.bf16.msra.mxu0 %v8703_v7  ;;  %v8579_v7 = vor.u32 %v12188_v63, %v8578_v57  ;;  %v8564_v57 = vld [vmem:[%s18501_s1 + $0xd8] sm:$0xf0]  ;;  %v8642_v63 = vld [vmem:[%s18501_s1 + $0x168] sm:$0xf] }
  0x77   : > { %1508 = vmatpush.bf16.msrb.mxu2 %v8635_v23  ;;  %1532 = vmatpush.bf16.msrb.mxu1 %v8543_v24  ;;  %v8460_v23 = vld [vmem:[%s18501_s1 + $0x10] sm:$0xf0]  ;;  %v12193_v24 = vld [vmem:[%s18501_s1 + $0x124] sm:$0xf] }
  0x78   : > { %1559 = vmatpush.bf16.msra.mxu3 %v1483_v19  ;;  %v12216_v19 = vld [vmem:[%s18501_s1 + $0x1d4] sm:$0xf0]  ;;  %v8607_v29 = vor.u32 %v12193_v24, %v8604_v5  ;;  %v8610_v24 = vld [vmem:[%s18501_s1 + $0x128] sm:$0xf]  ;;  %v8483_v5 = vor.u32 %v12164_v13, %v8482_v12  ;;  %v8740_v12 = vld [vmem:[%s18501_s1 + $0x238] sm:$0xf0] }
  0x79   : > { %8776 = vmatmul.msk.bf16.vlgmr.msrb.gmra.mxu3 %vm893_vm1, %v13772_v30  ;;  %v8691_v27 = vor.u32 %v12216_v19, %v8690_v18  ;;  %v12174_v18 = vld [vmem:[%s18501_s1 + $0x8c] sm:$0xf]  ;;  %v1311_v19 = vunpack.c.h.b16 %v13827_v55  ;;  %v12196_v55 = vld [vmem:[%s18501_s1 + $0x134] sm:$0xf0] }
  0x7a   : > { %1544 = vmatpush.bf16.msra.mxu0 %v8687_v20  ;;  %v12157_v20 = vld [vmem:[%s18501_s1 + $0x4] sm:$0xf]  ;;  %v12158_v13 = vld [vmem:[%s18501_s1 + $0xc] sm:$0xf] }
  0x7b   : > { %1509 = vmatpush.bf16.msrb.mxu2 %v8619_v35  ;;  %1533 = vmatpush.bf16.msrb.mxu1 %v8527_v36  ;;  %v8463_v28 = vor.u32 %v12157_v20, %v8460_v23  ;;  %v8530_v35 = vld [vmem:[%s18501_s1 + $0x88] sm:$0xf]  ;;  %v12189_v36 = vld [vmem:[%s18501_s1 + $0x104] sm:$0xf]  ;;  %v8627_v20 = vor.u32 %v12200_v8, %v8626_v3  ;;  %v8708_v23 = vld [vmem:[%s18501_s1 + $0x1f8] sm:$0xf0] }
  0x7c   : > { %1560 = vmatpush.bf16.msra.mxu3 %v8767_v31  ;;  %v1486_v31 = vsel %vm897_vm0, %v1394_v21, 0  ;;  %v8531_v47 = vor.u32 %v12176_v38, %v8530_v35  ;;  %v8532_v21 = vld [vmem:[%s18501_s1 + $0x98] sm:$0xf0]  ;;  %v12226_v3 = vld [vmem:[%s18501_s1 + $0x22c] sm:$0xf] }
  0x7d   : > { %v8535_v26 = vor.u32 %v12174_v18, %v8532_v21  ;;  %v8516_v35 = vld [vmem:[%s18501_s1 + $0x78] sm:$0xf0]  ;;  %v9104_v21 = vld [vmem:[%s18501_s1 + $0x700] sm:$0xf] }
  0x7e   : > { %1545 = vmatpush.bf16.msra.mxu0 %v8671_v32  ;;  %v8674_v32 = vld [vmem:[%s18501_s1 + $0x1a8] sm:$0xf]  ;;  %v8692_v38 = vld [vmem:[%s18501_s1 + $0x1d8] sm:$0xf0] }
  0x7f   : > { %1510 = vmatpush.bf16.msrb.mxu2 %v8603_v48  ;;  %1534 = vmatpush.bf16.msrb.mxu1 %v8511_v50  ;;  %v8675_v41 = vor.u32 %v12212_v33, %v8674_v32  ;;  %v8771_v48 = vor.u32 %v12236_v40, %v8770_v39  ;;  %v8514_v50 = vld [vmem:[%s18501_s1 + $0x68] sm:$0xf]  ;;  %v8611_v32 = vor.u32 %v12196_v55, %v8610_v24  ;;  %v8976_v40 = vld [vmem:[%s18501_s1 + $0x600] sm:$0xf]  ;;  %v8644_v18 = vld [vmem:[%s18501_s1 + $0x178] sm:$0xf0] }
  0x80   : > { %1561 = vmatpush.bf16.msra.mxu3 %v8751_v43  ;;  %v8580_v43 = vld [vmem:[%s18501_s1 + $0xf8] sm:$0xf0]  ;;  %v8515_v59 = vor.u32 %v12172_v51, %v8514_v50  ;;  %v8594_v33 = vld [vmem:[%s18501_s1 + $0x108] sm:$0xf]  ;;  %v12210_v51 = vld [vmem:[%s18501_s1 + $0x1ac] sm:$0xf] }
  0x81   : > { %v8583_v0 = vor.u32 %v12186_v42, %v8580_v43 }
  0x82   : > { %1546 = vmatpush.bf16.msra.mxu0 %v8655_v44  ;;  %v8591_v44 = vor.u32 %v12189_v36, %v8588_v37  ;;  %v12192_v36 = vld [vmem:[%s18501_s1 + $0x114] sm:$0xf0]  ;;  %v12214_v37 = vld [vmem:[%s18501_s1 + $0x1cc] sm:$0xf] }
  0x83   : > { %1511 = vmatpush.bf16.msrb.mxu2 %v8587_v61  ;;  %1535 = vmatpush.bf16.msrb.mxu1 %v8495_v62  ;;  %v12168_v62 = vld [vmem:[%s18501_s1 + $0x54] sm:$0xf0]  ;;  %v8695_v45 = vor.u32 %v12214_v37, %v8692_v38  ;;  %v12194_v38 = vld [vmem:[%s18501_s1 + $0x12c] sm:$0xf] }
  0x84   : > { %1562 = vmatpush.bf16.msra.mxu3 %v8735_v56  ;;  %v12182_v56 = vld [vmem:[%s18501_s1 + $0xcc] sm:$0xf]  ;;  %v8499_v10 = vor.u32 %v12168_v62, %v8498_v49  ;;  %v14083_v49 = vld [vmem:[%s18501_s1 + $0x7a0] sm:$0x33]  ;;  %v8484_v62 = vld [vmem:[%s18501_s1 + $0x38] sm:$0xf0] }
  0x85   : > { %v8567_v61 = vor.u32 %v12182_v56, %v8564_v57  ;;  %v12230_v57 = vld [vmem:[%s18501_s1 + $0x24c] sm:$0xf]  ;;  %v2004_v8 = vunpack.c.l.b16 %v14083_v49 }
  0x86   : > { %1547 = vmatpush.bf16.msra.mxu0 %v8639_v58  ;;  %1512 = vmatmul.bf16.vlgmr.msrb.gmra.mxu2 %v13867_v14  ;;  %v12204_v58 = vld [vmem:[%s18501_s1 + $0x174] sm:$0xf0] }
  0x87   : > { %1569 = vmatpush.bf16.msra.mxu2 %v8579_v7  ;;  %1536 = vmatpush.bf16.msrb.mxu1 %v8479_v9  ;;  %v8643_v4 = vor.u32 %v12204_v58, %v8642_v63  ;;  %v8548_v7 = vld [vmem:[%s18501_s1 + $0xb8] sm:$0xf0]  ;;  %v8722_v9 = vld [vmem:[%s18501_s1 + $0x208] sm:$0xf]  ;;  %v8679_v58 = vor.u32 %v12210_v51, %v8676_v52  ;;  %v2088_v24 = vpack.c.b16 %v2004_v8, %v2004_v8  ;;  %v12190_v51 = vld [vmem:[%s18501_s1 + $0x10c] sm:$0xf]  ;;  %v2005_v52 = vunpack.c.h.b16 %v14083_v49 }
  0x88   : > { %1563 = vmatpush.bf16.msra.mxu3 %v8719_v11  ;;  %v8739_v11 = vor.u32 %v12228_v2, %v8738_v1  ;;  %v12206_v1 = vld [vmem:[%s18501_s1 + $0x18c] sm:$0xf]  ;;  %v8660_v2 = vld [vmem:[%s18501_s1 + $0x198] sm:$0xf0]  ;;  %v12391_v49 = vld [vmem:[%s18501_s1 + $0x76c] sm:$0xf0] }
  0x89   : > { %v2176_v37 = vsel %vm897_vm0, %v2088_v24, 0  ;;  %v8962_v24 = vld [vmem:[%s18501_s1 + $0x5f0] sm:$0xf0] }
  0x8a   : > { %1548 = vmatpush.bf16.msra.mxu0 %v8623_v17  ;;  %v12224_v17 = vld [vmem:[%s18501_s1 + $0x214] sm:$0xf0] }
  0x8b   : > { %1570 = vmatpush.bf16.msra.mxu2 %v8563_v22  ;;  %8777 = vmatmul.msk.bf16.vlgmr.msra.gmra.mxu3 %vm893_vm1, %v13772_v30  ;;  %v12218_v22 = vld [vmem:[%s18501_s1 + $0x1ec] sm:$0xf]  ;;  %v8723_v25 = vor.u32 %v12224_v17, %v8722_v9 }
  0x8c   : > { %1582 = vmatpush.bf16.msrb.mxu3 %v8707_v16  ;;  %1537 = vmatpush.bf16.msrb.mxu1 %v8463_v28  ;;  %v8551_v16 = vor.u32 %v12178_v6, %v8548_v7  ;;  %v8466_v28 = vld [vmem:[%s18501_s1 + $0x8] sm:$0xf]  ;;  %v12339_v6 = vld [vmem:[%s18501_s1 + $0x5cc] sm:$0xf0]  ;;  %v12202_v17 = vld [vmem:[%s18501_s1 + $0x16c] sm:$0xf] }
  0x8e   : > { %1549 = vmatpush.bf16.msra.mxu0 %v8607_v29  ;;  %v12160_v29 = vld [vmem:[%s18501_s1 + $0x14] sm:$0xf0] }
  0x8f   : > { %1571 = vmatpush.bf16.msra.mxu2 %v8547_v34  ;;  %1538 = vmatmul.bf16.vlgmr.msrb.gmra.mxu1 %v13733_v15  ;;  %v12170_v34 = vld [vmem:[%s18501_s1 + $0x6c] sm:$0xf]  ;;  %v8467_v39 = vor.u32 %v12160_v29, %v8466_v28 }
  0x90   : > { %1583 = vmatpush.bf16.msrb.mxu3 %v8691_v27  ;;  %1598 = vmatpush.bf16.msra.mxu1 %v1486_v31  ;;  %v8711_v27 = vor.u32 %v12218_v22, %v8708_v23  ;;  %v1395_v31 = vpack.c.b16 %v1311_v19, %v1311_v19  ;;  %v8519_v43 = vor.u32 %v12170_v34, %v8516_v35  ;;  %v8928_v19 = vld [vmem:[%s18501_s1 + $0x5a0] sm:$0xf]  ;;  %v12379_v22 = vld [vmem:[%s18501_s1 + $0x70c] sm:$0xf0]  ;;  %v12198_v29 = vld [vmem:[%s18501_s1 + $0x14c] sm:$0xf] }
  0x91   : > { %v8743_v23 = vor.u32 %v12226_v3, %v8740_v12  ;;  %v9105_v28 = vor.u32 %v12379_v22, %v9104_v21  ;;  %v9088_v34 = vld [vmem:[%s18501_s1 + $0x6e0] sm:$0xf]  ;;  %v12375_v35 = vld [vmem:[%s18501_s1 + $0x6ec] sm:$0xf0] }
  0x92   : > { %1550 = vmatpush.bf16.msra.mxu0 %v8591_v44  ;;  %v1489_v42 = vsel %vm897_vm0, %v1395_v31, 0  ;;  %v8595_v44 = vor.u32 %v12192_v36, %v8594_v33  ;;  %v8628_v31 = vld [vmem:[%s18501_s1 + $0x158] sm:$0xf0]  ;;  %v12331_v33 = vld [vmem:[%s18501_s1 + $0x58c] sm:$0xf0] }
  0x93   : > { %1572 = vmatpush.bf16.msra.mxu2 %v8531_v47  ;;  %v8772_v47 = vld [vmem:[%s18501_s1 + $0x278] sm:$0xf0]  ;;  %v12387_v12 = vld [vmem:[%s18501_s1 + $0x74c] sm:$0xf0] }
  0x94   : > { %1584 = vmatpush.bf16.msrb.mxu3 %v8675_v41  ;;  %1599 = vmatpush.bf16.msra.mxu1 %v8771_v48  ;;  %v12347_v41 = vld [vmem:[%s18501_s1 + $0x60c] sm:$0xf0]  ;;  %v12166_v48 = vld [vmem:[%s18501_s1 + $0x4c] sm:$0xf]  ;;  %v8775_v56 = vor.u32 %v12234_v46, %v8772_v47  ;;  %v1647_v46 = vld [vmem:[%s13317_s30] sm:$0xfe] }
  0x95   : > { %1551 = vmatmul.bf16.vlgmr.msra.gmra.mxu0 %v13867_v14  ;;  %v8977_v50 = vor.u32 %v12347_v41, %v8976_v40  ;;  %v8612_v40 = vld [vmem:[%s18501_s1 + $0x138] sm:$0xf0]  ;;  %v9168_v41 = vld [vmem:[%s18501_s1 + $0x780] sm:$0xf]  ;;  %v1650_v47 = vld [vmem:[%s13317_s30 + $0x18] sm:$0x1] }
  0x96   : > { %1608 = vmatpush.bf16.msrb.mxu0 %v8583_v0  ;;  %v8500_v0 = vld [vmem:[%s18501_s1 + $0x58] sm:$0xf0]  ;;  %v12363_v22 = vld [vmem:[%s18501_s1 + $0x68c] sm:$0xf0] }
  0x97   : > { %1573 = vmatpush.bf16.msra.mxu2 %v8515_v59  ;;  %v8503_v63 = vor.u32 %v12166_v48, %v8500_v0  ;;  %v8756_v59 = vld [vmem:[%s18501_s1 + $0x258] sm:$0xf0]  ;;  %v12327_v48 = vld [vmem:[%s18501_s1 + $0x56c] sm:$0xf0] }
  0x98   : > { %1585 = vmatpush.bf16.msrb.mxu3 %v8659_v54  ;;  %1600 = vmatpush.bf16.msra.mxu1 %v8755_v60  ;;  %v12343_v54 = vld [vmem:[%s18501_s1 + $0x5ec] sm:$0xf0]  ;;  %v12162_v60 = vld [vmem:[%s18501_s1 + $0x2c] sm:$0xf]  ;;  %v8759_v7 = vor.u32 %v12230_v57, %v8756_v59  ;;  %v14192_v57 = vpack.c.bf16 %v1650_v47, %v1647_v46  ;;  %v12393_v46 = vld [vmem:[%s18501_s1 + $0x784] sm:$0xf] }
  0x99   : > { %v12371_v0 = vld [vmem:[%s18501_s1 + $0x6cc] sm:$0xf0]  ;;  %v9170_v47 = vld [vmem:[%s18501_s1 + $0x790] sm:$0xf0] }
  0x9a   : > { %1609 = vmatpush.bf16.msrb.mxu0 %v8567_v61  ;;  %v8961_v61 = vor.u32 %v12343_v54, %v8960_v53  ;;  %v8615_v53 = vor.u32 %v12194_v38, %v8612_v40  ;;  %v1648_v38 = vld [vmem:[%s13317_s30 + $0x8] sm:$0xfe] }
  0x9b   : > { %1574 = vmatpush.bf16.msra.mxu2 %v8499_v10  ;;  %v8487_v10 = vor.u32 %v12162_v60, %v8484_v62  ;;  %v9152_v60 = vld [vmem:[%s18501_s1 + $0x760] sm:$0xf]  ;;  %v12323_v62 = vld [vmem:[%s18501_s1 + $0x54c] sm:$0xf0] }
  0x9c   : > { %1586 = vmatpush.bf16.msrb.mxu3 %v8643_v4  ;;  %1601 = vmatpush.bf16.msra.mxu1 %v8739_v11  ;;  %v8944_v4 = vld [vmem:[%s18501_s1 + $0x5c0] sm:$0xf]  ;;  %v8663_v11 = vor.u32 %v12206_v1, %v8660_v2  ;;  %v12367_v2 = vld [vmem:[%s18501_s1 + $0x6ac] sm:$0xf0] }
  0x9d   : > { %v8945_v9 = vor.u32 %v12339_v6, %v8944_v4  ;;  %v9056_v1 = vld [vmem:[%s18501_s1 + $0x6a0] sm:$0xf]  ;;  %v12345_v4 = vld [vmem:[%s18501_s1 + $0x604] sm:$0xf] }
  0x9e   : > { %1610 = vmatpush.bf16.msrb.mxu0 %v8551_v16  ;;  %v8468_v16 = vld [vmem:[%s18501_s1 + $0x18] sm:$0xf0] }
  0x9f   : > { %1575 = vmatpush.bf16.msra.mxu2 %v8483_v5  ;;  %v8471_v55 = vor.u32 %v12158_v13, %v8468_v16  ;;  %v8647_v5 = vor.u32 %v12202_v17, %v8644_v18  ;;  %v1742_v13 = vshll.u32 %v14192_v57, 16  ;;  %v8864_v17 = vld [vmem:[%s18501_s1 + $0x520] sm:$0xf]  ;;  %v12319_v18 = vld [vmem:[%s18501_s1 + $0x52c] sm:$0xf0] }
  0xa0   : > { %1587 = vmatpush.bf16.msrb.mxu3 %v8627_v20  ;;  %1602 = vmatpush.bf16.msra.mxu1 %v8723_v25  ;;  %v12335_v20 = vld [vmem:[%s18501_s1 + $0x5ac] sm:$0xf0]  ;;  %v12222_v25 = vld [vmem:[%s18501_s1 + $0x20c] sm:$0xf] }
  0xa2   : > { %1611 = vmatpush.bf16.msrb.mxu0 %v8535_v26  ;;  %v8724_v26 = vld [vmem:[%s18501_s1 + $0x218] sm:$0xf0] }
  0xa3   : > { %8778 = vmatmul.msk.bf16.vlgmr.msra.gmra.mxu1 %vm893_vm1, %v13772_v30  ;;  %1576 = vmatpush.bf16.msra.mxu2 %v8467_v39  ;;  %v8727_v36 = vor.u32 %v12222_v25, %v8724_v26  ;;  %v8631_v39 = vor.u32 %v12198_v29, %v8628_v31  ;;  %v9120_v25 = vld [vmem:[%s18501_s1 + $0x720] sm:$0xf]  ;;  %v12383_v26 = vld [vmem:[%s18501_s1 + $0x72c] sm:$0xf0] }
  0xa4   : > { %1621 = vmatpush.bf16.msrb.mxu1 %v8711_v27  ;;  %1588 = vmatpush.bf16.msrb.mxu3 %v8611_v32  ;;  %v8929_v27 = vor.u32 %v12335_v20, %v8928_v19  ;;  %v8912_v32 = vld [vmem:[%s18501_s1 + $0x580] sm:$0xf] }
  0xa5   : > { %v9040_v19 = vld [vmem:[%s18501_s1 + $0x680] sm:$0xf] }
  0xa6   : > { %1612 = vmatpush.bf16.msrb.mxu0 %v8519_v43  ;;  %1577 = vmatmul.bf16.vlgmr.msra.gmra.mxu2 %v13733_v15  ;;  %v8913_v43 = vor.u32 %v12331_v33, %v8912_v32  ;;  %v9024_v31 = vld [vmem:[%s18501_s1 + $0x660] sm:$0xf]  ;;  %v12359_v32 = vld [vmem:[%s18501_s1 + $0x66c] sm:$0xf0]  ;;  %v1740_v33 = vshrl.u32 %v14192_v57, 16 }
  0xa7   : > { %1637 = vmatpush.bf16.msrb.mxu2 %v1489_v42  ;;  %v12395_v42 = vld [vmem:[%s18501_s1 + $0x78c] sm:$0xf0] }
  0xa8   : > { %1589 = vmatpush.bf16.msrb.mxu3 %v8595_v44  ;;  %1622 = vmatpush.bf16.msrb.mxu1 %v8695_v45  ;;  %v9089_v44 = vor.u32 %v12375_v35, %v9088_v34  ;;  %v8896_v45 = vld [vmem:[%s18501_s1 + $0x560] sm:$0xf]  ;;  %v9169_v54 = vor.u32 %v12395_v42, %v9168_v41  ;;  %v1744_v34 = vrot.slane %v1742_v13, 1  ;;  %v8865_v35 = vor.u32 %v12319_v18, %v8864_v17  ;;  %v8946_v42 = vld [vmem:[%s18501_s1 + $0x5d0] sm:$0xf0] }
  0xa9   : > { %v12355_v57 = vld [vmem:[%s18501_s1 + $0x64c] sm:$0xf0]  ;;  %v12369_v13 = vld [vmem:[%s18501_s1 + $0x6c4] sm:$0xf]  ;;  %v9138_v18 = vld [vmem:[%s18501_s1 + $0x750] sm:$0xf0] }
  0xaa   : > { %1613 = vmatpush.bf16.msrb.mxu0 %v8503_v63  ;;  %v1649_v63 = vld [vmem:[%s13317_s30 + $0x10] sm:$0xfe]  ;;  %v919_v6 = vpop.f32.mrf.mxu0  ;;  %v12385_v17 = vld [vmem:[%s18501_s1 + $0x744] sm:$0xf] }
  0xab   : > { %1590 = vmatmul.bf16.vlgmr.msrb.gmra.mxu3 %v13867_v14  ;;  %1638 = vmatpush.bf16.msrb.mxu2 %v8775_v56  ;;  %v8596_v56 = vld [vmem:[%s18501_s1 + $0x118] sm:$0xf0]  ;;  %v932_v20 = vpop.f32.mrf.mxu1 }
  0xac   : > { %2187 = vmatpush.bf16.msra.mxu3 %v8977_v50  ;;  %1623 = vmatpush.bf16.msrb.mxu1 %v8679_v58  ;;  %v9072_v50 = vld [vmem:[%s18501_s1 + $0x6c0] sm:$0xf]  ;;  %v1652_v58 = vld [vmem:[%s13317_s30 + $0x28] sm:$0x1]  ;;  %v8599_v8 = vor.u32 %v12190_v51, %v8596_v56  ;;  %v9121_v51 = vor.u32 %v12383_v26, %v9120_v25  ;;  %v12325_v25 = vld [vmem:[%s18501_s1 + $0x564] sm:$0xf] }
  0xad   : > { %v9073_v59 = vor.u32 %v12371_v0, %v9072_v50  ;;  %v14222_v3 = vpack.c.bf16 %v1652_v58, %v1649_v63  ;;  %v945_v29 = vpop.f32.mrf.mxu2  ;;  %v9008_v56 = vld [vmem:[%s18501_s1 + $0x640] sm:$0xf]  ;;  %v8898_v26 = vld [vmem:[%s18501_s1 + $0x570] sm:$0xf0] }
  0xae   : > { %1614 = vmatpush.bf16.msrb.mxu0 %v8487_v10  ;;  %v9153_v10 = vor.u32 %v12391_v49, %v9152_v60  ;;  %v12373_v60 = vld [vmem:[%s18501_s1 + $0x6e4] sm:$0xf]  ;;  %v9090_v49 = vld [vmem:[%s18501_s1 + $0x6f0] sm:$0xf0] }
  0xaf   : > { %1639 = vmatpush.bf16.msrb.mxu2 %v8759_v7  ;;  %v2089_v7 = vpack.c.b16 %v2005_v52, %v2005_v52  ;;  %v14290_v52 = vor.u32 %v1744_v34, %v1740_v33  ;;  %v9122_v34 = vld [vmem:[%s18501_s1 + $0x730] sm:$0xf0] }
  0xb0   : > { %2188 = vmatpush.bf16.msra.mxu3 %v8961_v61  ;;  %1624 = vmatpush.bf16.msrb.mxu1 %v8663_v11  ;;  %v8880_v61 = vld [vmem:[%s18501_s1 + $0x540] sm:$0xf] }
  0xb1   : > { %v9136_v11 = vld [vmem:[%s18501_s1 + $0x740] sm:$0xf]  ;;  %v8881_v16 = vor.u32 %v12323_v62, %v8880_v61  ;;  %v8930_v61 = vld [vmem:[%s18501_s1 + $0x5b0] sm:$0xf0]  ;;  %v12389_v62 = vld [vmem:[%s18501_s1 + $0x764] sm:$0xf] }
  0xb2   : > { %1615 = vmatpush.bf16.msrb.mxu0 %v8471_v55  ;;  %v933_v55 = vadd.f32 %v932_v20, %v919_v6  ;;  %v9009_v6 = vor.u32 %v12355_v57, %v9008_v56  ;;  %v8984_v20 = vld [vmem:[%s18501_s1 + $0x608] sm:$0xf] }
  0xb3   : > { %1640 = vmatpush.bf16.msrb.mxu2 %v8743_v23  ;;  %v12341_v23 = vld [vmem:[%s18501_s1 + $0x5e4] sm:$0xf]  ;;  %v934_v63 = vpop.f32.mrf.mxu1  ;;  %v9096_v57 = vld [vmem:[%s18501_s1 + $0x6e8] sm:$0xf] }
  0xb4   : > { %2189 = vmatpush.bf16.msra.mxu3 %v8945_v9  ;;  %1625 = vmatpush.bf16.msrb.mxu1 %v8647_v5  ;;  %v9057_v9 = vor.u32 %v12367_v2, %v9056_v1  ;;  %v2179_v5 = vsel %vm897_vm0, %v2089_v7, 0  ;;  %v14269_v40 = vadd.f32 %v945_v29, %v933_v55  ;;  %v8965_v41 = vor.u32 %v12341_v23, %v8962_v24  ;;  %v14288_v0 = vpop.f32.mrf.mxu3  ;;  %v9154_v1 = vld [vmem:[%s18501_s1 + $0x770] sm:$0xf0]  ;;  %v12365_v29 = vld [vmem:[%s18501_s1 + $0x6a4] sm:$0xf] }
  0xb5   : > { %1616 = vmatmul.bf16.vlgmr.msrb.gmra.mxu0 %v13733_v15  ;;  %v8897_v15 = vor.u32 %v12327_v48, %v8896_v45  ;;  %v921_v45 = vpop.f32.mrf.mxu0  ;;  %v1754_v48 = vshrl.u32 %v14222_v3, 16  ;;  %v9093_v7 = vor.u32 %v12373_v60, %v9090_v49  ;;  %v12376_v63 = vld [vmem:[%s18501_s1 + $0x6f4] sm:$0xf0] }
  0xb6   : > { %2200 = vmatpush.bf16.msra.mxu0 %v9105_v28  ;;  %v9137_v28 = vor.u32 %v12387_v12, %v9136_v11  ;;  %v9157_v11 = vor.u32 %v12389_v62, %v9154_v1  ;;  %v12329_v12 = vld [vmem:[%s18501_s1 + $0x584] sm:$0xf]  ;;  %v9026_v62 = vld [vmem:[%s18501_s1 + $0x670] sm:$0xf0]  ;;  %v9097_v1 = vor.u32 %v12376_v63, %v9096_v57  ;;  %v12324_v63 = vld [vmem:[%s18501_s1 + $0x554] sm:$0xf0] }
  0xb7   : > { %1641 = vmatpush.bf16.msrb.mxu2 %v8727_v36  ;;  %v9041_v36 = vor.u32 %v12363_v22, %v9040_v19  ;;  %v12321_v45 = vld [vmem:[%s18501_s1 + $0x544] sm:$0xf] }
  0xb8   : > { %2190 = vmatpush.bf16.msra.mxu3 %v8929_v27  ;;  %1626 = vmatpush.bf16.msrb.mxu1 %v8631_v39  ;;  %v1756_v27 = vshll.u32 %v14222_v3, 16  ;;  %v1651_v39 = vld [vmem:[%s13317_s30 + $0x20] sm:$0x1] }
  0xb9   : > { %v8992_v3 = vld [vmem:[%s18501_s1 + $0x620] sm:$0xf] }
  0xba   : > { %2201 = vmatpush.bf16.msra.mxu0 %v9089_v44  ;;  %8779 = vmatmul.msk.bf16.vlgmr.msrb.gmra.mxu2 %vm893_vm1, %v13772_v30  ;;  %v8978_v30 = vld [vmem:[%s18501_s1 + $0x610] sm:$0xf0]  ;;  %v1758_v50 = vrot.slane %v1756_v27, 1 }
  0xbb   : > { %2216 = vmatpush.bf16.msra.mxu2 %v2176_v37  ;;  %v8981_v21 = vor.u32 %v12345_v4, %v8978_v30  ;;  %v12337_v37 = vld [vmem:[%s18501_s1 + $0x5c4] sm:$0xf]  ;;  %v9106_v44 = vld [vmem:[%s18501_s1 + $0x710] sm:$0xf0]  ;;  %v947_v4 = vpop.f32.mrf.mxu2 }
  0xbc   : > { %2191 = vmatpush.bf16.msra.mxu3 %v8913_v43  ;;  %1627 = vmatpush.bf16.msrb.mxu1 %v8615_v53  ;;  %v12377_v43 = vld [vmem:[%s18501_s1 + $0x704] sm:$0xf]  ;;  %v14292_v53 = vpack.c.bf16 %v1651_v39, %v1648_v38  ;;  %v8949_v58 = vor.u32 %v12337_v37, %v8946_v42  ;;  %v14318_v2 = vor.u32 %v1758_v50, %v1754_v48  ;;  %v960_v19 = vpop.f32.mrf.mxu3  ;;  %v9112_v38 = vld [vmem:[%s18501_s1 + $0x708] sm:$0xf]  ;;  %v12380_v39 = vld [vmem:[%s18501_s1 + $0x714] sm:$0xf0] }
  0xbd   : > { %v9113_v50 = vor.u32 %v12380_v39, %v9112_v38  ;;  %v8866_v4 = vld [vmem:[%s18501_s1 + $0x530] sm:$0xf0]  ;;  %v8920_v19 = vld [vmem:[%s18501_s1 + $0x588] sm:$0xf]  ;;  %v12328_v39 = vld [vmem:[%s18501_s1 + $0x574] sm:$0xf0] }
  0xbe   : > { %2202 = vmatpush.bf16.msra.mxu0 %v9073_v59  ;;  %v12333_v59 = vld [vmem:[%s18501_s1 + $0x5a4] sm:$0xf]  ;;  %v1749_v30 = vshll.u32 %v14292_v53, 16  ;;  %v1747_v22 = vshrl.u32 %v14292_v53, 16  ;;  %v8952_v53 = vld [vmem:[%s18501_s1 + $0x5c8] sm:$0xf] }
  0xbf   : > { %2217 = vmatpush.bf16.msra.mxu2 %v9169_v54  ;;  %v9109_v54 = vor.u32 %v12377_v43, %v9106_v44  ;;  %v8901_v43 = vor.u32 %v12325_v25, %v8898_v26  ;;  %v12368_v25 = vld [vmem:[%s18501_s1 + $0x6b4] sm:$0xf0] }
  0xc0   : > { %2192 = vmatpush.bf16.msra.mxu3 %v8897_v15  ;;  %1628 = vmatpush.bf16.msrb.mxu1 %v8599_v8  ;;  %v9173_v15 = vor.u32 %v12393_v46, %v9170_v47  ;;  %v12351_v8 = vld [vmem:[%s18501_s1 + $0x62c] sm:$0xf0]  ;;  %v1751_v23 = vrot.slane %v1749_v30, 1  ;;  %v12361_v46 = vld [vmem:[%s18501_s1 + $0x684] sm:$0xf] }
  0xc1   : > { %v8993_v24 = vor.u32 %v12351_v8, %v8992_v3  ;;  %v9042_v47 = vld [vmem:[%s18501_s1 + $0x690] sm:$0xf0]  ;;  %v12336_v3 = vld [vmem:[%s18501_s1 + $0x5b4] sm:$0xf0] }
  0xc2   : > { %2203 = vmatpush.bf16.msra.mxu0 %v9057_v9  ;;  %v8914_v9 = vld [vmem:[%s18501_s1 + $0x590] sm:$0xf0]  ;;  %v14379_v37 = vor.u32 %v1751_v23, %v1747_v22  ;;  %v9176_v22 = vld [vmem:[%s18501_s1 + $0x788] sm:$0xf]  ;;  %v12396_v23 = vld [vmem:[%s18501_s1 + $0x794] sm:$0xf0] }
  0xc3   : > { %2218 = vmatpush.bf16.msra.mxu2 %v9153_v10  ;;  %1629 = vmatmul.bf16.vlgmr.msrb.gmra.mxu1 %v13867_v14  ;;  %v9025_v14 = vor.u32 %v12359_v32, %v9024_v31  ;;  %v8933_v10 = vor.u32 %v12333_v59, %v8930_v61  ;;  %v8917_v27 = vor.u32 %v12329_v12, %v8914_v9  ;;  %v9058_v31 = vld [vmem:[%s18501_s1 + $0x6b0] sm:$0xf0]  ;;  %v12381_v32 = vld [vmem:[%s18501_s1 + $0x724] sm:$0xf]  ;;  %v12372_v12 = vld [vmem:[%s18501_s1 + $0x6d4] sm:$0xf0] }
  0xc4   : > { %2193 = vmatpush.bf16.msra.mxu3 %v8881_v16  ;;  %2226 = vmatpush.bf16.msra.mxu1 %v8981_v21  ;;  %v9074_v16 = vld [vmem:[%s18501_s1 + $0x6d0] sm:$0xf0]  ;;  %v12348_v21 = vld [vmem:[%s18501_s1 + $0x614] sm:$0xf0]  ;;  %v9061_v42 = vor.u32 %v12365_v29, %v9058_v31  ;;  %v9125_v44 = vor.u32 %v12381_v32, %v9122_v34  ;;  %v12357_v61 = vld [vmem:[%s18501_s1 + $0x664] sm:$0xf] }
  0xc5   : > { %v9077_v55 = vor.u32 %v12369_v13, %v9074_v16  ;;  %v8985_v33 = vor.u32 %v12348_v21, %v8984_v20  ;;  %v12353_v16 = vld [vmem:[%s18501_s1 + $0x644] sm:$0xf]  ;;  %v9010_v9 = vld [vmem:[%s18501_s1 + $0x650] sm:$0xf0]  ;;  %v12332_v21 = vld [vmem:[%s18501_s1 + $0x594] sm:$0xf0] }
  0xc6   : > { %2204 = vmatpush.bf16.msra.mxu0 %v9041_v36  ;;  %v12344_v36 = vld [vmem:[%s18501_s1 + $0x5f4] sm:$0xf0]  ;;  %v8921_v32 = vor.u32 %v12332_v21, %v8920_v19  ;;  %v8904_v34 = vld [vmem:[%s18501_s1 + $0x568] sm:$0xf]  ;;  %v12334_v21 = vld [vmem:[%s18501_s1 + $0x5ac] sm:$0xf] }
  0xc7   : > { %2219 = vmatpush.bf16.msra.mxu2 %v9137_v28  ;;  %v9141_v28 = vor.u32 %v12385_v17, %v9138_v18 }
  0xc8   : > { %2194 = vmatpush.bf16.msra.mxu3 %v8865_v35  ;;  %2227 = vmatpush.bf16.msra.mxu1 %v8965_v41  ;;  %v8968_v35 = vld [vmem:[%s18501_s1 + $0x5e8] sm:$0xf] }
  0xc9   : > { %v14390_v41 = vld [vmem:[%s18501_s1 + $0x7a8] sm:$0x33]  ;;  %v8969_v48 = vor.u32 %v12344_v36, %v8968_v35  ;;  %v971_v56 = vpop.f32.mrf.mxu2  ;;  %v8986_v36 = vld [vmem:[%s18501_s1 + $0x618] sm:$0xf0] }
  0xca   : > { %2205 = vmatpush.bf16.msra.mxu0 %v9025_v14  ;;  %v12340_v14 = vld [vmem:[%s18501_s1 + $0x5d4] sm:$0xf0]  ;;  %v12346_v35 = vld [vmem:[%s18501_s1 + $0x60c] sm:$0xf] }
  0xcb   : > { %2220 = vmatpush.bf16.msra.mxu2 %v9121_v51  ;;  %2195 = vmatmul.bf16.vlgmr.msra.gmra.mxu3 %v14290_v52  ;;  %v8882_v51 = vld [vmem:[%s18501_s1 + $0x550] sm:$0xf0]  ;;  %v8953_v49 = vor.u32 %v12340_v14, %v8952_v53  ;;  %v997_v8 = vpop.f32.mrf.mxu1  ;;  %v8888_v14 = vld [vmem:[%s18501_s1 + $0x548] sm:$0xf] }
  0xcc   : > { %2255 = vmatpush.bf16.msrb.mxu3 %v2179_v5  ;;  %2228 = vmatpush.bf16.msra.mxu1 %v8949_v58  ;;  %v984_v5 = vpop.f32.mrf.mxu0  ;;  %v972_v58 = vadd.f32 %v971_v56, %v14288_v0  ;;  %v8885_v60 = vor.u32 %v12321_v45, %v8882_v51  ;;  %v12317_v0 = vld [vmem:[%s18501_s1 + $0x524] sm:$0xf]  ;;  %v8905_v51 = vor.u32 %v12328_v39, %v8904_v34  ;;  %v8970_v56 = vld [vmem:[%s18501_s1 + $0x5f8] sm:$0xf0]  ;;  %v12330_v34 = vld [vmem:[%s18501_s1 + $0x58c] sm:$0xf] }
  0xcd   : > { %v8869_v13 = vor.u32 %v12317_v0, %v8866_v4 }
  0xce   : > { %9182 = vmatmul.msk.bf16.vlgmr.msra.gmra.mxu2 %vm893_vm1, %v14318_v2  ;;  %2206 = vmatpush.bf16.msra.mxu0 %v9009_v6  ;;  %v14431_v6 = vadd.f32 %v984_v5, %v972_v58  ;;  %v9064_v5 = vld [vmem:[%s18501_s1 + $0x6a8] sm:$0xf] }
  0xcf   : > { %2239 = vmatpush.bf16.msrb.mxu2 %v9109_v54  ;;  %v2006_v54 = vunpack.c.l.b16 %v14390_v41  ;;  %v9065_v38 = vor.u32 %v12368_v25, %v9064_v5  ;;  %v9144_v58 = vld [vmem:[%s18501_s1 + $0x748] sm:$0xf]  ;;  %v12352_v25 = vld [vmem:[%s18501_s1 + $0x634] sm:$0xf0] }
  0xd0   : > { %2256 = vmatpush.bf16.msrb.mxu3 %v9173_v15  ;;  %2229 = vmatpush.bf16.msra.mxu1 %v8933_v10  ;;  %v9045_v15 = vor.u32 %v12361_v46, %v9042_v47  ;;  %v9029_v10 = vor.u32 %v12357_v61, %v9026_v62  ;;  %v9048_v47 = vld [vmem:[%s18501_s1 + $0x688] sm:$0xf] }
  0xd1   : > { %v2090_v30 = vpack.c.b16 %v2006_v54, %v2006_v54  ;;  %v12342_v54 = vld [vmem:[%s18501_s1 + $0x5ec] sm:$0xf]  ;;  %v9000_v5 = vld [vmem:[%s18501_s1 + $0x628] sm:$0xf] }
  0xd2   : > { %2207 = vmatpush.bf16.msra.mxu0 %v8993_v24  ;;  %v973_v24 = vpop.f32.mrf.mxu2  ;;  %v8973_v62 = vor.u32 %v12342_v54, %v8970_v56  ;;  %v12326_v54 = vld [vmem:[%s18501_s1 + $0x56c] sm:$0xf]  ;;  %v8906_v56 = vld [vmem:[%s18501_s1 + $0x578] sm:$0xf0] }
  0xd3   : > { %2240 = vmatpush.bf16.msrb.mxu2 %v9093_v7  ;;  %v8936_v7 = vld [vmem:[%s18501_s1 + $0x5a8] sm:$0xf]  ;;  %v2182_v18 = vsel %vm897_vm0, %v2090_v30, 0  ;;  %v12320_v30 = vld [vmem:[%s18501_s1 + $0x534] sm:$0xf0] }
  0xd4   : > { %2257 = vmatpush.bf16.msrb.mxu3 %v9157_v11  ;;  %2230 = vmatpush.bf16.msra.mxu1 %v8917_v27  ;;  %v986_v59 = vpop.f32.mrf.mxu0  ;;  %v9080_v11 = vld [vmem:[%s18501_s1 + $0x6c8] sm:$0xf]  ;;  %v8937_v17 = vor.u32 %v12336_v3, %v8936_v7  ;;  %v1010_v26 = vpop.f32.mrf.mxu3  ;;  %v12349_v27 = vld [vmem:[%s18501_s1 + $0x624] sm:$0xf]  ;;  %v12338_v7 = vld [vmem:[%s18501_s1 + $0x5cc] sm:$0xf] }
  0xd5   : > { %2208 = vmatmul.bf16.vlgmr.msra.gmra.mxu0 %v14379_v37  ;;  %v9081_v20 = vor.u32 %v12372_v12, %v9080_v11  ;;  %v1011_v31 = vadd.f32 %v1010_v26, %v997_v8  ;;  %v2007_v59 = vunpack.c.h.b16 %v14390_v41  ;;  %v8889_v41 = vor.u32 %v12324_v63, %v8888_v14  ;;  %v8954_v3 = vld [vmem:[%s18501_s1 + $0x5d8] sm:$0xf0]  ;;  %v12384_v11 = vld [vmem:[%s18501_s1 + $0x734] sm:$0xf0]  ;;  %v9016_v12 = vld [vmem:[%s18501_s1 + $0x648] sm:$0xf] }
  0xd6   : > { %2265 = vmatpush.bf16.msrb.mxu0 %v8985_v33  ;;  %v9177_v33 = vor.u32 %v12396_v23, %v9176_v22  ;;  %v8938_v22 = vld [vmem:[%s18501_s1 + $0x5b8] sm:$0xf0]  ;;  %v12374_v26 = vld [vmem:[%s18501_s1 + $0x6ec] sm:$0xf] }
  0xd7   : > { %2241 = vmatpush.bf16.msrb.mxu2 %v9077_v55  ;;  %v9013_v55 = vor.u32 %v12353_v16, %v9010_v9  ;;  %v12356_v16 = vld [vmem:[%s18501_s1 + $0x654] sm:$0xf0]  ;;  %v12378_v9 = vld [vmem:[%s18501_s1 + $0x70c] sm:$0xf] }
  0xd8   : > { %2258 = vmatpush.bf16.msrb.mxu3 %v9141_v28  ;;  %2231 = vmatpush.bf16.msra.mxu1 %v8901_v43  ;;  %v8994_v28 = vld [vmem:[%s18501_s1 + $0x630] sm:$0xf0]  ;;  %v12392_v43 = vld [vmem:[%s18501_s1 + $0x774] sm:$0xf0]  ;;  %v9017_v23 = vor.u32 %v12356_v16, %v9016_v12 }
  0xd9   : > { %v8997_v46 = vor.u32 %v12349_v27, %v8994_v28  ;;  %v9098_v27 = vld [vmem:[%s18501_s1 + $0x6f8] sm:$0xf0]  ;;  %v12394_v28 = vld [vmem:[%s18501_s1 + $0x78c] sm:$0xf] }
  0xda   : > { %2266 = vmatpush.bf16.msrb.mxu0 %v8969_v48  ;;  %v12364_v48 = vld [vmem:[%s18501_s1 + $0x694] sm:$0xf0] }
  0xdb   : > { %2242 = vmatpush.bf16.msrb.mxu2 %v9061_v42  ;;  %v9160_v42 = vld [vmem:[%s18501_s1 + $0x768] sm:$0xf]  ;;  %v9049_v57 = vor.u32 %v12364_v48, %v9048_v47  ;;  %v12390_v47 = vld [vmem:[%s18501_s1 + $0x76c] sm:$0xf] }
  0xdc   : > { %2259 = vmatpush.bf16.msrb.mxu3 %v9125_v44  ;;  %2232 = vmatpush.bf16.msra.mxu1 %v8885_v60  ;;  %v1023_v29 = vpop.f32.mrf.mxu0  ;;  %v999_v44 = vpop.f32.mrf.mxu1  ;;  %v9161_v53 = vor.u32 %v12392_v43, %v9160_v42  ;;  %v9032_v60 = vld [vmem:[%s18501_s1 + $0x668] sm:$0xf] }
  0xdd   : > { %v14496_v45 = vadd.f32 %v1023_v29, %v1011_v31  ;;  %v1012_v61 = vpop.f32.mrf.mxu3  ;;  %v8941_v29 = vor.u32 %v12334_v21, %v8938_v22  ;;  %v9178_v31 = vld [vmem:[%s18501_s1 + $0x798] sm:$0xf0]  ;;  %v12370_v44 = vld [vmem:[%s18501_s1 + $0x6cc] sm:$0xf]  ;;  %v9340_v21 = vld [vmem:[%s18501_s1 + $0x830] sm:$0xf] }
  0xde   : > { %2267 = vmatpush.bf16.msrb.mxu0 %v8953_v49  ;;  %v12360_v49 = vld [vmem:[%s18501_s1 + $0x674] sm:$0xf0]  ;;  %v9181_v42 = vor.u32 %v12394_v28, %v9178_v31  ;;  %v12386_v61 = vld [vmem:[%s18501_s1 + $0x74c] sm:$0xf]  ;;  %v12415_v22 = vld [vmem:[%s18501_s1 + $0x83c] sm:$0xf0] }
  0xdf   : > { %2243 = vmatpush.bf16.msrb.mxu2 %v9045_v15  ;;  %9183 = vmatmul.msk.bf16.vlgmr.msrb.gmra.mxu3 %vm893_vm1, %v14318_v2  ;;  %v12388_v15 = vld [vmem:[%s18501_s1 + $0x754] sm:$0xf0]  ;;  %v9033_v8 = vor.u32 %v12360_v49, %v9032_v60  ;;  %v12366_v60 = vld [vmem:[%s18501_s1 + $0x6ac] sm:$0xf]  ;;  %v9066_v49 = vld [vmem:[%s18501_s1 + $0x6b8] sm:$0xf0]  ;;  %v9341_v31 = vor.u32 %v12415_v22, %v9340_v21 }
  0xe0   : > { %2278 = vmatpush.bf16.msra.mxu3 %v9113_v50  ;;  %2233 = vmatpush.bf16.msra.mxu1 %v8869_v13  ;;  %v8989_v50 = vor.u32 %v12346_v35, %v8986_v36  ;;  %v9145_v4 = vor.u32 %v12388_v15, %v9144_v58  ;;  %v2091_v13 = vpack.c.b16 %v2007_v59, %v2007_v59  ;;  %v8922_v35 = vld [vmem:[%s18501_s1 + $0x598] sm:$0xf0]  ;;  %v14628_v58 = vld [vmem:[%s18501_s1 + $0xa30] sm:$0x33]  ;;  %v12467_v21 = vld [vmem:[%s18501_s1 + $0x9dc] sm:$0xf0] }
  0xe1   : > { %v9001_v36 = vor.u32 %v12352_v25, %v9000_v5  ;;  %v8925_v48 = vor.u32 %v12330_v34, %v8922_v35  ;;  %v9069_v12 = vor.u32 %v12366_v60, %v9066_v49  ;;  %v12318_v5 = vld [vmem:[%s18501_s1 + $0x52c] sm:$0xf]  ;;  %v8874_v25 = vld [vmem:[%s18501_s1 + $0x538] sm:$0xf0]  ;;  %v9484_v60 = vld [vmem:[%s18501_s1 + $0x950] sm:$0xf] }
  0xe2   : > { %2268 = vmatpush.bf16.msrb.mxu0 %v8937_v17  ;;  %v9114_v17 = vld [vmem:[%s18501_s1 + $0x718] sm:$0xf0]  ;;  %v8877_v35 = vor.u32 %v12318_v5, %v8874_v25  ;;  %v12451_v49 = vld [vmem:[%s18501_s1 + $0x95c] sm:$0xf0]  ;;  %v9452_v25 = vld [vmem:[%s18501_s1 + $0x910] sm:$0xf] }
  0xe3   : > { %2244 = vmatpush.bf16.msrb.mxu2 %v9029_v10  ;;  %2234 = vmatmul.bf16.vlgmr.msra.gmra.mxu1 %v14290_v52  ;;  %v9128_v10 = vld [vmem:[%s18501_s1 + $0x728] sm:$0xf]  ;;  %v9117_v24 = vor.u32 %v12378_v9, %v9114_v17  ;;  %v12399_v5 = vld [vmem:[%s18501_s1 + $0x7bc] sm:$0xf0] }
  0xe4   : > { %2279 = vmatpush.bf16.msra.mxu3 %v9097_v1  ;;  %2294 = vmatpush.bf16.msrb.mxu1 %v2182_v18  ;;  %v8872_v1 = vld [vmem:[%s18501_s1 + $0x528] sm:$0xf]  ;;  %v1025_v0 = vpop.f32.mrf.mxu0  ;;  %v8957_v18 = vor.u32 %v12338_v7, %v8954_v3  ;;  %v12322_v7 = vld [vmem:[%s18501_s1 + $0x54c] sm:$0xf]  ;;  %v8890_v3 = vld [vmem:[%s18501_s1 + $0x558] sm:$0xf0] }
  0xe5   : > { %v8873_v19 = vor.u32 %v12320_v30, %v8872_v1  ;;  %v8909_v1 = vor.u32 %v12326_v54, %v8906_v56  ;;  %v9146_v0 = vld [vmem:[%s18501_s1 + $0x758] sm:$0xf0]  ;;  %v9186_v54 = vld [vmem:[%s13317_s30 + $0x30] sm:$0xfe]  ;;  %v9189_v56 = vld [vmem:[%s13317_s30 + $0x48] sm:$0x1] }
  0xe6   : > { %2269 = vmatpush.bf16.msrb.mxu0 %v8921_v32  ;;  %v9388_v32 = vld [vmem:[%s18501_s1 + $0x890] sm:$0xf]  ;;  %v9149_v9 = vor.u32 %v12386_v61, %v9146_v0  ;;  %v12471_v0 = vld [vmem:[%s18501_s1 + $0x9fc] sm:$0xf0] }
  0xe7   : > { %2245 = vmatpush.bf16.msrb.mxu2 %v9013_v55  ;;  %v2185_v55 = vsel %vm897_vm0, %v2091_v13, 0  ;;  %v12362_v13 = vld [vmem:[%s18501_s1 + $0x68c] sm:$0xf]  ;;  %v9564_v61 = vld [vmem:[%s18501_s1 + $0x9f0] sm:$0xf] }
  0xe8   : > { %2280 = vmatpush.bf16.msra.mxu3 %v9081_v20  ;;  %2295 = vmatpush.bf16.msrb.mxu1 %v9177_v33  ;;  %v9129_v20 = vor.u32 %v12384_v11, %v9128_v10  ;;  %v12427_v33 = vld [vmem:[%s18501_s1 + $0x89c] sm:$0xf0]  ;;  %v1062_v39 = vpop.f32.mrf.mxu3 }
  0xe9   : > { %v9389_v43 = vor.u32 %v12427_v33, %v9388_v32  ;;  %v1036_v14 = vpop.f32.mrf.mxu2  ;;  %v12358_v32 = vld [vmem:[%s18501_s1 + $0x66c] sm:$0xf]  ;;  %v9034_v33 = vld [vmem:[%s18501_s1 + $0x678] sm:$0xf0] }
  0xea   : > { %2270 = vmatpush.bf16.msrb.mxu0 %v8905_v51  ;;  %v9372_v51 = vld [vmem:[%s18501_s1 + $0x870] sm:$0xf] }
  0xeb   : > { %2246 = vmatpush.bf16.msrb.mxu2 %v8997_v46  ;;  %v9082_v46 = vld [vmem:[%s18501_s1 + $0x6d8] sm:$0xf0]  ;;  %v1049_v63 = vpop.f32.mrf.mxu1 }
  0xec   : > { %2281 = vmatpush.bf16.msra.mxu3 %v9065_v38  ;;  %2296 = vmatpush.bf16.msrb.mxu1 %v9161_v53  ;;  %v9101_v38 = vor.u32 %v12374_v26, %v9098_v27  ;;  %v12423_v53 = vld [vmem:[%s18501_s1 + $0x87c] sm:$0xf0] }
  0xed   : > { %v9373_v59 = vor.u32 %v12423_v53, %v9372_v51  ;;  %v9018_v53 = vld [vmem:[%s18501_s1 + $0x658] sm:$0xf0] }
  0xee   : > { %2247 = vmatmul.bf16.vlgmr.msrb.gmra.mxu2 %v14379_v37  ;;  %2271 = vmatpush.bf16.msrb.mxu0 %v8889_v41  ;;  %v9356_v41 = vld [vmem:[%s18501_s1 + $0x850] sm:$0xf] }
  0xef   : > { %2304 = vmatpush.bf16.msra.mxu2 %v8989_v50  ;;  %v9162_v50 = vld [vmem:[%s18501_s1 + $0x778] sm:$0xf0] }
  0xf0   : > { %2282 = vmatpush.bf16.msra.mxu3 %v9049_v57  ;;  %2297 = vmatpush.bf16.msrb.mxu1 %v9145_v4  ;;  %v9085_v57 = vor.u32 %v12370_v44, %v9082_v46  ;;  %v9165_v15 = vor.u32 %v12390_v47, %v9162_v50  ;;  %v12419_v4 = vld [vmem:[%s18501_s1 + $0x85c] sm:$0xf0]  ;;  %v1064_v16 = vpop.f32.mrf.mxu3  ;;  %v9037_v46 = vor.u32 %v12358_v32, %v9034_v33  ;;  %v12354_v47 = vld [vmem:[%s18501_s1 + $0x64c] sm:$0xf] }
  0xf1   : > { %v9357_v17 = vor.u32 %v12419_v4, %v9356_v41  ;;  %v12475_v50 = vld [vmem:[%s18501_s1 + $0xa1c] sm:$0xf0]  ;;  %v14747_v41 = vpack.c.bf16 %v9189_v56, %v9186_v54  ;;  %v9565_v16 = vor.u32 %v12471_v0, %v9564_v61  ;;  %v9187_v54 = vld [vmem:[%s13317_s30 + $0x38] sm:$0xfe]  ;;  %v9190_v56 = vld [vmem:[%s13317_s30 + $0x50] sm:$0x1] }
  0xf2   : > { %2272 = vmatpush.bf16.msrb.mxu0 %v8873_v19  ;;  %v1500_v30 = vpop.f32.mrf.mxu0  ;;  %v12382_v19 = vld [vmem:[%s18501_s1 + $0x72c] sm:$0xf]  ;;  %v9188_v4 = vld [vmem:[%s13317_s30 + $0x40] sm:$0xfe] }
  0xf3   : > { %2305 = vmatpush.bf16.msra.mxu2 %v8973_v62  ;;  %v1050_v62 = vadd.f32 %v1049_v63, %v1036_v14  ;;  %v14659_v11 = vadd.f32 %v1500_v30, %v14269_v40  ;;  %v9130_v40 = vld [vmem:[%s18501_s1 + $0x738] sm:$0xf0]  ;;  %v1051_v28 = vpop.f32.mrf.mxu1  ;;  %v9308_v63 = vld [vmem:[%s18501_s1 + $0x7f0] sm:$0xf]  ;;  %v9191_v30 = vld [vmem:[%s13317_s30 + $0x58] sm:$0x1] }
  0xf4   : > { %2283 = vmatpush.bf16.msra.mxu3 %v9033_v8  ;;  %2298 = vmatpush.bf16.msrb.mxu1 %v9129_v20  ;;  %v2704_v8 = vunpack.c.l.b16 %v14628_v58  ;;  %v8893_v20 = vor.u32 %v12322_v7, %v8890_v3  ;;  %v9002_v3 = vld [vmem:[%s18501_s1 + $0x638] sm:$0xf0]  ;;  %v2442_v22 = vshll.u32 %v14747_v41, 16  ;;  %v12443_v28 = vld [vmem:[%s18501_s1 + $0x91c] sm:$0xf0]  ;;  %s8046_s30 = sshll.u32 %s18517_s28, 3 }
  0xf5   : > { %2273 = vmatmul.bf16.vlgmr.msrb.gmra.mxu0 %v14290_v52  ;;  %v14656_v10 = vadd.f32 %v1062_v39, %v1050_v62  ;;  %v2705_v62 = vunpack.c.h.b16 %v14628_v58  ;;  %v12350_v58 = vld [vmem:[%s18501_s1 + $0x62c] sm:$0xf]  ;;  %s18492_s9 = scalar_lea.vmem %s18508_s8, %s8046_s30 }
  0xf6   : > { %2317 = vmatpush.bf16.msra.mxu0 %v9117_v24  ;;  %v1038_v24 = vpop.f32.mrf.mxu2  ;;  %v2788_v26 = vpack.c.b16 %v2704_v8, %v2704_v8  ;;  %v9485_v8 = vor.u32 %v12451_v49, %v9484_v60 }
  0xf7   : > { %2306 = vmatpush.bf16.msra.mxu2 %v8957_v18  ;;  %9184 = vmatmul.msk.bf16.vlgmr.msrb.gmra.mxu1 %vm893_vm1, %v14318_v2  ;;  %v9050_v18 = vld [vmem:[%s18501_s1 + $0x698] sm:$0xf0] }
  0xf8   : > { %2284 = vmatpush.bf16.msra.mxu3 %v9017_v23  ;;  %2333 = vmatpush.bf16.msra.mxu1 %v2185_v55  ;;  %v9516_v23 = vld [vmem:[%s18501_s1 + $0x990] sm:$0xf]  ;;  %v12459_v55 = vld [vmem:[%s18501_s1 + $0x99c] sm:$0xf0]  ;;  %v9053_v27 = vor.u32 %v12362_v13, %v9050_v18  ;;  %v2876_v39 = vsel %vm897_vm0, %v2788_v26, 0  ;;  %v2789_v18 = vpack.c.b16 %v2705_v62, %v2705_v62 }
  0xf9   : > { %v9517_v34 = vor.u32 %v12459_v55, %v9516_v23  ;;  %v9390_v13 = vld [vmem:[%s18501_s1 + $0x8a0] sm:$0xf0]  ;;  %v9276_v55 = vld [vmem:[%s18501_s1 + $0x7b0] sm:$0xf] }
  0xfa   : > { %2318 = vmatpush.bf16.msra.mxu0 %v9101_v38  ;;  %v12411_v38 = vld [vmem:[%s18501_s1 + $0x81c] sm:$0xf0]  ;;  %v1502_v44 = vpop.f32.mrf.mxu0  ;;  %v2879_v33 = vsel %vm897_vm0, %v2789_v18, 0 }
  0xfb   : > { %2307 = vmatpush.bf16.msra.mxu2 %v8941_v29  ;;  %v9133_v29 = vor.u32 %v12382_v19, %v9130_v40  ;;  %v14776_v19 = vpack.c.bf16 %v9191_v30, %v9188_v4  ;;  %v9005_v40 = vor.u32 %v12350_v58, %v9002_v3  ;;  %v9277_v44 = vor.u32 %v12399_v5, %v9276_v55  ;;  %v12453_v4 = vld [vmem:[%s18501_s1 + $0x974] sm:$0xf]  ;;  %v9502_v30 = vld [vmem:[%s18501_s1 + $0x980] sm:$0xf0] }
  0xfc   : > { %2285 = vmatpush.bf16.msra.mxu3 %v9001_v36  ;;  %2334 = vmatpush.bf16.msra.mxu1 %v9181_v42  ;;  %v9324_v36 = vld [vmem:[%s18501_s1 + $0x810] sm:$0xf]  ;;  %v14722_v14 = vpop.f32.mrf.mxu3  ;;  %v14849_v58 = vpack.c.bf16 %v9190_v56, %v9187_v54  ;;  %v12409_v55 = vld [vmem:[%s18501_s1 + $0x814] sm:$0xf]  ;;  %v9326_v5 = vld [vmem:[%s18501_s1 + $0x820] sm:$0xf0] }
  0xfd   : > { %v9500_v42 = vld [vmem:[%s18501_s1 + $0x970] sm:$0xf]  ;;  %v9325_v51 = vor.u32 %v12411_v38, %v9324_v36  ;;  %v2456_v36 = vshll.u32 %v14776_v19, 16  ;;  %v2454_v60 = vshrl.u32 %v14776_v19, 16  ;;  %v12449_v19 = vld [vmem:[%s18501_s1 + $0x954] sm:$0xf] }
  0xfe   : > { %2319 = vmatpush.bf16.msra.mxu0 %v9085_v57  ;;  %v9436_v38 = vld [vmem:[%s18501_s1 + $0x8f0] sm:$0xf]  ;;  %v14936_v56 = vld [vmem:[%s18501_s1 + $0xa38] sm:$0x33] }
  0xff   : > { %2308 = vmatpush.bf16.msra.mxu2 %v8925_v48  ;;  %2286 = vmatmul.bf16.vlgmr.msra.gmra.mxu3 %v14379_v37  ;;  %v9580_v48 = vld [vmem:[%s18501_s1 + $0xa10] sm:$0xf]  ;;  %v2458_v49 = vrot.slane %v2456_v36, 1 }
 0x100   : > { %2887 = vmatpush.bf16.msrb.mxu3 %v9389_v43  ;;  %2335 = vmatpush.bf16.msra.mxu1 %v9165_v15  ;;  %v12455_v43 = vld [vmem:[%s18501_s1 + $0x97c] sm:$0xf0] }
 0x101   : > { %v9501_v57 = vor.u32 %v12455_v43, %v9500_v42  ;;  %v12407_v15 = vld [vmem:[%s18501_s1 + $0x7fc] sm:$0xf0]  ;;  %v2440_v42 = vshrl.u32 %v14747_v41, 16  ;;  %v2444_v43 = vrot.slane %v2442_v22, 1 }
 0x102   : > { %2320 = vmatpush.bf16.msra.mxu0 %v9069_v12  ;;  %v9309_v7 = vor.u32 %v12407_v15, %v9308_v63  ;;  %v12403_v12 = vld [vmem:[%s18501_s1 + $0x7dc] sm:$0xf0]  ;;  %v12473_v15 = vld [vmem:[%s18501_s1 + $0xa14] sm:$0xf] }
 0x103   : > { %2309 = vmatpush.bf16.msra.mxu2 %v8909_v1  ;;  %v9021_v1 = vor.u32 %v12354_v47, %v9018_v53  ;;  %v12417_v47 = vld [vmem:[%s18501_s1 + $0x854] sm:$0xf]  ;;  %v9358_v53 = vld [vmem:[%s18501_s1 + $0x860] sm:$0xf0] }
 0x104   : > { %2888 = vmatpush.bf16.msrb.mxu3 %v9373_v59  ;;  %2336 = vmatpush.bf16.msra.mxu1 %v9149_v9  ;;  %v9581_v59 = vor.u32 %v12475_v50, %v9580_v48  ;;  %v9468_v9 = vld [vmem:[%s18501_s1 + $0x930] sm:$0xf]  ;;  %v1528_v26 = vpop.f32.mrf.mxu3  ;;  %v12457_v48 = vld [vmem:[%s18501_s1 + $0x994] sm:$0xf]  ;;  %v9518_v50 = vld [vmem:[%s18501_s1 + $0x9a0] sm:$0xf0]  ;;  %v9361_v41 = vor.u32 %v12417_v47, %v9358_v53 }
 0x105   : > { %v9521_v62 = vor.u32 %v12457_v48, %v9518_v50  ;;  %v12465_v26 = vld [vmem:[%s18501_s1 + $0x9d4] sm:$0xf]  ;;  %v9310_v48 = vld [vmem:[%s18501_s1 + $0x800] sm:$0xf0]  ;;  %v9524_v53 = vld [vmem:[%s18501_s1 + $0x998] sm:$0xf] }
 0x106   : > { %2321 = vmatpush.bf16.msra.mxu0 %v9053_v27  ;;  %v12405_v47 = vld [vmem:[%s18501_s1 + $0x7f4] sm:$0xf] }
 0x107   : > { %2310 = vmatpush.bf16.msra.mxu2 %v8893_v20  ;;  %v9548_v20 = vld [vmem:[%s18501_s1 + $0x9d0] sm:$0xf]  ;;  %v12461_v50 = vld [vmem:[%s18501_s1 + $0x9b4] sm:$0xf] }
 0x108   : > { %2889 = vmatpush.bf16.msrb.mxu3 %v9357_v17  ;;  %2337 = vmatpush.bf16.msra.mxu1 %v9133_v29  ;;  %v12447_v17 = vld [vmem:[%s18501_s1 + $0x93c] sm:$0xf0]  ;;  %v12421_v29 = vld [vmem:[%s18501_s1 + $0x874] sm:$0xf]  ;;  %v9549_v32 = vor.u32 %v12467_v21, %v9548_v20  ;;  %v2449_v20 = vshll.u32 %v14849_v58, 16 }
 0x109   : > { %v9469_v27 = vor.u32 %v12447_v17, %v9468_v9  ;;  %v9505_v9 = vor.u32 %v12453_v4, %v9502_v30  ;;  %v9294_v4 = vld [vmem:[%s18501_s1 + $0x7e0] sm:$0xf0]  ;;  %v2706_v30 = vunpack.c.l.b16 %v14936_v56 }
 0x10a   : > { %2322 = vmatpush.bf16.msra.mxu0 %v9037_v46  ;;  %v2451_v36 = vrot.slane %v2449_v20, 1  ;;  %v9492_v20 = vld [vmem:[%s18501_s1 + $0x958] sm:$0xf] }
 0x10b   : > { %2311 = vmatpush.bf16.msra.mxu2 %v8877_v35  ;;  %9185 = vmatmul.msk.bf16.vlgmr.msra.gmra.mxu1 %vm893_vm1, %v14318_v2  ;;  %v9292_v2 = vld [vmem:[%s18501_s1 + $0x7d0] sm:$0xf]  ;;  %v12463_v35 = vld [vmem:[%s18501_s1 + $0x9bc] sm:$0xf0] }
 0x10c   : > { %2890 = vmatpush.bf16.msrb.mxu3 %v9341_v31  ;;  %2900 = vmatpush.bf16.msrb.mxu1 %v9517_v34  ;;  %v9293_v23 = vor.u32 %v12403_v12, %v9292_v2  ;;  %v9374_v31 = vld [vmem:[%s18501_s1 + $0x880] sm:$0xf0]  ;;  %v9532_v34 = vld [vmem:[%s18501_s1 + $0x9b0] sm:$0xf]  ;;  %v12413_v12 = vld [vmem:[%s18501_s1 + $0x834] sm:$0xf] }
 0x10d   : > { %v9377_v46 = vor.u32 %v12421_v29, %v9374_v31  ;;  %v9533_v63 = vor.u32 %v12463_v35, %v9532_v34  ;;  %v9329_v34 = vor.u32 %v12409_v55, %v9326_v5  ;;  %v2447_v35 = vshrl.u32 %v14849_v58, 16  ;;  %v9508_v58 = vld [vmem:[%s18501_s1 + $0x978] sm:$0xf]  ;;  %v12416_v55 = vld [vmem:[%s18501_s1 + $0x844] sm:$0xf0] }
 0x10e   : > { %2312 = vmatmul.bf16.vlgmr.msra.gmra.mxu2 %v14290_v52  ;;  %v12425_v52 = vld [vmem:[%s18501_s1 + $0x894] sm:$0xf]  ;;  %2323 = vmatpush.bf16.msra.mxu0 %v9021_v1  ;;  %v14841_v1 = vor.u32 %v2444_v43, %v2440_v42 }
 0x10f   : > { %2916 = vmatpush.bf16.msrb.mxu2 %v2876_v39  ;;  %v9393_v24 = vor.u32 %v12425_v52, %v9390_v13  ;;  %v12439_v39 = vld [vmem:[%s18501_s1 + $0x8fc] sm:$0xf0]  ;;  %v9342_v52 = vld [vmem:[%s18501_s1 + $0x840] sm:$0xf0] }
 0x110   : > { %2891 = vmatpush.bf16.msrb.mxu3 %v9325_v51  ;;  %2901 = vmatpush.bf16.msrb.mxu1 %v9501_v57  ;;  %v9453_v51 = vor.u32 %v12443_v28, %v9452_v25  ;;  %v1513_v57 = vpop.f32.mrf.mxu2  ;;  %v9437_v0 = vor.u32 %v12439_v39, %v9436_v38  ;;  %v9566_v13 = vld [vmem:[%s18501_s1 + $0xa00] sm:$0xf0]  ;;  %v9345_v18 = vor.u32 %v12413_v12, %v9342_v52  ;;  %v12431_v25 = vld [vmem:[%s18501_s1 + $0x8bc] sm:$0xf0]  ;;  %v12445_v38 = vld [vmem:[%s18501_s1 + $0x934] sm:$0xf] }
 0x111   : > { %v1514_v61 = vadd.f32 %v1513_v57, %v14659_v11  ;;  %v9470_v39 = vld [vmem:[%s18501_s1 + $0x940] sm:$0xf0]  ;;  %v9364_v12 = vld [vmem:[%s18501_s1 + $0x858] sm:$0xf]  ;;  %v12420_v52 = vld [vmem:[%s18501_s1 + $0x864] sm:$0xf0] }
 0x112   : > { %2324 = vmatpush.bf16.msra.mxu0 %v9005_v40  ;;  %v1552_v17 = vpop.f32.mrf.mxu0  ;;  %v9486_v40 = vld [vmem:[%s18501_s1 + $0x960] sm:$0xf0]  ;;  %v9473_v57 = vor.u32 %v12445_v38, %v9470_v39  ;;  %v9332_v38 = vld [vmem:[%s18501_s1 + $0x818] sm:$0xf]  ;;  %v12412_v39 = vld [vmem:[%s18501_s1 + $0x824] sm:$0xf0] }
 0x113   : > { %2917 = vmatpush.bf16.msrb.mxu2 %v9581_v59  ;;  %v9582_v59 = vld [vmem:[%s18501_s1 + $0xa20] sm:$0xf0]  ;;  %v14852_v11 = vadd.f32 %v14722_v14, %v1514_v61  ;;  %v12435_v14 = vld [vmem:[%s18501_s1 + $0x8dc] sm:$0xf0]  ;;  %v9489_v31 = vor.u32 %v12449_v19, %v9486_v40  ;;  %v12441_v61 = vld [vmem:[%s18501_s1 + $0x914] sm:$0xf] }
 0x114   : > { %2892 = vmatpush.bf16.msrb.mxu3 %v9309_v7  ;;  %2902 = vmatpush.bf16.msrb.mxu1 %v9485_v8  ;;  %v1565_v7 = vpop.f32.mrf.mxu3  ;;  %v9585_v2 = vor.u32 %v12473_v15, %v9582_v59  ;;  %v9420_v8 = vld [vmem:[%s18501_s1 + $0x8d0] sm:$0xf]  ;;  %v9380_v15 = vld [vmem:[%s18501_s1 + $0x878] sm:$0xf]  ;;  %v12424_v59 = vld [vmem:[%s18501_s1 + $0x884] sm:$0xf0] }
 0x115   : > { %2325 = vmatmul.bf16.vlgmr.msra.gmra.mxu0 %v14379_v37  ;;  %v1539_v37 = vpop.f32.mrf.mxu1  ;;  %v9421_v22 = vor.u32 %v12435_v14, %v9420_v8  ;;  %v12456_v8 = vld [vmem:[%s18501_s1 + $0x984] sm:$0xf0] }
 0x116   : > { %2926 = vmatpush.bf16.msrb.mxu0 %v9393_v24  ;;  %v1540_v3 = vadd.f32 %v1539_v37, %v14431_v6  ;;  %v12469_v6 = vld [vmem:[%s18501_s1 + $0x9f4] sm:$0xf]  ;;  %v9404_v24 = vld [vmem:[%s18501_s1 + $0x8b0] sm:$0xf]  ;;  %v9509_v40 = vor.u32 %v12456_v8, %v9508_v58  ;;  %v9556_v58 = vld [vmem:[%s18501_s1 + $0x9d8] sm:$0xf] }
 0x117   : > { %2918 = vmatpush.bf16.msrb.mxu2 %v9565_v16  ;;  %v14873_v16 = vor.u32 %v2458_v49, %v2454_v60  ;;  %v14947_v60 = vor.u32 %v2451_v36, %v2447_v35  ;;  %v9313_v49 = vor.u32 %v12405_v47, %v9310_v48  ;;  %v12448_v36 = vld [vmem:[%s18501_s1 + $0x944] sm:$0xf0]  ;;  %v9398_v47 = vld [vmem:[%s18501_s1 + $0x8a8] sm:$0xf0] }
 0x118   : > { %2893 = vmatpush.bf16.msrb.mxu3 %v9293_v23  ;;  %2903 = vmatpush.bf16.msrb.mxu1 %v9469_v27  ;;  %v1553_v21 = vadd.f32 %v1552_v17, %v1540_v3  ;;  %v9569_v23 = vor.u32 %v12469_v6, %v9566_v13  ;;  %v9550_v27 = vld [vmem:[%s18501_s1 + $0x9e0] sm:$0xf0]  ;;  %v1515_v28 = vpop.f32.mrf.mxu2  ;;  %v9381_v3 = vor.u32 %v12424_v59, %v9380_v15  ;;  %v12437_v6 = vld [vmem:[%s18501_s1 + $0x8f4] sm:$0xf]  ;;  %v9460_v15 = vld [vmem:[%s18501_s1 + $0x918] sm:$0xf] }
 0x119   : > { %v9438_v13 = vld [vmem:[%s18501_s1 + $0x900] sm:$0xf0]  ;;  %v12444_v59 = vld [vmem:[%s18501_s1 + $0x924] sm:$0xf0] }
 0x11a   : > { %2927 = vmatpush.bf16.msrb.mxu0 %v9377_v46  ;;  %v14903_v29 = vadd.f32 %v1565_v7, %v1553_v21  ;;  %v9553_v46 = vor.u32 %v12465_v26, %v9550_v27  ;;  %v1554_v37 = vpop.f32.mrf.mxu0  ;;  %v9278_v17 = vld [vmem:[%s18501_s1 + $0x7c0] sm:$0xf0]  ;;  %v9365_v21 = vor.u32 %v12420_v52, %v9364_v12  ;;  %v12440_v8 = vld [vmem:[%s18501_s1 + $0x904] sm:$0xf0] }
 0x11b   : > { %2919 = vmatpush.bf16.msrb.mxu2 %v9549_v32  ;;  %v9396_v32 = vld [vmem:[%s18501_s1 + $0x898] sm:$0xf]  ;;  %v9422_v26 = vld [vmem:[%s18501_s1 + $0x8e0] sm:$0xf0]  ;;  %v12408_v37 = vld [vmem:[%s18501_s1 + $0x804] sm:$0xf0] }
 0x11c   : > { %2894 = vmatpush.bf16.msrb.mxu3 %v9277_v44  ;;  %2904 = vmatpush.bf16.msrb.mxu1 %v9453_v51  ;;  %v1567_v42 = vpop.f32.mrf.mxu3  ;;  %v9405_v44 = vor.u32 %v12431_v25, %v9404_v24  ;;  %v9534_v51 = vld [vmem:[%s18501_s1 + $0x9c0] sm:$0xf0]  ;;  %v9348_v24 = vld [vmem:[%s18501_s1 + $0x838] sm:$0xf]  ;;  %v12433_v25 = vld [vmem:[%s18501_s1 + $0x8d4] sm:$0xf] }
 0x11d   : > { %v1541_v43 = vpop.f32.mrf.mxu1  ;;  %v9425_v35 = vor.u32 %v12433_v25, %v9422_v26  ;;  %v12429_v42 = vld [vmem:[%s18501_s1 + $0x8b4] sm:$0xf] }
 0x11e   : > { %2928 = vmatpush.bf16.msrb.mxu0 %v9361_v41  ;;  %v12401_v41 = vld [vmem:[%s18501_s1 + $0x7d4] sm:$0xf]  ;;  %v9406_v43 = vld [vmem:[%s18501_s1 + $0x8c0] sm:$0xf0] }
 0x11f   : > { %2920 = vmatpush.bf16.msrb.mxu2 %v9533_v63  ;;  %2895 = vmatmul.bf16.vlgmr.msrb.gmra.mxu3 %v14841_v1  ;;  %v12460_v63 = vld [vmem:[%s18501_s1 + $0x9a4] sm:$0xf0]  ;;  %v9297_v14 = vor.u32 %v12401_v41, %v9294_v4  ;;  %v12422_v4 = vld [vmem:[%s18501_s1 + $0x87c] sm:$0xf] }
 0x120   : > { %2955 = vmatpush.bf16.msra.mxu3 %v2879_v33  ;;  %2905 = vmatpush.bf16.msrb.mxu1 %v9437_v0  ;;  %v12428_v33 = vld [vmem:[%s18501_s1 + $0x8a4] sm:$0xf0]  ;;  %v9537_v0 = vor.u32 %v12461_v50, %v9534_v51  ;;  %v9525_v7 = vor.u32 %v12460_v63, %v9524_v53  ;;  %v9572_v51 = vld [vmem:[%s18501_s1 + $0x9f8] sm:$0xf]  ;;  %v9409_v63 = vor.u32 %v12429_v42, %v9406_v43  ;;  %v12454_v43 = vld [vmem:[%s18501_s1 + $0x97c] sm:$0xf] }
 0x121   : > { %v9397_v54 = vor.u32 %v12428_v33, %v9396_v32  ;;  %v12476_v32 = vld [vmem:[%s18501_s1 + $0xa24] sm:$0xf0]  ;;  %v9476_v33 = vld [vmem:[%s18501_s1 + $0x938] sm:$0xf] }
 0x122   : > { %9594 = vmatmul.msk.bf16.vlgmr.msrb.gmra.mxu2 %vm893_vm1, %v14873_v16  ;;  %2929 = vmatpush.bf16.msrb.mxu0 %v9345_v18  ;;  %v2790_v18 = vpack.c.b16 %v2706_v30, %v2706_v30  ;;  %v9477_v50 = vor.u32 %v12448_v36, %v9476_v33  ;;  %v12472_v53 = vld [vmem:[%s18501_s1 + $0xa04] sm:$0xf0]  ;;  %v12414_v33 = vld [vmem:[%s18501_s1 + $0x83c] sm:$0xf] }
 0x123   : > { %2939 = vmatpush.bf16.msra.mxu2 %v9521_v62  ;;  %v9454_v62 = vld [vmem:[%s18501_s1 + $0x920] sm:$0xf0]  ;;  %v9573_v41 = vor.u32 %v12472_v53, %v9572_v51  ;;  %v12432_v42 = vld [vmem:[%s18501_s1 + $0x8c4] sm:$0xf0]  ;;  %v12474_v53 = vld [vmem:[%s18501_s1 + $0xa1c] sm:$0xf] }
 0x124   : > { %2956 = vmatpush.bf16.msra.mxu3 %v9585_v2  ;;  %2906 = vmatpush.bf16.msrb.mxu1 %v9421_v22  ;;  %v9457_v2 = vor.u32 %v12441_v61, %v9454_v62  ;;  %v9441_v22 = vor.u32 %v12437_v6, %v9438_v13  ;;  %v2882_v27 = vsel %vm897_vm0, %v2790_v18, 0  ;;  %v9316_v62 = vld [vmem:[%s18501_s1 + $0x7f8] sm:$0xf]  ;;  %v12404_v13 = vld [vmem:[%s18501_s1 + $0x7e4] sm:$0xf0] }
 0x125   : > { %v14987_v19 = vpop.f32.mrf.mxu1  ;;  %v9317_v12 = vor.u32 %v12408_v37, %v9316_v62  ;;  %v9300_v6 = vld [vmem:[%s18501_s1 + $0x7d8] sm:$0xf]  ;;  %v9366_v18 = vld [vmem:[%s18501_s1 + $0x868] sm:$0xf0] }
 0x126   : > { %2930 = vmatpush.bf16.msrb.mxu0 %v9329_v34  ;;  %v9349_v34 = vor.u32 %v12416_v55, %v9348_v24  ;;  %v12458_v55 = vld [vmem:[%s18501_s1 + $0x99c] sm:$0xf]  ;;  %v9301_v25 = vor.u32 %v12404_v13, %v9300_v6  ;;  %v9302_v6 = vld [vmem:[%s18501_s1 + $0x7e8] sm:$0xf0] }
 0x127   : > { %2940 = vmatpush.bf16.msra.mxu2 %v9505_v9  ;;  %v12397_v9 = vld [vmem:[%s18501_s1 + $0x7b4] sm:$0xf]  ;;  %v12466_v13 = vld [vmem:[%s18501_s1 + $0x9dc] sm:$0xf] }
 0x128   : > { %2957 = vmatpush.bf16.msra.mxu3 %v9569_v23  ;;  %2907 = vmatpush.bf16.msrb.mxu1 %v9405_v44  ;;  %v12452_v23 = vld [vmem:[%s18501_s1 + $0x964] sm:$0xf0]  ;;  %v9281_v5 = vor.u32 %v12397_v9, %v9278_v17  ;;  %v12418_v17 = vld [vmem:[%s18501_s1 + $0x85c] sm:$0xf] }
 0x129   : > { %v9493_v28 = vor.u32 %v12452_v23, %v9492_v20  ;;  %v9540_v20 = vld [vmem:[%s18501_s1 + $0x9b8] sm:$0xf] }
 0x12a   : > { %2931 = vmatpush.bf16.msrb.mxu0 %v9313_v49 }
 0x12b   : > { %2941 = vmatpush.bf16.msra.mxu2 %v9489_v31  ;;  %2908 = vmatmul.bf16.vlgmr.msrb.gmra.mxu1 %v14947_v60  ;;  %v9588_v31 = vld [vmem:[%s18501_s1 + $0xa18] sm:$0xf] }
 0x12c   : > { %2958 = vmatpush.bf16.msra.mxu3 %v9553_v46  ;;  %2965 = vmatpush.bf16.msra.mxu1 %v9397_v54  ;;  %v9589_v44 = vor.u32 %v12476_v32, %v9588_v31  ;;  %v12426_v46 = vld [vmem:[%s18501_s1 + $0x89c] sm:$0xf]  ;;  %v9333_v54 = vor.u32 %v12412_v39, %v9332_v38  ;;  %v12400_v31 = vld [vmem:[%s18501_s1 + $0x7c4] sm:$0xf0]  ;;  %v9412_v39 = vld [vmem:[%s18501_s1 + $0x8b8] sm:$0xf] }
 0x12d   : > { %v1606_v48 = vpop.f32.mrf.mxu1  ;;  %v9401_v61 = vor.u32 %v12426_v46, %v9398_v47 }
 0x12e   : > { %2932 = vmatpush.bf16.msrb.mxu0 %v9297_v14  ;;  %v12410_v48 = vld [vmem:[%s18501_s1 + $0x81c] sm:$0xf] }
 0x12f   : > { %2942 = vmatpush.bf16.msra.mxu2 %v9473_v57  ;;  %v1578_v57 = vpop.f32.mrf.mxu2 }
 0x130   : > { %2959 = vmatpush.bf16.msra.mxu3 %v9537_v0  ;;  %2966 = vmatpush.bf16.msra.mxu1 %v9381_v3  ;;  %v1579_v49 = vadd.f32 %v1578_v57, %v14496_v45  ;;  %v1591_v0 = vpop.f32.mrf.mxu3  ;;  %v9382_v45 = vld [vmem:[%s18501_s1 + $0x888] sm:$0xf0]  ;;  %v12468_v3 = vld [vmem:[%s18501_s1 + $0x9e4] sm:$0xf0]  ;;  %v9413_v57 = vor.u32 %v12432_v42, %v9412_v39 }
 0x131   : > { %v9385_v14 = vor.u32 %v12422_v4, %v9382_v45  ;;  %v9557_v9 = vor.u32 %v12468_v3, %v9556_v58  ;;  %v12470_v4 = vld [vmem:[%s18501_s1 + $0x9fc] sm:$0xf]  ;;  %v9574_v45 = vld [vmem:[%s18501_s1 + $0xa08] sm:$0xf0] }
 0x132   : > { %2933 = vmatpush.bf16.msrb.mxu0 %v9281_v5  ;;  %v1592_v30 = vadd.f32 %v1591_v0, %v1579_v49  ;;  %v1617_v23 = vpop.f32.mrf.mxu0  ;;  %v9526_v5 = vld [vmem:[%s18501_s1 + $0x9a8] sm:$0xf0]  ;;  %v12406_v0 = vld [vmem:[%s18501_s1 + $0x7fc] sm:$0xf] }
 0x133   : > { %2943 = vmatpush.bf16.msra.mxu2 %v9457_v2  ;;  %9595 = vmatmul.msk.bf16.vlgmr.msra.gmra.mxu3 %vm893_vm1, %v14873_v16  ;;  %v9444_v2 = vld [vmem:[%s18501_s1 + $0x8f8] sm:$0xf]  ;;  %v1618_v26 = vadd.f32 %v1617_v23, %v14656_v10  ;;  %v9350_v10 = vld [vmem:[%s18501_s1 + $0x848] sm:$0xf0]  ;;  %v9529_v38 = vor.u32 %v12458_v55, %v9526_v5  ;;  %v12446_v58 = vld [vmem:[%s18501_s1 + $0x93c] sm:$0xf] }
 0x134   : > { %2978 = vmatpush.bf16.msrb.mxu3 %v9525_v7  ;;  %2967 = vmatpush.bf16.msra.mxu1 %v9365_v21  ;;  %v9461_v7 = vor.u32 %v12444_v59, %v9460_v15  ;;  %v15079_v52 = vadd.f32 %v14987_v19, %v1592_v30  ;;  %v2707_v19 = vunpack.c.h.b16 %v14936_v56  ;;  %v12464_v21 = vld [vmem:[%s18501_s1 + $0x9c4] sm:$0xf0]  ;;  %v9353_v47 = vor.u32 %v12414_v33, %v9350_v10  ;;  %v12450_v15 = vld [vmem:[%s18501_s1 + $0x95c] sm:$0xf]  ;;  %v9494_v59 = vld [vmem:[%s18501_s1 + $0x968] sm:$0xf0] }
 0x135   : > { %2934 = vmatmul.bf16.vlgmr.msrb.gmra.mxu0 %v14841_v1  ;;  %v12436_v56 = vld [vmem:[%s18501_s1 + $0x8e4] sm:$0xf0]  ;;  %v9541_v32 = vor.u32 %v12464_v21, %v9540_v20  ;;  %v9497_v30 = vor.u32 %v12450_v15, %v9494_v59  ;;  %v9478_v3 = vld [vmem:[%s18501_s1 + $0x948] sm:$0xf0]  ;;  %v12398_v23 = vld [vmem:[%s18501_s1 + $0x7bc] sm:$0xf] }
 0x136   : > { %2994 = vmatpush.bf16.msra.mxu0 %v2882_v27  ;;  %v9369_v27 = vor.u32 %v12418_v17, %v9366_v18  ;;  %v9481_v18 = vor.u32 %v12446_v58, %v9478_v3  ;;  %v9542_v55 = vld [vmem:[%s18501_s1 + $0x9c8] sm:$0xf0]  ;;  %v12434_v10 = vld [vmem:[%s18501_s1 + $0x8dc] sm:$0xf] }
 0x137   : > { %2944 = vmatpush.bf16.msra.mxu2 %v9441_v22  ;;  %v9428_v22 = vld [vmem:[%s18501_s1 + $0x8d8] sm:$0xf]  ;;  %v1580_v24 = vpop.f32.mrf.mxu2  ;;  %v9414_v39 = vld [vmem:[%s18501_s1 + $0x8c8] sm:$0xf0] }
 0x138   : > { %2979 = vmatpush.bf16.msrb.mxu3 %v9509_v40  ;;  %2968 = vmatpush.bf16.msra.mxu1 %v9349_v34  ;;  %v9445_v40 = vor.u32 %v12440_v8, %v9444_v2  ;;  %v2791_v34 = vpack.c.b16 %v2707_v19, %v2707_v19  ;;  %v9429_v36 = vor.u32 %v12436_v56, %v9428_v22  ;;  %v12442_v19 = vld [vmem:[%s18501_s1 + $0x91c] sm:$0xf]  ;;  %v9286_v24 = vld [vmem:[%s18501_s1 + $0x7c8] sm:$0xf0] }
 0x139   : > { %v12462_v56 = vld [vmem:[%s18501_s1 + $0x9bc] sm:$0xf] }
 0x13a   : > { %2995 = vmatpush.bf16.msra.mxu0 %v9589_v44  ;;  %v9510_v44 = vld [vmem:[%s18501_s1 + $0x988] sm:$0xf0]  ;;  %v2885_v51 = vsel %vm897_vm0, %v2791_v34, 0  ;;  %v1619_v49 = vpop.f32.mrf.mxu0 }
 0x13b   : > { %2945 = vmatpush.bf16.msra.mxu2 %v9425_v35  ;;  %v1593_v35 = vpop.f32.mrf.mxu3  ;;  %v9430_v34 = vld [vmem:[%s18501_s1 + $0x8e8] sm:$0xf0] }
 0x13c   : > { %2980 = vmatpush.bf16.msrb.mxu3 %v9493_v28  ;;  %2969 = vmatpush.bf16.msra.mxu1 %v9333_v54  ;;  %v9284_v28 = vld [vmem:[%s18501_s1 + $0x7b8] sm:$0xf]  ;;  %v9590_v54 = vld [vmem:[%s18501_s1 + $0xa28] sm:$0xf0] }
 0x13d   : > { %v9285_v46 = vor.u32 %v12400_v31, %v9284_v28  ;;  %v9593_v37 = vor.u32 %v12474_v53, %v9590_v54  ;;  %v9289_v28 = vor.u32 %v12398_v23, %v9286_v24  ;;  %v9545_v31 = vor.u32 %v12462_v56, %v9542_v55 }
 0x13e   : > { %2996 = vmatpush.bf16.msra.mxu0 %v9573_v41  ;;  %v9318_v41 = vld [vmem:[%s18501_s1 + $0x808] sm:$0xf0] }
 0x13f   : > { %2946 = vmatpush.bf16.msra.mxu2 %v9409_v63  ;;  %v9513_v63 = vor.u32 %v12454_v43, %v9510_v44  ;;  %v1643_v62 = vpop.f32.mrf.mxu2  ;;  %v9321_v8 = vor.u32 %v12406_v0, %v9318_v41 }
 0x140   : > { %2981 = vmatpush.bf16.msrb.mxu3 %v9477_v50  ;;  %2970 = vmatpush.bf16.msra.mxu1 %v9317_v12  ;;  %v9334_v50 = vld [vmem:[%s18501_s1 + $0x828] sm:$0xf0]  ;;  %v9577_v12 = vor.u32 %v12470_v4, %v9574_v45 }
 0x142   : > { %2947 = vmatmul.bf16.vlgmr.msra.gmra.mxu2 %v14947_v60  ;;  %2997 = vmatpush.bf16.msra.mxu0 %v9557_v9  ;;  %v9558_v9 = vld [vmem:[%s18501_s1 + $0x9e8] sm:$0xf0] }
 0x143   : > { %3004 = vmatpush.bf16.msrb.mxu2 %v9401_v61  ;;  %v9337_v61 = vor.u32 %v12410_v48, %v9334_v50  ;;  %v9561_v22 = vor.u32 %v12466_v13, %v9558_v9 }
 0x144   : > { %2982 = vmatpush.bf16.msrb.mxu3 %v9461_v7  ;;  %2971 = vmatpush.bf16.msra.mxu1 %v9301_v25  ;;  %v1630_v7 = vpop.f32.mrf.mxu1  ;;  %v12438_v25 = vld [vmem:[%s18501_s1 + $0x8fc] sm:$0xf] }
 0x145   : > { %v1631_v2 = vadd.f32 %v1630_v7, %v1618_v26  ;;  %v9446_v26 = vld [vmem:[%s18501_s1 + $0x908] sm:$0xf0] }
 0x146   : > { %2998 = vmatpush.bf16.msra.mxu0 %v9541_v32  ;;  %v9449_v32 = vor.u32 %v12438_v25, %v9446_v26 }
 0x147   : > { %3005 = vmatpush.bf16.msrb.mxu2 %v9385_v14  ;;  %v12402_v14 = vld [vmem:[%s18501_s1 + $0x7dc] sm:$0xf]  ;;  %v15191_v17 = vadd.f32 %v1643_v62, %v1631_v2  ;;  %v1645_v21 = vpop.f32.mrf.mxu2 }
 0x148   : > { %2983 = vmatpush.bf16.msrb.mxu3 %v9445_v40  ;;  %2972 = vmatpush.bf16.msra.mxu1 %v9285_v46  ;;  %v9462_v40 = vld [vmem:[%s18501_s1 + $0x928] sm:$0xf0]  ;;  %v9305_v20 = vor.u32 %v12402_v14, %v9302_v6 }
 0x149   : > { %9596 = vmatmul.msk.bf16.vlgmr.msra.gmra.mxu0 %vm893_vm1, %v14873_v16  ;;  %v9465_v5 = vor.u32 %v12442_v19, %v9462_v40 }
 0x14a   : > { %3017 = vmatpush.bf16.msrb.mxu0 %v9529_v38  ;;  %v12430_v38 = vld [vmem:[%s18501_s1 + $0x8bc] sm:$0xf] }
 0x14b   : > { %3006 = vmatpush.bf16.msrb.mxu2 %v9369_v27  ;;  %2973 = vmatmul.bf16.vlgmr.msra.gmra.mxu1 %v14841_v1  ;;  %v9417_v44 = vor.u32 %v12430_v38, %v9414_v39 }
 0x14c   : > { %2984 = vmatpush.bf16.msrb.mxu3 %v9429_v36  ;;  %3033 = vmatpush.bf16.msrb.mxu1 %v2885_v51  ;;  %v1632_v27 = vpop.f32.mrf.mxu1  ;;  %v9433_v36 = vor.u32 %v12434_v10, %v9430_v34 }
 0x14e   : > { %3018 = vmatpush.bf16.msrb.mxu0 %v9513_v63  ;;  %v2196_v33 = vpop.f32.mrf.mxu3 }
 0x14f   : > { %3007 = vmatpush.bf16.msrb.mxu2 %v9353_v47 }
 0x150   : > { %2985 = vmatpush.bf16.msrb.mxu3 %v9413_v57  ;;  %3034 = vmatpush.bf16.msrb.mxu1 %v9593_v37 }
 0x151   : > { %v2222_v35 = vpop.f32.mrf.mxu2 }
 0x152   : > { %3019 = vmatpush.bf16.msrb.mxu0 %v9497_v30  ;;  %v2209_v42 = vpop.f32.mrf.mxu0 }
 0x153   : > { %3008 = vmatpush.bf16.msrb.mxu2 %v9337_v61  ;;  %2986 = vmatmul.bf16.vlgmr.msrb.gmra.mxu3 %v14947_v60  ;;  %v2210_v43 = vadd.f32 %v2209_v42, %v2196_v33 }
 0x154   : > { %3035 = vmatpush.bf16.msrb.mxu1 %v9577_v12 }
 0x155   : > { %v2223_v47 = vadd.f32 %v2222_v35, %v2210_v43 }
 0x156   : > { %3020 = vmatpush.bf16.msrb.mxu0 %v9481_v18  ;;  %v2198_v46 = vpop.f32.mrf.mxu3  ;;  %v3047_v18 = vld [vmem:[%s18502_s2] sm:$0xf] }
 0x157   : > { %3009 = vmatpush.bf16.msrb.mxu2 %v9321_v8  ;;  %v2343_v48 = vadd.f32 %v2223_v47, %v14852_v11 }
 0x158   : > { %3036 = vmatpush.bf16.msrb.mxu1 %v9561_v22 }
 0x15a   : > { %3021 = vmatpush.bf16.msrb.mxu0 %v9465_v5  ;;  %v2211_v50 = vpop.f32.mrf.mxu0 }
 0x15b   : > { %3010 = vmatpush.bf16.msrb.mxu2 %v9305_v20  ;;  %v3049_v20 = vperm.slane %v3047_v18, 0 }
 0x15c   : > { %3037 = vmatpush.bf16.msrb.mxu1 %v9545_v31 }
 0x15e   : > { %3022 = vmatpush.bf16.msrb.mxu0 %v9449_v32  ;;  %v3050_v32 = vperm.slane %v3047_v18, 1 }
 0x15f   : > { %3011 = vmatpush.bf16.msrb.mxu2 %v9289_v28  ;;  %9597 = vmatmul.msk.bf16.vlgmr.msrb.gmra.mxu1 %vm893_vm1, %v14873_v16 }
 0x160   : > { %v2235_v51 = vpop.f32.mrf.mxu1 }
 0x162   : > { %3012 = vmatmul.bf16.vlgmr.msrb.gmra.mxu2 %v14841_v1  ;;  %3023 = vmatpush.bf16.msrb.mxu0 %v9433_v36  ;;  %v2224_v1 = vpop.f32.mrf.mxu2  ;;  %v2261_v16 = vpop.f32.mrf.mxu3 }
 0x166   : > { %3024 = vmatpush.bf16.msrb.mxu0 %v9417_v44 }
 0x168   : > { %v2237_v54 = vpop.f32.mrf.mxu1 }
 0x169   : > { %3025 = vmatmul.bf16.vlgmr.msrb.gmra.mxu0 %v14947_v60 }
 0x16a   : > { %v2263_v53 = vpop.f32.mrf.mxu3 }
 0x171   : > { %v2248_v57 = vpop.f32.mrf.mxu2 }
 0x172   : > { %v2249_v63 = vadd.f32 %v2248_v57, %v2235_v51  ;;  %v2274_v59 = vpop.f32.mrf.mxu0 }
 0x174   : > { %v2262_v15 = vadd.f32 %v2261_v16, %v2249_v63  ;;  %v2300_v61 = vpop.f32.mrf.mxu1 }
 0x176   : > { %v2344_v49 = vadd.f32 %v2262_v15, %v14903_v29 }
 0x179   : > { %v2250_v62 = vpop.f32.mrf.mxu2 }
 0x17a   : > { %v2276_v37 = vpop.f32.mrf.mxu0 }
 0x17c   : > { %v2302_v0 = vpop.f32.mrf.mxu1 }
 0x182   : > { %v2287_v11 = vpop.f32.mrf.mxu3 }
 0x183   : > { %v2288_v41 = vadd.f32 %v2287_v11, %v2274_v59  ;;  %v3073_v11 = vlaneseq }
 0x185   : > { %v2301_v4 = vadd.f32 %v2300_v61, %v2288_v41  ;;  %v3052_v61 = vperm.slane %v3047_v18, 3  ;;  %vm15266_vm8 = vcmp.lt.s32.totalorder %v3073_v11, 400  ;;  %vm17299_vm11 = vcmp.lt.s32.totalorder %v3073_v11, 288 }
 0x186   : > { %vm18327_vm15 = vcmp.lt.s32.totalorder %v3073_v11, 256 }
 0x187   : > { %v2345_v45 = vadd.f32 %v2301_v4, %v15079_v52 }
 0x188   : > { %v2339_v60 = vpop.f32.mrf.mxu1 }
 0x18a   : > { %v2289_v30 = vpop.f32.mrf.mxu3 }
 0x18b   : > { %v12598_v30 = vld [vmem:[%s18503_s3 + $0x3c8] sm:$0xf0] }
 0x190   : > { %v2341_v58 = vpop.f32.mrf.mxu1 }
 0x191   : > { %v2313_v7 = vpop.f32.mrf.mxu2  ;;  %v9882_v58 = vld [vmem:[%s18503_s3 + $0x3cc] sm:$0xf0] }
 0x192   : > { %v2326_v3 = vpop.f32.mrf.mxu0 }
 0x193   : > { %v2327_v2 = vadd.f32 %v2326_v3, %v2313_v7  ;;  %v12597_v7 = vld [vmem:[%s18503_s3 + $0x3c4] sm:$0xf] }
 0x195   : > { %v2340_v8 = vadd.f32 %v2339_v60, %v2327_v2  ;;  %v9880_v60 = vld [vmem:[%s18503_s3 + $0x3c0] sm:$0xf] }
 0x196   : > { %v9881_v2 = vor.u32 %v12598_v30, %v9880_v60  ;;  %v12616_v30 = vld [vmem:[%s18503_s3 + $0x458] sm:$0xf0] }
 0x197   : > { %v2346_v14 = vadd.f32 %v2340_v8, %v15191_v17  ;;  %v9885_v8 = vor.u32 %v12597_v7, %v9882_v58  ;;  %v9808_v58 = vld [vmem:[%s18503_s3 + $0x330] sm:$0xf] }
 0x198   : > { %3802 = vmatpush.bf16.msra.mxu1 %v9881_v2  ;;  %v12580_v2 = vld [vmem:[%s18503_s3 + $0x338] sm:$0xf0] }
 0x199   : > { %v2315_v12 = vpop.f32.mrf.mxu2  ;;  %3854 = vmatpush.bf16.msra.mxu0 %v9885_v8  ;;  %v9809_v8 = vor.u32 %v12580_v2, %v9808_v58  ;;  %v9892_v58 = vld [vmem:[%s18503_s3 + $0x3d8] sm:$0xf] }
 0x19a   : > { %v2328_v29 = vpop.f32.mrf.mxu0 }
 0x1a2   : > { %v2896_v6 = vpop.f32.mrf.mxu3 }
 0x1a5   : > { %v2922_v13 = vpop.f32.mrf.mxu2 }
 0x1a8   : > { %v2909_v9 = vpop.f32.mrf.mxu1 }
 0x1a9   : > { %v2910_v19 = vadd.f32 %v2909_v9, %v2896_v6  ;;  %v9868_v6 = vld [vmem:[%s18503_s3 + $0x3a8] sm:$0xf]  ;;  %v12594_v9 = vld [vmem:[%s18503_s3 + $0x3ac] sm:$0xf] }
 0x1aa   : > { %v2898_v52 = vpop.f32.mrf.mxu3 }
 0x1ab   : > { %v2923_v40 = vadd.f32 %v2922_v13, %v2910_v19  ;;  %v12595_v13 = vld [vmem:[%s18503_s3 + $0x3b0] sm:$0xf0] }
 0x1ac   : > { %v9869_v52 = vor.u32 %v12595_v13, %v9868_v6  ;;  %v9748_v13 = vld [vmem:[%s18503_s3 + $0x2b8] sm:$0xf] }
 0x1ad   : > { %v2924_v21 = vpop.f32.mrf.mxu2  ;;  %v3043_v22 = vadd.f32 %v2923_v40, %v2343_v48  ;;  %v3051_v48 = vperm.slane %v3047_v18, 2  ;;  %v9870_v40 = vld [vmem:[%s18503_s3 + $0x3b4] sm:$0xf0] }
 0x1ae   : > { %v9873_v21 = vor.u32 %v12594_v9, %v9870_v40  ;;  %3803 = vmatpush.bf16.msra.mxu1 %v9869_v52  ;;  %v12565_v9 = vld [vmem:[%s18503_s3 + $0x2c0] sm:$0xf0] }
 0x1af   : > { %v3057_v23 = vadd.f32 %v3049_v20, %v3043_v22  ;;  %v9856_v22 = vld [vmem:[%s18503_s3 + $0x390] sm:$0xf]  ;;  %v9749_v52 = vor.u32 %v12565_v9, %v9748_v13 }
 0x1b0   : > { %v2911_v24 = vpop.f32.mrf.mxu1  ;;  %3855 = vmatpush.bf16.msra.mxu0 %v9873_v21  ;;  %v12577_v21 = vld [vmem:[%s18503_s3 + $0x320] sm:$0xf0] }
 0x1b1   : > { %vm3061_vm2 = vcmp.gt.f32.partialorder %v3057_v23, 0.0  ;;  %v3065_v56 = vmul.f32 0.2, %v3057_v23  ;;  %v12591_v24 = vld [vmem:[%s18503_s3 + $0x394] sm:$0xf] }
 0x1b2   : > { %v2935_v5 = vpop.f32.mrf.mxu0 }
 0x1b3   : > { %v15240_v17 = vsel %vm3061_vm2, %v3057_v23, %v3065_v56  ;;  %v12592_v23 = vld [vmem:[%s18503_s3 + $0x398] sm:$0xf0] }
 0x1b4   : > { %3098 = vst [vmem:[#allocation1] sm:$0xff] %v15240_v17  ;;  %v9857_v56 = vor.u32 %v12592_v23, %v9856_v22  ;;  %v12576_v22 = vld [vmem:[%s18503_s3 + $0x31c] sm:$0xf] }
 0x1b6   : > { %v2961_v55 = vpop.f32.mrf.mxu3  ;;  %3804 = vmatpush.bf16.msra.mxu1 %v9857_v56  ;;  %v9736_v56 = vld [vmem:[%s18503_s3 + $0x2a0] sm:$0xf] }
 0x1ba   : > { %v2937_v26 = vpop.f32.mrf.mxu0 }
 0x1bb   : > { %v9844_v26 = vld [vmem:[%s18503_s3 + $0x378] sm:$0xf] }
 0x1be   : > { %v2963_v25 = vpop.f32.mrf.mxu3 }
 0x1c5   : > { %v2948_v27 = vpop.f32.mrf.mxu2 }
 0x1c6   : > { %v2949_v28 = vadd.f32 %v2948_v27, %v2935_v5  ;;  %v3000_v10 = vpop.f32.mrf.mxu0  ;;  %v12589_v27 = vld [vmem:[%s18503_s3 + $0x380] sm:$0xf0] }
 0x1c8   : > { %v2962_v31 = vadd.f32 %v2961_v55, %v2949_v28  ;;  %v2974_v35 = vpop.f32.mrf.mxu1  ;;  %v9858_v55 = vld [vmem:[%s18503_s3 + $0x39c] sm:$0xf0]  ;;  %v9845_v28 = vor.u32 %v12589_v27, %v9844_v26  ;;  %v12610_v27 = vld [vmem:[%s18503_s3 + $0x428] sm:$0xf0] }
 0x1c9   : > { %v9861_v25 = vor.u32 %v12591_v24, %v9858_v55  ;;  %v9798_v24 = vld [vmem:[%s18503_s3 + $0x324] sm:$0xf0]  ;;  %v12562_v55 = vld [vmem:[%s18503_s3 + $0x2a8] sm:$0xf0]  ;;  %v9928_v26 = vld [vmem:[%s18503_s3 + $0x420] sm:$0xf] }
 0x1ca   : > { %v3044_v33 = vadd.f32 %v2962_v31, %v2344_v49  ;;  %v12588_v31 = vld [vmem:[%s18503_s3 + $0x37c] sm:$0xf]  ;;  %3805 = vmatpush.bf16.msra.mxu1 %v9845_v28  ;;  %v12621_v28 = vld [vmem:[%s18503_s3 + $0x484] sm:$0xf] }
 0x1cb   : > { %3856 = vmatpush.bf16.msra.mxu0 %v9861_v25  ;;  %v9737_v25 = vor.u32 %v12562_v55, %v9736_v56  ;;  %v12609_v56 = vld [vmem:[%s18503_s3 + $0x424] sm:$0xf]  ;;  %v9930_v55 = vld [vmem:[%s18503_s3 + $0x42c] sm:$0xf0] }
 0x1cc   : > { %v3058_v34 = vadd.f32 %v3050_v32, %v3044_v33  ;;  %v9846_v32 = vld [vmem:[%s18503_s3 + $0x384] sm:$0xf0] }
 0x1cd   : > { %v2950_v36 = vpop.f32.mrf.mxu2  ;;  %v9849_v33 = vor.u32 %v12588_v31, %v9846_v32  ;;  %v9929_v31 = vor.u32 %v12610_v27, %v9928_v26  ;;  %v9978_v32 = vld [vmem:[%s18503_s3 + $0x48c] sm:$0xf0]  ;;  %v12611_v26 = vld [vmem:[%s18503_s3 + $0x430] sm:$0xf0] }
 0x1ce   : > { %vm3062_vm3 = vcmp.gt.f32.partialorder %v3058_v34, 0.0  ;;  %v3066_v38 = vmul.f32 0.2, %v3058_v34  ;;  %v3002_v42 = vpop.f32.mrf.mxu0  ;;  %v9976_v36 = vld [vmem:[%s18503_s3 + $0x480] sm:$0xf] }
 0x1cf   : > { %3857 = vmatpush.bf16.msra.mxu0 %v9849_v33  ;;  %v9832_v42 = vld [vmem:[%s18503_s3 + $0x360] sm:$0xf]  ;;  %v9984_v33 = vld [vmem:[%s18503_s3 + $0x488] sm:$0xf] }
 0x1d0   : > { %v15243_v39 = vsel %vm3062_vm3, %v3058_v34, %v3066_v38  ;;  %v2976_v44 = vpop.f32.mrf.mxu1  ;;  %v12574_v34 = vld [vmem:[%s18503_s3 + $0x308] sm:$0xf0] }
 0x1d1   : > { %3099 = vst [vmem:[#allocation1 + $0x9] sm:$0xff] %v15243_v39  ;;  %v3087_v4 = vrot.slane %v15243_v39, 7  ;;  %v12622_v38 = vld [vmem:[%s18503_s3 + $0x488] sm:$0xf0] }
 0x1d2   : > { %v9977_v44 = vor.u32 %v12622_v38, %v9976_v36  ;;  %v9724_v38 = vld [vmem:[%s18503_s3 + $0x288] sm:$0xf] }
 0x1d3   : > { %v3091_v18 = vsel %vm3090_vm5, %v15240_v17, %v3087_v4  ;;  %v12568_v4 = vld [vmem:[%s18503_s3 + $0x2d8] sm:$0xf0] }
 0x1d4   : > { %3815 = vmatpush.bf16.msra.mxu2 %v9977_v44  ;;  %v9916_v44 = vld [vmem:[%s18503_s3 + $0x408] sm:$0xf] }
 0x1d6   : > { %v2987_v43 = vpop.f32.mrf.mxu3 }
 0x1d7   : > { %v2988_v46 = vadd.f32 %v2987_v43, %v2974_v35  ;;  %v12586_v43 = vld [vmem:[%s18503_s3 + $0x368] sm:$0xf0] }
 0x1d9   : > { %v3001_v47 = vadd.f32 %v3000_v10, %v2988_v46  ;;  %v9784_v10 = vld [vmem:[%s18503_s3 + $0x300] sm:$0xf]  ;;  %v9833_v46 = vor.u32 %v12586_v43, %v9832_v42  ;;  %v12559_v42 = vld [vmem:[%s18503_s3 + $0x290] sm:$0xf0] }
 0x1da   : > { %v9785_v35 = vor.u32 %v12574_v34, %v9784_v10  ;;  %v12623_v10 = vld [vmem:[%s18503_s3 + $0x490] sm:$0xf0]  ;;  %v9725_v43 = vor.u32 %v12559_v42, %v9724_v38  ;;  %v9906_v38 = vld [vmem:[%s18503_s3 + $0x3fc] sm:$0xf0] }
 0x1db   : > { %v3045_v1 = vadd.f32 %v3001_v47, %v2345_v45  ;;  %v12585_v47 = vld [vmem:[%s18503_s3 + $0x364] sm:$0xf]  ;;  %3806 = vmatpush.bf16.msra.mxu1 %v9833_v46  ;;  %v9985_v36 = vor.u32 %v12623_v10, %v9984_v33  ;;  %v12607_v46 = vld [vmem:[%s18503_s3 + $0x410] sm:$0xf0]  ;;  %v9924_v33 = vld [vmem:[%s18503_s3 + $0x410] sm:$0xf] }
 0x1dc   : > { %v3039_v16 = vpop.f32.mrf.mxu1  ;;  %3789 = vmatpush.bf16.msra.mxu3 %v9785_v35  ;;  %v9981_v35 = vor.u32 %v12621_v28, %v9978_v32  ;;  %v12606_v28 = vld [vmem:[%s18503_s3 + $0x40c] sm:$0xf]  ;;  %v12608_v10 = vld [vmem:[%s18503_s3 + $0x418] sm:$0xf0] }
 0x1dd   : > { %v3059_v50 = vadd.f32 %v3051_v48, %v3045_v1  ;;  %v9834_v48 = vld [vmem:[%s18503_s3 + $0x36c] sm:$0xf0]  ;;  %v9772_v1 = vld [vmem:[%s18503_s3 + $0x2e8] sm:$0xf] }
 0x1de   : > { %v2989_v51 = vpop.f32.mrf.mxu3 }
 0x1df   : > { %vm3063_vm4 = vcmp.gt.f32.partialorder %v3059_v50, 0.0  ;;  %v3067_v53 = vmul.f32 0.2, %v3059_v50  ;;  %v9964_v51 = vld [vmem:[%s18503_s3 + $0x468] sm:$0xf] }
 0x1e1   : > { %v15246_v54 = vsel %vm3063_vm4, %v3059_v50, %v3067_v53  ;;  %v9837_v50 = vor.u32 %v12585_v47, %v9834_v48  ;;  %v12619_v53 = vld [vmem:[%s18503_s3 + $0x470] sm:$0xf0]  ;;  %v9917_v47 = vor.u32 %v12607_v46, %v9916_v44  ;;  %v12618_v48 = vld [vmem:[%s18503_s3 + $0x46c] sm:$0xf]  ;;  %v12605_v44 = vld [vmem:[%s18503_s3 + $0x400] sm:$0xf0] }
 0x1e2   : > { %3100 = vst [vmem:[#allocation1 + $0x12] sm:$0xff] %v15246_v54  ;;  %v3088_v12 = vrot.slane %v15246_v54, 6 }
 0x1e3   : > { %3858 = vmatpush.bf16.msra.mxu0 %v9837_v50 }
 0x1e4   : > { %v3041_v63 = vpop.f32.mrf.mxu1 }
 0x1e5   : > { %v3013_v57 = vpop.f32.mrf.mxu2  ;;  %v9965_v63 = vor.u32 %v12619_v53, %v9964_v51  ;;  %v12620_v51 = vld [vmem:[%s18503_s3 + $0x478] sm:$0xf0] }
 0x1e6   : > { %v3026_v15 = vpop.f32.mrf.mxu0 }
 0x1e7   : > { %v3027_v59 = vadd.f32 %v3026_v15, %v3013_v57  ;;  %v9820_v15 = vld [vmem:[%s18503_s3 + $0x348] sm:$0xf]  ;;  %3816 = vmatpush.bf16.msra.mxu2 %v9965_v63  ;;  %v12556_v63 = vld [vmem:[%s18503_s3 + $0x278] sm:$0xf0] }
 0x1e9   : > { %v3040_v49 = vadd.f32 %v3039_v16, %v3027_v59  ;;  %v12571_v16 = vld [vmem:[%s18503_s3 + $0x2f0] sm:$0xf0] }
 0x1ea   : > { %v9773_v57 = vor.u32 %v12571_v16, %v9772_v1  ;;  %v12583_v59 = vld [vmem:[%s18503_s3 + $0x350] sm:$0xf0]  ;;  %v9966_v1 = vld [vmem:[%s18503_s3 + $0x474] sm:$0xf0]  ;;  %v9972_v16 = vld [vmem:[%s18503_s3 + $0x470] sm:$0xf] }
 0x1eb   : > { %v3046_v37 = vadd.f32 %v3040_v49, %v2346_v14  ;;  %v12582_v49 = vld [vmem:[%s18503_s3 + $0x34c] sm:$0xf]  ;;  %v9969_v50 = vor.u32 %v12618_v48, %v9966_v1  ;;  %v9973_v53 = vor.u32 %v12620_v51, %v9972_v16  ;;  %v9894_v48 = vld [vmem:[%s18503_s3 + $0x3e4] sm:$0xf0] }
 0x1ec   : > { %3790 = vmatpush.bf16.msra.mxu3 %v9773_v57  ;;  %v9712_v57 = vld [vmem:[%s18503_s3 + $0x270] sm:$0xf]  ;;  %v12602_v16 = vld [vmem:[%s18503_s3 + $0x3e8] sm:$0xf0] }
 0x1ed   : > { %v3015_v62 = vpop.f32.mrf.mxu2  ;;  %v3060_v0 = vadd.f32 %v3052_v61, %v3046_v37  ;;  %v9822_v37 = vld [vmem:[%s18503_s3 + $0x354] sm:$0xf0] }
 0x1ee   : > { %v3028_v41 = vpop.f32.mrf.mxu0  ;;  %v9821_v62 = vor.u32 %v12583_v59, %v9820_v15  ;;  %v9904_v15 = vld [vmem:[%s18503_s3 + $0x3f0] sm:$0xf]  ;;  %v12604_v59 = vld [vmem:[%s18503_s3 + $0x3f8] sm:$0xf0] }
 0x1ef   : > { %vm3064_vm6 = vcmp.gt.f32.partialorder %v3060_v0, 0.0  ;;  %v3068_v45 = vmul.f32 0.2, %v3060_v0  ;;  %v9825_v41 = vor.u32 %v12582_v49, %v9822_v37  ;;  %v9713_v49 = vor.u32 %v12556_v63, %v9712_v57  ;;  %v9954_v37 = vld [vmem:[%s18503_s3 + $0x45c] sm:$0xf0] }
 0x1f0   : > { %3807 = vmatpush.bf16.msra.mxu1 %v9821_v62  ;;  %v12615_v62 = vld [vmem:[%s18503_s3 + $0x454] sm:$0xf]  ;;  %v12573_v57 = vld [vmem:[%s18503_s3 + $0x304] sm:$0xf]  ;;  %v9786_v63 = vld [vmem:[%s18503_s3 + $0x30c] sm:$0xf0] }
 0x1f1   : > { %v15262_v3 = vsel %vm3064_vm6, %v3060_v0, %v3068_v45  ;;  %v9760_v0 = vld [vmem:[%s18503_s3 + $0x2d0] sm:$0xf]  ;;  %3859 = vmatpush.bf16.msra.mxu0 %v9825_v41  ;;  %v9957_v41 = vor.u32 %v12615_v62, %v9954_v37 }
 0x1f2   : > { %v3089_v29 = vrot.slane %v15262_v3, 5  ;;  %3101 = vst [vmem:[#allocation1 + $0x1b] sm:$0xff] %v15262_v3  ;;  %v9952_v45 = vld [vmem:[%s18503_s3 + $0x450] sm:$0xf]  ;;  %v9761_v60 = vor.u32 %v12568_v4, %v9760_v0  ;;  %v9960_v0 = vld [vmem:[%s18503_s3 + $0x458] sm:$0xf] }
 0x1f3   : > { %v9953_v7 = vor.u32 %v12616_v30, %v9952_v45  ;;  %v12617_v4 = vld [vmem:[%s18503_s3 + $0x460] sm:$0xf0]  ;;  %v13007_v45 = vmov 0.0   ;;  %v9700_v30 = vld [vmem:[%s18503_s3 + $0x258] sm:$0xf] }
 0x1f4   : > { %v3093_v19 = vsel %vm3092_vm7, %v3088_v12, %v3089_v29  ;;  %3791 = vmatpush.bf16.msra.mxu3 %v9761_v60  ;;  %v12579_v12 = vld [vmem:[%s18503_s3 + $0x334] sm:$0xf]  ;;  %v9810_v29 = vld [vmem:[%s18503_s3 + $0x33c] sm:$0xf0]  ;;  %3808 = vmatpush.bf16.msra.mxu1 %v9809_v8  ;;  %v9961_v60 = vor.u32 %v12617_v4, %v9960_v0  ;;  %v12601_v8 = vld [vmem:[%s18503_s3 + $0x3e0] sm:$0xf0]  ;;  %7978 = vst [vmem:[%s18492_s9] sm:$0xff] %v13007_v45 }
 0x1f5   : > { %v3094_v20 = vsel %vm897_vm0, %v3091_v18, %v3093_v19  ;;  %v9813_v6 = vor.u32 %v12579_v12, %v9810_v29  ;;  %3817 = vmatpush.bf16.msra.mxu2 %v9953_v7  ;;  %v9940_v18 = vld [vmem:[%s18503_s3 + $0x438] sm:$0xf]  ;;  %v12613_v19 = vld [vmem:[%s18503_s3 + $0x440] sm:$0xf0]  ;;  %v12612_v12 = vld [vmem:[%s18503_s3 + $0x43c] sm:$0xf]  ;;  %v9893_v13 = vor.u32 %v12601_v8, %v9892_v58 }
 0x1f6   : > { %3096 = vst.msk [vmem:[#allocation2 + $0x20] ss:$8 sm:$0xf] %vm15266_vm8, %v3094_v20  ;;  %v9941_v40 = vor.u32 %v12613_v19, %v9940_v18  ;;  %v9796_v20 = vld [vmem:[%s18503_s3 + $0x318] sm:$0xf] }
 0x1f7   : > { %3860 = vmatpush.bf16.msra.mxu0 %v9813_v6  ;;  %v9797_v23 = vor.u32 %v12577_v21, %v9796_v20  ;;  %3077 = vst.msk [vmem:[#allocation2] ss:$8 sm:$0xf] %vm15266_vm8, %v13007_v45  ;;  %v12553_v7 = vld [vmem:[%s18503_s3 + $0x260] sm:$0xf0] }
 0x1f8   : > { %3792 = vmatpush.bf16.msra.mxu3 %v9749_v52  ;;  %v9701_v2 = vor.u32 %v12553_v7, %v9700_v30  ;;  %v9942_v29 = vld [vmem:[%s18503_s3 + $0x444] sm:$0xf0]  ;;  %v9948_v18 = vld [vmem:[%s18503_s3 + $0x440] sm:$0xf]  ;;  %v12614_v19 = vld [vmem:[%s18503_s3 + $0x448] sm:$0xf0] }
 0x1f9   : > { %v3103_v5 = vld [vmem:[#allocation1 + $0x1] ss:$9 sm:$0xff]  ;;  %3818 = vmatpush.bf16.msra.mxu2 %v9941_v40  ;;  %3809 = vmatpush.bf16.msra.mxu1 %v9797_v23  ;;  %v9945_v9 = vor.u32 %v12612_v12, %v9942_v29  ;;  %v9949_v52 = vor.u32 %v12614_v19, %v9948_v18  ;;  %v9988_v40 = vld [vmem:[%s18503_s3 + $0x498] sm:$0xf] }
 0x1fa   : > { %3108 = vst [vmem:[#allocation1] sm:$0xff] %v15240_v17  ;;  %v12625_v20 = vld [vmem:[%s18503_s3 + $0x4a0] sm:$0xf0]  ;;  %v9990_v23 = vld [vmem:[%s18503_s3 + $0x4a4] sm:$0xf0] }
 0x1fb   : > { %3109 = vst [vmem:[#allocation1 + $0x9] sm:$0xff] %v15243_v39  ;;  %v9989_v21 = vor.u32 %v12625_v20, %v9988_v40  ;;  %v12570_v7 = vld [vmem:[%s18503_s3 + $0x2ec] sm:$0xf]  ;;  %v9774_v58 = vld [vmem:[%s18503_s3 + $0x2f4] sm:$0xf0] }
 0x1fc   : > { %3110 = vst [vmem:[#allocation1 + $0x12] sm:$0xff] %v15246_v54  ;;  %3793 = vmatpush.bf16.msra.mxu3 %v9737_v25  ;;  %v9936_v25 = vld [vmem:[%s18503_s3 + $0x428] sm:$0xf]  ;;  %v12572_v8 = vld [vmem:[%s18503_s3 + $0x2f8] sm:$0xf0]  ;;  %v9777_v29 = vor.u32 %v12570_v7, %v9774_v58 }
 0x1fd   : > { %3111 = vst [vmem:[#allocation1 + $0x1b] sm:$0xff] %v15262_v3  ;;  %3867 = vmatpush.bf16.msrb.mxu1 %v9981_v35  ;;  %3819 = vmatpush.bf16.msra.mxu2 %v9929_v31  ;;  %v9937_v27 = vor.u32 %v12611_v26, %v9936_v25  ;;  %v9918_v31 = vld [vmem:[%s18503_s3 + $0x414] sm:$0xf0]  ;;  %v9925_v35 = vor.u32 %v12608_v10, %v9924_v33  ;;  %v12569_v19 = vld [vmem:[%s18503_s3 + $0x2e0] sm:$0xf0] }
 0x1fe   : > { %3106 = vst.msk [vmem:[#allocation2 + $0x1] ss:$8 sm:$0xf] %vm15266_vm8, %v3103_v5  ;;  %v9801_v5 = vor.u32 %v12576_v22, %v9798_v24  ;;  %v12624_v22 = vld [vmem:[%s18503_s3 + $0x49c] sm:$0xf]  ;;  %v9921_v32 = vor.u32 %v12606_v28, %v9918_v31 }
 0x1ff   : > { %v9993_v24 = vor.u32 %v12624_v22, %v9990_v23  ;;  %3081 = vst.msk [vmem:[#allocation2 + $0x24] ss:$8 sm:$0xf] %vm15266_vm8, %v13007_v45  ;;  %v9768_v18 = vld [vmem:[%s18503_s3 + $0x2d8] sm:$0xf] }
 0x200   : > { %3861 = vmatpush.bf16.msra.mxu0 %v9801_v5  ;;  %3794 = vmatpush.bf16.msra.mxu3 %v9725_v43  ;;  %v9933_v5 = vor.u32 %v12609_v56, %v9930_v55  ;;  %v9912_v43 = vld [vmem:[%s18503_s3 + $0x3f8] sm:$0xf]  ;;  %v9769_v40 = vor.u32 %v12569_v19, %v9768_v18  ;;  %v12564_v20 = vld [vmem:[%s18503_s3 + $0x2bc] sm:$0xf]  ;;  %v9756_v22 = vld [vmem:[%s18503_s3 + $0x2c0] sm:$0xf] }
 0x201   : > { %3868 = vmatpush.bf16.msrb.mxu1 %v9969_v50  ;;  %3820 = vmatpush.bf16.msra.mxu2 %v9917_v47  ;;  %v9913_v46 = vor.u32 %v12605_v44, %v9912_v43  ;;  %v12600_v47 = vld [vmem:[%s18503_s3 + $0x3dc] sm:$0xf]  ;;  %v9900_v50 = vld [vmem:[%s18503_s3 + $0x3e0] sm:$0xf]  ;;  %v12566_v23 = vld [vmem:[%s18503_s3 + $0x2c8] sm:$0xf0] }
 0x202   : > { %v9897_v1 = vor.u32 %v12600_v47, %v9894_v48  ;;  %v9901_v51 = vor.u32 %v12602_v16, %v9900_v50  ;;  %v12561_v56 = vld [vmem:[%s18503_s3 + $0x2a4] sm:$0xf]  ;;  %v9757_v55 = vor.u32 %v12566_v23, %v9756_v22  ;;  %v9738_v25 = vld [vmem:[%s18503_s3 + $0x2ac] sm:$0xf0]  ;;  %v9744_v26 = vld [vmem:[%s18503_s3 + $0x2a8] sm:$0xf] }
 0x203   : > { %v10087_v28 = vld [vmem:[%s18503_s3 + $0xa8] sm:$0xf]  ;;  %v12499_v31 = vld [vmem:[%s18503_s3 + $0xb0] sm:$0xf0]  ;;  %v10089_v33 = vld [vmem:[%s18503_s3 + $0xb4] sm:$0xf0] }
 0x204   : > { %v3113_v61 = vld [vmem:[#allocation1 + $0x2] ss:$9 sm:$0xff]  ;;  %3919 = vmatpush.bf16.msrb.mxu0 %v9985_v36  ;;  %3795 = vmatpush.bf16.msra.mxu3 %v9713_v49  ;;  %v9732_v43 = vld [vmem:[%s18503_s3 + $0x290] sm:$0xf] }
 0x205   : > { %3118 = vst [vmem:[#allocation1] sm:$0xff] %v15240_v17  ;;  %3869 = vmatpush.bf16.msrb.mxu1 %v9957_v41  ;;  %v12603_v36 = vld [vmem:[%s18503_s3 + $0x3f4] sm:$0xf]  ;;  %v12550_v49 = vld [vmem:[%s18503_s3 + $0x248] sm:$0xf0]  ;;  %v9789_v41 = vor.u32 %v12573_v57, %v9786_v63 }
 0x206   : > { %3119 = vst [vmem:[#allocation1 + $0x9] sm:$0xff] %v15243_v39  ;;  %v9909_v42 = vor.u32 %v12603_v36, %v9906_v38  ;;  %v10088_v36 = vor.u32 %v12499_v31, %v10087_v28  ;;  %v12558_v38 = vld [vmem:[%s18503_s3 + $0x28c] sm:$0xf]  ;;  %v10075_v47 = vld [vmem:[%s18503_s3 + $0x90] sm:$0xf] }
 0x207   : > { %3120 = vst [vmem:[#allocation1 + $0x12] sm:$0xff] %v15246_v54  ;;  %v12496_v48 = vld [vmem:[%s18503_s3 + $0x98] sm:$0xf0]  ;;  %v10077_v50 = vld [vmem:[%s18503_s3 + $0x9c] sm:$0xf0] }
 0x208   : > { %3121 = vst [vmem:[#allocation1 + $0x1b] sm:$0xff] %v15262_v3  ;;  %3920 = vmatpush.bf16.msrb.mxu0 %v9973_v53  ;;  %3796 = vmatpush.bf16.msra.mxu3 %v9701_v2  ;;  %v9780_v2 = vld [vmem:[%s18503_s3 + $0x2f0] sm:$0xf]  ;;  %v12555_v57 = vld [vmem:[%s18503_s3 + $0x274] sm:$0xf] }
 0x209   : > { %3116 = vst.msk [vmem:[#allocation2 + $0x21] ss:$8 sm:$0xf] %vm15266_vm8, %v3113_v61  ;;  %v9905_v61 = vor.u32 %v12604_v59, %v9904_v15  ;;  %3870 = vmatpush.bf16.msrb.mxu1 %v9945_v9  ;;  %v10291_v59 = vld [vmem:[%s18503_s3 + $0x240] sm:$0xf] }
 0x20a   : > { %v10292_v12 = vor.u32 %v12550_v49, %v10291_v59  ;;  %v9762_v9 = vld [vmem:[%s18503_s3 + $0x2dc] sm:$0xf0]  ;;  %v12492_v59 = vld [vmem:[%s18503_s3 + $0x7c] sm:$0xf]  ;;  %v10065_v49 = vld [vmem:[%s18503_s3 + $0x84] sm:$0xf0] }
 0x20b   : > { %3821 = vmatpush.bf16.msra.mxu2 %v9905_v61  ;;  %v9714_v63 = vld [vmem:[%s18503_s3 + $0x27c] sm:$0xf0]  ;;  %v12554_v7 = vld [vmem:[%s18503_s3 + $0x268] sm:$0xf0]  ;;  %v10068_v58 = vor.u32 %v12492_v59, %v10065_v49  ;;  %v12523_v18 = vld [vmem:[%s18503_s3 + $0x170] sm:$0xf0] }
 0x20c   : > { %3921 = vmatpush.bf16.msrb.mxu0 %v9961_v60  ;;  %3835 = vmatpush.bf16.msrb.mxu3 %v9989_v21  ;;  %v9750_v21 = vld [vmem:[%s18503_s3 + $0x2c4] sm:$0xf0]  ;;  %v12487_v22 = vld [vmem:[%s18503_s3 + $0x50] sm:$0xf0]  ;;  %v12486_v23 = vld [vmem:[%s18503_s3 + $0x4c] sm:$0xf] }
 0x20d   : > { %3871 = vmatpush.bf16.msrb.mxu1 %v9933_v5  ;;  %v12478_v49 = vld [vmem:[%s18503_s3 + $0x8] sm:$0xf0]  ;;  %5930 = vst.msk [vmem:[#allocation3] ss:$4 sm:$0x7] %vm17299_vm11, %v13007_v45 }
 0x20e   : > { %5933 = vst.msk [vmem:[#allocation3 + $0xe] ss:$4 sm:$0x7] %vm17299_vm11, %v13007_v45 }
 0x20f   : > { %v3123_v34 = vld [vmem:[#allocation1 + $0x3] ss:$9 sm:$0xff]  ;;  %3822 = vmatpush.bf16.msra.mxu2 %v9893_v13  ;;  %7289 = vst.msk [vmem:[#allocation4] ss:$2 sm:$0x3] %vm18327_vm15, %v13007_v45 }
 0x210   : > { %3128 = vst [vmem:[#allocation1] sm:$0xff] %v15240_v17  ;;  %3922 = vmatpush.bf16.msrb.mxu0 %v9949_v52  ;;  %v12567_v13 = vld [vmem:[%s18503_s3 + $0x2d4] sm:$0xf] }
 0x211   : > { %3129 = vst [vmem:[#allocation1 + $0x9] sm:$0xff] %v15243_v39  ;;  %3872 = vmatpush.bf16.msrb.mxu1 %v9921_v32  ;;  %v9765_v52 = vor.u32 %v12567_v13, %v9762_v9  ;;  %v12498_v32 = vld [vmem:[%s18503_s3 + $0xac] sm:$0xf]  ;;  %v10183_v9 = vld [vmem:[%s18503_s3 + $0x168] sm:$0xf] }
 0x212   : > { %3130 = vst [vmem:[#allocation1 + $0x12] sm:$0xff] %v15246_v54  ;;  %v10092_v44 = vor.u32 %v12498_v32, %v10089_v33  ;;  %v10027_v33 = vld [vmem:[%s18503_s3 + $0x30] sm:$0xf] }
 0x213   : > { %3131 = vst [vmem:[#allocation1 + $0x1b] sm:$0xff] %v15262_v3  ;;  %3887 = vmatpush.bf16.msrb.mxu2 %v9993_v24  ;;  %v9753_v24 = vor.u32 %v12564_v20, %v9750_v21  ;;  %v10039_v21 = vld [vmem:[%s18503_s3 + $0x48] sm:$0xf] }
 0x214   : > { %3126 = vst.msk [vmem:[#allocation2 + $0x2] ss:$8 sm:$0xf] %vm15266_vm8, %v3123_v34  ;;  %3923 = vmatpush.bf16.msrb.mxu0 %v9937_v27  ;;  %v12563_v27 = vld [vmem:[%s18503_s3 + $0x2b0] sm:$0xf0]  ;;  %v10040_v28 = vor.u32 %v12487_v22, %v10039_v21 }
 0x215   : > { %3873 = vmatpush.bf16.msrb.mxu1 %v9909_v42  ;;  %v9726_v42 = vld [vmem:[%s18503_s3 + $0x294] sm:$0xf0]  ;;  %v12508_v21 = vld [vmem:[%s18503_s3 + $0xf8] sm:$0xf0]  ;;  %v12519_v22 = vld [vmem:[%s18503_s3 + $0x154] sm:$0xf] }
 0x216   : > { %v9729_v16 = vor.u32 %v12558_v38, %v9726_v42  ;;  %v10029_v42 = vld [vmem:[%s18503_s3 + $0x3c] sm:$0xf0]  ;;  %7292 = vst.msk [vmem:[#allocation4 + $0x5] ss:$2 sm:$0x3] %vm18327_vm15, %v13007_v45 }
 0x218   : > { %3924 = vmatpush.bf16.msrb.mxu0 %v9925_v35  ;;  %v9745_v35 = vor.u32 %v12563_v27, %v9744_v26  ;;  %v10171_v26 = vld [vmem:[%s18503_s3 + $0x150] sm:$0xf]  ;;  %v12520_v27 = vld [vmem:[%s18503_s3 + $0x158] sm:$0xf0] }
 0x219   : > { %3874 = vmatpush.bf16.msrb.mxu1 %v9897_v1  ;;  %v12495_v1 = vld [vmem:[%s18503_s3 + $0x94] sm:$0xf]  ;;  %v10172_v38 = vor.u32 %v12520_v27, %v10171_v26  ;;  %v9816_v27 = vld [vmem:[%s18503_s3 + $0x338] sm:$0xf] }
 0x21a   : > { %v3133_v6 = vld [vmem:[#allocation1 + $0x4] ss:$9 sm:$0xff] }
 0x21b   : > { %3138 = vst [vmem:[#allocation1] sm:$0xff] %v15240_v17 }
 0x21c   : > { %3139 = vst [vmem:[#allocation1 + $0x9] sm:$0xff] %v15243_v39  ;;  %3925 = vmatpush.bf16.msrb.mxu0 %v9913_v46  ;;  %v12560_v46 = vld [vmem:[%s18503_s3 + $0x298] sm:$0xf0] }
 0x21d   : > { %3140 = vst [vmem:[#allocation1 + $0x12] sm:$0xff] %v15246_v54 }
 0x21e   : > { %3141 = vst [vmem:[#allocation1 + $0x1b] sm:$0xff] %v15262_v3 }
 0x21f   : > { %3136 = vst.msk [vmem:[#allocation2 + $0x22] ss:$8 sm:$0xf] %vm15266_vm8, %v3133_v6  ;;  %v9781_v6 = vor.u32 %v12572_v8, %v9780_v2  ;;  %v12490_v2 = vld [vmem:[%s18503_s3 + $0x68] sm:$0xf0] }
 0x220   : > { %3926 = vmatpush.bf16.msrb.mxu0 %v9901_v51  ;;  %v9733_v51 = vor.u32 %v12560_v46, %v9732_v43  ;;  %v12489_v8 = vld [vmem:[%s18503_s3 + $0x64] sm:$0xf]  ;;  %v9864_v43 = vld [vmem:[%s18503_s3 + $0x398] sm:$0xf] }
 0x221   : > { %v10159_v46 = vld [vmem:[%s18503_s3 + $0x138] sm:$0xf] }
 0x225   : > { %v3143_v34 = vld [vmem:[#allocation1 + $0x5] ss:$9 sm:$0xff] }
 0x226   : > { %3148 = vst [vmem:[#allocation1] sm:$0xff] %v15240_v17 }
 0x227   : > { %3149 = vst [vmem:[#allocation1 + $0x9] sm:$0xff] %v15243_v39 }
 0x228   : > { %3150 = vst [vmem:[#allocation1 + $0x12] sm:$0xff] %v15246_v54 }
 0x229   : > { %3151 = vst [vmem:[#allocation1 + $0x1b] sm:$0xff] %v15262_v3 }
 0x22a   : > { %3146 = vst.msk [vmem:[#allocation2 + $0x3] ss:$8 sm:$0xf] %vm15266_vm8, %v3143_v34  ;;  %v9741_v34 = vor.u32 %v12561_v56, %v9738_v25  ;;  %v10041_v56 = vld [vmem:[%s18503_s3 + $0x54] sm:$0xf0] }
 0x22b   : > { %v10044_v31 = vor.u32 %v12486_v23, %v10041_v56  ;;  %v10173_v23 = vld [vmem:[%s18503_s3 + $0x15c] sm:$0xf0]  ;;  %v12521_v56 = vld [vmem:[%s18503_s3 + $0x160] sm:$0xf0] }
 0x22c   : > { %v10176_v26 = vor.u32 %v12519_v22, %v10173_v23 }
 0x230   : > { %v3153_v53 = vld [vmem:[#allocation1 + $0x6] ss:$9 sm:$0xff] }
 0x231   : > { %3158 = vst [vmem:[#allocation1] sm:$0xff] %v15240_v17  ;;  %v9792_v17 = vld [vmem:[%s18503_s3 + $0x308] sm:$0xf]  ;;  %v3171_v25 = vld [vmem:[#allocation2 + $0x18] sm:$0xf] }
 0x232   : > { %3159 = vst [vmem:[#allocation1 + $0x9] sm:$0xff] %v15243_v39  ;;  %v12575_v39 = vld [vmem:[%s18503_s3 + $0x310] sm:$0xf0] }
 0x233   : > { %3160 = vst [vmem:[#allocation1 + $0x12] sm:$0xff] %v15246_v54  ;;  %v9996_v54 = vld [vmem:[%s18503_s3 + $0x4a0] sm:$0xf]  ;;  %v9793_v30 = vor.u32 %v12575_v39, %v9792_v17  ;;  %v9720_v17 = vld [vmem:[%s18503_s3 + $0x278] sm:$0xf]  ;;  %v10080_v39 = vor.u32 %v12495_v1, %v10077_v50 }
 0x234   : > { %3161 = vst [vmem:[#allocation1 + $0x1b] sm:$0xff] %v15262_v3  ;;  %v12626_v3 = vld [vmem:[%s18503_s3 + $0x4a8] sm:$0xf0]  ;;  %v12481_v50 = vld [vmem:[%s18503_s3 + $0x20] sm:$0xf0] }
 0x235   : > { %3156 = vst.msk [vmem:[#allocation2 + $0x23] ss:$8 sm:$0xf] %vm15266_vm8, %v3153_v53  ;;  %v9997_v14 = vor.u32 %v12626_v3, %v9996_v54  ;;  %v10076_v53 = vor.u32 %v12496_v48, %v10075_v47  ;;  %v12557_v54 = vld [vmem:[%s18503_s3 + $0x280] sm:$0xf0] }
 0x236   : > { %v10063_v3 = vld [vmem:[%s18503_s3 + $0x78] sm:$0xf]  ;;  %v12517_v47 = vld [vmem:[%s18503_s3 + $0x140] sm:$0xf0] }
 0x23b   : > { %v3163_v15 = vld [vmem:[#allocation1 + $0x7] ss:$9 sm:$0xff] }
 0x23c   : > { %3166 = vst.msk [vmem:[#allocation2 + $0x4] ss:$8 sm:$0xf] %vm15266_vm8, %v3163_v15  ;;  %v3276_v61 = vld [vmem:[#allocation2 + $0x20] sm:$0xf] }
 0x23d   : > { %v15633_v62 = vpack.c.bf16 %v3276_v61, %v3276_v61  ;;  %v3277_v37 = vld [vmem:[#allocation2 + $0x28] sm:$0xf]  ;;  %v3278_v0 = vld [vmem:[#allocation2 + $0x30] sm:$0xf]  ;;  %v3279_v5 = vld [vmem:[#allocation2 + $0x38] sm:$0xf]  ;;  %v9717_v61 = vor.u32 %v12555_v57, %v9714_v63 }
 0x23e   : > { %v15635_v4 = vpack.c.bf16 %v3277_v37, %v3277_v37  ;;  %v3282_v60 = vpack.c.bf16 %v3278_v0, %v3278_v0  ;;  %v15700_v10 = vpack.c.bf16 %v3279_v5, %v3279_v5  ;;  %v12493_v15 = vld [vmem:[%s18503_s3 + $0x80] sm:$0xf0]  ;;  %v12552_v37 = vld [vmem:[%s18503_s3 + $0x25c] sm:$0xf]  ;;  %v9721_v0 = vor.u32 %v12557_v54, %v9720_v17  ;;  %v9852_v57 = vld [vmem:[%s18503_s3 + $0x380] sm:$0xf] }
 0x23f   : > { %3797 = vmatmul.bf16.vlgmr.msra.gmra.mxu3 %v15633_v62  ;;  %v12596_v5 = vld [vmem:[%s18503_s3 + $0x3b8] sm:$0xf0]  ;;  %v12590_v63 = vld [vmem:[%s18503_s3 + $0x388] sm:$0xf0]  ;;  %v10147_v17 = vld [vmem:[%s18503_s3 + $0x120] sm:$0xf] }
 0x240   : > { %3810 = vmatmul.bf16.vlgmr.msra.gmra.mxu1 %v15635_v4  ;;  %3823 = vmatmul.bf16.vlgmr.msra.gmra.mxu2 %v3282_v60  ;;  %v9853_v59 = vor.u32 %v12590_v63, %v9852_v57  ;;  %v10279_v57 = vld [vmem:[%s18503_s3 + $0x228] sm:$0xf]  ;;  %v12547_v63 = vld [vmem:[%s18503_s3 + $0x230] sm:$0xf0] }
 0x241   : > { %3841 = vmatpush.bf16.msra.mxu3 %v9789_v41  ;;  %3862 = vmatmul.bf16.vlgmr.msra.gmra.mxu0 %v15635_v4  ;;  %v10064_v41 = vor.u32 %v12493_v15, %v10063_v3  ;;  %v10003_v3 = vld [vmem:[%s18503_s3] sm:$0xf] }
 0x242   : > { %3893 = vmatpush.bf16.msra.mxu2 %v9793_v30  ;;  %3939 = vmatpush.bf16.msra.mxu1 %v9997_v14  ;;  %v9708_v30 = vld [vmem:[%s18503_s3 + $0x260] sm:$0xf] }
 0x243   : > { %4394 = vmatpush.bf16.msra.mxu0 %v10292_v12  ;;  %v10051_v14 = vld [vmem:[%s18503_s3 + $0x60] sm:$0xf]  ;;  %v10053_v12 = vld [vmem:[%s18503_s3 + $0x6c] sm:$0xf0]  ;;  %v9709_v19 = vor.u32 %v12554_v7, %v9708_v30  ;;  %v10135_v30 = vld [vmem:[%s18503_s3 + $0x108] sm:$0xf] }
 0x244   : > { %v12511_v7 = vld [vmem:[%s18503_s3 + $0x110] sm:$0xf0] }
 0x245   : > { %3842 = vmatpush.bf16.msra.mxu3 %v9777_v29  ;;  %v9888_v29 = vld [vmem:[%s18503_s3 + $0x3c8] sm:$0xf] }
 0x246   : > { %3894 = vmatpush.bf16.msra.mxu2 %v9781_v6  ;;  %v12599_v6 = vld [vmem:[%s18503_s3 + $0x3d0] sm:$0xf0] }
 0x247   : > { %v9889_v20 = vor.u32 %v12599_v6, %v9888_v29 }
 0x249   : > { %3843 = vmatpush.bf16.msra.mxu3 %v9765_v52  ;;  %v10052_v52 = vor.u32 %v12490_v2, %v10051_v14  ;;  %v10185_v14 = vld [vmem:[%s18503_s3 + $0x174] sm:$0xf0]  ;;  %v10004_v2 = vor.u32 %v12478_v49, %v10003_v3 }
 0x24a   : > { %3895 = vmatpush.bf16.msra.mxu2 %v9769_v40  ;;  %v10056_v40 = vor.u32 %v12489_v8, %v10053_v12  ;;  %v10191_v8 = vld [vmem:[%s18503_s3 + $0x170] sm:$0xf]  ;;  %v12524_v12 = vld [vmem:[%s18503_s3 + $0x178] sm:$0xf0] }
 0x24d   : > { %3844 = vmatpush.bf16.msra.mxu3 %v9753_v24  ;;  %v10184_v24 = vor.u32 %v12523_v18, %v10183_v9  ;;  %v10136_v9 = vor.u32 %v12511_v7, %v10135_v30  ;;  %v12512_v30 = vld [vmem:[%s18503_s3 + $0x118] sm:$0xf0]  ;;  %v10267_v7 = vld [vmem:[%s18503_s3 + $0x210] sm:$0xf] }
 0x24e   : > { %3896 = vmatpush.bf16.msra.mxu2 %v9757_v55  ;;  %v9876_v55 = vld [vmem:[%s18503_s3 + $0x3b0] sm:$0xf] }
 0x24f   : > { %9998 = vmatmul.msk.bf16.vlgmr.msrb.gmra.mxu3 %vm3785_vm9, %v15700_v10  ;;  %v9877_v32 = vor.u32 %v12596_v5, %v9876_v55 }
 0x250   : > { %3875 = vmatmul.bf16.vlgmr.msrb.gmra.mxu1 %v3282_v60  ;;  %9999 = vmatmul.msk.bf16.vlgmr.msrb.gmra.mxu2 %vm3785_vm9, %v15700_v10 }
 0x251   : > { %3845 = vmatpush.bf16.msra.mxu3 %v9741_v34  ;;  %3927 = vmatmul.bf16.vlgmr.msrb.gmra.mxu0 %v3282_v60  ;;  %v9702_v60 = vld [vmem:[%s18503_s3 + $0x264] sm:$0xf0]  ;;  %v12484_v34 = vld [vmem:[%s18503_s3 + $0x38] sm:$0xf0] }
 0x252   : > { %3897 = vmatpush.bf16.msra.mxu2 %v9745_v35  ;;  %4348 = vmatpush.bf16.msrb.mxu1 %v10088_v36  ;;  %v9705_v13 = vor.u32 %v12552_v37, %v9702_v60  ;;  %v12483_v35 = vld [vmem:[%s18503_s3 + $0x34] sm:$0xf]  ;;  %v15824_v36 = vpack.c.bf16 %v3171_v25, %v3171_v25  ;;  %v10028_v48 = vor.u32 %v12484_v34, %v10027_v33  ;;  %v10005_v37 = vld [vmem:[%s18503_s3 + $0xc] sm:$0xf0]  ;;  %v12505_v33 = vld [vmem:[%s18503_s3 + $0xe0] sm:$0xf0] }
 0x253   : > { %4400 = vmatpush.bf16.msrb.mxu0 %v10092_v44  ;;  %v12593_v44 = vld [vmem:[%s18503_s3 + $0x3a0] sm:$0xf0]  ;;  %v10032_v1 = vor.u32 %v12483_v35, %v10029_v42  ;;  %v12587_v60 = vld [vmem:[%s18503_s3 + $0x370] sm:$0xf0]  ;;  %v12516_v34 = vld [vmem:[%s18503_s3 + $0x13c] sm:$0xf] }
 0x254   : > { %v10161_v35 = vld [vmem:[%s18503_s3 + $0x144] sm:$0xf0]  ;;  %v12518_v42 = vld [vmem:[%s18503_s3 + $0x148] sm:$0xf0] }
 0x255   : > { %3846 = vmatpush.bf16.msra.mxu3 %v9729_v16  ;;  %v12480_v16 = vld [vmem:[%s18503_s3 + $0x1c] sm:$0xf] }
 0x256   : > { %3898 = vmatpush.bf16.msra.mxu2 %v9733_v51  ;;  %4349 = vmatpush.bf16.msrb.mxu1 %v10076_v53  ;;  %v10160_v51 = vor.u32 %v12517_v47, %v10159_v46  ;;  %v10017_v53 = vld [vmem:[%s18503_s3 + $0x24] sm:$0xf0]  ;;  %v10164_v47 = vor.u32 %v12516_v34, %v10161_v35  ;;  %v12501_v35 = vld [vmem:[%s18503_s3 + $0xc4] sm:$0xf] }
 0x257   : > { %4401 = vmatpush.bf16.msrb.mxu0 %v10080_v39  ;;  %v12514_v39 = vld [vmem:[%s18503_s3 + $0x128] sm:$0xf0]  ;;  %v10020_v15 = vor.u32 %v12480_v16, %v10017_v53  ;;  %v10149_v16 = vld [vmem:[%s18503_s3 + $0x12c] sm:$0xf0]  ;;  %v12515_v53 = vld [vmem:[%s18503_s3 + $0x130] sm:$0xf0] }
 0x259   : > { %3847 = vmatpush.bf16.msra.mxu3 %v9717_v61  ;;  %v12477_v61 = vld [vmem:[%s18503_s3 + $0x4] sm:$0xf] }
 0x25a   : > { %3899 = vmatpush.bf16.msra.mxu2 %v9721_v0  ;;  %4350 = vmatpush.bf16.msrb.mxu1 %v10064_v41  ;;  %v10148_v0 = vor.u32 %v12514_v39, %v10147_v17  ;;  %v9840_v41 = vld [vmem:[%s18503_s3 + $0x368] sm:$0xf]  ;;  %v10008_v29 = vor.u32 %v12477_v61, %v10005_v37  ;;  %v12546_v39 = vld [vmem:[%s18503_s3 + $0x22c] sm:$0xf]  ;;  %v10280_v61 = vor.u32 %v12547_v63, %v10279_v57  ;;  %v12697_v57 = vld [vmem:[%s18503_s3 + $0x6e0] sm:$0xf0] }
 0x25b   : > { %4402 = vmatpush.bf16.msrb.mxu0 %v10068_v58  ;;  %v12522_v58 = vld [vmem:[%s18503_s3 + $0x16c] sm:$0xf]  ;;  %v9841_v6 = vor.u32 %v12587_v60, %v9840_v41  ;;  %v10143_v41 = vld [vmem:[%s18503_s3 + $0x110] sm:$0xf] }
 0x25c   : > { %v10188_v18 = vor.u32 %v12522_v58, %v10185_v14  ;;  %v12510_v37 = vld [vmem:[%s18503_s3 + $0x10c] sm:$0xf]  ;;  %v12544_v58 = vld [vmem:[%s18503_s3 + $0x218] sm:$0xf0]  ;;  %v12543_v14 = vld [vmem:[%s18503_s3 + $0x214] sm:$0xf] }
 0x25d   : > { %3848 = vmatpush.bf16.msra.mxu3 %v9705_v13  ;;  %v3168_v13 = vld [vmem:[#allocation2] sm:$0xf] }
 0x25e   : > { %3900 = vmatpush.bf16.msra.mxu2 %v9709_v19  ;;  %4351 = vmatpush.bf16.msrb.mxu1 %v10052_v52  ;;  %v9828_v19 = vld [vmem:[%s18503_s3 + $0x350] sm:$0xf]  ;;  %v12584_v52 = vld [vmem:[%s18503_s3 + $0x358] sm:$0xf0]  ;;  %v15930_v55 = vpack.c.bf16 %v3168_v13, %v3168_v13  ;;  %v12507_v13 = vld [vmem:[%s18503_s3 + $0xf4] sm:$0xf] }
 0x25f   : > { %4403 = vmatpush.bf16.msrb.mxu0 %v10056_v40  ;;  %v10123_v40 = vld [vmem:[%s18503_s3 + $0xf0] sm:$0xf]  ;;  %v9829_v5 = vor.u32 %v12584_v52, %v9828_v19  ;;  %v12509_v52 = vld [vmem:[%s18503_s3 + $0x100] sm:$0xf0] }
 0x260   : > { %3849 = vmatmul.bf16.vlgmr.msra.gmra.mxu3 %v15633_v62  ;;  %10000 = vmatmul.msk.bf16.vlgmr.msra.gmra.mxu1 %vm3785_vm9, %v15700_v10  ;;  %v10015_v10 = vld [vmem:[%s18503_s3 + $0x18] sm:$0xf]  ;;  %v10124_v25 = vor.u32 %v12508_v21, %v10123_v40  ;;  %v12540_v21 = vld [vmem:[%s18503_s3 + $0x1fc] sm:$0xf] }
 0x261   : > { %3906 = vmatpush.bf16.msrb.mxu3 %v9889_v20  ;;  %3901 = vmatmul.bf16.vlgmr.msra.gmra.mxu2 %v15633_v62  ;;  %v9865_v62 = vor.u32 %v12593_v44, %v9864_v43  ;;  %v10016_v54 = vor.u32 %v12481_v50, %v10015_v10  ;;  %v10192_v20 = vor.u32 %v12524_v12, %v10191_v8  ;;  %v9804_v44 = vld [vmem:[%s18503_s3 + $0x320] sm:$0xf]  ;;  %v12513_v50 = vld [vmem:[%s18503_s3 + $0x124] sm:$0xf]  ;;  %v10255_v40 = vld [vmem:[%s18503_s3 + $0x1f8] sm:$0xf] }
 0x262   : > { %4361 = vmatpush.bf16.msrb.mxu2 %v10184_v24  ;;  %4352 = vmatpush.bf16.msrb.mxu1 %v10040_v28  ;;  %v10179_v24 = vld [vmem:[%s18503_s3 + $0x158] sm:$0xf]  ;;  %v12581_v28 = vld [vmem:[%s18503_s3 + $0x340] sm:$0xf0] }
 0x263   : > { %10301 = vmatmul.msk.bf16.vlgmr.msra.gmra.mxu0 %vm3785_vm9, %v15824_v36  ;;  %v9817_v43 = vor.u32 %v12581_v28, %v9816_v27  ;;  %v12506_v27 = vld [vmem:[%s18503_s3 + $0xe8] sm:$0xf0]  ;;  %v10243_v28 = vld [vmem:[%s18503_s3 + $0x1e0] sm:$0xf] }
 0x264   : > { %4404 = vmatpush.bf16.msrb.mxu0 %v10044_v31  ;;  %v10111_v31 = vld [vmem:[%s18503_s3 + $0xd8] sm:$0xf] }
 0x265   : > { %3907 = vmatpush.bf16.msrb.mxu3 %v9877_v32  ;;  %v10180_v32 = vor.u32 %v12521_v56, %v10179_v24  ;;  %v10112_v46 = vor.u32 %v12505_v33, %v10111_v31  ;;  %v12504_v56 = vld [vmem:[%s18503_s3 + $0xdc] sm:$0xf]  ;;  %v12538_v31 = vld [vmem:[%s18503_s3 + $0x1e8] sm:$0xf0]  ;;  %v10245_v33 = vld [vmem:[%s18503_s3 + $0x1ec] sm:$0xf0] }
 0x266   : > { %4362 = vmatpush.bf16.msrb.mxu2 %v10172_v38  ;;  %4353 = vmatpush.bf16.msrb.mxu1 %v10028_v48  ;;  %v10167_v38 = vld [vmem:[%s18503_s3 + $0x140] sm:$0xf]  ;;  %v12578_v48 = vld [vmem:[%s18503_s3 + $0x328] sm:$0xf0] }
 0x267   : > { %v10168_v10 = vor.u32 %v12518_v42, %v10167_v38  ;;  %v9805_v17 = vor.u32 %v12578_v48, %v9804_v44  ;;  %v10244_v42 = vor.u32 %v12538_v31, %v10243_v28  ;;  %v10107_v44 = vld [vmem:[%s18503_s3 + $0xc8] sm:$0xf]  ;;  %v3170_v31 = vld [vmem:[#allocation2 + $0x10] sm:$0xf] }
 0x268   : > { %4405 = vmatpush.bf16.msrb.mxu0 %v10032_v1  ;;  %v10099_v1 = vld [vmem:[%s18503_s3 + $0xc0] sm:$0xf]  ;;  %v10231_v48 = vld [vmem:[%s18503_s3 + $0x1c8] sm:$0xf] }
 0x269   : > { %3908 = vmatpush.bf16.msrb.mxu3 %v9865_v62  ;;  %v12502_v62 = vld [vmem:[%s18503_s3 + $0xc8] sm:$0xf0] }
 0x26a   : > { %4363 = vmatpush.bf16.msrb.mxu2 %v10160_v51  ;;  %4354 = vmatpush.bf16.msrb.mxu1 %v10016_v54  ;;  %v10155_v51 = vld [vmem:[%s18503_s3 + $0x128] sm:$0xf]  ;;  %v10281_v54 = vld [vmem:[%s18503_s3 + $0x234] sm:$0xf0]  ;;  %v10100_v3 = vor.u32 %v12502_v62, %v10099_v1  ;;  %v12535_v1 = vld [vmem:[%s18503_s3 + $0x1d0] sm:$0xf0] }
 0x26b   : > { %v10156_v49 = vor.u32 %v12515_v53, %v10155_v51  ;;  %v10284_v60 = vor.u32 %v12546_v39, %v10281_v54  ;;  %v12534_v62 = vld [vmem:[%s18503_s3 + $0x1cc] sm:$0xf]  ;;  %v10682_v53 = vld [vmem:[%s18503_s3 + $0x6d8] sm:$0xf] }
 0x26c   : > { %4406 = vmatpush.bf16.msrb.mxu0 %v10020_v15  ;;  %v10152_v15 = vor.u32 %v12513_v50, %v10149_v16  ;;  %v10287_v50 = vld [vmem:[%s18503_s3 + $0x230] sm:$0xf]  ;;  %v12548_v16 = vld [vmem:[%s18503_s3 + $0x238] sm:$0xf0] }
 0x26d   : > { %3909 = vmatpush.bf16.msrb.mxu3 %v9853_v59  ;;  %v3169_v59 = vld [vmem:[#allocation2 + $0x8] sm:$0xf]  ;;  %v10288_v54 = vor.u32 %v12548_v16, %v10287_v50  ;;  %v12685_v50 = vld [vmem:[%s18503_s3 + $0x680] sm:$0xf0] }
 0x26e   : > { %4364 = vmatpush.bf16.msrb.mxu2 %v10148_v0  ;;  %4355 = vmatpush.bf16.msrb.mxu1 %v10004_v2  ;;  %v10137_v0 = vld [vmem:[%s18503_s3 + $0x114] sm:$0xf0]  ;;  %v10269_v2 = vld [vmem:[%s18503_s3 + $0x21c] sm:$0xf0]  ;;  %v16018_v12 = vpack.c.bf16 %v3169_v59, %v3169_v59  ;;  %v12531_v59 = vld [vmem:[%s18503_s3 + $0x1b4] sm:$0xf] }
 0x26f   : > { %v10140_v8 = vor.u32 %v12510_v37, %v10137_v0  ;;  %v10272_v19 = vor.u32 %v12543_v14, %v10269_v2  ;;  %v10275_v37 = vld [vmem:[%s18503_s3 + $0x218] sm:$0xf]  ;;  %v12545_v0 = vld [vmem:[%s18503_s3 + $0x220] sm:$0xf0] }
 0x270   : > { %4407 = vmatpush.bf16.msrb.mxu0 %v10008_v29  ;;  %v10144_v29 = vor.u32 %v12512_v30, %v10143_v41  ;;  %v10670_v41 = vld [vmem:[%s18503_s3 + $0x6c0] sm:$0xf]  ;;  %v10207_v14 = vld [vmem:[%s18503_s3 + $0x198] sm:$0xf]  ;;  %v12529_v2 = vld [vmem:[%s18503_s3 + $0x1a0] sm:$0xf0] }
 0x271   : > { %3910 = vmatpush.bf16.msrb.mxu3 %v9841_v6  ;;  %4356 = vmatmul.bf16.vlgmr.msrb.gmra.mxu1 %v15930_v55  ;;  %v10268_v6 = vor.u32 %v12544_v58, %v10267_v7  ;;  %v10276_v58 = vor.u32 %v12545_v0, %v10275_v37  ;;  %v12682_v37 = vld [vmem:[%s18503_s3 + $0x668] sm:$0xf0] }
 0x272   : > { %4365 = vmatpush.bf16.msrb.mxu2 %v10136_v9  ;;  %4413 = vmatpush.bf16.msra.mxu1 %v10188_v18  ;;  %v10125_v9 = vld [vmem:[%s18503_s3 + $0xfc] sm:$0xf0]  ;;  %v10131_v18 = vld [vmem:[%s18503_s3 + $0xf8] sm:$0xf] }
 0x273   : > { %4408 = vmatmul.bf16.vlgmr.msrb.gmra.mxu0 %v15930_v55  ;;  %v10128_v22 = vor.u32 %v12507_v13, %v10125_v9  ;;  %v10132_v23 = vor.u32 %v12509_v52, %v10131_v18  ;;  %v10263_v13 = vld [vmem:[%s18503_s3 + $0x200] sm:$0xf]  ;;  %v12542_v9 = vld [vmem:[%s18503_s3 + $0x208] sm:$0xf0]  ;;  %v10658_v18 = vld [vmem:[%s18503_s3 + $0x6a8] sm:$0xf]  ;;  %v10208_v52 = vor.u32 %v12529_v2, %v10207_v14 }
 0x274   : > { %4465 = vmatpush.bf16.msra.mxu0 %v10192_v20  ;;  %v12541_v20 = vld [vmem:[%s18503_s3 + $0x200] sm:$0xf0]  ;;  %v10215_v14 = vld [vmem:[%s18503_s3 + $0x1a0] sm:$0xf] }
 0x275   : > { %3911 = vmatpush.bf16.msrb.mxu3 %v9829_v5  ;;  %v10256_v24 = vor.u32 %v12541_v20, %v10255_v40  ;;  %v10113_v5 = vld [vmem:[%s18503_s3 + $0xe4] sm:$0xf0]  ;;  %v10195_v40 = vld [vmem:[%s18503_s3 + $0x180] sm:$0xf] }
 0x276   : > { %4366 = vmatpush.bf16.msrb.mxu2 %v10124_v25  ;;  %4414 = vmatpush.bf16.msra.mxu1 %v10176_v26  ;;  %v10119_v25 = vld [vmem:[%s18503_s3 + $0xe0] sm:$0xf]  ;;  %v10116_v34 = vor.u32 %v12504_v56, %v10113_v5  ;;  %v12539_v56 = vld [vmem:[%s18503_s3 + $0x1f0] sm:$0xf0]  ;;  %v10646_v5 = vld [vmem:[%s18503_s3 + $0x690] sm:$0xf] }
 0x277   : > { %v10120_v38 = vor.u32 %v12506_v27, %v10119_v25  ;;  %v12688_v25 = vld [vmem:[%s18503_s3 + $0x698] sm:$0xf0]  ;;  %v10293_v27 = vld [vmem:[%s18503_s3 + $0x24c] sm:$0xf0] }
 0x278   : > { %4466 = vmatpush.bf16.msra.mxu0 %v10180_v32  ;;  %v12537_v32 = vld [vmem:[%s18503_s3 + $0x1e4] sm:$0xf] }
 0x279   : > { %3912 = vmatpush.bf16.msrb.mxu3 %v9817_v43  ;;  %v10101_v43 = vld [vmem:[%s18503_s3 + $0xcc] sm:$0xf0] }
 0x27a   : > { %4367 = vmatpush.bf16.msrb.mxu2 %v10112_v46  ;;  %4415 = vmatpush.bf16.msra.mxu1 %v10164_v47  ;;  %v12503_v46 = vld [vmem:[%s18503_s3 + $0xd0] sm:$0xf0]  ;;  %v10248_v47 = vor.u32 %v12537_v32, %v10245_v33  ;;  %v10104_v51 = vor.u32 %v12501_v35, %v10101_v43  ;;  %v10299_v32 = vld [vmem:[%s18503_s3 + $0x248] sm:$0xf]  ;;  %v10239_v43 = vld [vmem:[%s18503_s3 + $0x1d0] sm:$0xf] }
 0x27b   : > { %v10108_v63 = vor.u32 %v12503_v46, %v10107_v44  ;;  %v12551_v33 = vld [vmem:[%s18503_s3 + $0x250] sm:$0xf0]  ;;  %v10647_v44 = vor.u32 %v12688_v25, %v10646_v5  ;;  %v12676_v5 = vld [vmem:[%s18503_s3 + $0x638] sm:$0xf0]  ;;  %v10694_v25 = vld [vmem:[%s18503_s3 + $0x6f0] sm:$0xf] }
 0x27c   : > { %4467 = vmatpush.bf16.msra.mxu0 %v10168_v10  ;;  %v10233_v10 = vld [vmem:[%s18503_s3 + $0x1d4] sm:$0xf0] }
 0x27d   : > { %3913 = vmatpush.bf16.msrb.mxu3 %v9805_v17  ;;  %v10232_v17 = vor.u32 %v12535_v1, %v10231_v48  ;;  %v10236_v39 = vor.u32 %v12534_v62, %v10233_v10  ;;  %v10490_v48 = vld [vmem:[%s18503_s3 + $0x558] sm:$0xf]  ;;  %v12649_v1 = vld [vmem:[%s18503_s3 + $0x560] sm:$0xf0]  ;;  %v10300_v62 = vor.u32 %v12551_v33, %v10299_v32 }
 0x27e   : > { %4368 = vmatpush.bf16.msrb.mxu2 %v10100_v3  ;;  %4416 = vmatpush.bf16.msra.mxu1 %v10152_v15  ;;  %v10219_v3 = vld [vmem:[%s18503_s3 + $0x1b0] sm:$0xf]  ;;  %v12532_v15 = vld [vmem:[%s18503_s3 + $0x1b8] sm:$0xf0]  ;;  %v10634_v10 = vld [vmem:[%s18503_s3 + $0x678] sm:$0xf] }
 0x27f   : > { %v10220_v30 = vor.u32 %v12532_v15, %v10219_v3  ;;  %v10635_v3 = vor.u32 %v12685_v50, %v10634_v10  ;;  %v12533_v15 = vld [vmem:[%s18503_s3 + $0x1c0] sm:$0xf0]  ;;  %v12650_v10 = vld [vmem:[%s18503_s3 + $0x568] sm:$0xf0] }
 0x280   : > { %4468 = vmatpush.bf16.msra.mxu0 %v10156_v49  ;;  %3914 = vmatmul.bf16.vlgmr.msrb.gmra.mxu3 %v15635_v4  ;;  %v10257_v4 = vld [vmem:[%s18503_s3 + $0x204] sm:$0xf0]  ;;  %v10683_v49 = vor.u32 %v12697_v57, %v10682_v53  ;;  %v16216_v53 = vpack.c.bf16 %v3170_v31, %v3170_v31  ;;  %v10696_v31 = vld [vmem:[%s18503_s3 + $0x6fc] sm:$0xf0] }
 0x281   : > { %4374 = vmatpush.bf16.msra.mxu3 %v10280_v61  ;;  %4369 = vmatmul.bf16.vlgmr.msrb.gmra.mxu2 %v16018_v12  ;;  %v10260_v26 = vor.u32 %v12540_v21, %v10257_v4  ;;  %v10221_v61 = vld [vmem:[%s18503_s3 + $0x1bc] sm:$0xf0]  ;;  %v10264_v21 = vor.u32 %v12542_v9, %v10263_v13  ;;  %v12525_v4 = vld [vmem:[%s18503_s3 + $0x184] sm:$0xf]  ;;  %v10610_v13 = vld [vmem:[%s18503_s3 + $0x648] sm:$0xf] }
 0x282   : > { %4426 = vmatpush.bf16.msra.mxu2 %v10284_v60  ;;  %4417 = vmatpush.bf16.msra.mxu1 %v10140_v8  ;;  %v12694_v60 = vld [vmem:[%s18503_s3 + $0x6c8] sm:$0xf0]  ;;  %v10224_v7 = vor.u32 %v12531_v59, %v10221_v61  ;;  %v12528_v8 = vld [vmem:[%s18503_s3 + $0x19c] sm:$0xf]  ;;  %v10478_v59 = vld [vmem:[%s18503_s3 + $0x540] sm:$0xf] }
 0x283   : > { %v10622_v61 = vld [vmem:[%s18503_s3 + $0x660] sm:$0xf]  ;;  %v12679_v9 = vld [vmem:[%s18503_s3 + $0x650] sm:$0xf0] }
 0x284   : > { %4469 = vmatpush.bf16.msra.mxu0 %v10144_v29  ;;  %v10671_v29 = vor.u32 %v12694_v60, %v10670_v41  ;;  %v10623_v2 = vor.u32 %v12682_v37, %v10622_v61  ;;  %v12645_v61 = vld [vmem:[%s18503_s3 + $0x544] sm:$0xf]  ;;  %v10480_v37 = vld [vmem:[%s18503_s3 + $0x54c] sm:$0xf0] }
 0x285   : > { %4375 = vmatpush.bf16.msra.mxu3 %v10268_v6  ;;  %v10209_v6 = vld [vmem:[%s18503_s3 + $0x1a4] sm:$0xf0] }
 0x286   : > { %4427 = vmatpush.bf16.msra.mxu2 %v10272_v19  ;;  %4418 = vmatpush.bf16.msra.mxu1 %v10128_v22  ;;  %v12691_v19 = vld [vmem:[%s18503_s3 + $0x6b0] sm:$0xf0]  ;;  %v10212_v20 = vor.u32 %v12528_v8, %v10209_v6  ;;  %v10197_v22 = vld [vmem:[%s18503_s3 + $0x18c] sm:$0xf0]  ;;  %v12530_v8 = vld [vmem:[%s18503_s3 + $0x1a8] sm:$0xf0] }
 0x287   : > { %v12643_v6 = vld [vmem:[%s18503_s3 + $0x530] sm:$0xf0] }
 0x288   : > { %4470 = vmatpush.bf16.msra.mxu0 %v10132_v23  ;;  %v10659_v23 = vor.u32 %v12691_v19, %v10658_v18  ;;  %v10059_v19 = vld [vmem:[%s18503_s3 + $0x68] sm:$0xf] }
 0x289   : > { %4376 = vmatpush.bf16.msra.mxu3 %v10256_v24  ;;  %v10251_v24 = vld [vmem:[%s18503_s3 + $0x1e8] sm:$0xf] }
 0x28a   : > { %4428 = vmatpush.bf16.msra.mxu2 %v10260_v26  ;;  %4419 = vmatpush.bf16.msra.mxu1 %v10116_v34  ;;  %v12549_v26 = vld [vmem:[%s18503_s3 + $0x244] sm:$0xf]  ;;  %v10200_v34 = vor.u32 %v12525_v4, %v10197_v22  ;;  %v10252_v35 = vor.u32 %v12539_v56, %v10251_v24  ;;  %v12527_v4 = vld [vmem:[%s18503_s3 + $0x190] sm:$0xf0]  ;;  %v10611_v22 = vor.u32 %v12679_v9, %v10610_v13  ;;  %v12640_v24 = vld [vmem:[%s18503_s3 + $0x518] sm:$0xf0] }
 0x28b   : > { %v10296_v46 = vor.u32 %v12549_v26, %v10293_v27  ;;  %v10598_v56 = vld [vmem:[%s18503_s3 + $0x630] sm:$0xf]  ;;  %v12700_v26 = vld [vmem:[%s18503_s3 + $0x6f8] sm:$0xf0]  ;;  %v10468_v13 = vld [vmem:[%s18503_s3 + $0x534] sm:$0xf0] }
 0x28c   : > { %4471 = vmatpush.bf16.msra.mxu0 %v10120_v38  ;;  %v10095_v38 = vld [vmem:[%s18503_s3 + $0xb0] sm:$0xf] }
 0x28d   : > { %4377 = vmatpush.bf16.msra.mxu3 %v10244_v42  ;;  %v12500_v42 = vld [vmem:[%s18503_s3 + $0xb8] sm:$0xf0]  ;;  %v10474_v9 = vld [vmem:[%s18503_s3 + $0x530] sm:$0xf] }
 0x28e   : > { %4429 = vmatpush.bf16.msra.mxu2 %v10248_v47  ;;  %4420 = vmatpush.bf16.msra.mxu1 %v10104_v51  ;;  %v12536_v47 = vld [vmem:[%s18503_s3 + $0x1d8] sm:$0xf0]  ;;  %v10096_v16 = vor.u32 %v12500_v42, %v10095_v38  ;;  %v10695_v38 = vor.u32 %v12700_v26, %v10694_v25  ;;  %v10047_v42 = vld [vmem:[%s18503_s3 + $0x50] sm:$0xf]  ;;  %v10462_v25 = vld [vmem:[%s18503_s3 + $0x518] sm:$0xf] }
 0x28f   : > { %v4506_v51 = vld [vmem:[#allocation2 + $0x10] sm:$0x1e]  ;;  %v10240_v57 = vor.u32 %v12536_v47, %v10239_v43  ;;  %v12637_v47 = vld [vmem:[%s18503_s3 + $0x500] sm:$0xf0] }
 0x290   : > { %4472 = vmatpush.bf16.msra.mxu0 %v10108_v63  ;;  %v10491_v63 = vor.u32 %v12649_v1, %v10490_v48  ;;  %v16244_v41 = vpack.c.bf16 %v4506_v51, %v4506_v51  ;;  %v12488_v43 = vld [vmem:[%s18503_s3 + $0x58] sm:$0xf0]  ;;  %v10492_v1 = vld [vmem:[%s18503_s3 + $0x564] sm:$0xf0]  ;;  %v12641_v26 = vld [vmem:[%s18503_s3 + $0x520] sm:$0xf0] }
 0x291   : > { %4378 = vmatpush.bf16.msra.mxu3 %v10232_v17  ;;  %4421 = vmatmul.bf16.vlgmr.msra.gmra.mxu1 %v16018_v12  ;;  %v10083_v17 = vld [vmem:[%s18503_s3 + $0x98] sm:$0xf]  ;;  %v12648_v48 = vld [vmem:[%s18503_s3 + $0x55c] sm:$0xf]  ;;  %v4504_v51 = vld [vmem:[#allocation2] sm:$0x1e] }
 0x292   : > { %4430 = vmatpush.bf16.msra.mxu2 %v10236_v39  ;;  %4478 = vmatpush.bf16.msrb.mxu1 %v10288_v54  ;;  %v12497_v39 = vld [vmem:[%s18503_s3 + $0xa0] sm:$0xf0]  ;;  %v10227_v54 = vld [vmem:[%s18503_s3 + $0x1b8] sm:$0xf]  ;;  %v4628_v50 = vshrl.u32 %v16244_v41, 16 }
 0x293   : > { %4473 = vmatmul.bf16.vlgmr.msra.gmra.mxu0 %v16018_v12  ;;  %v12526_v12 = vld [vmem:[%s18503_s3 + $0x188] sm:$0xf0]  ;;  %v10084_v0 = vor.u32 %v12497_v39, %v10083_v17  ;;  %v10228_v60 = vor.u32 %v12533_v15, %v10227_v54  ;;  %v10495_v17 = vor.u32 %v12648_v48, %v10492_v1  ;;  %v10035_v39 = vld [vmem:[%s18503_s3 + $0x38] sm:$0xf]  ;;  %v12485_v54 = vld [vmem:[%s18503_s3 + $0x40] sm:$0xf0] }
 0x294   : > { %5073 = vmatpush.bf16.msrb.mxu0 %v10683_v49  ;;  %v10196_v28 = vor.u32 %v12526_v12, %v10195_v40  ;;  %v12646_v49 = vld [vmem:[%s18503_s3 + $0x548] sm:$0xf0]  ;;  %v10216_v40 = vor.u32 %v12530_v8, %v10215_v14  ;;  %v10203_v12 = vld [vmem:[%s18503_s3 + $0x188] sm:$0xf]  ;;  %v10450_v1 = vld [vmem:[%s18503_s3 + $0x500] sm:$0xf] }
 0x295   : > { %4379 = vmatpush.bf16.msra.mxu3 %v10220_v30  ;;  %v10479_v30 = vor.u32 %v12646_v49, %v10478_v59  ;;  %v10204_v32 = vor.u32 %v12527_v4, %v10203_v12  ;;  %v12634_v49 = vld [vmem:[%s18503_s3 + $0x4e8] sm:$0xf0]  ;;  %v12479_v4 = vld [vmem:[%s18503_s3 + $0x10] sm:$0xf0]  ;;  %v10444_v48 = vld [vmem:[%s18503_s3 + $0x504] sm:$0xf0] }
 0x296   : > { %4431 = vmatpush.bf16.msra.mxu2 %v10224_v7  ;;  %4479 = vmatpush.bf16.msrb.mxu1 %v10276_v58  ;;  %v10071_v7 = vld [vmem:[%s18503_s3 + $0x80] sm:$0xf]  ;;  %v12494_v58 = vld [vmem:[%s18503_s3 + $0x88] sm:$0xf0] }
 0x297   : > { %v10072_v18 = vor.u32 %v12494_v58, %v10071_v7  ;;  %v10023_v58 = vld [vmem:[%s18503_s3 + $0x20] sm:$0xf]  ;;  %v12482_v14 = vld [vmem:[%s18503_s3 + $0x28] sm:$0xf0] }
 0x298   : > { %5074 = vmatpush.bf16.msrb.mxu0 %v10671_v29  ;;  %v10466_v29 = vld [vmem:[%s18503_s3 + $0x528] sm:$0xf] }
 0x299   : > { %4380 = vmatpush.bf16.msra.mxu3 %v10208_v52  ;;  %v4630_v52 = vshll.u32 %v16244_v41, 16  ;;  %v12647_v41 = vld [vmem:[%s18503_s3 + $0x550] sm:$0xf0] }
 0x29a   : > { %4432 = vmatpush.bf16.msra.mxu2 %v10212_v20  ;;  %4480 = vmatpush.bf16.msrb.mxu1 %v10264_v21  ;;  %v10467_v20 = vor.u32 %v12643_v6, %v10466_v29  ;;  %v12491_v21 = vld [vmem:[%s18503_s3 + $0x70] sm:$0xf0]  ;;  %v12642_v6 = vld [vmem:[%s18503_s3 + $0x52c] sm:$0xf] }
 0x29b   : > { %v10060_v27 = vor.u32 %v12491_v21, %v10059_v19  ;;  %v12631_v29 = vld [vmem:[%s18503_s3 + $0x4d0] sm:$0xf0]  ;;  %v10024_v19 = vor.u32 %v12482_v14, %v10023_v58  ;;  %v10471_v12 = vor.u32 %v12642_v6, %v10468_v13  ;;  %v10426_v6 = vld [vmem:[%s18503_s3 + $0x4d0] sm:$0xf] }
 0x29c   : > { %5075 = vmatpush.bf16.msrb.mxu0 %v10659_v23  ;;  %v10454_v23 = vld [vmem:[%s18503_s3 + $0x510] sm:$0xf] }
 0x29d   : > { %4381 = vmatpush.bf16.msra.mxu3 %v10196_v28  ;;  %v12699_v28 = vld [vmem:[%s18503_s3 + $0x6f4] sm:$0xf]  ;;  %v10455_v33 = vor.u32 %v12640_v24, %v10454_v23  ;;  %v12628_v23 = vld [vmem:[%s18503_s3 + $0x4b8] sm:$0xf0] }
 0x29e   : > { %4433 = vmatpush.bf16.msra.mxu2 %v10200_v34  ;;  %4481 = vmatpush.bf16.msrb.mxu1 %v10252_v35  ;;  %v4632_v34 = vrot.slane %v4630_v52, 1  ;;  %v10599_v35 = vor.u32 %v12676_v5, %v10598_v56  ;;  %v10011_v52 = vld [vmem:[%s18503_s3 + $0x8] sm:$0xf]  ;;  %v12639_v56 = vld [vmem:[%s18503_s3 + $0x514] sm:$0xf] }
 0x29f   : > { %v10456_v5 = vld [vmem:[%s18503_s3 + $0x51c] sm:$0xf0] }
 0x2a0   : > { %5076 = vmatpush.bf16.msrb.mxu0 %v10647_v44  ;;  %4382 = vmatmul.bf16.vlgmr.msra.gmra.mxu3 %v16216_v53  ;;  %v10442_v44 = vld [vmem:[%s18503_s3 + $0x4f8] sm:$0xf]  ;;  %v16343_v15 = vor.u32 %v4632_v34, %v4628_v50  ;;  %v10574_v50 = vld [vmem:[%s18503_s3 + $0x600] sm:$0xf] }
 0x2a1   : > { %4446 = vmatpush.bf16.msrb.mxu3 %v10296_v46  ;;  %4434 = vmatmul.bf16.vlgmr.msra.gmra.mxu2 %v16216_v53  ;;  %v10699_v46 = vor.u32 %v12699_v28, %v10696_v31  ;;  %v12673_v28 = vld [vmem:[%s18503_s3 + $0x620] sm:$0xf0]  ;;  %v10012_v31 = vor.u32 %v12479_v4, %v10011_v52 }
 0x2a2   : > { %4498 = vmatpush.bf16.msrb.mxu2 %v10300_v62  ;;  %4482 = vmatpush.bf16.msrb.mxu1 %v10240_v57  ;;  %v10498_v62 = vld [vmem:[%s18503_s3 + $0x560] sm:$0xf] }
 0x2a3   : > { %v4507_v57 = vld [vmem:[#allocation2 + $0x18] sm:$0x1e]  ;;  %v10499_v59 = vor.u32 %v12650_v10, %v10498_v62  ;;  %v12638_v10 = vld [vmem:[%s18503_s3 + $0x508] sm:$0xf0] }
 0x2a4   : > { %5077 = vmatpush.bf16.msrb.mxu0 %v10635_v3  ;;  %v10430_v3 = vld [vmem:[%s18503_s3 + $0x4e0] sm:$0xf]  ;;  %v16366_v7 = vpack.c.bf16 %v4507_v57, %v4507_v57  ;;  %v12669_v57 = vld [vmem:[%s18503_s3 + $0x604] sm:$0xf] }
 0x2a5   : > { %4452 = vmatpush.bf16.msra.mxu3 %v10096_v16  ;;  %v10048_v16 = vor.u32 %v12488_v43, %v10047_v42 }
 0x2a6   : > { %5047 = vmatpush.bf16.msra.mxu2 %v10491_v63  ;;  %4483 = vmatpush.bf16.msrb.mxu1 %v10228_v60  ;;  %v10443_v63 = vor.u32 %v12637_v47, %v10442_v44  ;;  %v10036_v60 = vor.u32 %v12485_v54, %v10035_v39  ;;  %v10463_v44 = vor.u32 %v12641_v26, %v10462_v25  ;;  %v12636_v47 = vld [vmem:[%s18503_s3 + $0x4fc] sm:$0xf]  ;;  %v12629_v25 = vld [vmem:[%s18503_s3 + $0x4c0] sm:$0xf0] }
 0x2a7   : > { %v10447_v39 = vor.u32 %v12636_v47, %v10444_v48 }
 0x2a8   : > { %5078 = vmatpush.bf16.msrb.mxu0 %v10623_v2  ;;  %v10418_v2 = vld [vmem:[%s18503_s3 + $0x4c8] sm:$0xf] }
 0x2a9   : > { %4453 = vmatpush.bf16.msra.mxu3 %v10084_v0  ;;  %v10486_v0 = vld [vmem:[%s18503_s3 + $0x548] sm:$0xf]  ;;  %v10419_v21 = vor.u32 %v12631_v29, %v10418_v2  ;;  %v10420_v29 = vld [vmem:[%s18503_s3 + $0x4d4] sm:$0xf0] }
 0x2aa   : > { %5048 = vmatpush.bf16.msra.mxu2 %v10479_v30  ;;  %4484 = vmatpush.bf16.msrb.mxu1 %v10216_v40  ;;  %v16364_v30 = vpack.c.bf16 %v4504_v51, %v4504_v51  ;;  %v10487_v8 = vor.u32 %v12647_v41, %v10486_v0  ;;  %v4635_v51 = vshrl.u32 %v16366_v7, 16 }
 0x2ac   : > { %5079 = vmatpush.bf16.msrb.mxu0 %v10611_v22  ;;  %v4616_v40 = vshll.u32 %v16364_v30, 16  ;;  %v10406_v22 = vld [vmem:[%s18503_s3 + $0x4b0] sm:$0xf]  ;;  %v4614_v34 = vshrl.u32 %v16364_v30, 16  ;;  %v10562_v30 = vld [vmem:[%s18503_s3 + $0x5e8] sm:$0xf] }
 0x2ad   : > { %4454 = vmatpush.bf16.msra.mxu3 %v10072_v18  ;;  %v12644_v18 = vld [vmem:[%s18503_s3 + $0x538] sm:$0xf0] }
 0x2ae   : > { %5049 = vmatpush.bf16.msra.mxu2 %v10467_v20  ;;  %4485 = vmatpush.bf16.msrb.mxu1 %v10204_v32  ;;  %v4637_v20 = vshll.u32 %v16366_v7, 16  ;;  %v10475_v24 = vor.u32 %v12644_v18, %v10474_v9  ;;  %v12672_v32 = vld [vmem:[%s18503_s3 + $0x61c] sm:$0xf]  ;;  %v4618_v42 = vrot.slane %v4616_v40, 1  ;;  %v12667_v7 = vld [vmem:[%s18503_s3 + $0x5f0] sm:$0xf0] }
 0x2af   : > { %v10563_v2 = vor.u32 %v12667_v7, %v10562_v30  ;;  %v12632_v9 = vld [vmem:[%s18503_s3 + $0x4d8] sm:$0xf0]  ;;  %v10550_v18 = vld [vmem:[%s18503_s3 + $0x5d0] sm:$0xf]  ;;  %v12663_v40 = vld [vmem:[%s18503_s3 + $0x5d4] sm:$0xf] }
 0x2b0   : > { %5080 = vmatpush.bf16.msrb.mxu0 %v10599_v35  ;;  %10302 = vmatmul.msk.bf16.vlgmr.msrb.gmra.mxu3 %vm3785_vm9, %v15824_v36  ;;  %v10407_v35 = vor.u32 %v12628_v23, %v10406_v22  ;;  %v4639_v43 = vrot.slane %v4637_v20, 1  ;;  %v10552_v20 = vld [vmem:[%s18503_s3 + $0x5dc] sm:$0xf0]  ;;  %v12627_v22 = vld [vmem:[%s18503_s3 + $0x4b4] sm:$0xf]  ;;  %v10427_v23 = vor.u32 %v12632_v9, %v10426_v6 }
 0x2b1   : > { %4455 = vmatpush.bf16.msra.mxu3 %v10060_v27  ;;  %4486 = vmatmul.bf16.vlgmr.msrb.gmra.mxu1 %v16216_v53  ;;  %v10431_v53 = vor.u32 %v12634_v49, %v10430_v3  ;;  %v10586_v27 = vld [vmem:[%s18503_s3 + $0x618] sm:$0xf]  ;;  %v10451_v3 = vor.u32 %v12638_v10, %v10450_v1  ;;  %v12633_v49 = vld [vmem:[%s18503_s3 + $0x4e4] sm:$0xf]  ;;  %v4505_v1 = vld [vmem:[#allocation2 + $0x8] sm:$0x1e] }
 0x2b2   : > { %5050 = vmatpush.bf16.msra.mxu2 %v10455_v33  ;;  %5093 = vmatpush.bf16.msra.mxu1 %v10695_v38  ;;  %v10588_v33 = vld [vmem:[%s18503_s3 + $0x624] sm:$0xf0]  ;;  %v10459_v38 = vor.u32 %v12639_v56, %v10456_v5  ;;  %v16458_v54 = vor.u32 %v4639_v43, %v4635_v51  ;;  %v10408_v56 = vld [vmem:[%s18503_s3 + $0x4bc] sm:$0xf0]  ;;  %v10414_v5 = vld [vmem:[%s18503_s3 + $0x4b8] sm:$0xf] }
 0x2b3   : > { %10303 = vmatmul.msk.bf16.vlgmr.msrb.gmra.mxu2 %vm3785_vm9, %v15824_v36  ;;  %5081 = vmatmul.bf16.vlgmr.msrb.gmra.mxu0 %v16343_v15  ;;  %v10483_v36 = vor.u32 %v12645_v61, %v10480_v37  ;;  %v10591_v62 = vor.u32 %v12672_v32, %v10588_v33  ;;  %v10432_v61 = vld [vmem:[%s18503_s3 + $0x4ec] sm:$0xf0]  ;;  %v10438_v37 = vld [vmem:[%s18503_s3 + $0x4e8] sm:$0xf]  ;;  %v12661_v32 = vld [vmem:[%s18503_s3 + $0x5c0] sm:$0xf0]  ;;  %v10411_v43 = vor.u32 %v12627_v22, %v10408_v56 }
 0x2b4   : > { %5145 = vmatpush.bf16.msra.mxu0 %v10699_v46  ;;  %v10587_v46 = vor.u32 %v12673_v28, %v10586_v27  ;;  %v10435_v58 = vor.u32 %v12633_v49, %v10432_v61  ;;  %v10555_v27 = vor.u32 %v12663_v40, %v10552_v20  ;;  %v12660_v33 = vld [vmem:[%s18503_s3 + $0x5bc] sm:$0xf]  ;;  %v10415_v47 = vor.u32 %v12629_v25, %v10414_v5  ;;  %v12657_v51 = vld [vmem:[%s18503_s3 + $0x5a4] sm:$0xf]  ;;  %v10977_v61 = vld [vmem:[%s18503_s3 + $0x858] sm:$0xf] }
 0x2b5   : > { %4456 = vmatpush.bf16.msra.mxu3 %v10048_v16  ;;  %v12670_v16 = vld [vmem:[%s18503_s3 + $0x608] sm:$0xf0]  ;;  %v12668_v6 = vld [vmem:[%s18503_s3 + $0x5f8] sm:$0xf0]  ;;  %v10953_v56 = vld [vmem:[%s18503_s3 + $0x828] sm:$0xf] }
 0x2b6   : > { %5051 = vmatpush.bf16.msra.mxu2 %v10443_v63  ;;  %5099 = vmatpush.bf16.msrb.mxu1 %v10495_v17  ;;  %v10576_v63 = vld [vmem:[%s18503_s3 + $0x60c] sm:$0xf0]  ;;  %v16456_v17 = vor.u32 %v4618_v42, %v4614_v34  ;;  %v12674_v42 = vld [vmem:[%s18503_s3 + $0x628] sm:$0xf0]  ;;  %v12652_v20 = vld [vmem:[%s18503_s3 + $0x578] sm:$0xf0] }
 0x2b7   : > { %v10579_v0 = vor.u32 %v12669_v57, %v10576_v63  ;;  %v12742_v9 = vld [vmem:[%s18503_s3 + $0x848] sm:$0xf0] }
 0x2b8   : > { %5151 = vmatpush.bf16.msrb.mxu0 %v10499_v59  ;;  %v10575_v59 = vor.u32 %v12670_v16, %v10574_v50  ;;  %v10526_v50 = vld [vmem:[%s18503_s3 + $0x5a0] sm:$0xf]  ;;  %v12658_v16 = vld [vmem:[%s18503_s3 + $0x5a8] sm:$0xf0] }
 0x2b9   : > { %4457 = vmatpush.bf16.msra.mxu3 %v10036_v60  ;;  %v12635_v60 = vld [vmem:[%s18503_s3 + $0x4f0] sm:$0xf0] }
 0x2ba   : > { %5052 = vmatpush.bf16.msra.mxu2 %v10431_v53  ;;  %5100 = vmatpush.bf16.msrb.mxu1 %v10483_v36  ;;  %v12666_v53 = vld [vmem:[%s18503_s3 + $0x5ec] sm:$0xf]  ;;  %v10564_v36 = vld [vmem:[%s18503_s3 + $0x5f4] sm:$0xf0]  ;;  %v10439_v14 = vor.u32 %v12635_v60, %v10438_v37  ;;  %v12745_v37 = vld [vmem:[%s18503_s3 + $0x860] sm:$0xf0] }
 0x2bb   : > { %v10567_v13 = vor.u32 %v12666_v53, %v10564_v36  ;;  %v10514_v53 = vld [vmem:[%s18503_s3 + $0x588] sm:$0xf]  ;;  %v12655_v36 = vld [vmem:[%s18503_s3 + $0x590] sm:$0xf0] }
 0x2bc   : > { %5152 = vmatpush.bf16.msrb.mxu0 %v10487_v8  ;;  %v12630_v8 = vld [vmem:[%s18503_s3 + $0x4cc] sm:$0xf] }
 0x2bd   : > { %4458 = vmatpush.bf16.msra.mxu3 %v10024_v19  ;;  %v3811_v41 = vpop.f32.mrf.mxu1  ;;  %v12664_v19 = vld [vmem:[%s18503_s3 + $0x5d8] sm:$0xf0] }
 0x2be   : > { %5053 = vmatpush.bf16.msra.mxu2 %v10419_v21  ;;  %5101 = vmatpush.bf16.msrb.mxu1 %v10471_v12  ;;  %v10423_v21 = vor.u32 %v12630_v8, %v10420_v29  ;;  %v10516_v8 = vld [vmem:[%s18503_s3 + $0x594] sm:$0xf0]  ;;  %v10570_v29 = vld [vmem:[%s18503_s3 + $0x5f0] sm:$0xf] }
 0x2c0   : > { %5153 = vmatpush.bf16.msrb.mxu0 %v10475_v24  ;;  %v10551_v24 = vor.u32 %v12664_v19, %v10550_v18  ;;  %v10515_v18 = vor.u32 %v12655_v36, %v10514_v53  ;;  %v10502_v19 = vld [vmem:[%s18503_s3 + $0x570] sm:$0xf]  ;;  %v12733_v36 = vld [vmem:[%s18503_s3 + $0x800] sm:$0xf0] }
 0x2c1   : > { %4459 = vmatpush.bf16.msra.mxu3 %v10012_v31  ;;  %10704 = vmatmul.msk.bf16.vlgmr.msra.gmra.mxu1 %vm3785_vm9, %v16458_v54  ;;  %v10538_v31 = vld [vmem:[%s18503_s3 + $0x5b8] sm:$0xf] }
 0x2c2   : > { %5054 = vmatpush.bf16.msra.mxu2 %v10407_v35  ;;  %5102 = vmatpush.bf16.msrb.mxu1 %v10459_v38  ;;  %v3798_v52 = vpop.f32.mrf.mxu3  ;;  %v10540_v35 = vld [vmem:[%s18503_s3 + $0x5c4] sm:$0xf0]  ;;  %v10594_v38 = vld [vmem:[%s18503_s3 + $0x620] sm:$0xf]  ;;  %v10539_v48 = vor.u32 %v12661_v32, %v10538_v31  ;;  %v10503_v32 = vor.u32 %v12652_v20, %v10502_v19 }
 0x2c3   : > { %10705 = vmatmul.msk.bf16.vlgmr.msra.gmra.mxu0 %vm3785_vm9, %v16458_v54  ;;  %v3812_v12 = vadd.f32 %v3811_v41, %v3798_v52  ;;  %v3824_v4 = vpop.f32.mrf.mxu2  ;;  %v10595_v10 = vor.u32 %v12674_v42, %v10594_v38  ;;  %v16578_v41 = vpack.c.bf16 %v4505_v1, %v4505_v1  ;;  %v10684_v31 = vld [vmem:[%s18503_s3 + $0x6e4] sm:$0xf0]  ;;  %v12662_v1 = vld [vmem:[%s18503_s3 + $0x5c8] sm:$0xf0] }
 0x2c4   : > { %5154 = vmatpush.bf16.msrb.mxu0 %v10463_v44  ;;  %4460 = vmatmul.bf16.vlgmr.msra.gmra.mxu3 %v15930_v55  ;;  %v16482_v55 = vpop.f32.mrf.mxu0  ;;  %v10989_v44 = vld [vmem:[%s18503_s3 + $0x870] sm:$0xf] }
 0x2c5   : > { %5060 = vmatpush.bf16.msrb.mxu3 %v10587_v46  ;;  %5055 = vmatmul.bf16.vlgmr.msra.gmra.mxu2 %v16456_v17  ;;  %v16528_v26 = vadd.f32 %v3824_v4, %v3812_v12  ;;  %v3813_v28 = vpop.f32.mrf.mxu1  ;;  %v12748_v46 = vld [vmem:[%s18503_s3 + $0x878] sm:$0xf0]  ;;  %v4623_v52 = vshll.u32 %v16578_v41, 16  ;;  %v10504_v12 = vld [vmem:[%s18503_s3 + $0x57c] sm:$0xf0]  ;;  %v4621_v42 = vshrl.u32 %v16578_v41, 16 }
 0x2c6   : > { %5112 = vmatpush.bf16.msrb.mxu2 %v10591_v62  ;;  %5103 = vmatpush.bf16.msrb.mxu1 %v10447_v39  ;;  %v10543_v62 = vor.u32 %v12660_v33, %v10540_v35  ;;  %v10990_v57 = vor.u32 %v12748_v46, %v10989_v44  ;;  %v10528_v39 = vld [vmem:[%s18503_s3 + $0x5ac] sm:$0xf0]  ;;  %v12696_v28 = vld [vmem:[%s18503_s3 + $0x6dc] sm:$0xf]  ;;  %v12698_v33 = vld [vmem:[%s18503_s3 + $0x6e8] sm:$0xf0] }
 0x2c7   : > { %v10531_v60 = vor.u32 %v12657_v51, %v10528_v39  ;;  %v10687_v46 = vor.u32 %v12696_v28, %v10684_v31  ;;  %v10672_v51 = vld [vmem:[%s18503_s3 + $0x6cc] sm:$0xf0]  ;;  %v12659_v41 = vld [vmem:[%s18503_s3 + $0x5b0] sm:$0xf0] }
 0x2c8   : > { %5155 = vmatpush.bf16.msrb.mxu0 %v10451_v3  ;;  %v10582_v3 = vld [vmem:[%s18503_s3 + $0x608] sm:$0xf] }
 0x2c9   : > { %5061 = vmatpush.bf16.msrb.mxu3 %v10575_v59  ;;  %v12671_v59 = vld [vmem:[%s18503_s3 + $0x610] sm:$0xf0] }
 0x2ca   : > { %5113 = vmatpush.bf16.msrb.mxu2 %v10579_v0  ;;  %5104 = vmatpush.bf16.msrb.mxu1 %v10435_v58  ;;  %v3800_v63 = vpop.f32.mrf.mxu3  ;;  %v10527_v0 = vor.u32 %v12658_v16, %v10526_v50  ;;  %v10583_v30 = vor.u32 %v12671_v59, %v10582_v3  ;;  %v12654_v58 = vld [vmem:[%s18503_s3 + $0x58c] sm:$0xf]  ;;  %v12736_v50 = vld [vmem:[%s18503_s3 + $0x818] sm:$0xf0]  ;;  %v12693_v16 = vld [vmem:[%s18503_s3 + $0x6c4] sm:$0xf] }
 0x2cb   : > { %v3826_v49 = vpop.f32.mrf.mxu2  ;;  %v10519_v40 = vor.u32 %v12654_v58, %v10516_v8  ;;  %v12695_v63 = vld [vmem:[%s18503_s3 + $0x6d0] sm:$0xf0]  ;;  %v12690_v58 = vld [vmem:[%s18503_s3 + $0x6ac] sm:$0xf]  ;;  %v10666_v8 = vld [vmem:[%s18503_s3 + $0x6b0] sm:$0xf] }
 0x2cc   : > { %5156 = vmatpush.bf16.msrb.mxu0 %v10439_v14  ;;  %v3865_v34 = vpop.f32.mrf.mxu0  ;;  %v10978_v14 = vor.u32 %v12745_v37, %v10977_v61  ;;  %v5207_v59 = vld [vmem:[#allocation2 + $0x28] sm:$0x1e]  ;;  %v10675_v61 = vor.u32 %v12693_v16, %v10672_v51 }
 0x2cd   : > { %5062 = vmatpush.bf16.msrb.mxu3 %v10563_v2  ;;  %v16580_v7 = vpop.f32.mrf.mxu1 }
 0x2ce   : > { %5114 = vmatpush.bf16.msrb.mxu2 %v10567_v13  ;;  %5105 = vmatpush.bf16.msrb.mxu1 %v10423_v21  ;;  %v10965_v13 = vld [vmem:[%s18503_s3 + $0x840] sm:$0xf]  ;;  %v12651_v21 = vld [vmem:[%s18503_s3 + $0x574] sm:$0xf] }
 0x2cf   : > { %v10966_v4 = vor.u32 %v12742_v9, %v10965_v13  ;;  %v10507_v34 = vor.u32 %v12651_v21, %v10504_v12  ;;  %v16705_v13 = vpack.c.bf16 %v5207_v59, %v5207_v59  ;;  %v12730_v12 = vld [vmem:[%s18503_s3 + $0x7e8] sm:$0xf0] }
 0x2d0   : > { %5157 = vmatpush.bf16.msrb.mxu0 %v10427_v23  ;;  %v10558_v23 = vld [vmem:[%s18503_s3 + $0x5d8] sm:$0xf] }
 0x2d1   : > { %5063 = vmatpush.bf16.msrb.mxu3 %v10551_v24  ;;  %v12665_v24 = vld [vmem:[%s18503_s3 + $0x5e0] sm:$0xf0]  ;;  %v5325_v28 = vshll.u32 %v16705_v13, 16 }
 0x2d2   : > { %5115 = vmatpush.bf16.msrb.mxu2 %v10555_v27  ;;  %5106 = vmatpush.bf16.msrb.mxu1 %v10411_v43  ;;  %v3837_v22 = vpop.f32.mrf.mxu3  ;;  %v12739_v27 = vld [vmem:[%s18503_s3 + $0x830] sm:$0xf0]  ;;  %v10559_v35 = vor.u32 %v12665_v24, %v10558_v23  ;;  %v4625_v43 = vrot.slane %v4623_v52, 1  ;;  %v10522_v52 = vld [vmem:[%s18503_s3 + $0x590] sm:$0xf] }
 0x2d3   : > { %v16633_v5 = vadd.f32 %v3837_v22, %v16528_v26  ;;  %v16635_v25 = vpop.f32.mrf.mxu2  ;;  %v10690_v26 = vld [vmem:[%s18503_s3 + $0x6e0] sm:$0xf]  ;;  %v10954_v44 = vor.u32 %v12739_v27, %v10953_v56  ;;  %v10654_v23 = vld [vmem:[%s18503_s3 + $0x698] sm:$0xf]  ;;  %v12689_v24 = vld [vmem:[%s18503_s3 + $0x6a0] sm:$0xf0] }
 0x2d4   : > { %5158 = vmatpush.bf16.msrb.mxu0 %v10415_v47  ;;  %v16592_v2 = vpop.f32.mrf.mxu0  ;;  %v16677_v39 = vor.u32 %v4625_v43, %v4621_v42  ;;  %v10648_v22 = vld [vmem:[%s18503_s3 + $0x69c] sm:$0xf0]  ;;  %v10510_v27 = vld [vmem:[%s18503_s3 + $0x578] sm:$0xf]  ;;  %v12684_v42 = vld [vmem:[%s18503_s3 + $0x67c] sm:$0xf] }
 0x2d5   : > { %5064 = vmatpush.bf16.msrb.mxu3 %v10539_v48  ;;  %5107 = vmatmul.bf16.vlgmr.msrb.gmra.mxu1 %v16456_v17  ;;  %v3878_v38 = vpop.f32.mrf.mxu1  ;;  %v10546_v48 = vld [vmem:[%s18503_s3 + $0x5c0] sm:$0xf]  ;;  %v10636_v43 = vld [vmem:[%s18503_s3 + $0x684] sm:$0xf0] }
 0x2d6   : > { %5116 = vmatpush.bf16.msrb.mxu2 %v10543_v62  ;;  %5164 = vmatpush.bf16.msra.mxu1 %v10595_v10  ;;  %v10941_v62 = vld [vmem:[%s18503_s3 + $0x810] sm:$0xf]  ;;  %v10691_v10 = vor.u32 %v12698_v33, %v10690_v26  ;;  %v10547_v3 = vor.u32 %v12662_v1, %v10546_v48  ;;  %v12653_v26 = vld [vmem:[%s18503_s3 + $0x580] sm:$0xf0]  ;;  %v10905_v33 = vld [vmem:[%s18503_s3 + $0x7c8] sm:$0xf] }
 0x2d7   : > { %5159 = vmatmul.bf16.vlgmr.msrb.gmra.mxu0 %v16456_v17  ;;  %v10571_v17 = vor.u32 %v12668_v6, %v10570_v29  ;;  %v10942_v49 = vor.u32 %v12736_v50, %v10941_v62  ;;  %v12692_v29 = vld [vmem:[%s18503_s3 + $0x6b8] sm:$0xf0]  ;;  %v12686_v48 = vld [vmem:[%s18503_s3 + $0x688] sm:$0xf0]  ;;  %v11085_v1 = vld [vmem:[%s18503_s3 + $0x930] sm:$0xf] }
 0x2d8   : > { %5762 = vmatpush.bf16.msra.mxu0 %v10990_v57  ;;  %v10678_v57 = vld [vmem:[%s18503_s3 + $0x6c8] sm:$0xf]  ;;  %v10667_v20 = vor.u32 %v12692_v29, %v10666_v8  ;;  %v12772_v62 = vld [vmem:[%s18503_s3 + $0x938] sm:$0xf0]  ;;  %v11087_v50 = vld [vmem:[%s18503_s3 + $0x93c] sm:$0xf0] }
 0x2d9   : > { %5065 = vmatpush.bf16.msrb.mxu3 %v10527_v0  ;;  %v10534_v0 = vld [vmem:[%s18503_s3 + $0x5a8] sm:$0xf] }
 0x2da   : > { %5117 = vmatpush.bf16.msrb.mxu2 %v10531_v60  ;;  %5165 = vmatpush.bf16.msra.mxu1 %v10583_v30  ;;  %v3839_v37 = vpop.f32.mrf.mxu3  ;;  %v10929_v60 = vld [vmem:[%s18503_s3 + $0x7f8] sm:$0xf]  ;;  %v10679_v30 = vor.u32 %v12695_v63, %v10678_v57  ;;  %v10535_v6 = vor.u32 %v12659_v41, %v10534_v0  ;;  %v10639_v57 = vor.u32 %v12684_v42, %v10636_v43  ;;  %v10624_v0 = vld [vmem:[%s18503_s3 + $0x66c] sm:$0xf0]  ;;  %v11075_v8 = vld [vmem:[%s18503_s3 + $0x924] sm:$0xf0] }
 0x2db   : > { %v3891_v53 = vpop.f32.mrf.mxu2  ;;  %v10930_v9 = vor.u32 %v12733_v36, %v10929_v60  ;;  %v12681_v37 = vld [vmem:[%s18503_s3 + $0x664] sm:$0xf]  ;;  %v12683_v60 = vld [vmem:[%s18503_s3 + $0x670] sm:$0xf0] }
 0x2dc   : > { %5763 = vmatpush.bf16.msra.mxu0 %v10978_v14  ;;  %v3930_v47 = vpop.f32.mrf.mxu0  ;;  %v10660_v14 = vld [vmem:[%s18503_s3 + $0x6b4] sm:$0xf0]  ;;  %v12769_v53 = vld [vmem:[%s18503_s3 + $0x920] sm:$0xf0]  ;;  %v10627_v29 = vor.u32 %v12681_v37, %v10624_v0  ;;  %v12763_v43 = vld [vmem:[%s18503_s3 + $0x8f0] sm:$0xf0] }
 0x2dd   : > { %5066 = vmatpush.bf16.msrb.mxu3 %v10515_v18  ;;  %v10663_v18 = vor.u32 %v12690_v58, %v10660_v14  ;;  %v16707_v19 = vpop.f32.mrf.mxu1  ;;  %v5323_v58 = vshrl.u32 %v16705_v13, 16  ;;  %v12768_v14 = vld [vmem:[%s18503_s3 + $0x91c] sm:$0xf]  ;;  %v12678_v13 = vld [vmem:[%s18503_s3 + $0x64c] sm:$0xf] }
 0x2de   : > { %5118 = vmatpush.bf16.msrb.mxu2 %v10519_v40  ;;  %5166 = vmatpush.bf16.msra.mxu1 %v10571_v17  ;;  %v12656_v40 = vld [vmem:[%s18503_s3 + $0x598] sm:$0xf0]  ;;  %v10917_v17 = vld [vmem:[%s18503_s3 + $0x7e0] sm:$0xf] }
 0x2df   : > { %v10523_v56 = vor.u32 %v12656_v40, %v10522_v52  ;;  %v10918_v31 = vor.u32 %v12730_v12, %v10917_v17  ;;  %v10612_v52 = vld [vmem:[%s18503_s3 + $0x654] sm:$0xf0]  ;;  %v10618_v40 = vld [vmem:[%s18503_s3 + $0x650] sm:$0xf]  ;;  %v11078_v17 = vor.u32 %v12768_v14, %v11075_v8  ;;  %v12680_v12 = vld [vmem:[%s18503_s3 + $0x658] sm:$0xf0] }
 0x2e0   : > { %5764 = vmatpush.bf16.msra.mxu0 %v10966_v4  ;;  %v12687_v4 = vld [vmem:[%s18503_s3 + $0x694] sm:$0xf]  ;;  %v10895_v37 = vld [vmem:[%s18503_s3 + $0x7bc] sm:$0xf0] }
 0x2e1   : > { %5067 = vmatpush.bf16.msrb.mxu3 %v10503_v32  ;;  %v10651_v32 = vor.u32 %v12687_v4, %v10648_v22  ;;  %v11061_v4 = vld [vmem:[%s18503_s3 + $0x900] sm:$0xf]  ;;  %v12766_v22 = vld [vmem:[%s18503_s3 + $0x908] sm:$0xf0] }
 0x2e2   : > { %5119 = vmatpush.bf16.msrb.mxu2 %v10507_v34  ;;  %5167 = vmatpush.bf16.msra.mxu1 %v10559_v35  ;;  %v12727_v34 = vld [vmem:[%s18503_s3 + $0x7d0] sm:$0xf0]  ;;  %v10655_v35 = vor.u32 %v12689_v24, %v10654_v23  ;;  %v11063_v23 = vld [vmem:[%s18503_s3 + $0x90c] sm:$0xf0]  ;;  %v10615_v24 = vor.u32 %v12678_v13, %v10612_v52  ;;  %v12757_v13 = vld [vmem:[%s18503_s3 + $0x8c0] sm:$0xf0] }
 0x2e3   : > { %v3850_v38 = vpop.f32.mrf.mxu3  ;;  %v10906_v51 = vor.u32 %v12727_v34, %v10905_v33  ;;  %v10600_v33 = vld [vmem:[%s18503_s3 + $0x63c] sm:$0xf0]  ;;  %v10606_v34 = vld [vmem:[%s18503_s3 + $0x638] sm:$0xf]  ;;  %v12720_v52 = vld [vmem:[%s18503_s3 + $0x79c] sm:$0xf] }
 0x2e4   : > { %5765 = vmatpush.bf16.msra.mxu0 %v10954_v44  ;;  %5068 = vmatmul.bf16.vlgmr.msrb.gmra.mxu3 %v16677_v39  ;;  %v16718_v21 = vpop.f32.mrf.mxu0  ;;  %v10642_v44 = vld [vmem:[%s18503_s3 + $0x680] sm:$0xf]  ;;  %v16758_v47 = vpop.f32.mrf.mxu2 }
 0x2e5   : > { %5125 = vmatpush.bf16.msra.mxu3 %v10687_v46  ;;  %5120 = vmatmul.bf16.vlgmr.msrb.gmra.mxu2 %v16677_v39  ;;  %v3864_v46 = vadd.f32 %v16482_v55, %v3850_v38  ;;  %v12771_v55 = vld [vmem:[%s18503_s3 + $0x934] sm:$0xf]  ;;  %v3943_v63 = vpop.f32.mrf.mxu1  ;;  %v10643_v59 = vor.u32 %v12686_v48, %v10642_v44  ;;  %v12762_v44 = vld [vmem:[%s18503_s3 + $0x8ec] sm:$0xf]  ;;  %v10702_v48 = vld [vmem:[%s18503_s3 + $0x6f8] sm:$0xf] }
 0x2e6   : > { %5177 = vmatpush.bf16.msra.mxu2 %v10691_v10  ;;  %5168 = vmatpush.bf16.msra.mxu1 %v10547_v3  ;;  %v10511_v10 = vor.u32 %v12653_v26, %v10510_v27  ;;  %v5327_v3 = vrot.slane %v5325_v28, 1  ;;  %v11090_v41 = vor.u32 %v12771_v55, %v11087_v50  ;;  %v12675_v27 = vld [vmem:[%s18503_s3 + $0x634] sm:$0xf]  ;;  %v10619_v28 = vor.u32 %v12680_v12, %v10618_v40  ;;  %v11037_v63 = vld [vmem:[%s18503_s3 + $0x8d0] sm:$0xf] }
 0x2e7   : > { %v3877_v16 = vadd.f32 %v16580_v7, %v3864_v46  ;;  %v10630_v7 = vld [vmem:[%s18503_s3 + $0x668] sm:$0xf]  ;;  %v11051_v46 = vld [vmem:[%s18503_s3 + $0x8f4] sm:$0xf0]  ;;  %v12775_v55 = vld [vmem:[%s18503_s3 + $0x950] sm:$0xf0] }
 0x2e8   : > { %5766 = vmatpush.bf16.msra.mxu0 %v10942_v49  ;;  %v11086_v49 = vor.u32 %v12772_v62, %v11085_v1  ;;  %v12701_v1 = vld [vmem:[%s18503_s3 + $0x700] sm:$0xf0]  ;;  %v10603_v62 = vor.u32 %v12675_v27, %v10600_v33  ;;  %v10883_v40 = vld [vmem:[%s18503_s3 + $0x7a4] sm:$0xf0] }
 0x2e9   : > { %5126 = vmatpush.bf16.msra.mxu3 %v10675_v61  ;;  %v3890_v36 = vadd.f32 %v16635_v25, %v3877_v16  ;;  %v12753_v33 = vld [vmem:[%s18503_s3 + $0x8a4] sm:$0xf] }
 0x2ea   : > { %5178 = vmatpush.bf16.msra.mxu2 %v10679_v30  ;;  %5169 = vmatpush.bf16.msra.mxu1 %v10535_v6  ;;  %v11073_v30 = vld [vmem:[%s18503_s3 + $0x918] sm:$0xf]  ;;  %v16802_v6 = vor.u32 %v5327_v3, %v5323_v58  ;;  %v11054_v3 = vor.u32 %v12762_v44, %v11051_v46 }
 0x2eb   : > { %v11074_v25 = vor.u32 %v12769_v53, %v11073_v30  ;;  %v5208_v53 = vld [vmem:[#allocation2 + $0x30] sm:$0x1e] }
 0x2ec   : > { %5767 = vmatpush.bf16.msra.mxu0 %v10930_v9  ;;  %v4398_v61 = vpop.f32.mrf.mxu0  ;;  %v10631_v9 = vor.u32 %v12683_v60, %v10630_v7  ;;  %v12759_v7 = vld [vmem:[%s18503_s3 + $0x8d4] sm:$0xf] }
 0x2ed   : > { %5127 = vmatpush.bf16.msra.mxu3 %v10663_v18  ;;  %v3852_v18 = vpop.f32.mrf.mxu3  ;;  %v12723_v61 = vld [vmem:[%s18503_s3 + $0x7b4] sm:$0xf] }
 0x2ee   : > { %5179 = vmatpush.bf16.msra.mxu2 %v10667_v20  ;;  %5170 = vmatpush.bf16.msra.mxu1 %v10523_v56  ;;  %v3904_v20 = vpop.f32.mrf.mxu2  ;;  %v4357_v56 = vpop.f32.mrf.mxu1  ;;  %v10898_v14 = vor.u32 %v12723_v61, %v10895_v37 }
 0x2ef   : > { %v11027_v20 = vld [vmem:[%s18503_s3 + $0x8c4] sm:$0xf0] }
 0x2f0   : > { %5768 = vmatpush.bf16.msra.mxu0 %v10918_v31  ;;  %v11062_v31 = vor.u32 %v12766_v22, %v11061_v4  ;;  %v16921_v4 = vpack.c.bf16 %v5208_v53, %v5208_v53 }
 0x2f1   : > { %5128 = vmatpush.bf16.msra.mxu3 %v10651_v32  ;;  %v16834_v32 = vadd.f32 %v4357_v56, %v16633_v5  ;;  %v11049_v5 = vld [vmem:[%s18503_s3 + $0x8e8] sm:$0xf]  ;;  %v12718_v56 = vld [vmem:[%s18503_s3 + $0x788] sm:$0xf0] }
 0x2f2   : > { %5180 = vmatpush.bf16.msra.mxu2 %v10655_v35  ;;  %5171 = vmatpush.bf16.msra.mxu1 %v10511_v10  ;;  %v12677_v35 = vld [vmem:[%s18503_s3 + $0x640] sm:$0xf0]  ;;  %v11097_v10 = vld [vmem:[%s18503_s3 + $0x948] sm:$0xf]  ;;  %v11050_v16 = vor.u32 %v12763_v43, %v11049_v5  ;;  %v5332_v5 = vshll.u32 %v16921_v4, 16  ;;  %v5330_v37 = vshrl.u32 %v16921_v4, 16 }
 0x2f3   : > { %v10607_v50 = vor.u32 %v12677_v35, %v10606_v34  ;;  %v11098_v0 = vor.u32 %v12775_v55, %v11097_v10  ;;  %v11015_v34 = vld [vmem:[%s18503_s3 + $0x8ac] sm:$0xf0]  ;;  %v12714_v55 = vld [vmem:[%s18503_s3 + $0x76c] sm:$0xf] }
 0x2f4   : > { %5769 = vmatpush.bf16.msra.mxu0 %v10906_v51  ;;  %v4409_v26 = vpop.f32.mrf.mxu0  ;;  %v10893_v51 = vld [vmem:[%s18503_s3 + $0x7b0] sm:$0xf]  ;;  %v11018_v10 = vor.u32 %v12753_v33, %v11015_v34 }
 0x2f5   : > { %5129 = vmatpush.bf16.msra.mxu3 %v10639_v57  ;;  %5172 = vmatmul.bf16.vlgmr.msra.gmra.mxu1 %v16677_v39  ;;  %v12765_v39 = vld [vmem:[%s18503_s3 + $0x904] sm:$0xf]  ;;  %v16845_v42 = vadd.f32 %v4409_v26, %v3890_v36  ;;  %v12724_v57 = vld [vmem:[%s18503_s3 + $0x7b8] sm:$0xf0]  ;;  %v10871_v26 = vld [vmem:[%s18503_s3 + $0x78c] sm:$0xf0] }
 0x2f6   : > { %5181 = vmatpush.bf16.msra.mxu2 %v10643_v59  ;;  %5775 = vmatpush.bf16.msrb.mxu1 %v11086_v49  ;;  %v11066_v38 = vor.u32 %v12765_v39, %v11063_v23  ;;  %v10703_v59 = vor.u32 %v12701_v1, %v10702_v48  ;;  %v12760_v49 = vld [vmem:[%s18503_s3 + $0x8d8] sm:$0xf0]  ;;  %v10894_v60 = vor.u32 %v12724_v57, %v10893_v51  ;;  %v4359_v30 = vpop.f32.mrf.mxu1  ;;  %v5209_v36 = vld [vmem:[#allocation2 + $0x38] sm:$0x1e]  ;;  %v12715_v48 = vld [vmem:[%s18503_s3 + $0x770] sm:$0xf0] }
 0x2f7   : > { %5770 = vmatmul.bf16.vlgmr.msra.gmra.mxu0 %v16802_v6  ;;  %v11038_v58 = vor.u32 %v12760_v49, %v11037_v63  ;;  %v16923_v22 = vpack.c.bf16 %v5209_v36, %v5209_v36  ;;  %v10886_v23 = vor.u32 %v12720_v52, %v10883_v40  ;;  %v11001_v1 = vld [vmem:[%s18503_s3 + $0x888] sm:$0xf]  ;;  %v11003_v57 = vld [vmem:[%s18503_s3 + $0x894] sm:$0xf0]  ;;  %v12774_v63 = vld [vmem:[%s18503_s3 + $0x94c] sm:$0xf] }
 0x2f8   : > { %5827 = vmatpush.bf16.msrb.mxu0 %v11090_v41  ;;  %v11039_v41 = vld [vmem:[%s18503_s3 + $0x8dc] sm:$0xf0] }
 0x2f9   : > { %5130 = vmatpush.bf16.msra.mxu3 %v10627_v29  ;;  %v10881_v29 = vld [vmem:[%s18503_s3 + $0x798] sm:$0xf]  ;;  %v11042_v18 = vor.u32 %v12759_v7, %v11039_v41  ;;  %v5339_v43 = vshll.u32 %v16923_v22, 16  ;;  %v11105_v7 = vld [vmem:[%s18503_s3 + $0x950] sm:$0xf] }
 0x2fa   : > { %5182 = vmatpush.bf16.msra.mxu2 %v10631_v9  ;;  %5776 = vmatpush.bf16.msrb.mxu1 %v11074_v25  ;;  %v12721_v9 = vld [vmem:[%s18503_s3 + $0x7a0] sm:$0xf0]  ;;  %v11025_v25 = vld [vmem:[%s18503_s3 + $0x8b8] sm:$0xf]  ;;  %v12776_v41 = vld [vmem:[%s18503_s3 + $0x958] sm:$0xf0] }
 0x2fb   : > { %v10882_v12 = vor.u32 %v12721_v9, %v10881_v29  ;;  %v11026_v39 = vor.u32 %v12757_v13, %v11025_v25  ;;  %v5341_v53 = vrot.slane %v5339_v43, 1  ;;  %v12712_v29 = vld [vmem:[%s18503_s3 + $0x758] sm:$0xf0]  ;;  %v10847_v9 = vld [vmem:[%s18503_s3 + $0x75c] sm:$0xf0]  ;;  %v5337_v13 = vshrl.u32 %v16923_v22, 16 }
 0x2fc   : > { %5828 = vmatpush.bf16.msrb.mxu0 %v11078_v17  ;;  %v4411_v8 = vpop.f32.mrf.mxu0  ;;  %v12756_v17 = vld [vmem:[%s18503_s3 + $0x8bc] sm:$0xf]  ;;  %v12725_v25 = vld [vmem:[%s18503_s3 + $0x7c0] sm:$0xf0] }
 0x2fd   : > { %5131 = vmatpush.bf16.msra.mxu3 %v10615_v24  ;;  %v10869_v24 = vld [vmem:[%s18503_s3 + $0x780] sm:$0xf]  ;;  %v11030_v27 = vor.u32 %v12756_v17, %v11027_v20  ;;  %v10845_v8 = vld [vmem:[%s18503_s3 + $0x750] sm:$0xf]  ;;  %v5206_v20 = vld [vmem:[#allocation2 + $0x20] sm:$0x1e] }
 0x2fe   : > { %5183 = vmatpush.bf16.msra.mxu2 %v10619_v28  ;;  %5777 = vmatpush.bf16.msrb.mxu1 %v11062_v31  ;;  %v12754_v28 = vld [vmem:[%s18503_s3 + $0x8a8] sm:$0xf0]  ;;  %v12717_v31 = vld [vmem:[%s18503_s3 + $0x784] sm:$0xf]  ;;  %v10870_v35 = vor.u32 %v12718_v56, %v10869_v24  ;;  %v10846_v17 = vor.u32 %v12712_v29, %v10845_v8  ;;  %v12708_v22 = vld [vmem:[%s18503_s3 + $0x73c] sm:$0xf] }
 0x2ff   : > { %v10874_v46 = vor.u32 %v12717_v31, %v10871_v26  ;;  %v10835_v56 = vld [vmem:[%s18503_s3 + $0x744] sm:$0xf0]  ;;  %v5210_v31 = vpack.c.bf16 %v5206_v20, %v5206_v20  ;;  %v10853_v8 = vld [vmem:[%s18503_s3 + $0x758] sm:$0xf]  ;;  %v12713_v29 = vld [vmem:[%s18503_s3 + $0x760] sm:$0xf0] }
 0x300   : > { %5829 = vmatpush.bf16.msrb.mxu0 %v11066_v38  ;;  %v10857_v38 = vld [vmem:[%s18503_s3 + $0x768] sm:$0xf]  ;;  %v10838_v26 = vor.u32 %v12708_v22, %v10835_v56 }
 0x301   : > { %5132 = vmatpush.bf16.msra.mxu3 %v10603_v62  ;;  %v12751_v62 = vld [vmem:[%s18503_s3 + $0x890] sm:$0xf0]  ;;  %v10858_v61 = vor.u32 %v12715_v48, %v10857_v38  ;;  %v12706_v38 = vld [vmem:[%s18503_s3 + $0x728] sm:$0xf0]  ;;  %v10877_v48 = vld [vmem:[%s18503_s3 + $0x788] sm:$0xf] }
 0x302   : > { %5184 = vmatpush.bf16.msra.mxu2 %v10607_v50  ;;  %5778 = vmatpush.bf16.msrb.mxu1 %v11050_v16  ;;  %v10859_v50 = vld [vmem:[%s18503_s3 + $0x774] sm:$0xf0]  ;;  %v12750_v16 = vld [vmem:[%s18503_s3 + $0x88c] sm:$0xf]  ;;  %v11002_v30 = vor.u32 %v12751_v62, %v11001_v1  ;;  %v12719_v1 = vld [vmem:[%s18503_s3 + $0x790] sm:$0xf0] }
 0x303   : > { %v3915_v51 = vpop.f32.mrf.mxu3  ;;  %v10973_v22 = vld [vmem:[%s18503_s3 + $0x848] sm:$0xf] }
 0x304   : > { %5830 = vmatpush.bf16.msrb.mxu0 %v11054_v3  ;;  %5133 = vmatmul.bf16.vlgmr.msra.gmra.mxu3 %v16343_v15  ;;  %v11099_v3 = vld [vmem:[%s18503_s3 + $0x954] sm:$0xf0]  ;;  %v4370_v49 = vpop.f32.mrf.mxu2 }
 0x305   : > { %5197 = vmatpush.bf16.msrb.mxu3 %v10703_v59  ;;  %5185 = vmatmul.bf16.vlgmr.msra.gmra.mxu2 %v16343_v15  ;;  %v11013_v15 = vld [vmem:[%s18503_s3 + $0x8a0] sm:$0xf]  ;;  %v3916_v59 = vadd.f32 %v3915_v51, %v16758_v47  ;;  %v10862_v47 = vor.u32 %v12714_v55, %v10859_v50  ;;  %v10878_v50 = vor.u32 %v12719_v1, %v10877_v48  ;;  %v12702_v51 = vld [vmem:[%s18503_s3 + $0x70c] sm:$0xf] }
 0x306   : > { %5795 = vmatpush.bf16.msrb.mxu2 %v11098_v0  ;;  %5779 = vmatpush.bf16.msrb.mxu1 %v11038_v58  ;;  %v11014_v44 = vor.u32 %v12754_v28, %v11013_v15  ;;  %v5334_v0 = vrot.slane %v5332_v5, 1  ;;  %v11006_v58 = vor.u32 %v12750_v16, %v11003_v57  ;;  %v10889_v15 = vld [vmem:[%s18503_s3 + $0x7a0] sm:$0xf]  ;;  %v12705_v5 = vld [vmem:[%s18503_s3 + $0x724] sm:$0xf] }
 0x307   : > { %v3929_v36 = vadd.f32 %v16592_v2, %v3916_v59  ;;  %v10901_v2 = vld [vmem:[%s18503_s3 + $0x7b8] sm:$0xf]  ;;  %v12703_v16 = vld [vmem:[%s18503_s3 + $0x710] sm:$0xf0] }
 0x308   : > { %5831 = vmatpush.bf16.msrb.mxu0 %v11042_v18  ;;  %v11106_v18 = vor.u32 %v12776_v41, %v11105_v7  ;;  %v17015_v40 = vor.u32 %v5334_v0, %v5330_v37  ;;  %v10811_v57 = vld [vmem:[%s18503_s3 + $0x714] sm:$0xf0]  ;;  %v12747_v59 = vld [vmem:[%s18503_s3 + $0x874] sm:$0xf]  ;;  %v12749_v37 = vld [vmem:[%s18503_s3 + $0x880] sm:$0xf0] }
 0x309   : > { %5749 = vmatpush.bf16.msra.mxu3 %v10894_v60  ;;  %v16990_v60 = vadd.f32 %v4370_v49, %v16834_v32  ;;  %v12711_v32 = vld [vmem:[%s18503_s3 + $0x754] sm:$0xf]  ;;  %v17013_v52 = vadd.f32 %v16707_v19, %v3929_v36  ;;  %v12709_v19 = vld [vmem:[%s18503_s3 + $0x740] sm:$0xf0]  ;;  %v10991_v49 = vld [vmem:[%s18503_s3 + $0x87c] sm:$0xf0]  ;;  %v10814_v7 = vor.u32 %v12702_v51, %v10811_v57 }
 0x30a   : > { %5801 = vmatpush.bf16.msra.mxu2 %v10898_v14  ;;  %5780 = vmatpush.bf16.msrb.mxu1 %v11026_v39  ;;  %v11102_v14 = vor.u32 %v12774_v63, %v11099_v3  ;;  %v10850_v4 = vor.u32 %v12711_v32, %v10847_v9  ;;  %v10902_v39 = vor.u32 %v12725_v25, %v10901_v2  ;;  %v10865_v63 = vld [vmem:[%s18503_s3 + $0x770] sm:$0xf]  ;;  %v12716_v3 = vld [vmem:[%s18503_s3 + $0x778] sm:$0xf0]  ;;  %v10979_v9 = vld [vmem:[%s18503_s3 + $0x864] sm:$0xf0] }
 0x30b   : > { %v3917_v24 = vpop.f32.mrf.mxu3  ;;  %v10866_v41 = vor.u32 %v12716_v3, %v10865_v63  ;;  %v12744_v32 = vld [vmem:[%s18503_s3 + $0x85c] sm:$0xf]  ;;  %v10985_v2 = vld [vmem:[%s18503_s3 + $0x860] sm:$0xf]  ;;  %v12746_v25 = vld [vmem:[%s18503_s3 + $0x868] sm:$0xf0] }
 0x30c   : > { %5832 = vmatpush.bf16.msrb.mxu0 %v11030_v27  ;;  %v12722_v27 = vld [vmem:[%s18503_s3 + $0x7a8] sm:$0xf0]  ;;  %v10986_v20 = vor.u32 %v12746_v25, %v10985_v2  ;;  %v12743_v24 = vld [vmem:[%s18503_s3 + $0x850] sm:$0xf0]  ;;  %v10931_v63 = vld [vmem:[%s18503_s3 + $0x804] sm:$0xf0] }
 0x30d   : > { %5750 = vmatpush.bf16.msra.mxu3 %v10882_v12  ;;  %v17017_v12 = vor.u32 %v5341_v53, %v5337_v13  ;;  %v10890_v33 = vor.u32 %v12722_v27, %v10889_v15  ;;  %v10854_v13 = vor.u32 %v12713_v29, %v10853_v8  ;;  %v10974_v27 = vor.u32 %v12743_v24, %v10973_v22  ;;  %v10937_v3 = vld [vmem:[%s18503_s3 + $0x800] sm:$0xf]  ;;  %v12726_v8 = vld [vmem:[%s18503_s3 + $0x7cc] sm:$0xf]  ;;  %v10907_v29 = vld [vmem:[%s18503_s3 + $0x7d4] sm:$0xf0] }
 0x30e   : > { %5802 = vmatpush.bf16.msra.mxu2 %v10886_v23  ;;  %5781 = vmatpush.bf16.msrb.mxu1 %v11014_v44  ;;  %v10833_v23 = vld [vmem:[%s18503_s3 + $0x738] sm:$0xf]  ;;  %v4422_v34 = vpop.f32.mrf.mxu1  ;;  %v11081_v22 = vld [vmem:[%s18503_s3 + $0x920] sm:$0xf]  ;;  %v12770_v24 = vld [vmem:[%s18503_s3 + $0x928] sm:$0xf0] }
 0x30f   : > { %v10834_v28 = vor.u32 %v12709_v19, %v10833_v23  ;;  %v17053_v43 = vadd.f32 %v4422_v34, %v16845_v42  ;;  %v10809_v42 = vld [vmem:[%s18503_s3 + $0x708] sm:$0xf]  ;;  %v12741_v23 = vld [vmem:[%s18503_s3 + $0x844] sm:$0xf]  ;;  %v10967_v19 = vld [vmem:[%s18503_s3 + $0x84c] sm:$0xf0] }
 0x310   : > { %5833 = vmatpush.bf16.msrb.mxu0 %v11018_v10  ;;  %v17055_v44 = vpop.f32.mrf.mxu0  ;;  %v5318_v10 = vshll.u32 %v5210_v31, 16  ;;  %v10810_v0 = vor.u32 %v12703_v16, %v10809_v42  ;;  %v10970_v15 = vor.u32 %v12741_v23, %v10967_v19  ;;  %v12704_v42 = vld [vmem:[%s18503_s3 + $0x718] sm:$0xf0]  ;;  %v11093_v25 = vld [vmem:[%s18503_s3 + $0x938] sm:$0xf] }
 0x311   : > { %5751 = vmatpush.bf16.msra.mxu3 %v10870_v35  ;;  %v10821_v35 = vld [vmem:[%s18503_s3 + $0x720] sm:$0xf] }
 0x312   : > { %5803 = vmatpush.bf16.msra.mxu2 %v10874_v46  ;;  %5782 = vmatpush.bf16.msrb.mxu1 %v11002_v30  ;;  %v10823_v46 = vld [vmem:[%s18503_s3 + $0x72c] sm:$0xf0]  ;;  %v10822_v62 = vor.u32 %v12706_v38, %v10821_v35  ;;  %v5320_v53 = vrot.slane %v5318_v10, 1 }
 0x313   : > { %v10826_v55 = vor.u32 %v12705_v5, %v10823_v46 }
 0x314   : > { %5834 = vmatpush.bf16.msrb.mxu0 %v11006_v58  ;;  %10706 = vmatmul.msk.bf16.vlgmr.msrb.gmra.mxu3 %vm3785_vm9, %v16458_v54  ;;  %v4372_v54 = vpop.f32.mrf.mxu2  ;;  %v10994_v58 = vor.u32 %v12747_v59, %v10991_v49  ;;  %v12734_v59 = vld [vmem:[%s18503_s3 + $0x808] sm:$0xf0] }
 0x315   : > { %5752 = vmatpush.bf16.msra.mxu3 %v10858_v61  ;;  %5783 = vmatmul.bf16.vlgmr.msrb.gmra.mxu1 %v17015_v40  ;;  %v10997_v61 = vld [vmem:[%s18503_s3 + $0x878] sm:$0xf]  ;;  %v10829_v54 = vld [vmem:[%s18503_s3 + $0x728] sm:$0xf] }
 0x316   : > { %5804 = vmatpush.bf16.msra.mxu2 %v10862_v47  ;;  %5847 = vmatpush.bf16.msra.mxu1 %v11102_v14  ;;  %v4424_v30 = vpop.f32.mrf.mxu1  ;;  %v5316_v47 = vshrl.u32 %v5210_v31, 16  ;;  %v10998_v14 = vor.u32 %v12749_v37, %v10997_v61  ;;  %v12738_v31 = vld [vmem:[%s18503_s3 + $0x82c] sm:$0xf] }
 0x317   : > { %11107 = vmatmul.msk.bf16.vlgmr.msrb.gmra.mxu2 %vm3785_vm9, %v17017_v12  ;;  %5835 = vmatmul.bf16.vlgmr.msrb.gmra.mxu0 %v17015_v40  ;;  %v10919_v30 = vld [vmem:[%s18503_s3 + $0x7ec] sm:$0xf0] }
 0x318   : > { %5899 = vmatpush.bf16.msra.mxu0 %v11106_v18  ;;  %v4476_v36 = vpop.f32.mrf.mxu0  ;;  %v17114_v18 = vor.u32 %v5320_v53, %v5316_v47  ;;  %v10925_v47 = vld [vmem:[%s18503_s3 + $0x7e8] sm:$0xf]  ;;  %v12731_v53 = vld [vmem:[%s18503_s3 + $0x7f0] sm:$0xf0] }
 0x319   : > { %5753 = vmatpush.bf16.msra.mxu3 %v10846_v17  ;;  %v10982_v17 = vor.u32 %v12744_v32, %v10979_v9  ;;  %v10913_v32 = vld [vmem:[%s18503_s3 + $0x7d0] sm:$0xf]  ;;  %v12728_v9 = vld [vmem:[%s18503_s3 + $0x7d8] sm:$0xf0] }
 0x31a   : > { %5805 = vmatpush.bf16.msra.mxu2 %v10850_v4  ;;  %5853 = vmatpush.bf16.msrb.mxu1 %v10902_v39  ;;  %v10841_v4 = vld [vmem:[%s18503_s3 + $0x740] sm:$0xf]  ;;  %v12710_v39 = vld [vmem:[%s18503_s3 + $0x748] sm:$0xf0] }
 0x31b   : > { %v10842_v56 = vor.u32 %v12710_v39, %v10841_v4  ;;  %v10914_v4 = vor.u32 %v12728_v9, %v10913_v32 }
 0x31d   : > { %5754 = vmatpush.bf16.msra.mxu3 %v10834_v28  ;;  %v12707_v28 = vld [vmem:[%s18503_s3 + $0x730] sm:$0xf0] }
 0x31e   : > { %5806 = vmatpush.bf16.msra.mxu2 %v10838_v26  ;;  %5854 = vmatpush.bf16.msrb.mxu1 %v10890_v33  ;;  %v10961_v26 = vld [vmem:[%s18503_s3 + $0x830] sm:$0xf]  ;;  %v12740_v33 = vld [vmem:[%s18503_s3 + $0x838] sm:$0xf0]  ;;  %v10830_v5 = vor.u32 %v12707_v28, %v10829_v54  ;;  %v12767_v54 = vld [vmem:[%s18503_s3 + $0x910] sm:$0xf0] }
 0x31f   : > { %v10962_v1 = vor.u32 %v12740_v33, %v10961_v26  ;;  %v11057_v26 = vld [vmem:[%s18503_s3 + $0x8f0] sm:$0xf]  ;;  %v12764_v33 = vld [vmem:[%s18503_s3 + $0x8f8] sm:$0xf0] }
 0x321   : > { %5755 = vmatpush.bf16.msra.mxu3 %v10822_v62  ;;  %v10817_v62 = vld [vmem:[%s18503_s3 + $0x710] sm:$0xf] }
 0x322   : > { %5807 = vmatpush.bf16.msra.mxu2 %v10826_v55  ;;  %5855 = vmatpush.bf16.msrb.mxu1 %v10878_v50  ;;  %v10949_v55 = vld [vmem:[%s18503_s3 + $0x818] sm:$0xf]  ;;  %v12737_v50 = vld [vmem:[%s18503_s3 + $0x820] sm:$0xf0]  ;;  %v10818_v16 = vor.u32 %v12704_v42, %v10817_v62 }
 0x323   : > { %v4383_v34 = vpop.f32.mrf.mxu3  ;;  %v10950_v57 = vor.u32 %v12737_v50, %v10949_v55 }
 0x324   : > { %v4384_v35 = vadd.f32 %v4383_v34, %v16990_v60  ;;  %v4435_v38 = vpop.f32.mrf.mxu2  ;;  %v12735_v60 = vld [vmem:[%s18503_s3 + $0x814] sm:$0xf] }
 0x325   : > { %5756 = vmatpush.bf16.msra.mxu3 %v10810_v0  ;;  %11108 = vmatmul.msk.bf16.vlgmr.msra.gmra.mxu1 %vm3785_vm9, %v17017_v12  ;;  %v4436_v46 = vadd.f32 %v4435_v38, %v17053_v43  ;;  %v10943_v43 = vld [vmem:[%s18503_s3 + $0x81c] sm:$0xf0]  ;;  %v10938_v0 = vor.u32 %v12734_v59, %v10937_v3  ;;  %v11045_v38 = vld [vmem:[%s18503_s3 + $0x8d8] sm:$0xf]  ;;  %v11009_v59 = vld [vmem:[%s18503_s3 + $0x890] sm:$0xf] }
 0x326   : > { %5808 = vmatpush.bf16.msra.mxu2 %v10814_v7  ;;  %5856 = vmatpush.bf16.msrb.mxu1 %v10866_v41  ;;  %v17170_v10 = vadd.f32 %v16718_v21, %v4384_v35  ;;  %v10946_v51 = vor.u32 %v12735_v60, %v10943_v43  ;;  %v12732_v21 = vld [vmem:[%s18503_s3 + $0x7fc] sm:$0xf]  ;;  %v12729_v7 = vld [vmem:[%s18503_s3 + $0x7e4] sm:$0xf]  ;;  %v11058_v35 = vor.u32 %v12764_v33, %v11057_v26  ;;  %v11033_v60 = vld [vmem:[%s18503_s3 + $0x8c0] sm:$0xf] }
 0x327   : > { %11109 = vmatmul.msk.bf16.vlgmr.msra.gmra.mxu0 %vm3785_vm9, %v17017_v12  ;;  %v10955_v12 = vld [vmem:[%s18503_s3 + $0x834] sm:$0xf0]  ;;  %v10934_v37 = vor.u32 %v12732_v21, %v10931_v63  ;;  %v12758_v43 = vld [vmem:[%s18503_s3 + $0x8c8] sm:$0xf0] }
 0x328   : > { %5757 = vmatmul.bf16.vlgmr.msra.gmra.mxu3 %v17114_v18  ;;  %v10958_v48 = vor.u32 %v12738_v31, %v10955_v12 }
 0x329   : > { %5814 = vmatpush.bf16.msrb.mxu3 %v10994_v58  ;;  %5809 = vmatmul.bf16.vlgmr.msra.gmra.mxu2 %v17114_v18  ;;  %v10922_v58 = vor.u32 %v12729_v7, %v10919_v30 }
 0x32a   : > { %5866 = vmatpush.bf16.msrb.mxu2 %v10998_v14  ;;  %5857 = vmatpush.bf16.msrb.mxu1 %v10854_v13  ;;  %v10926_v14 = vor.u32 %v12731_v53, %v10925_v47 }
 0x32b   : > { %v4385_v49 = vpop.f32.mrf.mxu3 }
 0x32c   : > { %v4437_v61 = vpop.f32.mrf.mxu2  ;;  %v12752_v49 = vld [vmem:[%s18503_s3 + $0x898] sm:$0xf0] }
 0x32d   : > { %5815 = vmatpush.bf16.msrb.mxu3 %v10982_v17 }
 0x32e   : > { %5867 = vmatpush.bf16.msrb.mxu2 %v10986_v20  ;;  %5858 = vmatpush.bf16.msrb.mxu1 %v10842_v56  ;;  %v4487_v41 = vpop.f32.mrf.mxu1  ;;  %v10910_v20 = vor.u32 %v12726_v8, %v10907_v29  ;;  %v11082_v56 = vor.u32 %v12770_v24, %v11081_v22 }
 0x330   : > { %v17206_v36 = vpop.f32.mrf.mxu0 }
 0x331   : > { %5816 = vmatpush.bf16.msrb.mxu3 %v10970_v15 }
 0x332   : > { %5868 = vmatpush.bf16.msrb.mxu2 %v10974_v27  ;;  %5859 = vmatpush.bf16.msrb.mxu1 %v10830_v5  ;;  %v11069_v27 = vld [vmem:[%s18503_s3 + $0x908] sm:$0xf] }
 0x333   : > { %v4448_v2 = vpop.f32.mrf.mxu3  ;;  %v11070_v31 = vor.u32 %v12767_v54, %v11069_v27 }
 0x334   : > { %v17226_v13 = vadd.f32 %v4448_v2, %v4436_v46 }
 0x335   : > { %5817 = vmatpush.bf16.msrb.mxu3 %v10958_v48 }
 0x336   : > { %5869 = vmatpush.bf16.msrb.mxu2 %v10962_v1  ;;  %5860 = vmatpush.bf16.msrb.mxu1 %v10818_v16  ;;  %v4500_v17 = vpop.f32.mrf.mxu2  ;;  %v4489_v39 = vpop.f32.mrf.mxu1  ;;  %v11034_v16 = vor.u32 %v12758_v43, %v11033_v60 }
 0x338   : > { %v5084_v19 = vpop.f32.mrf.mxu0 }
 0x339   : > { %5818 = vmatpush.bf16.msrb.mxu3 %v10946_v51  ;;  %5861 = vmatmul.bf16.vlgmr.msrb.gmra.mxu1 %v17114_v18  ;;  %v12773_v18 = vld [vmem:[%s18503_s3 + $0x940] sm:$0xf0] }
 0x33a   : > { %5870 = vmatpush.bf16.msrb.mxu2 %v10950_v57  ;;  %v11094_v23 = vor.u32 %v12773_v18, %v11093_v25 }
 0x33b   : > { %v4450_v15 = vpop.f32.mrf.mxu3 }
 0x33d   : > { %5819 = vmatpush.bf16.msrb.mxu3 %v10934_v37  ;;  %v11010_v37 = vor.u32 %v12752_v49, %v11009_v59 }
 0x33e   : > { %5871 = vmatpush.bf16.msrb.mxu2 %v10938_v0  ;;  %v4502_v28 = vpop.f32.mrf.mxu2  ;;  %v5095_v12 = vpop.f32.mrf.mxu1 }
 0x340   : > { %v5147_v34 = vpop.f32.mrf.mxu0 }
 0x341   : > { %5820 = vmatpush.bf16.msrb.mxu3 %v10922_v58 }
 0x342   : > { %5872 = vmatpush.bf16.msrb.mxu2 %v10926_v14 }
 0x345   : > { %5821 = vmatpush.bf16.msrb.mxu3 %v10910_v20 }
 0x346   : > { %5873 = vmatpush.bf16.msrb.mxu2 %v10914_v4  ;;  %v5097_v42 = vpop.f32.mrf.mxu1 }
 0x347   : > { %v4461_v5 = vpop.f32.mrf.mxu3 }
 0x348   : > { %5822 = vmatmul.bf16.vlgmr.msrb.gmra.mxu3 %v16802_v6  ;;  %v4462_v46 = vadd.f32 %v4461_v5, %v17013_v52  ;;  %v5056_v48 = vpop.f32.mrf.mxu2  ;;  %v5149_v55 = vpop.f32.mrf.mxu0  ;;  %v11021_v52 = vld [vmem:[%s18503_s3 + $0x8a8] sm:$0xf] }
 0x349   : > { %5879 = vmatpush.bf16.msra.mxu3 %v11094_v23  ;;  %5874 = vmatmul.bf16.vlgmr.msrb.gmra.mxu2 %v16802_v6  ;;  %v12761_v6 = vld [vmem:[%s18503_s3 + $0x8e0] sm:$0xf0] }
 0x34a   : > { %v11046_v1 = vor.u32 %v12761_v6, %v11045_v38  ;;  %v4475_v62 = vadd.f32 %v17055_v44, %v4462_v46  ;;  %v12755_v44 = vld [vmem:[%s18503_s3 + $0x8b0] sm:$0xf0] }
 0x34b   : > { %v11022_v63 = vor.u32 %v12755_v44, %v11021_v52  ;;  %v12827_v44 = vld [vmem:[%s18505_s5 + $0x194] sm:$0xf] }
 0x34c   : > { %v4488_v50 = vadd.f32 %v4487_v41, %v4475_v62 }
 0x34d   : > { %5880 = vmatpush.bf16.msra.mxu3 %v11082_v56 }
 0x34e   : > { %v4501_v51 = vadd.f32 %v4500_v17, %v4488_v50 }
 0x34f   : > { %v4463_v57 = vpop.f32.mrf.mxu3 }
 0x350   : > { %v5058_v21 = vpop.f32.mrf.mxu2 }
 0x351   : > { %5881 = vmatpush.bf16.msra.mxu3 %v11070_v31 }
 0x352   : > { %v5108_v3 = vpop.f32.mrf.mxu1 }
 0x354   : > { %v5160_v61 = vpop.f32.mrf.mxu0 }
 0x355   : > { %5882 = vmatpush.bf16.msra.mxu3 %v11058_v35 }
 0x359   : > { %5883 = vmatpush.bf16.msra.mxu3 %v11046_v1 }
 0x35a   : > { %v5110_v0 = vpop.f32.mrf.mxu1 }
 0x35c   : > { %v5162_v7 = vpop.f32.mrf.mxu0 }
 0x35d   : > { %5884 = vmatpush.bf16.msra.mxu3 %v11034_v16 }
 0x361   : > { %5885 = vmatpush.bf16.msra.mxu3 %v11022_v63 }
 0x365   : > { %5886 = vmatpush.bf16.msra.mxu3 %v11010_v37 }
 0x367   : > { %v5069_v41 = vpop.f32.mrf.mxu3 }
 0x368   : > { %5887 = vmatmul.bf16.vlgmr.msra.gmra.mxu3 %v17015_v40  ;;  %v5070_v30 = vadd.f32 %v5069_v41, %v5056_v48  ;;  %v5121_v47 = vpop.f32.mrf.mxu2 }
 0x369   : > { %v5122_v53 = vadd.f32 %v5121_v47, %v5108_v3 }
 0x36a   : > { %v5083_v58 = vadd.f32 %v17206_v36, %v5070_v30  ;;  %v11302_v30 = vld [vmem:[%s18505_s5 + $0x10] sm:$0xf] }
 0x36c   : > { %v5096_v14 = vadd.f32 %v5095_v12, %v5083_v58 }
 0x36e   : > { %v5203_v8 = vadd.f32 %v5096_v14, %v17170_v10  ;;  %v12825_v14 = vld [vmem:[%s18505_s5 + $0x184] sm:$0xf] }
 0x36f   : > { %v5071_v29 = vpop.f32.mrf.mxu3 }
 0x370   : > { %v5123_v32 = vpop.f32.mrf.mxu2 }
 0x371   : > { %v12823_v32 = vld [vmem:[%s18505_s5 + $0x174] sm:$0xf] }
 0x372   : > { %v5173_v9 = vpop.f32.mrf.mxu1 }
 0x373   : > { %v5174_v2 = vadd.f32 %v5173_v9, %v5160_v61  ;;  %v11190_v9 = vld [vmem:[%s18505_s5 + $0x178] sm:$0xf0] }
 0x374   : > { %v5771_v25 = vpop.f32.mrf.mxu0 }
 0x37a   : > { %v5175_v18 = vpop.f32.mrf.mxu1 }
 0x37b   : > { %v12844_v18 = vld [vmem:[%s18505_s5 + $0x214] sm:$0xf0] }
 0x37c   : > { %v5773_v17 = vpop.f32.mrf.mxu0 }
 0x387   : > { %v5134_v20 = vpop.f32.mrf.mxu3 }
 0x388   : > { %v5135_v4 = vadd.f32 %v5134_v20, %v5122_v53  ;;  %v5186_v39 = vpop.f32.mrf.mxu2  ;;  %v12821_v20 = vld [vmem:[%s18505_s5 + $0x164] sm:$0xf] }
 0x389   : > { %v5187_v40 = vadd.f32 %v5186_v39, %v5174_v2  ;;  %v11193_v2 = vor.u32 %v12823_v32, %v11190_v9 }
 0x38a   : > { %v5148_v23 = vadd.f32 %v5147_v34, %v5135_v4  ;;  %v11182_v4 = vld [vmem:[%s18505_s5 + $0x168] sm:$0xf0] }
 0x38b   : > { %v11185_v39 = vor.u32 %v12821_v20, %v11182_v4  ;;  %v12834_v4 = vld [vmem:[%s18505_s5 + $0x1c4] sm:$0xf0] }
 0x38c   : > { %v5204_v19 = vadd.f32 %v5148_v23, %v17226_v13  ;;  %v17285_v13 = vld [vmem:[%s18504_s4] sm:$0x7]  ;;  %v12842_v23 = vld [vmem:[%s18505_s5 + $0x204] sm:$0xf0] }
 0x38d   : > { %v5910_v62 = vperm.slane %v17285_v13, 0  ;;  %v5911_v37 = vperm.slane %v17285_v13, 1 }
 0x38f   : > { %v5136_v22 = vpop.f32.mrf.mxu3 }
 0x390   : > { %v5188_v24 = vpop.f32.mrf.mxu2  ;;  %v12819_v22 = vld [vmem:[%s18505_s5 + $0x154] sm:$0xf] }
 0x391   : > { %v11174_v24 = vld [vmem:[%s18505_s5 + $0x158] sm:$0xf0] }
 0x392   : > { %v5784_v36 = vpop.f32.mrf.mxu1 }
 0x394   : > { %v5836_v56 = vpop.f32.mrf.mxu0 }
 0x397   : > { %v5199_v15 = vpop.f32.mrf.mxu3 }
 0x398   : > { %v5200_v10 = vadd.f32 %v5199_v15, %v5187_v40  ;;  %v11260_v40 = vld [vmem:[%s18505_s5 + $0x200] sm:$0xf] }
 0x39a   : > { %v5797_v27 = vpop.f32.mrf.mxu2  ;;  %v17278_v54 = vadd.f32 %v5200_v10, %v4501_v51  ;;  %v5786_v28 = vpop.f32.mrf.mxu1  ;;  %v11206_v51 = vld [vmem:[%s18505_s5 + $0x198] sm:$0xf0]  ;;  %v11252_v10 = vld [vmem:[%s18505_s5 + $0x1f0] sm:$0xf] }
 0x39b   : > { %v11209_v57 = vor.u32 %v12827_v44, %v11206_v51 }
 0x39c   : > { %v5838_v31 = vpop.f32.mrf.mxu0 }
 0x39d   : > { %6295 = vmatpush.bf16.msrb.mxu3 %v11209_v57 }
 0x39f   : > { %v5201_v12 = vpop.f32.mrf.mxu3 }
 0x3a0   : > { %v12817_v12 = vld [vmem:[%s18505_s5 + $0x144] sm:$0xf] }
 0x3a2   : > { %v5799_v26 = vpop.f32.mrf.mxu2  ;;  %v5849_v33 = vpop.f32.mrf.mxu1 }
 0x3a3   : > { %v11166_v26 = vld [vmem:[%s18505_s5 + $0x148] sm:$0xf0] }
 0x3a4   : > { %v17280_v35 = vpop.f32.mrf.mxu0 }
 0x3aa   : > { %v5851_v5 = vpop.f32.mrf.mxu1 }
 0x3ab   : > { %v5758_v38 = vpop.f32.mrf.mxu3  ;;  %v12838_v5 = vld [vmem:[%s18505_s5 + $0x1e4] sm:$0xf0] }
 0x3ac   : > { %v5772_v34 = vadd.f32 %v5771_v25, %v5758_v38  ;;  %v5810_v6 = vpop.f32.mrf.mxu2  ;;  %v5903_v48 = vpop.f32.mrf.mxu0  ;;  %v11268_v25 = vld [vmem:[%s18505_s5 + $0x210] sm:$0xf] }
 0x3ad   : > { %v11269_v17 = vor.u32 %v12844_v18, %v11268_v25  ;;  %v12826_v25 = vld [vmem:[%s18505_s5 + $0x184] sm:$0xf0]  ;;  %v11228_v18 = vld [vmem:[%s18505_s5 + $0x1c0] sm:$0xf] }
 0x3ae   : > { %v5785_v46 = vadd.f32 %v5784_v36, %v5772_v34  ;;  %v11177_v36 = vor.u32 %v12819_v22, %v11174_v24  ;;  %v5912_v34 = vperm.slane %v17285_v13, 2  ;;  %v12815_v13 = vld [vmem:[%s18505_s5 + $0x134] sm:$0xf]  ;;  %v11406_v22 = vld [vmem:[%s18505_s5 + $0xe0] sm:$0xf] }
 0x3af   : > { %6269 = vmatpush.bf16.msra.mxu1 %v11269_v17  ;;  %v12806_v24 = vld [vmem:[%s18505_s5 + $0xe4] sm:$0xf0] }
 0x3b0   : > { %v5798_v1 = vadd.f32 %v5797_v27, %v5785_v46  ;;  %v12840_v27 = vld [vmem:[%s18505_s5 + $0x1f4] sm:$0xf0] }
 0x3b1   : > { %v11253_v31 = vor.u32 %v12840_v27, %v11252_v10  ;;  %v11220_v27 = vld [vmem:[%s18505_s5 + $0x1b0] sm:$0xf] }
 0x3b2   : > { %v5905_v42 = vadd.f32 %v5798_v1, %v5203_v8  ;;  %v11198_v8 = vld [vmem:[%s18505_s5 + $0x188] sm:$0xf0]  ;;  %v11284_v1 = vld [vmem:[%s18505_s5 + $0x230] sm:$0xf] }
 0x3b3   : > { %v5760_v60 = vpop.f32.mrf.mxu3  ;;  %v11201_v29 = vor.u32 %v12825_v14, %v11198_v8  ;;  %v11414_v8 = vld [vmem:[%s18505_s5 + $0xf0] sm:$0xf] }
 0x3b4   : > { %v5916_v43 = vadd.f32 %v5910_v62, %v5905_v42  ;;  %v5812_v55 = vpop.f32.mrf.mxu2  ;;  %v11158_v42 = vld [vmem:[%s18505_s5 + $0x138] sm:$0xf0] }
 0x3b5   : > { %6296 = vmatpush.bf16.msrb.mxu3 %v11201_v29  ;;  %v11204_v55 = vld [vmem:[%s18505_s5 + $0x190] sm:$0xf]  ;;  %v12808_v29 = vld [vmem:[%s18505_s5 + $0xf4] sm:$0xf0] }
 0x3b6   : > { %vm5919_vm10 = vcmp.gt.f32.partialorder %v5916_v43, 0.0  ;;  %v5922_v50 = vmul.f32 0.2, %v5916_v43  ;;  %v5862_v16 = vpop.f32.mrf.mxu1  ;;  %v11415_v9 = vor.u32 %v12808_v29, %v11414_v8  ;;  %v12818_v8 = vld [vmem:[%s18505_s5 + $0x144] sm:$0xf0] }
 0x3b7   : > { %v11334_v29 = vld [vmem:[%s18505_s5 + $0x50] sm:$0xf] }
 0x3b8   : > { %v17288_v52 = vsel %vm5919_vm10, %v5916_v43, %v5922_v50  ;;  %v12828_v50 = vld [vmem:[%s18505_s5 + $0x194] sm:$0xf0] }
 0x3b9   : > { %5943 = vst [vmem:[#allocation1] sm:$0xff] %v17288_v52  ;;  %6297 = vmatpush.bf16.msrb.mxu3 %v11193_v2  ;;  %v11205_v57 = vor.u32 %v12828_v50, %v11204_v55  ;;  %v11196_v2 = vld [vmem:[%s18505_s5 + $0x180] sm:$0xf]  ;;  %v11246_v55 = vld [vmem:[%s18505_s5 + $0x1e8] sm:$0xf0] }
 0x3ba   : > { %v11197_v20 = vor.u32 %v12826_v25, %v11196_v2  ;;  %v12833_v2 = vld [vmem:[%s18505_s5 + $0x1c4] sm:$0xf]  ;;  %v11230_v25 = vld [vmem:[%s18505_s5 + $0x1c8] sm:$0xf0] }
 0x3bb   : > { %6256 = vmatpush.bf16.msrb.mxu0 %v11205_v57 }
 0x3bd   : > { %6298 = vmatpush.bf16.msrb.mxu3 %v11185_v39  ;;  %v12841_v39 = vld [vmem:[%s18505_s5 + $0x204] sm:$0xf] }
 0x3be   : > { %v5864_v21 = vpop.f32.mrf.mxu1 }
 0x3bf   : > { %v12836_v21 = vld [vmem:[%s18505_s5 + $0x1d4] sm:$0xf0]  ;;  %6257 = vmatpush.bf16.msrb.mxu0 %v11197_v20  ;;  %v11233_v20 = vor.u32 %v12833_v2, %v11230_v25  ;;  %v12811_v25 = vld [vmem:[%s18505_s5 + $0x114] sm:$0xf] }
 0x3c0   : > { %v12812_v2 = vld [vmem:[%s18505_s5 + $0x114] sm:$0xf0] }
 0x3c1   : > { %6299 = vmatpush.bf16.msrb.mxu3 %v11177_v36  ;;  %v11188_v36 = vld [vmem:[%s18505_s5 + $0x170] sm:$0xf] }
 0x3cb   : > { %v5823_v63 = vpop.f32.mrf.mxu3 }
 0x3cc   : > { %v5875_v3 = vpop.f32.mrf.mxu2  ;;  %v5824_v59 = vadd.f32 %v5823_v63, %v5810_v6  ;;  %v11244_v6 = vld [vmem:[%s18505_s5 + $0x1e0] sm:$0xf] }
 0x3cd   : > { %v11245_v48 = vor.u32 %v12838_v5, %v11244_v6  ;;  %v12804_v6 = vld [vmem:[%s18505_s5 + $0xd4] sm:$0xf0]  ;;  %v11180_v5 = vld [vmem:[%s18505_s5 + $0x160] sm:$0xf] }
 0x3ce   : > { %v5837_v49 = vadd.f32 %v5836_v56, %v5824_v59  ;;  %v5876_v56 = vadd.f32 %v5875_v3, %v5862_v16  ;;  %v11236_v16 = vld [vmem:[%s18505_s5 + $0x1d0] sm:$0xf]  ;;  %v11276_v3 = vld [vmem:[%s18505_s5 + $0x220] sm:$0xf]  ;;  %v12846_v59 = vld [vmem:[%s18505_s5 + $0x224] sm:$0xf0] }
 0x3cf   : > { %v11237_v63 = vor.u32 %v12836_v21, %v11236_v16  ;;  %v11390_v16 = vld [vmem:[%s18505_s5 + $0xc0] sm:$0xf]  ;;  %v12820_v21 = vld [vmem:[%s18505_s5 + $0x154] sm:$0xf0] }
 0x3d0   : > { %v5850_v61 = vadd.f32 %v5849_v33, %v5837_v49  ;;  %v11169_v33 = vor.u32 %v12817_v12, %v11166_v26  ;;  %v12813_v49 = vld [vmem:[%s18505_s5 + $0x124] sm:$0xf]  ;;  %v12839_v12 = vld [vmem:[%s18505_s5 + $0x1f4] sm:$0xf]  ;;  %v11254_v26 = vld [vmem:[%s18505_s5 + $0x1f8] sm:$0xf0] }
 0x3d2   : > { %v5906_v0 = vadd.f32 %v5850_v61, %v5204_v19  ;;  %v11261_v19 = vor.u32 %v12842_v23, %v11260_v40  ;;  %6300 = vmatpush.bf16.msrb.mxu3 %v11169_v33  ;;  %v11262_v40 = vld [vmem:[%s18505_s5 + $0x208] sm:$0xf0]  ;;  %v11229_v23 = vor.u32 %v12834_v4, %v11228_v18  ;;  %v11398_v33 = vld [vmem:[%s18505_s5 + $0xd0] sm:$0xf]  ;;  %v11374_v4 = vld [vmem:[%s18505_s5 + $0xa0] sm:$0xf] }
 0x3d3   : > { %v5825_v7 = vpop.f32.mrf.mxu3 }
 0x3d4   : > { %v5877_v41 = vpop.f32.mrf.mxu2  ;;  %v5917_v47 = vadd.f32 %v5911_v37, %v5906_v0  ;;  %6270 = vmatpush.bf16.msra.mxu1 %v11261_v19  ;;  %v11277_v37 = vor.u32 %v12846_v59, %v11276_v3  ;;  %v11150_v0 = vld [vmem:[%s18505_s5 + $0x128] sm:$0xf0]  ;;  %v12843_v7 = vld [vmem:[%s18505_s5 + $0x214] sm:$0xf]  ;;  %v11265_v19 = vor.u32 %v12841_v39, %v11262_v40  ;;  %v12790_v3 = vld [vmem:[%s18505_s5 + $0x64] sm:$0xf0] }
 0x3d5   : > { %v11270_v41 = vld [vmem:[%s18505_s5 + $0x218] sm:$0xf0]  ;;  %v12798_v39 = vld [vmem:[%s18505_s5 + $0xa4] sm:$0xf0] }
 0x3d6   : > { %vm5920_vm12 = vcmp.gt.f32.partialorder %v5917_v47, 0.0  ;;  %v5923_v53 = vmul.f32 0.2, %v5917_v47  ;;  %v11273_v14 = vor.u32 %v12843_v7, %v11270_v41  ;;  %v11382_v7 = vld [vmem:[%s18505_s5 + $0xb0] sm:$0xf]  ;;  %v11375_v40 = vor.u32 %v12798_v39, %v11374_v4 }
 0x3d8   : > { %v17309_v58 = vsel %vm5920_vm12, %v5917_v47, %v5923_v53  ;;  %6271 = vmatpush.bf16.msra.mxu1 %v11253_v31  ;;  %v11153_v53 = vor.u32 %v12813_v49, %v11150_v0  ;;  %v11238_v0 = vld [vmem:[%s18505_s5 + $0x1d8] sm:$0xf0] }
 0x3d9   : > { %5944 = vst [vmem:[#allocation1 + $0x9] sm:$0xff] %v17309_v58  ;;  %v5937_v44 = vrot.slane %v17309_v58, 7 }
 0x3db   : > { %v5939_v32 = vsel %vm3090_vm5, %v17288_v52, %v5937_v44  ;;  %v12802_v44 = vld [vmem:[%s18505_s5 + $0xc4] sm:$0xf0] }
 0x3dc   : > { %6272 = vmatpush.bf16.msra.mxu1 %v11245_v48  ;;  %v12822_v48 = vld [vmem:[%s18505_s5 + $0x164] sm:$0xf0]  ;;  %v11391_v57 = vor.u32 %v12802_v44, %v11390_v16  ;;  %v12780_v16 = vld [vmem:[%s18505_s5 + $0x14] sm:$0xf0] }
 0x3dd   : > { %v11303_v44 = vor.u32 %v12780_v16, %v11302_v30  ;;  %v11500_v30 = vld [vmem:[%s18505_s5 + $0x270] sm:$0xf] }
 0x3e0   : > { %6273 = vmatpush.bf16.msra.mxu1 %v11237_v63  ;;  %v11342_v63 = vld [vmem:[%s18505_s5 + $0x60] sm:$0xf] }
 0x3e1   : > { %v11343_v49 = vor.u32 %v12790_v3, %v11342_v63  ;;  %v12778_v3 = vld [vmem:[%s18505_s5 + $0x4] sm:$0xf0] }
 0x3e4   : > { %6274 = vmatpush.bf16.msra.mxu1 %v11229_v23  ;;  %v11156_v23 = vld [vmem:[%s18505_s5 + $0x130] sm:$0xf] }
 0x3eb   : > { %v5888_v15 = vpop.f32.mrf.mxu3 }
 0x3ec   : > { %v5889_v28 = vadd.f32 %v5888_v15, %v5876_v56  ;;  %v12824_v56 = vld [vmem:[%s18505_s5 + $0x174] sm:$0xf0]  ;;  %v11407_v15 = vor.u32 %v12806_v24, %v11406_v22  ;;  %v11326_v22 = vld [vmem:[%s18505_s5 + $0x40] sm:$0xf] }
 0x3ed   : > { %v11189_v10 = vor.u32 %v12824_v56, %v11188_v36  ;;  %v12786_v36 = vld [vmem:[%s18505_s5 + $0x44] sm:$0xf0] }
 0x3ee   : > { %v5902_v38 = vadd.f32 %v17280_v35, %v5889_v28  ;;  %v12848_v35 = vld [vmem:[%s18505_s5 + $0x234] sm:$0xf0]  ;;  %v11327_v56 = vor.u32 %v12786_v36, %v11326_v22 }
 0x3ef   : > { %v11285_v62 = vor.u32 %v12848_v35, %v11284_v1  ;;  %v12832_v28 = vld [vmem:[%s18505_s5 + $0x1b4] sm:$0xf0]  ;;  %6258 = vmatpush.bf16.msrb.mxu0 %v11189_v10  ;;  %v11181_v1 = vor.u32 %v12822_v48, %v11180_v5  ;;  %v11212_v35 = vld [vmem:[%s18505_s5 + $0x1a0] sm:$0xf]  ;;  %v12794_v5 = vld [vmem:[%s18505_s5 + $0x84] sm:$0xf0] }
 0x3f0   : > { %v5907_v46 = vadd.f32 %v5902_v38, %v17278_v54  ;;  %v11161_v54 = vor.u32 %v12815_v13, %v11158_v42  ;;  %v11221_v31 = vor.u32 %v12832_v28, %v11220_v27  ;;  %v12830_v13 = vld [vmem:[%s18505_s5 + $0x1a4] sm:$0xf0]  ;;  %v11350_v42 = vld [vmem:[%s18505_s5 + $0x70] sm:$0xf]  ;;  %v12796_v27 = vld [vmem:[%s18505_s5 + $0x94] sm:$0xf0] }
 0x3f1   : > { %6288 = vmatpush.bf16.msra.mxu2 %v11285_v62  ;;  %v11213_v62 = vor.u32 %v12830_v13, %v11212_v35  ;;  %v12814_v28 = vld [vmem:[%s18505_s5 + $0x124] sm:$0xf0]  ;;  %v11310_v35 = vld [vmem:[%s18505_s5 + $0x20] sm:$0xf] }
 0x3f2   : > { %v5918_v60 = vadd.f32 %v5912_v34, %v5907_v46  ;;  %6301 = vmatpush.bf16.msrb.mxu3 %v11161_v54  ;;  %v11257_v34 = vor.u32 %v12839_v12, %v11254_v26  ;;  %v11399_v46 = vor.u32 %v12804_v6, %v11398_v33  ;;  %6275 = vmatpush.bf16.msra.mxu1 %v11221_v31  ;;  %v11318_v26 = vld [vmem:[%s18505_s5 + $0x30] sm:$0xf]  ;;  %v12784_v33 = vld [vmem:[%s18505_s5 + $0x34] sm:$0xf0]  ;;  %v11358_v6 = vld [vmem:[%s18505_s5 + $0x80] sm:$0xf] }
 0x3f3   : > { %v5890_v43 = vpop.f32.mrf.mxu3  ;;  %6259 = vmatpush.bf16.msrb.mxu0 %v11181_v1  ;;  %v11359_v1 = vor.u32 %v12794_v5, %v11358_v6  ;;  %v11516_v5 = vld [vmem:[%s18505_s5 + $0x290] sm:$0xf] }
 0x3f4   : > { %vm5921_vm13 = vcmp.gt.f32.partialorder %v5918_v60, 0.0  ;;  %v5924_v51 = vmul.f32 0.2, %v5918_v60  ;;  %v12837_v43 = vld [vmem:[%s18505_s5 + $0x1e4] sm:$0xf] }
 0x3f5   : > { %6289 = vmatpush.bf16.msra.mxu2 %v11277_v37  ;;  %v11249_v50 = vor.u32 %v12837_v43, %v11246_v55  ;;  %v12835_v37 = vld [vmem:[%s18505_s5 + $0x1d4] sm:$0xf]  ;;  %v11286_v55 = vld [vmem:[%s18505_s5 + $0x238] sm:$0xf0] }
 0x3f6   : > { %v17403_v61 = vsel %vm5921_vm13, %v5918_v60, %v5924_v51  ;;  %6302 = vmatpush.bf16.msrb.mxu3 %v11153_v53  ;;  %v12792_v60 = vld [vmem:[%s18505_s5 + $0x74] sm:$0xf0]  ;;  %v11172_v51 = vld [vmem:[%s18505_s5 + $0x150] sm:$0xf]  ;;  %6276 = vmatpush.bf16.msra.mxu1 %v11213_v62  ;;  %v11241_v41 = vor.u32 %v12835_v37, %v11238_v0  ;;  %v12782_v62 = vld [vmem:[%s18505_s5 + $0x24] sm:$0xf0] }
 0x3f7   : > { %v5938_v47 = vrot.slane %v17403_v61, 6  ;;  %5945 = vst [vmem:[#allocation1 + $0x12] sm:$0xff] %v17403_v61  ;;  %v11351_v54 = vor.u32 %v12792_v60, %v11350_v42  ;;  %v11173_v59 = vor.u32 %v12820_v21, %v11172_v51  ;;  %v11311_v60 = vor.u32 %v12782_v62, %v11310_v35  ;;  %v12847_v43 = vld [vmem:[%s18505_s5 + $0x234] sm:$0xf]  ;;  %v12845_v51 = vld [vmem:[%s18505_s5 + $0x224] sm:$0xf] }
 0x3f8   : > { %v11294_v21 = vld [vmem:[%s18505_s5] sm:$0xf] }
 0x3f9   : > { %v5940_v17 = vsel %vm897_vm0, %v5939_v32, %v5938_v47  ;;  %6308 = vmatpush.bf16.msrb.mxu2 %v11273_v14  ;;  %v12800_v47 = vld [vmem:[%s18505_s5 + $0xb4] sm:$0xf0]  ;;  %6260 = vmatpush.bf16.msrb.mxu0 %v11173_v59  ;;  %v11164_v14 = vld [vmem:[%s18505_s5 + $0x140] sm:$0xf]  ;;  %v11295_v37 = vor.u32 %v12778_v3, %v11294_v21  ;;  %v12781_v21 = vld [vmem:[%s18505_s5 + $0x24] sm:$0xf] }
 0x3fa   : > { %5942 = vst.msk [vmem:[#allocation3 + $0xc] ss:$4 sm:$0x7] %vm17299_vm11, %v5940_v17  ;;  %6530 = vmatpush.bf16.msra.mxu3 %v11415_v9  ;;  %6517 = vmatpush.bf16.msrb.mxu1 %v11351_v54  ;;  %v11383_v53 = vor.u32 %v12800_v47, %v11382_v7  ;;  %v11165_v32 = vor.u32 %v12818_v8, %v11164_v14  ;;  %v12788_v9 = vld [vmem:[%s18505_s5 + $0x54] sm:$0xf0] }
 0x3fb   : > { %v11335_v17 = vor.u32 %v12788_v9, %v11334_v29  ;;  %v12791_v47 = vld [vmem:[%s18505_s5 + $0x74] sm:$0xf]  ;;  %v11532_v14 = vld [vmem:[%s18505_s5 + $0x2b0] sm:$0xf]  ;;  %v12864_v8 = vld [vmem:[%s18505_s5 + $0x2b4] sm:$0xf0] }
 0x3fc   : > { %v11430_v29 = vld [vmem:[%s18505_s5 + $0x110] sm:$0xf]  ;;  %v12789_v9 = vld [vmem:[%s18505_s5 + $0x64] sm:$0xf]  ;;  %v11533_v22 = vor.u32 %v12864_v8, %v11532_v14  ;;  %v11508_v62 = vld [vmem:[%s18505_s5 + $0x280] sm:$0xf] }
 0x3fd   : > { %6309 = vmatpush.bf16.msrb.mxu2 %v11265_v19  ;;  %6261 = vmatpush.bf16.msrb.mxu0 %v11165_v32  ;;  %v12816_v19 = vld [vmem:[%s18505_s5 + $0x134] sm:$0xf0]  ;;  %v11431_v36 = vor.u32 %v12812_v2, %v11430_v29  ;;  %v11492_v14 = vld [vmem:[%s18505_s5 + $0x260] sm:$0xf]  ;;  %v12854_v8 = vld [vmem:[%s18505_s5 + $0x264] sm:$0xf0] }
 0x3fe   : > { %v5947_v38 = vld [vmem:[#allocation1 + $0x1] ss:$9 sm:$0xff]  ;;  %6531 = vmatpush.bf16.msra.mxu3 %v11407_v15  ;;  %6518 = vmatpush.bf16.msrb.mxu1 %v11343_v49  ;;  %v11157_v24 = vor.u32 %v12816_v19, %v11156_v23 }
 0x3ff   : > { %5950 = vst.msk [vmem:[#allocation3 + $0x1] ss:$4 sm:$0x7] %vm17299_vm11, %v5947_v38  ;;  %v11222_v15 = vld [vmem:[%s18505_s5 + $0x1b8] sm:$0xf0] }
 0x400   : > { %5951 = vst [vmem:[#allocation1] sm:$0xff] %v17288_v52  ;;  %v12829_v38 = vld [vmem:[%s18505_s5 + $0x1a4] sm:$0xf]  ;;  %v12779_v2 = vld [vmem:[%s18505_s5 + $0x14] sm:$0xf] }
 0x401   : > { %5952 = vst [vmem:[#allocation1 + $0x9] sm:$0xff] %v17309_v58  ;;  %6310 = vmatpush.bf16.msrb.mxu2 %v11257_v34  ;;  %6262 = vmatpush.bf16.msrb.mxu0 %v11157_v24  ;;  %v11214_v34 = vld [vmem:[%s18505_s5 + $0x1a8] sm:$0xf0]  ;;  %v11524_v24 = vld [vmem:[%s18505_s5 + $0x2a0] sm:$0xf] }
 0x402   : > { %5953 = vst [vmem:[#allocation1 + $0x12] sm:$0xff] %v17403_v61  ;;  %6532 = vmatpush.bf16.msra.mxu3 %v11399_v46  ;;  %6519 = vmatpush.bf16.msrb.mxu1 %v11335_v17  ;;  %v11319_v46 = vor.u32 %v12784_v33, %v11318_v26  ;;  %v11217_v48 = vor.u32 %v12829_v38, %v11214_v34  ;;  %v11336_v26 = vld [vmem:[%s18505_s5 + $0x58] sm:$0xf0] }
 0x405   : > { %6311 = vmatpush.bf16.msrb.mxu2 %v11249_v50  ;;  %v11289_v50 = vor.u32 %v12847_v43, %v11286_v55  ;;  %v12807_v55 = vld [vmem:[%s18505_s5 + $0xf4] sm:$0xf] }
 0x406   : > { %6533 = vmatpush.bf16.msra.mxu3 %v11391_v57  ;;  %6520 = vmatpush.bf16.msrb.mxu1 %v11327_v56  ;;  %v5968_v42 = vld [vmem:[#allocation3 + $0x8] sm:$0x3]  ;;  %v5967_v54 = vld [vmem:[#allocation3] sm:$0x33] }
 0x407   : > { %v11278_v57 = vld [vmem:[%s18505_s5 + $0x228] sm:$0xf0] }
 0x408   : > { %v11281_v63 = vor.u32 %v12845_v51, %v11278_v57  ;;  %v11596_v51 = vld [vmem:[%s18505_s5 + $0x330] sm:$0xf]  ;;  %v12880_v57 = vld [vmem:[%s18505_s5 + $0x334] sm:$0xf0] }
 0x409   : > { %v5955_v18 = vld [vmem:[#allocation1 + $0x2] ss:$9 sm:$0xff]  ;;  %6312 = vmatpush.bf16.msrb.mxu2 %v11241_v41 }
 0x40a   : > { %5958 = vst.msk [vmem:[#allocation3 + $0xd] ss:$4 sm:$0x7] %vm17299_vm11, %v5955_v18  ;;  %6534 = vmatpush.bf16.msra.mxu3 %v11383_v53  ;;  %6521 = vmatpush.bf16.msrb.mxu1 %v11319_v46  ;;  %v11352_v53 = vld [vmem:[%s18505_s5 + $0x78] sm:$0xf0] }
 0x40b   : > { %5959 = vst [vmem:[#allocation1] sm:$0xff] %v17288_v52  ;;  %v12831_v52 = vld [vmem:[%s18505_s5 + $0x1b4] sm:$0xf]  ;;  %v11355_v17 = vor.u32 %v12791_v47, %v11352_v53  ;;  %v12860_v46 = vld [vmem:[%s18505_s5 + $0x294] sm:$0xf0]  ;;  %v11597_v47 = vor.u32 %v12880_v57, %v11596_v51 }
 0x40c   : > { %5960 = vst [vmem:[#allocation1 + $0x9] sm:$0xff] %v17309_v58  ;;  %v11366_v58 = vld [vmem:[%s18505_s5 + $0x90] sm:$0xf]  ;;  %v11225_v10 = vor.u32 %v12831_v52, %v11222_v15  ;;  %v11517_v35 = vor.u32 %v12860_v46, %v11516_v5  ;;  %v11408_v53 = vld [vmem:[%s18505_s5 + $0xe8] sm:$0xf0] }
 0x40d   : > { %5961 = vst [vmem:[#allocation1 + $0x12] sm:$0xff] %v17403_v61  ;;  %6313 = vmatpush.bf16.msrb.mxu2 %v11233_v20  ;;  %v11148_v61 = vld [vmem:[%s18505_s5 + $0x120] sm:$0xf]  ;;  %v11367_v31 = vor.u32 %v12796_v27, %v11366_v58  ;;  %v11432_v20 = vld [vmem:[%s18505_s5 + $0x118] sm:$0xf0] }
 0x40e   : > { %6535 = vmatpush.bf16.msra.mxu3 %v11375_v40  ;;  %v11149_v12 = vor.u32 %v12814_v28, %v11148_v61  ;;  %6522 = vmatpush.bf16.msrb.mxu1 %v11311_v60  ;;  %v11344_v40 = vld [vmem:[%s18505_s5 + $0x68] sm:$0xf0]  ;;  %v11435_v15 = vor.u32 %v12811_v25, %v11432_v20  ;;  %v11422_v58 = vld [vmem:[%s18505_s5 + $0x100] sm:$0xf]  ;;  %v12862_v61 = vld [vmem:[%s18505_s5 + $0x2a4] sm:$0xf0]  ;;  %v11493_v20 = vor.u32 %v12854_v8, %v11492_v14 }
 0x40f   : > { %v11347_v27 = vor.u32 %v12789_v9, %v11344_v40  ;;  %v12809_v28 = vld [vmem:[%s18505_s5 + $0x104] sm:$0xf]  ;;  %v11525_v38 = vor.u32 %v12862_v61, %v11524_v24  ;;  %v12783_v60 = vld [vmem:[%s18505_s5 + $0x34] sm:$0xf]  ;;  %v12878_v9 = vld [vmem:[%s18505_s5 + $0x324] sm:$0xf0] }
 0x410   : > { %6263 = vmatpush.bf16.msrb.mxu0 %v11149_v12  ;;  %v12787_v12 = vld [vmem:[%s18505_s5 + $0x54] sm:$0xf]  ;;  %v11484_v40 = vld [vmem:[%s18505_s5 + $0x250] sm:$0xf]  ;;  %v12876_v24 = vld [vmem:[%s18505_s5 + $0x314] sm:$0xf0] }
 0x411   : > { %6314 = vmatpush.bf16.msrb.mxu2 %v11225_v10  ;;  %v6020_v49 = vld [vmem:[#allocation3 + $0x14] sm:$0x3]  ;;  %v6019_v7 = vld [vmem:[#allocation3 + $0xc] sm:$0x33]  ;;  %v12810_v10 = vld [vmem:[%s18505_s5 + $0x104] sm:$0xf0]  ;;  %v11339_v6 = vor.u32 %v12787_v12, %v11336_v26 }
 0x412   : > { %6536 = vmatpush.bf16.msra.mxu3 %v11367_v31  ;;  %6523 = vmatpush.bf16.msrb.mxu1 %v11303_v44  ;;  %v11424_v31 = vld [vmem:[%s18505_s5 + $0x108] sm:$0xf0]  ;;  %v11423_v33 = vor.u32 %v12810_v10, %v11422_v58  ;;  %v12856_v44 = vld [vmem:[%s18505_s5 + $0x274] sm:$0xf0]  ;;  %v12801_v58 = vld [vmem:[%s18505_s5 + $0xc4] sm:$0xf] }
 0x413   : > { %v11427_v34 = vor.u32 %v12809_v28, %v11424_v31  ;;  %v11392_v10 = vld [vmem:[%s18505_s5 + $0xc8] sm:$0xf0]  ;;  %v11476_v28 = vld [vmem:[%s18505_s5 + $0x240] sm:$0xf]  ;;  %v12850_v31 = vld [vmem:[%s18505_s5 + $0x244] sm:$0xf0] }
 0x414   : > { %v5963_v13 = vld [vmem:[#allocation1 + $0x3] ss:$9 sm:$0xff]  ;;  %6327 = vmatpush.bf16.msra.mxu0 %v11289_v50  ;;  %v12882_v57 = vld [vmem:[%s18505_s5 + $0x344] sm:$0xf0] }
 0x415   : > { %5966 = vst.msk [vmem:[#allocation3 + $0x2] ss:$4 sm:$0x7] %vm17299_vm11, %v5963_v13  ;;  %6315 = vmatpush.bf16.msrb.mxu2 %v11217_v48  ;;  %v12785_v48 = vld [vmem:[%s18505_s5 + $0x44] sm:$0xf] }
 0x416   : > { %5973 = vst [vmem:[#allocation1 + $0x10] ss:$2 sm:$0xff] %v5968_v42  ;;  %6537 = vmatpush.bf16.msra.mxu3 %v11359_v1  ;;  %6524 = vmatpush.bf16.msrb.mxu1 %v11295_v37  ;;  %v11328_v1 = vld [vmem:[%s18505_s5 + $0x48] sm:$0xf0]  ;;  %v12858_v42 = vld [vmem:[%s18505_s5 + $0x284] sm:$0xf0] }
 0x417   : > { %5971 = vst [vmem:[#allocation1] ss:$2 sm:$0xff] %v5967_v54  ;;  %v11331_v13 = vor.u32 %v12785_v48, %v11328_v1  ;;  %v11320_v54 = vld [vmem:[%s18505_s5 + $0x38] sm:$0xf0]  ;;  %v11509_v43 = vor.u32 %v12858_v42, %v11508_v62  ;;  %v11572_v12 = vld [vmem:[%s18505_s5 + $0x300] sm:$0xf]  ;;  %v11395_v42 = vor.u32 %v12801_v58, %v11392_v10 }
 0x418   : > { %6328 = vmatpush.bf16.msra.mxu0 %v11281_v63  ;;  %v11416_v50 = vld [vmem:[%s18505_s5 + $0xf8] sm:$0xf0]  ;;  %v11323_v16 = vor.u32 %v12783_v60, %v11320_v54  ;;  %v11312_v63 = vld [vmem:[%s18505_s5 + $0x28] sm:$0xf0]  ;;  %v11612_v26 = vld [vmem:[%s18505_s5 + $0x350] sm:$0xf] }
 0x419   : > { %v11419_v3 = vor.u32 %v12807_v55, %v11416_v50  ;;  %v12874_v48 = vld [vmem:[%s18505_s5 + $0x304] sm:$0xf0]  ;;  %v11614_v62 = vld [vmem:[%s18505_s5 + $0x358] sm:$0xf0]  ;;  %v12799_v60 = vld [vmem:[%s18505_s5 + $0xb4] sm:$0xf] }
 0x41a   : > { %v11384_v54 = vld [vmem:[%s18505_s5 + $0xb8] sm:$0xf0]  ;;  %v11573_v55 = vor.u32 %v12874_v48, %v11572_v12  ;;  %v11564_v50 = vld [vmem:[%s18505_s5 + $0x2f0] sm:$0xf]  ;;  %v12916_v14 = vld [vmem:[%s18505_s5 + $0x454] sm:$0xf0] }
 0x41b   : > { %v12912_v12 = vld [vmem:[%s18505_s5 + $0x434] sm:$0xf0]  ;;  %v11534_v48 = vld [vmem:[%s18505_s5 + $0x2b8] sm:$0xf0] }
 0x41c   : > { %v6596_v32 = vld [vmem:[#allocation3 + $0x8] sm:$0x6]  ;;  %v6595_v4 = vld [vmem:[#allocation3] sm:$0x66] }
 0x41d   : > { %v17643_v59 = vld.sshfl [vmem:[#allocation1 + $0x10] sm:$0xff pattern:$0x75316420] }
 0x41e   : > { %6025 = vst [vmem:[#allocation1 + $0x10] ss:$2 sm:$0xff] %v6020_v49  ;;  %v17645_v0 = vld.sshfl [vmem:[#allocation1] sm:$0xff pattern:$0x75316420]  ;;  %v5982_v8 = vpack.c.bf16 %v17643_v59, %v17643_v59 }
 0x41f   : > { %v17647_v41 = vld.sshfl [vmem:[#allocation1 + $0x8] sm:$0xff pattern:$0x75316420]  ;;  %v12805_v49 = vld [vmem:[%s18505_s5 + $0xe4] sm:$0xf]  ;;  %v17760_v37 = vpack.c.bf16 %v17645_v0, %v17645_v0  ;;  %v11315_v0 = vor.u32 %v12781_v21, %v11312_v63 }
 0x420   : > { %6023 = vst [vmem:[#allocation1] ss:$2 sm:$0xff] %v6019_v7  ;;  %v11501_v7 = vor.u32 %v12856_v44, %v11500_v30  ;;  %v17773_v29 = vpack.c.bf16 %v17647_v41, %v17647_v41  ;;  %v11304_v41 = vld [vmem:[%s18505_s5 + $0x18] sm:$0xf0]  ;;  %v12872_v30 = vld [vmem:[%s18505_s5 + $0x2f4] sm:$0xf0] }
 0x421   : > { %v12881_v21 = vld [vmem:[%s18505_s5 + $0x344] sm:$0xf]  ;;  %v11606_v63 = vld [vmem:[%s18505_s5 + $0x348] sm:$0xf0]  ;;  %v11556_v59 = vld [vmem:[%s18505_s5 + $0x2e0] sm:$0xf] }
 0x425   : > { %v6028_v18 = vld.sshfl [vmem:[#allocation1 + $0x10] sm:$0xff pattern:$0x75316420] }
 0x426   : > { %v17676_v39 = vpack.c.bf16 %v6028_v18, %v6028_v18  ;;  %6601 = vst [vmem:[#allocation1 + $0x10] ss:$2 sm:$0xff] %v6596_v32  ;;  %v11588_v32 = vld [vmem:[%s18505_s5 + $0x320] sm:$0xf]  ;;  %v11411_v18 = vor.u32 %v12805_v49, %v11408_v53  ;;  %v11598_v49 = vld [vmem:[%s18505_s5 + $0x338] sm:$0xf0] }
 0x427   : > { %v6026_v23 = vld.sshfl [vmem:[#allocation1] sm:$0xff pattern:$0x75316420]  ;;  %v6027_v19 = vld.sshfl [vmem:[#allocation1 + $0x8] sm:$0xff pattern:$0x75316420] }
 0x428   : > { %v6032_v52 = vpack.c.bf16 %v6026_v23, %v6026_v23  ;;  %v6033_v56 = vpack.c.bf16 %v6027_v19, %v6027_v19  ;;  %6599 = vst [vmem:[#allocation1] ss:$2 sm:$0xff] %v6595_v4  ;;  %11290 = vmatmul.msk.bf16.vlgmr.msra.gmra.mxu2 %vm6252_vm14, %v17676_v39  ;;  %v11589_v4 = vor.u32 %v12878_v9, %v11588_v32  ;;  %v12852_v23 = vld [vmem:[%s18505_s5 + $0x254] sm:$0xf0]  ;;  %v11778_v53 = vld [vmem:[%s18505_s5 + $0x450] sm:$0xf] }
 0x429   : > { %6556 = vmatpush.bf16.msra.mxu2 %v11355_v17  ;;  %v12803_v17 = vld [vmem:[%s18505_s5 + $0xd4] sm:$0xf]  ;;  %v11307_v19 = vor.u32 %v12779_v2, %v11304_v41  ;;  %v12797_v9 = vld [vmem:[%s18505_s5 + $0xa4] sm:$0xf]  ;;  %v11376_v2 = vld [vmem:[%s18505_s5 + $0xa8] sm:$0xf0] }
 0x42a   : > { %6264 = vmatmul.bf16.vlgmr.msrb.gmra.mxu0 %v6032_v52  ;;  %6277 = vmatmul.bf16.vlgmr.msra.gmra.mxu1 %v6033_v56 }
 0x42b   : > { %6303 = vmatmul.bf16.vlgmr.msrb.gmra.mxu3 %v6032_v52  ;;  %6549 = vmatpush.bf16.msrb.mxu0 %v11431_v36  ;;  %v12777_v36 = vld [vmem:[%s18505_s5 + $0x4] sm:$0xf] }
 0x42c   : > { %6854 = vmatpush.bf16.msrb.mxu3 %v11533_v22  ;;  %6588 = vmatpush.bf16.msra.mxu1 %v11435_v15  ;;  %v11580_v22 = vld [vmem:[%s18505_s5 + $0x310] sm:$0xf]  ;;  %v11296_v15 = vld [vmem:[%s18505_s5 + $0x8] sm:$0xf0] }
 0x42d   : > { %6557 = vmatpush.bf16.msra.mxu2 %v11347_v27  ;;  %v6935_v27 = vld [vmem:[#allocation3 + $0x14] sm:$0x6]  ;;  %v17840_v5 = vld.sshfl [vmem:[#allocation1 + $0x10] sm:$0xff pattern:$0x75316420]  ;;  %v11299_v46 = vor.u32 %v12777_v36, %v11296_v15 }
 0x42e   : > { %6940 = vst [vmem:[#allocation1 + $0x10] ss:$2 sm:$0xff] %v6935_v27  ;;  %v6610_v58 = vpack.c.bf16 %v17840_v5, %v17840_v5  ;;  %v12875_v27 = vld [vmem:[%s18505_s5 + $0x314] sm:$0xf] }
 0x42f   : > { %6550 = vmatpush.bf16.msrb.mxu0 %v11423_v33  ;;  %v6602_v25 = vld.sshfl [vmem:[#allocation1] sm:$0xff pattern:$0x75316420]  ;;  %v12884_v33 = vld [vmem:[%s18505_s5 + $0x354] sm:$0xf0] }
 0x430   : > { %6855 = vmatpush.bf16.msrb.mxu3 %v11525_v38  ;;  %6589 = vmatpush.bf16.msra.mxu1 %v11427_v34  ;;  %v17812_v52 = vpack.c.bf16 %v6602_v25, %v6602_v25  ;;  %v11485_v38 = vor.u32 %v12852_v23, %v11484_v40  ;;  %v11581_v34 = vor.u32 %v12876_v24, %v11580_v22  ;;  %v11770_v40 = vld [vmem:[%s18505_s5 + $0x440] sm:$0xf]  ;;  %v12914_v23 = vld [vmem:[%s18505_s5 + $0x444] sm:$0xf0]  ;;  %v12795_v22 = vld [vmem:[%s18505_s5 + $0x94] sm:$0xf] }
 0x431   : > { %6558 = vmatpush.bf16.msra.mxu2 %v11339_v6  ;;  %v17838_v6 = vld.sshfl [vmem:[#allocation1 + $0x8] sm:$0xff pattern:$0x75316420]  ;;  %v11609_v25 = vor.u32 %v12881_v21, %v11606_v63  ;;  %v11368_v24 = vld [vmem:[%s18505_s5 + $0x98] sm:$0xf0]  ;;  %v11771_v10 = vor.u32 %v12914_v23, %v11770_v40 }
 0x432   : > { %v6651_v1 = vshll.u32 %v17812_v52, 16  ;;  %v6609_v15 = vpack.c.bf16 %v17838_v6, %v17838_v6  ;;  %v12866_v6 = vld [vmem:[%s18505_s5 + $0x2c4] sm:$0xf0]  ;;  %v12863_v5 = vld [vmem:[%s18505_s5 + $0x2b4] sm:$0xf] }
 0x433   : > { %v12896_v40 = vld [vmem:[%s18505_s5 + $0x3b4] sm:$0xf0]  ;;  %v12869_v23 = vld [vmem:[%s18505_s5 + $0x2e4] sm:$0xf] }
 0x434   : > { %6856 = vmatpush.bf16.msrb.mxu3 %v11517_v35  ;;  %v11613_v35 = vor.u32 %v12884_v33, %v11612_v26  ;;  %v6653_v51 = vrot.slane %v6651_v1, 1  ;;  %v12793_v26 = vld [vmem:[%s18505_s5 + $0x84] sm:$0xf]  ;;  %v11360_v33 = vld [vmem:[%s18505_s5 + $0x88] sm:$0xf0] }
 0x435   : > { %6559 = vmatpush.bf16.msra.mxu2 %v11331_v13  ;;  %v12883_v13 = vld [vmem:[%s18505_s5 + $0x354] sm:$0xf]  ;;  %v11714_v1 = vld [vmem:[%s18505_s5 + $0x3d0] sm:$0xf] }
 0x436   : > { %v11617_v44 = vor.u32 %v12883_v13, %v11614_v62  ;;  %v6665_v13 = vshll.u32 %v6610_v58, 16 }
 0x438   : > { %6857 = vmatpush.bf16.msrb.mxu3 %v11509_v43  ;;  %6316 = vmatmul.bf16.vlgmr.msrb.gmra.mxu2 %v6033_v56  ;;  %v6934_v56 = vld [vmem:[#allocation3 + $0xc] sm:$0x66]  ;;  %v11477_v43 = vor.u32 %v12850_v31, %v11476_v28  ;;  %v11762_v28 = vld [vmem:[%s18505_s5 + $0x430] sm:$0xf]  ;;  %v11371_v31 = vor.u32 %v12795_v22, %v11368_v24  ;;  %v12906_v22 = vld [vmem:[%s18505_s5 + $0x404] sm:$0xf0] }
 0x439   : > { %6560 = vmatpush.bf16.msra.mxu2 %v11323_v16  ;;  %6938 = vst [vmem:[#allocation1] ss:$2 sm:$0xff] %v6934_v56  ;;  %v11604_v16 = vld [vmem:[%s18505_s5 + $0x340] sm:$0xf]  ;;  %v12868_v56 = vld [vmem:[%s18505_s5 + $0x2d4] sm:$0xf0]  ;;  %v11763_v62 = vor.u32 %v12912_v12, %v11762_v28 }
 0x43a   : > { %11291 = vmatmul.msk.bf16.vlgmr.msra.gmra.mxu0 %vm6252_vm14, %v17676_v39  ;;  %6525 = vmatmul.bf16.vlgmr.msrb.gmra.mxu1 %v17760_v37  ;;  %v11400_v39 = vld [vmem:[%s18505_s5 + $0xd8] sm:$0xf0]  ;;  %v11605_v32 = vor.u32 %v12882_v57, %v11604_v16  ;;  %v11537_v16 = vor.u32 %v12863_v5, %v11534_v48  ;;  %v12867_v28 = vld [vmem:[%s18505_s5 + $0x2d4] sm:$0xf]  ;;  %v11730_v12 = vld [vmem:[%s18505_s5 + $0x3f0] sm:$0xf] }
 0x43b   : > { %6538 = vmatmul.bf16.vlgmr.msra.gmra.mxu3 %v17773_v29  ;;  %6569 = vmatpush.bf16.msra.mxu0 %v11419_v3  ;;  %v11403_v61 = vor.u32 %v12803_v17, %v11400_v39  ;;  %v12879_v3 = vld [vmem:[%s18505_s5 + $0x334] sm:$0xf]  ;;  %v12870_v17 = vld [vmem:[%s18505_s5 + $0x2e4] sm:$0xf0]  ;;  %v11379_v39 = vor.u32 %v12797_v9, %v11376_v2  ;;  %v12908_v9 = vld [vmem:[%s18505_s5 + $0x414] sm:$0xf0] }
 0x43c   : > { %6858 = vmatpush.bf16.msrb.mxu3 %v11501_v7  ;;  %6867 = vmatpush.bf16.msrb.mxu1 %v11597_v47  ;;  %v11387_v7 = vor.u32 %v12799_v60, %v11384_v54  ;;  %v6649_v47 = vshrl.u32 %v17812_v52, 16  ;;  %v11548_v52 = vld [vmem:[%s18505_s5 + $0x2d0] sm:$0xf]  ;;  %v12873_v60 = vld [vmem:[%s18505_s5 + $0x304] sm:$0xf] }
 0x43d   : > { %6561 = vmatpush.bf16.msra.mxu2 %v11315_v0  ;;  %v11565_v0 = vor.u32 %v12872_v30, %v11564_v50  ;;  %v11574_v54 = vld [vmem:[%s18505_s5 + $0x308] sm:$0xf0]  ;;  %v12910_v50 = vld [vmem:[%s18505_s5 + $0x424] sm:$0xf0]  ;;  %v11682_v48 = vld [vmem:[%s18505_s5 + $0x390] sm:$0xf] }
 0x43e   : > { %v17898_v41 = vor.u32 %v6653_v51, %v6649_v47  ;;  %v11526_v51 = vld [vmem:[%s18505_s5 + $0x2a8] sm:$0xf0]  ;;  %v11577_v21 = vor.u32 %v12873_v60, %v11574_v54  ;;  %v12902_v60 = vld [vmem:[%s18505_s5 + $0x3e4] sm:$0xf0]  ;;  %v12899_v54 = vld [vmem:[%s18505_s5 + $0x3d4] sm:$0xf] }
 0x43f   : > { %6570 = vmatpush.bf16.msra.mxu0 %v11411_v18  ;;  %v11601_v18 = vor.u32 %v12879_v3, %v11598_v49  ;;  %v6667_v3 = vrot.slane %v6665_v13, 1  ;;  %v11706_v49 = vld [vmem:[%s18505_s5 + $0x3c0] sm:$0xf] }
 0x440   : > { %6859 = vmatpush.bf16.msrb.mxu3 %v11493_v20  ;;  %6868 = vmatpush.bf16.msrb.mxu1 %v11589_v4  ;;  %v11779_v20 = vor.u32 %v12916_v14, %v11778_v53  ;;  %v11590_v4 = vld [vmem:[%s18505_s5 + $0x328] sm:$0xf0]  ;;  %v12871_v53 = vld [vmem:[%s18505_s5 + $0x2f4] sm:$0xf]  ;;  %v11566_v14 = vld [vmem:[%s18505_s5 + $0x2f8] sm:$0xf0] }
 0x441   : > { %6562 = vmatpush.bf16.msra.mxu2 %v11307_v19  ;;  %v11557_v19 = vor.u32 %v12870_v17, %v11556_v59  ;;  %v11569_v17 = vor.u32 %v12871_v53, %v11566_v14  ;;  %v11708_v53 = vld [vmem:[%s18505_s5 + $0x3c8] sm:$0xf0] }
 0x443   : > { %6571 = vmatpush.bf16.msra.mxu0 %v11403_v61  ;;  %v11582_v61 = vld [vmem:[%s18505_s5 + $0x318] sm:$0xf0] }
 0x444   : > { %6860 = vmatpush.bf16.msrb.mxu3 %v11485_v38  ;;  %6869 = vmatpush.bf16.msrb.mxu1 %v11581_v34  ;;  %v11549_v38 = vor.u32 %v12868_v56, %v11548_v52  ;;  %v11540_v34 = vld [vmem:[%s18505_s5 + $0x2c0] sm:$0xf] }
 0x445   : > { %6563 = vmatpush.bf16.msra.mxu2 %v11299_v46  ;;  %v11585_v46 = vor.u32 %v12875_v27, %v11582_v61  ;;  %v11541_v30 = vor.u32 %v12866_v6, %v11540_v34  ;;  %v12894_v61 = vld [vmem:[%s18505_s5 + $0x3a4] sm:$0xf0]  ;;  %v12855_v34 = vld [vmem:[%s18505_s5 + $0x274] sm:$0xf]  ;;  %v11502_v6 = vld [vmem:[%s18505_s5 + $0x278] sm:$0xf0] }
 0x447   : > { %6572 = vmatpush.bf16.msra.mxu0 %v11395_v42  ;;  %v12900_v42 = vld [vmem:[%s18505_s5 + $0x3d4] sm:$0xf0] }
 0x448   : > { %6861 = vmatpush.bf16.msrb.mxu3 %v11477_v43  ;;  %6870 = vmatpush.bf16.msrb.mxu1 %v11573_v55  ;;  %v11363_v43 = vor.u32 %v12793_v26, %v11360_v33  ;;  %v11754_v55 = vld [vmem:[%s18505_s5 + $0x420] sm:$0xf]  ;;  %v11715_v57 = vor.u32 %v12900_v42, %v11714_v1  ;;  %v12904_v26 = vld [vmem:[%s18505_s5 + $0x3f4] sm:$0xf0] }
 0x449   : > { %6886 = vmatpush.bf16.msrb.mxu2 %v11613_v35  ;;  %v6658_v35 = vshll.u32 %v6609_v15, 16  ;;  %v11755_v47 = vor.u32 %v12910_v50, %v11754_v55  ;;  %v12892_v1 = vld [vmem:[%s18505_s5 + $0x394] sm:$0xf0]  ;;  %v11731_v13 = vor.u32 %v12904_v26, %v11730_v12  ;;  %v11722_v42 = vld [vmem:[%s18505_s5 + $0x3e0] sm:$0xf]  ;;  %v11505_v50 = vor.u32 %v12855_v34, %v11502_v6 }
 0x44a   : > { %6564 = vmatmul.bf16.vlgmr.msra.gmra.mxu2 %v17760_v37  ;;  %11436 = vmatmul.msk.bf16.vlgmr.msrb.gmra.mxu0 %vm6252_vm14, %v5982_v8  ;;  %v12877_v37 = vld [vmem:[%s18505_s5 + $0x324] sm:$0xf]  ;;  %v11786_v26 = vld [vmem:[%s18505_s5 + $0x460] sm:$0xf]  ;;  %v11684_v6 = vld [vmem:[%s18505_s5 + $0x398] sm:$0xf0] }
 0x44b   : > { %11437 = vmatmul.msk.bf16.vlgmr.msra.gmra.mxu1 %vm6252_vm14, %v5982_v8  ;;  %6573 = vmatpush.bf16.msra.mxu0 %v11387_v7  ;;  %v11593_v36 = vor.u32 %v12877_v37, %v11590_v4  ;;  %v6660_v63 = vrot.slane %v6658_v35, 1  ;;  %v12898_v7 = vld [vmem:[%s18505_s5 + $0x3c4] sm:$0xf0]  ;;  %v6656_v8 = vshrl.u32 %v6609_v15, 16  ;;  %v11518_v37 = vld [vmem:[%s18505_s5 + $0x298] sm:$0xf0] }
 0x44c   : > { %6925 = vmatpush.bf16.msra.mxu3 %v11617_v44  ;;  %6871 = vmatpush.bf16.msrb.mxu1 %v11565_v0  ;;  %v12861_v44 = vld [vmem:[%s18505_s5 + $0x2a4] sm:$0xf]  ;;  %v6663_v0 = vshrl.u32 %v6610_v58, 16  ;;  %v11698_v4 = vld [vmem:[%s18505_s5 + $0x3b0] sm:$0xf] }
 0x44d   : > { %6862 = vmatmul.bf16.vlgmr.msrb.gmra.mxu3 %v17898_v41  ;;  %6887 = vmatpush.bf16.msrb.mxu2 %v11605_v32  ;;  %v11746_v32 = vld [vmem:[%s18505_s5 + $0x410] sm:$0xf]  ;;  %v11529_v2 = vor.u32 %v12861_v44, %v11526_v51  ;;  %v11699_v52 = vor.u32 %v12896_v40, %v11698_v4  ;;  %v12857_v15 = vld [vmem:[%s18505_s5 + $0x284] sm:$0xf]  ;;  %v11510_v58 = vld [vmem:[%s18505_s5 + $0x288] sm:$0xf0] }
 0x44e   : > { %v6668_v59 = vor.u32 %v6667_v3, %v6663_v0  ;;  %v12865_v35 = vld [vmem:[%s18505_s5 + $0x2c4] sm:$0xf]  ;;  %v11494_v51 = vld [vmem:[%s18505_s5 + $0x268] sm:$0xf0]  ;;  %v12890_v3 = vld [vmem:[%s18505_s5 + $0x384] sm:$0xf0] }
 0x44f   : > { %6574 = vmatpush.bf16.msra.mxu0 %v11379_v39  ;;  %v11747_v39 = vor.u32 %v12908_v9, %v11746_v32  ;;  %v12853_v44 = vld [vmem:[%s18505_s5 + $0x264] sm:$0xf]  ;;  %v12851_v32 = vld [vmem:[%s18505_s5 + $0x254] sm:$0xf]  ;;  %v11486_v9 = vld [vmem:[%s18505_s5 + $0x258] sm:$0xf0] }
 0x450   : > { %6926 = vmatpush.bf16.msra.mxu3 %v11609_v25  ;;  %6872 = vmatpush.bf16.msrb.mxu1 %v11557_v19  ;;  %v11707_v25 = vor.u32 %v12898_v7, %v11706_v49  ;;  %v11558_v19 = vld [vmem:[%s18505_s5 + $0x2e8] sm:$0xf0]  ;;  %v6941_v49 = vld.sshfl [vmem:[#allocation1] sm:$0xff pattern:$0x75316420]  ;;  %v11497_v14 = vor.u32 %v12853_v44, %v11494_v51 }
 0x451   : > { %6906 = vmatpush.bf16.msra.mxu2 %v11601_v18  ;;  %v18009_v18 = vor.u32 %v6660_v63, %v6656_v8  ;;  %v11561_v56 = vor.u32 %v12869_v23, %v11558_v19  ;;  %v11700_v4 = vld [vmem:[%s18505_s5 + $0x3b8] sm:$0xf0]  ;;  %v12849_v40 = vld [vmem:[%s18505_s5 + $0x244] sm:$0xf]  ;;  %v11478_v23 = vld [vmem:[%s18505_s5 + $0x248] sm:$0xf0] }
 0x453   : > { %6575 = vmatpush.bf16.msra.mxu0 %v11371_v31  ;;  %v11550_v31 = vld [vmem:[%s18505_s5 + $0x2d8] sm:$0xf0] }
 0x454   : > { %7206 = vmatpush.bf16.msrb.mxu3 %v11779_v20  ;;  %6873 = vmatpush.bf16.msrb.mxu1 %v11549_v38  ;;  %v12859_v20 = vld [vmem:[%s18505_s5 + $0x294] sm:$0xf]  ;;  %v11513_v38 = vor.u32 %v12857_v15, %v11510_v58  ;;  %v11692_v15 = vld [vmem:[%s18505_s5 + $0x3a8] sm:$0xf0] }
 0x455   : > { %6907 = vmatpush.bf16.msra.mxu2 %v11593_v36  ;;  %v11521_v24 = vor.u32 %v12859_v20, %v11518_v37  ;;  %v6942_v36 = vld.sshfl [vmem:[#allocation1 + $0x8] sm:$0xff pattern:$0x75316420]  ;;  %v12895_v37 = vld [vmem:[%s18505_s5 + $0x3b4] sm:$0xf] }
 0x456   : > { %v6948_v33 = vpack.c.bf16 %v6942_v36, %v6942_v36  ;;  %v11794_v36 = vld [vmem:[%s18505_s5 + $0x470] sm:$0xf]  ;;  %v12919_v58 = vld [vmem:[%s18505_s5 + $0x474] sm:$0xf] }
 0x457   : > { %6576 = vmatpush.bf16.msra.mxu0 %v11363_v43  ;;  %v11716_v43 = vld [vmem:[%s18505_s5 + $0x3d8] sm:$0xf0] }
 0x458   : > { %7207 = vmatpush.bf16.msrb.mxu3 %v11771_v10  ;;  %6874 = vmatpush.bf16.msrb.mxu1 %v11541_v30  ;;  %v11690_v10 = vld [vmem:[%s18505_s5 + $0x3a0] sm:$0xf]  ;;  %v6997_v55 = vshll.u32 %v6948_v33, 16  ;;  %v11683_v30 = vor.u32 %v12892_v1, %v11682_v48  ;;  %v11719_v63 = vor.u32 %v12899_v54, %v11716_v43  ;;  %v6995_v0 = vshrl.u32 %v6948_v33, 16  ;;  %v12918_v33 = vld [vmem:[%s18505_s5 + $0x464] sm:$0xf0] }
 0x459   : > { %6908 = vmatpush.bf16.msra.mxu2 %v11585_v46  ;;  %v11691_v5 = vor.u32 %v12894_v61, %v11690_v10  ;;  %v11553_v46 = vor.u32 %v12867_v28, %v11550_v31  ;;  %v11796_v10 = vld [vmem:[%s18505_s5 + $0x478] sm:$0xf0]  ;;  %v12917_v1 = vld [vmem:[%s18505_s5 + $0x464] sm:$0xf] }
 0x45a   : > { %6577 = vmatmul.bf16.vlgmr.msra.gmra.mxu0 %v17773_v29  ;;  %11618 = vmatmul.msk.bf16.vlgmr.msrb.gmra.mxu2 %vm6252_vm14, %v6668_v59  ;;  %v11738_v29 = vld [vmem:[%s18505_s5 + $0x400] sm:$0xf]  ;;  %v6999_v7 = vrot.slane %v6997_v55, 1  ;;  %v11799_v34 = vor.u32 %v12919_v58, %v11796_v10  ;;  %v12889_v54 = vld [vmem:[%s18505_s5 + $0x384] sm:$0xf] }
 0x45b   : > { %6893 = vmatpush.bf16.msrb.mxu0 %v11537_v16  ;;  %6875 = vmatmul.bf16.vlgmr.msrb.gmra.mxu1 %v18009_v18  ;;  %v11739_v27 = vor.u32 %v12906_v22, %v11738_v29  ;;  %v11658_v29 = vld [vmem:[%s18505_s5 + $0x360] sm:$0xf]  ;;  %v6943_v43 = vld.sshfl [vmem:[#allocation1 + $0x10] sm:$0xff pattern:$0x75316420] }
 0x45c   : > { %7208 = vmatpush.bf16.msrb.mxu3 %v11763_v62  ;;  %7193 = vmatpush.bf16.msra.mxu1 %v11715_v57  ;;  %v11542_v62 = vld [vmem:[%s18505_s5 + $0x2c8] sm:$0xf0]  ;;  %v11674_v57 = vld [vmem:[%s18505_s5 + $0x380] sm:$0xf]  ;;  %v18123_v20 = vor.u32 %v6999_v7, %v6995_v0  ;;  %v6949_v44 = vpack.c.bf16 %v6943_v43, %v6943_v43 }
 0x45d   : > { %6909 = vmatpush.bf16.msra.mxu2 %v11577_v21  ;;  %11619 = vmatmul.msk.bf16.vlgmr.msra.gmra.mxu3 %vm6252_vm14, %v6668_v59  ;;  %v11545_v16 = vor.u32 %v12865_v35, %v11542_v62  ;;  %v11723_v21 = vor.u32 %v12902_v60, %v11722_v42  ;;  %v11675_v8 = vor.u32 %v12890_v3, %v11674_v57  ;;  %v11666_v59 = vld [vmem:[%s18505_s5 + $0x370] sm:$0xf]  ;;  %v11788_v35 = vld [vmem:[%s18505_s5 + $0x468] sm:$0xf0]  ;;  %v12887_v57 = vld [vmem:[%s18505_s5 + $0x374] sm:$0xf] }
 0x45e   : > { %v11676_v55 = vld [vmem:[%s18505_s5 + $0x388] sm:$0xf0]  ;;  %v11764_v3 = vld [vmem:[%s18505_s5 + $0x438] sm:$0xf0] }
 0x45f   : > { %6894 = vmatpush.bf16.msrb.mxu0 %v11529_v2  ;;  %v6947_v2 = vpack.c.bf16 %v6941_v49, %v6941_v49  ;;  %v11679_v51 = vor.u32 %v12889_v54, %v11676_v55  ;;  %v7004_v49 = vshll.u32 %v6949_v44, 16  ;;  %v11756_v0 = vld [vmem:[%s18505_s5 + $0x428] sm:$0xf0] }
 0x460   : > { %7209 = vmatpush.bf16.msrb.mxu3 %v11755_v47  ;;  %7194 = vmatpush.bf16.msra.mxu1 %v11707_v25  ;;  %v12897_v47 = vld [vmem:[%s18505_s5 + $0x3c4] sm:$0xf] }
 0x461   : > { %6910 = vmatpush.bf16.msra.mxu2 %v11569_v17  ;;  %v11711_v25 = vor.u32 %v12897_v47, %v11708_v53  ;;  %v12888_v17 = vld [vmem:[%s18505_s5 + $0x374] sm:$0xf0]  ;;  %v6990_v22 = vshll.u32 %v6947_v2, 16  ;;  %v6988_v48 = vshrl.u32 %v6947_v2, 16  ;;  %v12885_v53 = vld [vmem:[%s18505_s5 + $0x364] sm:$0xf] }
 0x462   : > { %v11667_v19 = vor.u32 %v12888_v17, %v11666_v59  ;;  %v12907_v59 = vld [vmem:[%s18505_s5 + $0x414] sm:$0xf]  ;;  %v11748_v17 = vld [vmem:[%s18505_s5 + $0x418] sm:$0xf0] }
 0x463   : > { %6895 = vmatpush.bf16.msrb.mxu0 %v11521_v24  ;;  %v11703_v24 = vor.u32 %v12895_v37, %v11700_v4  ;;  %v6992_v31 = vrot.slane %v6990_v22, 1  ;;  %v11751_v4 = vor.u32 %v12907_v59, %v11748_v17  ;;  %v12901_v22 = vld [vmem:[%s18505_s5 + $0x3e4] sm:$0xf]  ;;  %v12943_v59 = vld [vmem:[%s18507_s7 + $0xb0] sm:$0xff] }
 0x464   : > { %7210 = vmatpush.bf16.msrb.mxu3 %v11747_v39  ;;  %7195 = vmatpush.bf16.msra.mxu1 %v11699_v52  ;;  %v11489_v39 = vor.u32 %v12851_v32, %v11486_v9  ;;  %v12920_v52 = vld [vmem:[%s18505_s5 + $0x474] sm:$0xf0]  ;;  %v7006_v32 = vrot.slane %v7004_v49, 1  ;;  %v12951_v17 = vld [vmem:[%s18507_s7 + $0xf0] sm:$0xff] }
 0x465   : > { %6911 = vmatpush.bf16.msra.mxu2 %v11561_v56  ;;  %v12893_v56 = vld [vmem:[%s18505_s5 + $0x3a4] sm:$0xf]  ;;  %v11795_v28 = vor.u32 %v12920_v52, %v11794_v36  ;;  %v6993_v62 = vor.u32 %v6992_v31, %v6988_v48 }
 0x466   : > { %v11695_v12 = vor.u32 %v12893_v56, %v11692_v15 }
 0x467   : > { %6896 = vmatpush.bf16.msrb.mxu0 %v11513_v38  ;;  %v12891_v38 = vld [vmem:[%s18505_s5 + $0x394] sm:$0xf] }
 0x468   : > { %7211 = vmatpush.bf16.msrb.mxu3 %v11739_v27  ;;  %7196 = vmatpush.bf16.msra.mxu1 %v11691_v5  ;;  %v11481_v27 = vor.u32 %v12849_v40, %v11478_v23  ;;  %v12915_v5 = vld [vmem:[%s18505_s5 + $0x454] sm:$0xf]  ;;  %v11687_v42 = vor.u32 %v12891_v38, %v11684_v6  ;;  %v11740_v40 = vld [vmem:[%s18505_s5 + $0x408] sm:$0xf0] }
 0x469   : > { %6912 = vmatpush.bf16.msra.mxu2 %v11553_v46  ;;  %v11780_v46 = vld [vmem:[%s18505_s5 + $0x458] sm:$0xf0] }
 0x46a   : > { %v11783_v60 = vor.u32 %v12915_v5, %v11780_v46 }
 0x46b   : > { %6897 = vmatpush.bf16.msrb.mxu0 %v11505_v50  ;;  %v12913_v50 = vld [vmem:[%s18505_s5 + $0x444] sm:$0xf] }
 0x46c   : > { %7212 = vmatpush.bf16.msrb.mxu3 %v11731_v13  ;;  %7197 = vmatpush.bf16.msra.mxu1 %v11683_v30  ;;  %v11787_v13 = vor.u32 %v12918_v33, %v11786_v26  ;;  %v11772_v30 = vld [vmem:[%s18505_s5 + $0x448] sm:$0xf0] }
 0x46d   : > { %6913 = vmatpush.bf16.msra.mxu2 %v11545_v16  ;;  %v11791_v16 = vor.u32 %v12917_v1, %v11788_v35 }
 0x46f   : > { %6898 = vmatpush.bf16.msrb.mxu0 %v11497_v14  ;;  %v11660_v14 = vld [vmem:[%s18505_s5 + $0x368] sm:$0xf0] }
 0x470   : > { %7213 = vmatpush.bf16.msrb.mxu3 %v11723_v21  ;;  %6914 = vmatmul.bf16.vlgmr.msra.gmra.mxu2 %v18009_v18  ;;  %v12886_v18 = vld [vmem:[%s18505_s5 + $0x364] sm:$0xf0]  ;;  %v11668_v21 = vld [vmem:[%s18505_s5 + $0x378] sm:$0xf0]  ;;  %v11663_v9 = vor.u32 %v12885_v53, %v11660_v14 }
 0x471   : > { %7232 = vmatpush.bf16.msrb.mxu2 %v11719_v63  ;;  %7198 = vmatpush.bf16.msra.mxu1 %v11675_v8  ;;  %v11659_v61 = vor.u32 %v12886_v18, %v11658_v29  ;;  %v12911_v63 = vld [vmem:[%s18505_s5 + $0x434] sm:$0xf]  ;;  %v11671_v7 = vor.u32 %v12887_v57, %v11668_v21  ;;  %v12909_v8 = vld [vmem:[%s18505_s5 + $0x424] sm:$0xf]  ;;  %v11732_v29 = vld [vmem:[%s18505_s5 + $0x3f8] sm:$0xf0] }
 0x472   : > { %v11767_v47 = vor.u32 %v12911_v63, %v11764_v3  ;;  %v11759_v2 = vor.u32 %v12909_v8, %v11756_v0  ;;  %v12928_v21 = vld [vmem:[%s18507_s7 + $0x38] sm:$0xff] }
 0x473   : > { %7214 = vmatmul.bf16.vlgmr.msrb.gmra.mxu3 %v18123_v20  ;;  %6899 = vmatpush.bf16.msrb.mxu0 %v11489_v39  ;;  %v12905_v39 = vld [vmem:[%s18505_s5 + $0x404] sm:$0xf]  ;;  %v12944_v8 = vld [vmem:[%s18507_s7 + $0xb8] sm:$0xff] }
 0x474   : > { %v11743_v23 = vor.u32 %v12905_v39, %v11740_v40  ;;  %v12952_v0 = vld [vmem:[%s18507_s7 + $0xf8] sm:$0xff]  ;;  %7483 = vmatpush.bf16.msra.mxu3 %v12944_v8  ;;  %v12942_v40 = vld [vmem:[%s18507_s7 + $0xa8] sm:$0xff] }
 0x475   : > { %7233 = vmatpush.bf16.msrb.mxu2 %v11711_v25  ;;  %7199 = vmatpush.bf16.msra.mxu1 %v11667_v19  ;;  %v7002_v25 = vshrl.u32 %v6949_v44, 16  ;;  %v12903_v19 = vld [vmem:[%s18505_s5 + $0x3f4] sm:$0xf]  ;;  %v12968_v8 = vld [vmem:[%s18507_s7 + $0x178] sm:$0xff] }
 0x476   : > { %v11735_v18 = vor.u32 %v12903_v19, %v11732_v29  ;;  %v12934_v29 = vld [vmem:[%s18507_s7 + $0x68] sm:$0xff] }
 0x477   : > { %6900 = vmatpush.bf16.msrb.mxu0 %v11481_v27  ;;  %v7007_v37 = vor.u32 %v7006_v32, %v7002_v25  ;;  %v12936_v32 = vld [vmem:[%s18507_s7 + $0x78] sm:$0xff] }
 0x478   : > { %7484 = vmatpush.bf16.msra.mxu3 %v12943_v59  ;;  %v12974_v59 = vld [vmem:[%s18507_s7 + $0x1a8] sm:$0xff] }
 0x479   : > { %7234 = vmatpush.bf16.msrb.mxu2 %v11703_v24  ;;  %7200 = vmatpush.bf16.msra.mxu1 %v11659_v61  ;;  %v11724_v24 = vld [vmem:[%s18505_s5 + $0x3e8] sm:$0xf0] }
 0x47a   : > { %6901 = vmatmul.bf16.vlgmr.msrb.gmra.mxu0 %v17898_v41  ;;  %v11775_v41 = vor.u32 %v12913_v50, %v11772_v30  ;;  %v11727_v36 = vor.u32 %v12901_v22, %v11724_v24 }
 0x47b   : > { %7225 = vmatpush.bf16.msra.mxu0 %v11795_v28 }
 0x47c   : > { %7201 = vmatmul.bf16.vlgmr.msra.gmra.mxu1 %v6993_v62  ;;  %7485 = vmatpush.bf16.msra.mxu3 %v12942_v40 }
 0x47d   : > { %7235 = vmatpush.bf16.msrb.mxu2 %v11695_v12  ;;  %7264 = vmatpush.bf16.msrb.mxu1 %v11799_v34 }
 0x47f   : > { %7226 = vmatpush.bf16.msra.mxu0 %v11787_v13 }
 0x481   : > { %7236 = vmatpush.bf16.msrb.mxu2 %v11687_v42  ;;  %7265 = vmatpush.bf16.msrb.mxu1 %v11791_v16 }
 0x483   : > { %7245 = vmatpush.bf16.msrb.mxu0 %v11783_v60 }
 0x485   : > { %7237 = vmatpush.bf16.msrb.mxu2 %v11679_v51  ;;  %7496 = vmatpush.bf16.msra.mxu1 %v12952_v0  ;;  %v12984_v0 = vld [vmem:[%s18507_s7 + $0x1f8] sm:$0xff] }
 0x487   : > { %7246 = vmatpush.bf16.msrb.mxu0 %v11775_v41 }
 0x489   : > { %7238 = vmatpush.bf16.msrb.mxu2 %v11671_v7  ;;  %v12927_v7 = vld [vmem:[%s18507_s7 + $0x30] sm:$0xff]  ;;  %7497 = vmatpush.bf16.msra.mxu1 %v12951_v17 }
 0x48a   : > { %11800 = vmatmul.msk.bf16.vlgmr.msra.gmra.mxu0 %vm6252_vm14, %v7007_v37 }
 0x48b   : > { %7247 = vmatpush.bf16.msrb.mxu0 %v11767_v47 }
 0x48c   : > { %11801 = vmatmul.msk.bf16.vlgmr.msrb.gmra.mxu1 %vm6252_vm14, %v7007_v37  ;;  %v12935_v37 = vld [vmem:[%s18507_s7 + $0x70] sm:$0xff] }
 0x48d   : > { %7239 = vmatpush.bf16.msrb.mxu2 %v11663_v9 }
 0x48f   : > { %7248 = vmatpush.bf16.msrb.mxu0 %v11759_v2  ;;  %v12926_v2 = vld [vmem:[%s18507_s7 + $0x28] sm:$0xff] }
 0x490   : > { %7240 = vmatmul.bf16.vlgmr.msrb.gmra.mxu2 %v6993_v62 }
 0x491   : > { %7605 = vmatpush.bf16.msra.mxu2 %v12928_v21  ;;  %v12937_v21 = vld [vmem:[%s18507_s7 + $0x80] sm:$0xff] }
 0x493   : > { %7249 = vmatpush.bf16.msrb.mxu0 %v11751_v4  ;;  %v12925_v4 = vld [vmem:[%s18507_s7 + $0x20] sm:$0xff] }
 0x495   : > { %7606 = vmatpush.bf16.msra.mxu2 %v12927_v7  ;;  %v12945_v7 = vld [vmem:[%s18507_s7 + $0xc0] sm:$0xff] }
 0x497   : > { %7250 = vmatpush.bf16.msrb.mxu0 %v11743_v23  ;;  %v12950_v23 = vld [vmem:[%s18507_s7 + $0xe8] sm:$0xff] }
 0x498   : > { %7498 = vmatpush.bf16.msra.mxu1 %v12950_v23  ;;  %v12983_v23 = vld [vmem:[%s18507_s7 + $0x1f0] sm:$0xff] }
 0x499   : > { %7607 = vmatpush.bf16.msra.mxu2 %v12926_v2 }
 0x49b   : > { %7251 = vmatpush.bf16.msrb.mxu0 %v11735_v18  ;;  %v12924_v18 = vld [vmem:[%s18507_s7 + $0x18] sm:$0xff] }
 0x49d   : > { %7608 = vmatpush.bf16.msra.mxu2 %v12925_v4 }
 0x49f   : > { %7252 = vmatpush.bf16.msrb.mxu0 %v11727_v36  ;;  %v12941_v36 = vld [vmem:[%s18507_s7 + $0xa0] sm:$0xff] }
 0x4a0   : > { %7486 = vmatpush.bf16.msra.mxu3 %v12941_v36 }
 0x4a1   : > { %7609 = vmatpush.bf16.msra.mxu2 %v12924_v18 }
 0x4a2   : > { %7253 = vmatmul.bf16.vlgmr.msrb.gmra.mxu0 %v18123_v20 }
 0x4a3   : > { %7618 = vmatpush.bf16.msra.mxu0 %v12936_v32 }
 0x4a7   : > { %v6265_v52 = vpop.f32.mrf.mxu0  ;;  %v6278_v56 = vpop.f32.mrf.mxu1  ;;  %7619 = vmatpush.bf16.msra.mxu0 %v12935_v37 }
 0x4a8   : > { %v6279_v15 = vadd.f32 %v6278_v56, %v6265_v52  ;;  %v12949_v52 = vld [vmem:[%s18507_s7 + $0xe0] sm:$0xff] }
 0x4a9   : > { %v12933_v56 = vld [vmem:[%s18507_s7 + $0x60] sm:$0xff]  ;;  %7499 = vmatpush.bf16.msra.mxu1 %v12949_v52  ;;  %v12982_v52 = vld [vmem:[%s18507_s7 + $0x1e8] sm:$0xff] }
 0x4ab   : > { %v6291_v58 = vpop.f32.mrf.mxu2  ;;  %7620 = vmatpush.bf16.msra.mxu0 %v12934_v29 }
 0x4ac   : > { %v6292_v10 = vadd.f32 %v6291_v58, %v6279_v15  ;;  %v12923_v15 = vld [vmem:[%s18507_s7 + $0x10] sm:$0xff] }
 0x4ad   : > { %7610 = vmatpush.bf16.msra.mxu2 %v12923_v15  ;;  %v12972_v15 = vld [vmem:[%s18507_s7 + $0x198] sm:$0xff] }
 0x4ae   : > { %v6304_v27 = vpop.f32.mrf.mxu3 }
 0x4af   : > { %v6267_v61 = vpop.f32.mrf.mxu0  ;;  %v6280_v28 = vpop.f32.mrf.mxu1  ;;  %7621 = vmatpush.bf16.msra.mxu0 %v12933_v56 }
 0x4b0   : > { %v12932_v28 = vld [vmem:[%s18507_s7 + $0x58] sm:$0xff] }
 0x4b3   : > { %v6293_v31 = vpop.f32.mrf.mxu2  ;;  %7622 = vmatpush.bf16.msra.mxu0 %v12932_v28  ;;  %v12981_v28 = vld [vmem:[%s18507_s7 + $0x1e0] sm:$0xff] }
 0x4b6   : > { %v6306_v12 = vpop.f32.mrf.mxu3 }
 0x4b7   : > { %v6330_v26 = vpop.f32.mrf.mxu0  ;;  %v6526_v33 = vpop.f32.mrf.mxu1 }
 0x4b8   : > { %v6527_v38 = vadd.f32 %v6526_v33, %v6292_v10  ;;  %v12940_v10 = vld [vmem:[%s18507_s7 + $0x98] sm:$0xff]  ;;  %v18334_v33 = vld [vmem:[%s18506_s6] sm:$0x3] }
 0x4b9   : > { %7487 = vmatpush.bf16.msra.mxu3 %v12940_v10  ;;  %v7276_v18 = vperm.slane %v18334_v33, 1  ;;  %v12957_v10 = vld [vmem:[%s18507_s7 + $0x120] sm:$0xff] }
 0x4bb   : > { %v6317_v34 = vpop.f32.mrf.mxu2 }
 0x4bc   : > { %v6318_v6 = vadd.f32 %v6317_v34, %v6304_v27  ;;  %v12948_v27 = vld [vmem:[%s18507_s7 + $0xd8] sm:$0xff] }
 0x4bd   : > { %7500 = vmatpush.bf16.msra.mxu1 %v12948_v27 }
 0x4be   : > { %v6539_v5 = vpop.f32.mrf.mxu3  ;;  %v6331_v46 = vadd.f32 %v6330_v26, %v6318_v6 }
 0x4bf   : > { %v18251_v48 = vadd.f32 %v6539_v5, %v6527_v38  ;;  %v6332_v20 = vpop.f32.mrf.mxu0  ;;  %v6528_v1 = vpop.f32.mrf.mxu1 }
 0x4c3   : > { %v6319_v35 = vpop.f32.mrf.mxu2 }
 0x4c6   : > { %v6541_v13 = vpop.f32.mrf.mxu3 }
 0x4c7   : > { %v18253_v62 = vpop.f32.mrf.mxu0  ;;  %v12922_v13 = vld [vmem:[%s18507_s7 + $0x8] sm:$0xff] }
 0x4c8   : > { %v6591_v42 = vpop.f32.mrf.mxu1  ;;  %v6553_v38 = vadd.f32 %v18253_v62, %v18251_v48  ;;  %v12939_v48 = vld [vmem:[%s18507_s7 + $0x90] sm:$0xff]  ;;  %7611 = vmatpush.bf16.msra.mxu2 %v12922_v13 }
 0x4c9   : > { %v12947_v62 = vld [vmem:[%s18507_s7 + $0xd0] sm:$0xff]  ;;  %7488 = vmatpush.bf16.msra.mxu3 %v12939_v48 }
 0x4ca   : > { %7501 = vmatpush.bf16.msra.mxu1 %v12947_v62  ;;  %v12969_v62 = vld [vmem:[%s18507_s7 + $0x180] sm:$0xff] }
 0x4cd   : > { %v6565_v60 = vpop.f32.mrf.mxu2 }
 0x4ce   : > { %v6566_v54 = vadd.f32 %v6565_v60, %v6331_v46  ;;  %v7275_v46 = vperm.slane %v18334_v33, 0  ;;  %v12931_v60 = vld [vmem:[%s18507_s7 + $0x50] sm:$0xff] }
 0x4cf   : > { %v6554_v55 = vpop.f32.mrf.mxu0  ;;  %7623 = vmatpush.bf16.msra.mxu0 %v12931_v60  ;;  %v12962_v60 = vld [vmem:[%s18507_s7 + $0x148] sm:$0xff] }
 0x4d0   : > { %v6863_v43 = vpop.f32.mrf.mxu3  ;;  %v6593_v50 = vpop.f32.mrf.mxu1  ;;  %v12921_v55 = vld [vmem:[%s18507_s7] sm:$0xff] }
 0x4d1   : > { %v12938_v50 = vld [vmem:[%s18507_s7 + $0x88] sm:$0xff]  ;;  %7612 = vmatpush.bf16.msra.mxu2 %v12921_v55 }
 0x4d2   : > { %7489 = vmatpush.bf16.msra.mxu3 %v12938_v50 }
 0x4d5   : > { %v6567_v30 = vpop.f32.mrf.mxu2 }
 0x4d6   : > { %7490 = vmatpush.bf16.msra.mxu3 %v12937_v21  ;;  %v12977_v21 = vld [vmem:[%s18507_s7 + $0x1c0] sm:$0xff] }
 0x4d7   : > { %v6578_v44 = vpop.f32.mrf.mxu0 }
 0x4d8   : > { %v6865_v16 = vpop.f32.mrf.mxu3  ;;  %v6579_v51 = vadd.f32 %v6578_v44, %v6566_v54  ;;  %v6876_v41 = vpop.f32.mrf.mxu1  ;;  %v12976_v44 = vld [vmem:[%s18507_s7 + $0x1b8] sm:$0xff] }
 0x4d9   : > { %v6877_v31 = vadd.f32 %v6876_v41, %v6863_v43  ;;  %v12930_v41 = vld [vmem:[%s18507_s7 + $0x48] sm:$0xff]  ;;  %7932 = vmatpush.bf16.msrb.mxu2 %v12976_v44 }
 0x4da   : > { %v18255_v57 = vadd.f32 %v6591_v42, %v6579_v51  ;;  %v12946_v51 = vld [vmem:[%s18507_s7 + $0xc8] sm:$0xff]  ;;  %7624 = vmatpush.bf16.msra.mxu0 %v12930_v41  ;;  %v12961_v41 = vld [vmem:[%s18507_s7 + $0x140] sm:$0xff] }
 0x4db   : > { %7502 = vmatpush.bf16.msra.mxu1 %v12946_v51 }
 0x4dd   : > { %v6889_v63 = vpop.f32.mrf.mxu2 }
 0x4de   : > { %v6890_v12 = vadd.f32 %v6889_v63, %v6877_v31 }
 0x4df   : > { %v6580_v49 = vpop.f32.mrf.mxu0  ;;  %7503 = vmatpush.bf16.msra.mxu1 %v12945_v7 }
 0x4e0   : > { %v18260_v3 = vpop.f32.mrf.mxu3  ;;  %v6878_v47 = vpop.f32.mrf.mxu1  ;;  %v6932_v6 = vadd.f32 %v6890_v12, %v6553_v38  ;;  %v12975_v49 = vld [vmem:[%s18507_s7 + $0x1b0] sm:$0xff]  ;;  %v12956_v38 = vld [vmem:[%s18507_s7 + $0x118] sm:$0xff] }
 0x4e1   : > { %v12929_v47 = vld [vmem:[%s18507_s7 + $0x40] sm:$0xff]  ;;  %7933 = vmatpush.bf16.msrb.mxu2 %v12975_v49  ;;  %v12971_v12 = vld [vmem:[%s18507_s7 + $0x190] sm:$0xff] }
 0x4e2   : > { %7625 = vmatpush.bf16.msra.mxu0 %v12929_v47 }
 0x4e3   : > { %7781 = vmatpush.bf16.msrb.mxu1 %v12968_v8 }
 0x4e5   : > { %v6891_v53 = vpop.f32.mrf.mxu2  ;;  %7934 = vmatpush.bf16.msrb.mxu2 %v12974_v59 }
 0x4e6   : > { %v12960_v53 = vld [vmem:[%s18507_s7 + $0x138] sm:$0xff]  ;;  %7945 = vmatpush.bf16.msrb.mxu0 %v12984_v0 }
 0x4e7   : > { %7768 = vmatpush.bf16.msrb.mxu3 %v12960_v53 }
 0x4e8   : > { %v6930_v14 = vpop.f32.mrf.mxu3 }
 0x4e9   : > { %v7306_v14 = vld [vmem:[#allocation4] ss:$2 sm:$0x3] }
 0x4ea   : > { %v7308_v32 = vperm.slane %v7306_v14, 0  ;;  %7946 = vmatpush.bf16.msrb.mxu0 %v12983_v23 }
 0x4ec   : > { %v7312_v17 = vpack.c.bf16 %v7308_v32, %v7308_v32 }
 0x4ee   : > { %7613 = vmatmul.bf16.vlgmr.msra.gmra.mxu2 %v7312_v17  ;;  %7947 = vmatpush.bf16.msrb.mxu0 %v12982_v52 }
 0x4f2   : > { %7948 = vmatpush.bf16.msrb.mxu0 %v12981_v28 }
 0x4f3   : > { %v18274_v9 = vpop.f32.mrf.mxu2 }
 0x4f6   : > { %v7215_v25 = vpop.f32.mrf.mxu3 }
 0x4f7   : > { %v18291_v39 = vpop.f32.mrf.mxu0 }
 0x4f8   : > { %v6916_v63 = vadd.f32 %v18274_v9, %v18291_v39  ;;  %v7309_v9 = vperm.slane %v7306_v14, 1  ;;  %v12959_v39 = vld [vmem:[%s18507_s7 + $0x130] sm:$0xff] }
 0x4f9   : > { %v7202_v19 = vpop.f32.mrf.mxu1  ;;  %7769 = vmatpush.bf16.msrb.mxu3 %v12959_v39 }
 0x4fa   : > { %v7216_v34 = vadd.f32 %v7215_v25, %v7202_v19  ;;  %v6929_v25 = vadd.f32 %v18260_v3, %v6916_v63  ;;  %v7313_v37 = vpack.c.bf16 %v7309_v9, %v7309_v9  ;;  %v12967_v3 = vld [vmem:[%s18507_s7 + $0x170] sm:$0xff] }
 0x4fb   : > { %v6917_v22 = vpop.f32.mrf.mxu2  ;;  %7782 = vmatpush.bf16.msrb.mxu1 %v12967_v3 }
 0x4fc   : > { %v6933_v19 = vadd.f32 %v6929_v25, %v18255_v57  ;;  %v12973_v22 = vld [vmem:[%s18507_s7 + $0x1a0] sm:$0xff]  ;;  %7626 = vmatmul.bf16.vlgmr.msra.gmra.mxu0 %v7313_v37  ;;  %v12966_v57 = vld [vmem:[%s18507_s7 + $0x168] sm:$0xff] }
 0x4fd   : > { %7935 = vmatpush.bf16.msrb.mxu2 %v12973_v22 }
 0x4fe   : > { %v7217_v24 = vpop.f32.mrf.mxu3 }
 0x4ff   : > { %v6904_v58 = vpop.f32.mrf.mxu0  ;;  %v12958_v24 = vld [vmem:[%s18507_s7 + $0x128] sm:$0xff]  ;;  %7783 = vmatpush.bf16.msrb.mxu1 %v12966_v57 }
 0x500   : > { %7770 = vmatpush.bf16.msrb.mxu3 %v12958_v24 }
 0x501   : > { %v7204_v61 = vpop.f32.mrf.mxu1  ;;  %7936 = vmatpush.bf16.msrb.mxu2 %v12972_v15 }
 0x502   : > { %v12965_v61 = vld [vmem:[%s18507_s7 + $0x160] sm:$0xff] }
 0x503   : > { %7784 = vmatpush.bf16.msrb.mxu1 %v12965_v61 }
 0x504   : > { %7771 = vmatpush.bf16.msrb.mxu3 %v12957_v10 }
 0x505   : > { %7937 = vmatpush.bf16.msrb.mxu2 %v12971_v12 }
 0x507   : > { %v7228_v11 = vpop.f32.mrf.mxu0 }
 0x508   : > { %v7229_v5 = vadd.f32 %v7228_v11, %v7216_v34  ;;  %v12964_v34 = vld [vmem:[%s18507_s7 + $0x158] sm:$0xff]  ;;  %7772 = vmatpush.bf16.msrb.mxu3 %v12956_v38 }
 0x509   : > { %v7267_v20 = vpop.f32.mrf.mxu1  ;;  %v12980_v11 = vld [vmem:[%s18507_s7 + $0x1d8] sm:$0xff]  ;;  %7785 = vmatpush.bf16.msrb.mxu1 %v12964_v34 }
 0x50a   : > { %v7271_v1 = vadd.f32 %v7229_v5, %v6932_v6  ;;  %v12970_v5 = vld [vmem:[%s18507_s7 + $0x188] sm:$0xff]  ;;  %7949 = vmatpush.bf16.msrb.mxu0 %v12980_v11 }
 0x50b   : > { %7938 = vmatpush.bf16.msrb.mxu2 %v12970_v5 }
 0x50c   : > { %v7279_v35 = vadd.f32 %v7275_v46, %v7271_v1  ;;  %v7795_v46 = vld [vmem:[#allocation4 + $0x5] ss:$2 sm:$0x3]  ;;  %v12963_v1 = vld [vmem:[%s18507_s7 + $0x150] sm:$0xff] }
 0x50d   : > { %v7797_v13 = vperm.slane %v7795_v46, 0  ;;  %7786 = vmatpush.bf16.msrb.mxu1 %v12963_v1 }
 0x50e   : > { %vm7281_vm0 = vcmp.gt.f32.partialorder %v7279_v35, 0.0  ;;  %v7283_v42 = vmul.f32 0.2, %v7279_v35 }
 0x50f   : > { %v7230_v54 = vpop.f32.mrf.mxu0  ;;  %v7801_v55 = vpack.c.bf16 %v7797_v13, %v7797_v13  ;;  %7939 = vmatpush.bf16.msrb.mxu2 %v12969_v62 }
 0x510   : > { %v18363_v30 = vsel %vm7281_vm0, %v7279_v35, %v7283_v42  ;;  %v12979_v35 = vld [vmem:[%s18507_s7 + $0x1d0] sm:$0xff]  ;;  %v12954_v42 = vld [vmem:[%s18507_s7 + $0x108] sm:$0xff] }
 0x511   : > { %v7269_v16 = vpop.f32.mrf.mxu1  ;;  %7299 = vst [vmem:[#allocation1] sm:$0xff] %v18363_v30  ;;  %7950 = vmatpush.bf16.msrb.mxu0 %v12979_v35  ;;  %v12978_v54 = vld [vmem:[%s18507_s7 + $0x1c8] sm:$0xff]  ;;  %7787 = vmatpush.bf16.msrb.mxu1 %v12962_v60 }
 0x512   : > { %v7798_v16 = vperm.slane %v7795_v46, 1  ;;  %7940 = vmatmul.bf16.vlgmr.msrb.gmra.mxu2 %v7801_v55 }
 0x513   : > { %v7241_v43 = vpop.f32.mrf.mxu2 }
 0x514   : > { %v7802_v63 = vpack.c.bf16 %v7798_v16, %v7798_v16 }
 0x515   : > { %7951 = vmatpush.bf16.msrb.mxu0 %v12978_v54  ;;  %7788 = vmatpush.bf16.msrb.mxu1 %v12961_v41 }
 0x519   : > { %7952 = vmatpush.bf16.msrb.mxu0 %v12977_v21 }
 0x51b   : > { %v7243_v2 = vpop.f32.mrf.mxu2 }
 0x51c   : > { %7953 = vmatmul.bf16.vlgmr.msrb.gmra.mxu0 %v7802_v63 }
 0x51f   : > { %v7254_v4 = vpop.f32.mrf.mxu0 }
 0x520   : > { %v7255_v40 = vadd.f32 %v7254_v4, %v7241_v43 }
 0x522   : > { %v7268_v29 = vadd.f32 %v7267_v20, %v7255_v40  ;;  %v12955_v20 = vld [vmem:[%s18507_s7 + $0x110] sm:$0xff] }
 0x523   : > { %7773 = vmatpush.bf16.msrb.mxu3 %v12955_v20 }
 0x524   : > { %v7272_v36 = vadd.f32 %v7268_v29, %v6933_v19 }
 0x526   : > { %v7280_v56 = vadd.f32 %v7276_v18, %v7272_v36 }
 0x527   : > { %v7256_v58 = vpop.f32.mrf.mxu0  ;;  %7774 = vmatpush.bf16.msrb.mxu3 %v12954_v42 }
 0x528   : > { %vm7282_vm1 = vcmp.gt.f32.partialorder %v7280_v56, 0.0  ;;  %v7284_v27 = vmul.f32 0.2, %v7280_v56 }
 0x52a   : > { %v7286_v31 = vsel %vm7282_vm1, %v7280_v56, %v7284_v27 }
 0x52b   : > { %v7295_v33 = vrot.slane %v7286_v31, 7  ;;  %7300 = vst [vmem:[#allocation1 + $0x9] sm:$0xff] %v7286_v31 }
 0x52d   : > { %v7296_v6 = vsel %vm3090_vm5, %v18363_v30, %v7295_v33  ;;  %v12953_v30 = vld [vmem:[%s18507_s7 + $0x100] sm:$0xff] }
 0x52e   : > { %7298 = vst.msk [vmem:[#allocation4 + $0x4] ss:$2 sm:$0x3] %vm18327_vm15, %v7296_v6  ;;  %7775 = vmatpush.bf16.msrb.mxu3 %v12953_v30 }
 0x532   : > { %v7302_v48 = vld [vmem:[#allocation1 + $0x1] ss:$9 sm:$0xff] }
 0x533   : > { %7305 = vst.msk [vmem:[#allocation4 + $0x1] ss:$2 sm:$0x3] %vm18327_vm15, %v7302_v48 }
 0x535   : > { %v7346_v43 = vld [vmem:[#allocation4 + $0x4] ss:$2 sm:$0x3] }
 0x536   : > { %v7348_v50 = vperm.slane %v7346_v43, 0  ;;  %v7349_v26 = vperm.slane %v7346_v43, 1 }
 0x538   : > { %v7352_v44 = vpack.c.bf16 %v7348_v50, %v7348_v50  ;;  %v7353_v51 = vpack.c.bf16 %v7349_v26, %v7349_v26 }
 0x53a   : > { %7491 = vmatmul.bf16.vlgmr.msra.gmra.mxu3 %v7352_v44  ;;  %7504 = vmatmul.bf16.vlgmr.msra.gmra.mxu1 %v7353_v51  ;;  %v7631_v49 = vld [vmem:[#allocation4 + $0x1] ss:$2 sm:$0x3] }
 0x53b   : > { %v7633_v7 = vperm.slane %v7631_v49, 0  ;;  %v7634_v47 = vperm.slane %v7631_v49, 1 }
 0x53d   : > { %v7637_v53 = vpack.c.bf16 %v7633_v7, %v7633_v7  ;;  %v7638_v14 = vpack.c.bf16 %v7634_v47, %v7634_v47 }
 0x54a   : > { %7776 = vmatmul.bf16.vlgmr.msrb.gmra.mxu3 %v7637_v53  ;;  %7789 = vmatmul.bf16.vlgmr.msrb.gmra.mxu1 %v7638_v14 }
 0x571   : > { %v7614_v0 = vpop.f32.mrf.mxu2 }
 0x579   : > { %v7627_v8 = vpop.f32.mrf.mxu0  ;;  %v7616_v9 = vpop.f32.mrf.mxu2 }
 0x581   : > { %v7629_v32 = vpop.f32.mrf.mxu0 }
 0x595   : > { %v7941_v25 = vpop.f32.mrf.mxu2 }
 0x599   : > { %v7954_v59 = vpop.f32.mrf.mxu0 }
 0x59a   : > { %v7955_v18 = vadd.f32 %v7954_v59, %v7941_v25 }
 0x59d   : > { %v7943_v4 = vpop.f32.mrf.mxu2 }
 0x5a1   : > { %v7956_v39 = vpop.f32.mrf.mxu0 }
 0x5b7   : > { %v7505_v2 = vpop.f32.mrf.mxu1 }
 0x5bd   : > { %v7492_v17 = vpop.f32.mrf.mxu3 }
 0x5be   : > { %v7506_v3 = vadd.f32 %v7505_v2, %v7492_v17 }
 0x5bf   : > { %v7507_v37 = vpop.f32.mrf.mxu1 }
 0x5c0   : > { %v7615_v19 = vadd.f32 %v7614_v0, %v7506_v3 }
 0x5c2   : > { %v7628_v45 = vadd.f32 %v7627_v8, %v7615_v19 }
 0x5c5   : > { %v7494_v40 = vpop.f32.mrf.mxu3 }
 0x5c7   : > { %v7790_v23 = vpop.f32.mrf.mxu1 }
 0x5cd   : > { %v7777_v29 = vpop.f32.mrf.mxu3 }
 0x5ce   : > { %v7791_v22 = vadd.f32 %v7790_v23, %v7777_v29 }
 0x5cf   : > { %v7792_v24 = vpop.f32.mrf.mxu1 }
 0x5d0   : > { %v7794_v36 = vadd.f32 %v7791_v22, %v7628_v45 }
 0x5d2   : > { %v7958_v57 = vadd.f32 %v7955_v18, %v7794_v36 }
 0x5d4   : > { %v12154_v52 = vmul.f32 -1.442695, %v7958_v57 }
 0x5d5   : > { %v7779_v56 = vpop.f32.mrf.mxu3 }
 0x5d6   : > { %12995 = vpow2.f32 %v12154_v52 }
 0x5dc   : > { %v12996_v15 = vpop.eup %12995 }
 0x5dd   : > { %v7962_v58 = vadd.f32 1.0, %v12996_v15 }
 0x5df   : > { %12997 = vrcp.f32 %v7962_v58  ;;  %v7974_v28 = vand.u32 2147483648, %v7962_v58  ;;  %v7972_v12 = vand.u32 2147483647, %v7962_v58  ;;  %vm7968_vm3 = vweird.f32 %v7962_v58 }
 0x5e1   : > { %v7975_v38 = vor.u32 1.1754944e-38, %v7974_v28  ;;  %vm7973_vm5 = vcmp.eq.f32.partialorder %v7972_v12, 8.507059e+37 }
 0x5e5   : > { %v12998_v10 = vpop.eup %12997 }
 0x5e6   : > { %v7964_v27 = vmul.f32 %v12998_v10, %v7962_v58  ;;  %vm7969_vm2 = vweird.f32 %v12998_v10 }
 0x5e7   : > { %vm7970_vm4 = vmor %vm7968_vm3, %vm7969_vm2 }
 0x5e8   : > { %v7965_v61 = vsub.f32 1.0, %v7964_v27 }
 0x5ea   : > { %v7966_v31 = vmul.f32 %v12998_v10, %v7965_v61 }
 0x5ec   : > { %v7967_v33 = vadd.f32 %v12998_v10, %v7966_v31 }
 0x5ee   : > { %v7971_v34 = vsel %vm7970_vm4, %v12998_v10, %v7967_v33 }
 0x5ef   : > { %v7976_v11 = vsel %vm7973_vm5, %v7975_v38, %v7971_v34 }
 0x5f0   : > { %7979 = vst [vmem:[%s18492_s9] sm:$0x1] %v7976_v11 }
 0x5f1 PF: > { %s18_s27 = sadd.s32 1, %s13005_s27  }
 0x5f2   : > { %p15_p4 = scmp.ge.s32.totalorder %s18_s27, 4  }
 0x5f4   :  { %17 = sbr.rel (!%p15_p4) target bundleno = 1 (0x1), region = 127 }

</bundles_post_ra>
